<compile_context>
chip_gen: v5e
topology: v5e:2x2
jax: 0.10.0
libtpu: 0.0.40
codegen_flags: <defaults>
</compile_context>

<pallas_src>
import jax
import jax.numpy as jnp
import numpy as np
from jax.experimental import pallas as pl
from jax.experimental.pallas import tpu as pltpu

_NEG_SLOPE = 0.2  # nn.LeakyReLU(0.2) per the PyTorch spec.


# ----------------------------------------------------------------------------
# Kernels
# ----------------------------------------------------------------------------
def _front_kernel(x_ref, wl_ref, s0_ref, c0_ref, w1_ref, s1_ref, c1_ref, o_ref):
    """input_map (Linear + BN1d + LReLU) chained with the k=(2,6,6) deconv + BN + LReLU."""
    h = jnp.dot(x_ref[...], wl_ref[...], preferred_element_type=jnp.float32)
    h = h * s0_ref[...] + c0_ref[...]
    h = jnp.where(h >= 0.0, h, _NEG_SLOPE * h)
    y = jnp.dot(h, w1_ref[...], preferred_element_type=jnp.float32)
    y = y * s1_ref[...] + c1_ref[...]
    o_ref[...] = jnp.where(y >= 0.0, y, _NEG_SLOPE * y)


def _deconv_kernel(a_ref, b_ref, s_ref, c_ref, o_ref):
    """(A @ W27) * scale + bias -> LeakyReLU.  Full-K / full-N blocks, M-tiled."""
    y = jnp.dot(a_ref[...], b_ref[...], preferred_element_type=jnp.float32)
    y = y * s_ref[...] + c_ref[...]
    o_ref[...] = jnp.where(y >= 0.0, y, _NEG_SLOPE * y)


def _deconv_final_kernel(a_ref, b_ref, s_ref, c_ref, w2_ref, o_ref):
    """Last deconv + BN + LeakyReLU, then fused 1x1-conv channel mix + Tanh."""
    y = jnp.dot(a_ref[...], b_ref[...], preferred_element_type=jnp.float32)
    y = y * s_ref[...] + c_ref[...]
    y = jnp.where(y >= 0.0, y, _NEG_SLOPE * y)
    z = jnp.dot(y, w2_ref[...], preferred_element_type=jnp.float32)
    o_ref[...] = jnp.tanh(z)


# ----------------------------------------------------------------------------
# Pallas wrappers
# ----------------------------------------------------------------------------
def _pick_tm(m, target=1024):
    """Largest M tile <= target that divides M (multiple of 8/16 when tiling)."""
    if m <= target:
        return m
    for d in range(target, 0, -16):
        if m % d == 0:
            return d
    return m


def fused_deconv_matmul(a, w27, scale, bias, w2=None):
    """activation((a @ w27) * scale + bias) [optionally @ w2 then tanh].

    a:      (M, K)   27-tap im2col rows (channels-last).
    w27:    (K, N)   block-sparse deconv weight, N = 8*Cout (parity packed).
    scale, bias: (N,) folded BatchNorm per output column.
    w2:     optional (N, N2) block-diagonal 1x1-conv weight -> tanh epilogue.
    """
    m, k = a.shape
    n = w27.shape[1]
    n_out = n if w2 is None else w2.shape[1]
    tm = _pick_tm(m)

    a_bf = a.astype(jnp.bfloat16)
    w_bf = w27.astype(jnp.bfloat16)
    s2 = scale.astype(jnp.float32).reshape(1, n)
    c2 = bias.astype(jnp.float32).reshape(1, n)

    in_specs = [
        pl.BlockSpec((tm, k), lambda i: (i, 0)),   # A: M-tiled, full K
        pl.BlockSpec((k, n), lambda i: (0, 0)),    # W27: resident, full block
        pl.BlockSpec((1, n), lambda i: (0, 0)),    # scale
        pl.BlockSpec((1, n), lambda i: (0, 0)),    # bias
    ]
    args = [a_bf, w_bf, s2, c2]
    if w2 is None:
        kernel = _deconv_kernel
    else:
        kernel = _deconv_final_kernel
        in_specs.append(pl.BlockSpec((n, n_out), lambda i: (0, 0)))
        args.append(w2.astype(jnp.float32))

    return pl.pallas_call(
        kernel,
        out_shape=jax.ShapeDtypeStruct((m, n_out), jnp.float32),
        grid_spec=pltpu.PrefetchScalarGridSpec(
            num_scalar_prefetch=0,
            grid=(m // tm,),
            in_specs=in_specs,
            out_specs=pl.BlockSpec((tm, n_out), lambda i: (i, 0)),
        ),
        compiler_params=pltpu.CompilerParams(
            dimension_semantics=("parallel",)),
    )(*args)


def front_stage(x, wl_t, s0, c0, w1m, s1v, c1v):
    """Fused input_map + first deconv k=(2,6,6): one pallas_call, whole-array blocks."""
    b, k0 = x.shape
    n1 = w1m.shape[1]
    bp = ((max(b, 8) + 7) // 8) * 8            # pad batch rows to a sublane multiple
    x_p = jnp.pad(x.astype(jnp.float32), ((0, bp - b), (0, 0)))

    out = pl.pallas_call(
        _front_kernel,
        out_shape=jax.ShapeDtypeStruct((bp, n1), jnp.float32),
        grid_spec=pltpu.PrefetchScalarGridSpec(
            num_scalar_prefetch=0,
            grid=(1,),
            in_specs=[
                pl.BlockSpec((bp, k0), lambda i: (0, 0)),
                pl.BlockSpec((k0, k0), lambda i: (0, 0)),
                pl.BlockSpec((1, k0), lambda i: (0, 0)),
                pl.BlockSpec((1, k0), lambda i: (0, 0)),
                pl.BlockSpec((k0, n1), lambda i: (0, 0)),
                pl.BlockSpec((1, n1), lambda i: (0, 0)),
                pl.BlockSpec((1, n1), lambda i: (0, 0)),
            ],
            out_specs=pl.BlockSpec((bp, n1), lambda i: (0, 0)),
        ),
    )(x_p, wl_t.astype(jnp.float32),
      s0.reshape(1, k0).astype(jnp.float32), c0.reshape(1, k0).astype(jnp.float32),
      w1m.astype(jnp.float32),
      s1v.reshape(1, n1).astype(jnp.float32), c1v.reshape(1, n1).astype(jnp.float32))
    return out[:b]


# ----------------------------------------------------------------------------
# ConvTranspose3d(k=4, s=2, p=1) as one lane-dense GEMM per layer
# ----------------------------------------------------------------------------
# Per-dimension tap selector: _MD[t, r, k] == 1 iff padded-input offset t
# contributes to output parity r through kernel tap k (k = 3 - r - 2*(t - r)).
_MD = np.zeros((3, 2, 4), np.float32)
for _t in range(3):
    for _r in range(2):
        _w = _t - _r
        if _w in (0, 1):
            _MD[_t, _r, 3 - _r - 2 * _w] = 1.0


def deconv_k4s2p1(x_cl, w, scale_c, bias_c, w2=None):
    """ConvTranspose3d(k=4, s=2, p=1, bias=False) + BN + LeakyReLU, channels-last.

    x_cl: (B, D, H, W, Cin); w: (Cin, Cout, 4, 4, 4).
    Returns (B, 2D, 2H, 2W, Cout) — or Cout' = w2.shape[1]//8 when the final
    1x1-conv + tanh is fused via w2.
    """
    b, d, h, wd, cin = x_cl.shape
    cout = w.shape[1]
    xp = jnp.pad(x_cl, ((0, 0), (1, 1), (1, 1), (1, 1), (0, 0)))

    # Shared 27-tap im2col gather, reused by all 8 output parities (cheap:
    # channels-last makes the final reshape contiguous).
    pats = [xp[:, td:td + d, th:th + h, tw:tw + wd, :]
            for td in range(3) for th in range(3) for tw in range(3)]
    a = jnp.stack(pats, axis=4).reshape(b * d * h * wd, 27 * cin)

    # Block-sparse weight: rows (td, th, tw, cin), cols (rd, rh, rw, cout).
    md = jnp.asarray(_MD)
    w27 = jnp.einsum("iojkl,apj,bqk,crl->abcipqro", w, md, md, md)
    w27 = w27.reshape(27 * cin, 8 * cout)

    s = jnp.tile(scale_c, 8)
    c = jnp.tile(bias_c, 8)

    out = fused_deconv_matmul(a, w27, s, c, w2=w2)
    c_fin = cout if w2 is None else w2.shape[1] // 8
    o = out.reshape(b, d, h, wd, 2, 2, 2, c_fin)
    o = jnp.transpose(o, (0, 1, 4, 2, 5, 3, 6, 7))
    return o.reshape(b, 2 * d, 2 * h, 2 * wd, c_fin)


# ----------------------------------------------------------------------------
# Full Gen forward
# ----------------------------------------------------------------------------
def gen_forward(params, x, cond=None):
    if cond is not None:
        x = jnp.concatenate((x, cond), axis=1)
    x = x.reshape(x.shape[0], x.shape[1])
    b = x.shape[0]

    # fused input_map (Linear+BN1d+LReLU) + first deconv k=(2,6,6) (+BN+LReLU)
    lin_w, lin_b = params["lin_w"], params["lin_b"]
    s0, sh0 = params["bn0"]
    c0 = lin_b * s0 + sh0
    w1 = params["w1"]                                   # (Cin, C1, 2, 6, 6)
    c1ch = w1.shape[1]
    w1m = jnp.transpose(w1, (0, 2, 3, 4, 1)).reshape(w1.shape[0], 2 * 6 * 6 * c1ch)
    s1, sh1 = params["bn1"]
    h = front_stage(x, lin_w.T, s0, c0, w1m,
                    jnp.tile(s1, 2 * 6 * 6), jnp.tile(sh1, 2 * 6 * 6))
    h = h.reshape(b, 2, 6, 6, c1ch)                     # channels-last

    s2, sh2 = params["bn2"]
    h = deconv_k4s2p1(h, params["w2"], s2, sh2)         # (B, 4, 12, 12, C2)
    s3, sh3 = params["bn3"]
    h = deconv_k4s2p1(h, params["w3"], s3, sh3)         # (B, 8, 24, 24, C3)

    # last deconv with fused 1x1-conv channel mix + tanh
    s4, sh4 = params["bn4"]
    c4ch = params["w4"].shape[1]
    nc = params["w5"].shape[1]
    w5bd = jnp.kron(jnp.eye(8, dtype=jnp.float32), params["w5"].reshape(c4ch, nc))
    h = deconv_k4s2p1(h, params["w4"], s4, sh4, w2=w5bd)  # (B, 16, 48, 48, nc)

    return jnp.transpose(h, (0, 4, 1, 2, 3))            # NCDHW like PyTorch


# ----------------------------------------------------------------------------
# Deterministic parameter construction
# ----------------------------------------------------------------------------
def _bn_scale_shift(key, c, eps=1e-5):
    k1, k2, k3, k4 = jax.random.split(key, 4)
    gamma = 1.0 + 0.1 * jax.random.normal(k1, (c,), jnp.float32)
    beta = 0.1 * jax.random.normal(k2, (c,), jnp.float32)
    mean = 0.1 * jax.random.normal(k3, (c,), jnp.float32)
    var = 1.0 + 0.1 * jnp.abs(jax.random.normal(k4, (c,), jnp.float32))
    s = gamma / jnp.sqrt(var + eps)
    return s, beta - mean * s


def make_params(key, in_size, channels, num_channels):
    c1, c2, c3, c4 = channels
    ks = jax.random.split(key, 12)
    nrm = lambda k, shp: 0.02 * jax.random.normal(k, shp, jnp.float32)
    return {
        "lin_w": nrm(ks[0], (in_size, in_size)),      # PyTorch Linear weight (out, in)
        "lin_b": nrm(ks[1], (in_size,)),
        "bn0": _bn_scale_shift(ks[2], in_size),
        "w1": nrm(ks[3], (in_size, c1, 2, 6, 6)),     # ConvTranspose3d (Cin, Cout, kD, kH, kW)
        "bn1": _bn_scale_shift(ks[4], c1),
        "w2": nrm(ks[5], (c1, c2, 4, 4, 4)),
        "bn2": _bn_scale_shift(ks[6], c2),
        "w3": nrm(ks[7], (c2, c3, 4, 4, 4)),
        "bn3": _bn_scale_shift(ks[8], c3),
        "w4": nrm(ks[9], (c3, c4, 4, 4, 4)),
        "bn4": _bn_scale_shift(ks[10], c4),
        "w5": nrm(ks[11], (c4, num_channels, 1, 1, 1)),
    }


if __name__ == "__main__":
    B = 2
    z_size = 16
    cond_dim = 0
    num_channels = 3
    scale_factor = 1.0 / 16.0
    channels = (int(512 * scale_factor), int(256 * scale_factor),
                int(128 * scale_factor), int(64 * scale_factor))  # 32, 16, 8, 4
    in_size = z_size + cond_dim

    key = jax.random.PRNGKey(0)
    kp, kx = jax.random.split(key)
    params = make_params(kp, in_size, channels, num_channels)
    x = jax.random.normal(kx, (B, z_size), jnp.float32)

    fwd = jax.jit(gen_forward)
    vids = fwd(params, x, None)
    vids = jax.block_until_ready(vids)

    assert vids.shape == (B, num_channels, 16, 48, 48), vids.shape
    assert bool(jnp.all(jnp.isfinite(vids)))
    print("KERNEL_OK")
</pallas_src>

<mosaic_0001>
module attributes {stable_mosaic.version = 11 : i64} {
  func.func @_front_kernel(%arg0: i32, %arg1: memref<8x16xf32, #tpu.memory_space<vmem>>, %arg2: memref<16x16xf32, #tpu.memory_space<vmem>>, %arg3: memref<1x16xf32, #tpu.memory_space<vmem>>, %arg4: memref<1x16xf32, #tpu.memory_space<vmem>>, %arg5: memref<16x2304xf32, #tpu.memory_space<vmem>>, %arg6: memref<1x2304xf32, #tpu.memory_space<vmem>>, %arg7: memref<1x2304xf32, #tpu.memory_space<vmem>>, %arg8: memref<8x2304xf32, #tpu.memory_space<vmem>>) attributes {dimension_semantics = [#tpu.dimension_semantics<arbitrary>], iteration_bounds = array<i64: 1>, scalar_prefetch = 0 : i64, scratch_operands = 0 : i64, tpu.core_type = #tpu.core_type<tc>, window_params = [{pipeline_mode = #tpu.pipeline_mode<synchronous>, transform_indices = @transform_0, window_bounds = array<i64: 8, 16>}, {pipeline_mode = #tpu.pipeline_mode<synchronous>, transform_indices = @transform_1, window_bounds = array<i64: 16, 16>}, {pipeline_mode = #tpu.pipeline_mode<synchronous>, transform_indices = @transform_2, window_bounds = array<i64: 1, 16>}, {pipeline_mode = #tpu.pipeline_mode<synchronous>, transform_indices = @transform_3, window_bounds = array<i64: 1, 16>}, {pipeline_mode = #tpu.pipeline_mode<synchronous>, transform_indices = @transform_4, window_bounds = array<i64: 16, 2304>}, {pipeline_mode = #tpu.pipeline_mode<synchronous>, transform_indices = @transform_5, window_bounds = array<i64: 1, 2304>}, {pipeline_mode = #tpu.pipeline_mode<synchronous>, transform_indices = @transform_6, window_bounds = array<i64: 1, 2304>}, {pipeline_mode = #tpu.pipeline_mode<synchronous>, transform_indices = @transform_7, window_bounds = array<i64: 8, 2304>}]} {
    %c0 = arith.constant 0 : index
    %c0_0 = arith.constant 0 : index
    %0 = vector.load %arg1[%c0, %c0_0] : memref<8x16xf32, #tpu.memory_space<vmem>>, vector<8x16xf32>
    %c0_1 = arith.constant 0 : index
    %c0_2 = arith.constant 0 : index
    %1 = vector.load %arg2[%c0_1, %c0_2] : memref<16x16xf32, #tpu.memory_space<vmem>>, vector<16x16xf32>
    %cst = arith.constant dense<0.000000e+00> : vector<8x16xf32>
    %2 = tpu.matmul %0, %1, %cst {dimension_numbers = #tpu.dot_dimension_numbers<[1], [0], [0], [1], [0, 0, 1, 1], [], []>} : vector<8x16xf32>, vector<16x16xf32>, vector<8x16xf32> -> vector<8x16xf32>
    %c0_3 = arith.constant 0 : index
    %c0_4 = arith.constant 0 : index
    %3 = vector.load %arg3[%c0_3, %c0_4] : memref<1x16xf32, #tpu.memory_space<vmem>>, vector<1x16xf32>
    %4 = vector.broadcast %3 : vector<1x16xf32> to vector<8x16xf32>
    %5 = arith.mulf %2, %4 : vector<8x16xf32>
    %c0_5 = arith.constant 0 : index
    %c0_6 = arith.constant 0 : index
    %6 = vector.load %arg4[%c0_5, %c0_6] : memref<1x16xf32, #tpu.memory_space<vmem>>, vector<1x16xf32>
    %7 = vector.broadcast %6 : vector<1x16xf32> to vector<8x16xf32>
    %8 = arith.addf %5, %7 : vector<8x16xf32>
    %cst_7 = arith.constant 0.000000e+00 : f32
    %9 = vector.broadcast %cst_7 : f32 to vector<8x16xf32>
    %10 = arith.cmpf oge, %8, %9 : vector<8x16xf32>
    %cst_8 = arith.constant 2.000000e-01 : f32
    %11 = vector.broadcast %cst_8 : f32 to vector<8x16xf32>
    %12 = arith.mulf %11, %8 : vector<8x16xf32>
    %13 = arith.select %10, %8, %12 : vector<8x16xi1>, vector<8x16xf32>
    %c0_9 = arith.constant 0 : index
    %c0_10 = arith.constant 0 : index
    %14 = vector.load %arg5[%c0_9, %c0_10] : memref<16x2304xf32, #tpu.memory_space<vmem>>, vector<16x2304xf32>
    %cst_11 = arith.constant dense<0.000000e+00> : vector<8x2304xf32>
    %15 = tpu.matmul %13, %14, %cst_11 {dimension_numbers = #tpu.dot_dimension_numbers<[1], [0], [0], [1], [0, 0, 1, 1], [], []>} : vector<8x16xf32>, vector<16x2304xf32>, vector<8x2304xf32> -> vector<8x2304xf32>
    %c0_12 = arith.constant 0 : index
    %c0_13 = arith.constant 0 : index
    %16 = vector.load %arg6[%c0_12, %c0_13] : memref<1x2304xf32, #tpu.memory_space<vmem>>, vector<1x2304xf32>
    %17 = vector.broadcast %16 : vector<1x2304xf32> to vector<8x2304xf32>
    %18 = arith.mulf %15, %17 : vector<8x2304xf32>
    %c0_14 = arith.constant 0 : index
    %c0_15 = arith.constant 0 : index
    %19 = vector.load %arg7[%c0_14, %c0_15] : memref<1x2304xf32, #tpu.memory_space<vmem>>, vector<1x2304xf32>
    %20 = vector.broadcast %19 : vector<1x2304xf32> to vector<8x2304xf32>
    %21 = arith.addf %18, %20 : vector<8x2304xf32>
    %cst_16 = arith.constant 0.000000e+00 : f32
    %22 = vector.broadcast %cst_16 : f32 to vector<8x2304xf32>
    %23 = arith.cmpf oge, %21, %22 : vector<8x2304xf32>
    %cst_17 = arith.constant 2.000000e-01 : f32
    %24 = vector.broadcast %cst_17 : f32 to vector<8x2304xf32>
    %25 = arith.mulf %24, %21 : vector<8x2304xf32>
    %26 = arith.select %23, %21, %25 : vector<8x2304xi1>, vector<8x2304xf32>
    %c0_18 = arith.constant 0 : index
    %c0_19 = arith.constant 0 : index
    %27 = vector.load %arg8[%c0_18, %c0_19] : memref<8x2304xf32, #tpu.memory_space<vmem>>, vector<8x2304xf32>
    tpu.vector_store %arg8[%c0_18, %c0_19], %26 {strides = array<i32>} : memref<8x2304xf32, #tpu.memory_space<vmem>>, vector<8x2304xf32>,
    return
  }
  func.func @transform_0(%arg0: i32) -> (i32, i32) {
    %c0_i32 = arith.constant 0 : i32
    %c0_i32_0 = arith.constant 0 : i32
    %c0_i32_1 = arith.constant 0 : i32
    return %c0_i32, %c0_i32_0 : i32, i32
  }
  func.func @transform_1(%arg0: i32) -> (i32, i32) {
    %c0_i32 = arith.constant 0 : i32
    %c0_i32_0 = arith.constant 0 : i32
    %c0_i32_1 = arith.constant 0 : i32
    return %c0_i32, %c0_i32_0 : i32, i32
  }
  func.func @transform_2(%arg0: i32) -> (i32, i32) {
    %c0_i32 = arith.constant 0 : i32
    %c0_i32_0 = arith.constant 0 : i32
    %c0_i32_1 = arith.constant 0 : i32
    return %c0_i32, %c0_i32_0 : i32, i32
  }
  func.func @transform_3(%arg0: i32) -> (i32, i32) {
    %c0_i32 = arith.constant 0 : i32
    %c0_i32_0 = arith.constant 0 : i32
    %c0_i32_1 = arith.constant 0 : i32
    return %c0_i32, %c0_i32_0 : i32, i32
  }
  func.func @transform_4(%arg0: i32) -> (i32, i32) {
    %c0_i32 = arith.constant 0 : i32
    %c0_i32_0 = arith.constant 0 : i32
    %c0_i32_1 = arith.constant 0 : i32
    return %c0_i32, %c0_i32_0 : i32, i32
  }
  func.func @transform_5(%arg0: i32) -> (i32, i32) {
    %c0_i32 = arith.constant 0 : i32
    %c0_i32_0 = arith.constant 0 : i32
    %c0_i32_1 = arith.constant 0 : i32
    return %c0_i32, %c0_i32_0 : i32, i32
  }
  func.func @transform_6(%arg0: i32) -> (i32, i32) {
    %c0_i32 = arith.constant 0 : i32
    %c0_i32_0 = arith.constant 0 : i32
    %c0_i32_1 = arith.constant 0 : i32
    return %c0_i32, %c0_i32_0 : i32, i32
  }
  func.func @transform_7(%arg0: i32) -> (i32, i32) {
    %c0_i32 = arith.constant 0 : i32
    %c0_i32_0 = arith.constant 0 : i32
    %c0_i32_1 = arith.constant 0 : i32
    return %c0_i32, %c0_i32_0 : i32, i32
  }
}

module attributes {stable_mosaic.version = 11 : i64} {
  func.func @_deconv_kernel(%arg0: i32, %arg1: memref<144x864xbf16, #tpu.memory_space<vmem>>, %arg2: memref<864x128xbf16, #tpu.memory_space<vmem>>, %arg3: memref<1x128xf32, #tpu.memory_space<vmem>>, %arg4: memref<1x128xf32, #tpu.memory_space<vmem>>, %arg5: memref<144x128xf32, #tpu.memory_space<vmem>>) attributes {dimension_semantics = [#tpu.dimension_semantics<parallel>], iteration_bounds = array<i64: 1>, scalar_prefetch = 0 : i64, scratch_operands = 0 : i64, tpu.core_type = #tpu.core_type<tc>, window_params = [{transform_indices = @transform_0, window_bounds = array<i64: 144, 864>}, {pipeline_mode = #tpu.pipeline_mode<synchronous>, transform_indices = @transform_1, window_bounds = array<i64: 864, 128>}, {pipeline_mode = #tpu.pipeline_mode<synchronous>, transform_indices = @transform_2, window_bounds = array<i64: 1, 128>}, {pipeline_mode = #tpu.pipeline_mode<synchronous>, transform_indices = @transform_3, window_bounds = array<i64: 1, 128>}, {transform_indices = @transform_4, window_bounds = array<i64: 144, 128>}]} {
    %c0 = arith.constant 0 : index
    %c0_0 = arith.constant 0 : index
    %0 = vector.load %arg1[%c0, %c0_0] : memref<144x864xbf16, #tpu.memory_space<vmem>>, vector<144x864xbf16>
    %c0_1 = arith.constant 0 : index
    %c0_2 = arith.constant 0 : index
    %1 = vector.load %arg2[%c0_1, %c0_2] : memref<864x128xbf16, #tpu.memory_space<vmem>>, vector<864x128xbf16>
    %cst = arith.constant dense<0.000000e+00> : vector<144x128xf32>
    %2 = tpu.matmul %0, %1, %cst {dimension_numbers = #tpu.dot_dimension_numbers<[1], [0], [0], [1], [0, 0, 1, 1], [], []>} : vector<144x864xbf16>, vector<864x128xbf16>, vector<144x128xf32> -> vector<144x128xf32>
    %c0_3 = arith.constant 0 : index
    %c0_4 = arith.constant 0 : index
    %3 = vector.load %arg3[%c0_3, %c0_4] : memref<1x128xf32, #tpu.memory_space<vmem>>, vector<1x128xf32>
    %4 = vector.broadcast %3 : vector<1x128xf32> to vector<144x128xf32>
    %5 = arith.mulf %2, %4 : vector<144x128xf32>
    %c0_5 = arith.constant 0 : index
    %c0_6 = arith.constant 0 : index
    %6 = vector.load %arg4[%c0_5, %c0_6] : memref<1x128xf32, #tpu.memory_space<vmem>>, vector<1x128xf32>
    %7 = vector.broadcast %6 : vector<1x128xf32> to vector<144x128xf32>
    %8 = arith.addf %5, %7 : vector<144x128xf32>
    %cst_7 = arith.constant 0.000000e+00 : f32
    %9 = vector.broadcast %cst_7 : f32 to vector<144x128xf32>
    %10 = arith.cmpf oge, %8, %9 : vector<144x128xf32>
    %cst_8 = arith.constant 2.000000e-01 : f32
    %11 = vector.broadcast %cst_8 : f32 to vector<144x128xf32>
    %12 = arith.mulf %11, %8 : vector<144x128xf32>
    %13 = arith.select %10, %8, %12 : vector<144x128xi1>, vector<144x128xf32>
    %c0_9 = arith.constant 0 : index
    %c0_10 = arith.constant 0 : index
    %14 = vector.load %arg5[%c0_9, %c0_10] : memref<144x128xf32, #tpu.memory_space<vmem>>, vector<144x128xf32>
    tpu.vector_store %arg5[%c0_9, %c0_10], %13 {strides = array<i32>} : memref<144x128xf32, #tpu.memory_space<vmem>>, vector<144x128xf32>,
    return
  }
  func.func @transform_0(%arg0: i32) -> (i32, i32) {
    %c0_i32 = arith.constant 0 : i32
    %c0_i32_0 = arith.constant 0 : i32
    return %arg0, %c0_i32 : i32, i32
  }
  func.func @transform_1(%arg0: i32) -> (i32, i32) {
    %c0_i32 = arith.constant 0 : i32
    %c0_i32_0 = arith.constant 0 : i32
    %c0_i32_1 = arith.constant 0 : i32
    return %c0_i32, %c0_i32_0 : i32, i32
  }
  func.func @transform_2(%arg0: i32) -> (i32, i32) {
    %c0_i32 = arith.constant 0 : i32
    %c0_i32_0 = arith.constant 0 : i32
    %c0_i32_1 = arith.constant 0 : i32
    return %c0_i32, %c0_i32_0 : i32, i32
  }
  func.func @transform_3(%arg0: i32) -> (i32, i32) {
    %c0_i32 = arith.constant 0 : i32
    %c0_i32_0 = arith.constant 0 : i32
    %c0_i32_1 = arith.constant 0 : i32
    return %c0_i32, %c0_i32_0 : i32, i32
  }
  func.func @transform_4(%arg0: i32) -> (i32, i32) {
    %c0_i32 = arith.constant 0 : i32
    %c0_i32_0 = arith.constant 0 : i32
    return %arg0, %c0_i32 : i32, i32
  }
}

module attributes {stable_mosaic.version = 11 : i64} {
  func.func @_deconv_kernel(%arg0: i32, %arg1: memref<576x432xbf16, #tpu.memory_space<vmem>>, %arg2: memref<432x64xbf16, #tpu.memory_space<vmem>>, %arg3: memref<1x64xf32, #tpu.memory_space<vmem>>, %arg4: memref<1x64xf32, #tpu.memory_space<vmem>>, %arg5: memref<576x64xf32, #tpu.memory_space<vmem>>) attributes {dimension_semantics = [#tpu.dimension_semantics<parallel>], iteration_bounds = array<i64: 2>, scalar_prefetch = 0 : i64, scratch_operands = 0 : i64, tpu.core_type = #tpu.core_type<tc>, window_params = [{transform_indices = @transform_0, window_bounds = array<i64: 576, 432>}, {pipeline_mode = #tpu.pipeline_mode<synchronous>, transform_indices = @transform_1, window_bounds = array<i64: 432, 64>}, {pipeline_mode = #tpu.pipeline_mode<synchronous>, transform_indices = @transform_2, window_bounds = array<i64: 1, 64>}, {pipeline_mode = #tpu.pipeline_mode<synchronous>, transform_indices = @transform_3, window_bounds = array<i64: 1, 64>}, {transform_indices = @transform_4, window_bounds = array<i64: 576, 64>}]} {
    %c0 = arith.constant 0 : index
    %c0_0 = arith.constant 0 : index
    %0 = vector.load %arg1[%c0, %c0_0] : memref<576x432xbf16, #tpu.memory_space<vmem>>, vector<576x432xbf16>
    %c0_1 = arith.constant 0 : index
    %c0_2 = arith.constant 0 : index
    %1 = vector.load %arg2[%c0_1, %c0_2] : memref<432x64xbf16, #tpu.memory_space<vmem>>, vector<432x64xbf16>
    %cst = arith.constant dense<0.000000e+00> : vector<576x64xf32>
    %2 = tpu.matmul %0, %1, %cst {dimension_numbers = #tpu.dot_dimension_numbers<[1], [0], [0], [1], [0, 0, 1, 1], [], []>} : vector<576x432xbf16>, vector<432x64xbf16>, vector<576x64xf32> -> vector<576x64xf32>
    %c0_3 = arith.constant 0 : index
    %c0_4 = arith.constant 0 : index
    %3 = vector.load %arg3[%c0_3, %c0_4] : memref<1x64xf32, #tpu.memory_space<vmem>>, vector<1x64xf32>
    %4 = vector.broadcast %3 : vector<1x64xf32> to vector<576x64xf32>
    %5 = arith.mulf %2, %4 : vector<576x64xf32>
    %c0_5 = arith.constant 0 : index
    %c0_6 = arith.constant 0 : index
    %6 = vector.load %arg4[%c0_5, %c0_6] : memref<1x64xf32, #tpu.memory_space<vmem>>, vector<1x64xf32>
    %7 = vector.broadcast %6 : vector<1x64xf32> to vector<576x64xf32>
    %8 = arith.addf %5, %7 : vector<576x64xf32>
    %cst_7 = arith.constant 0.000000e+00 : f32
    %9 = vector.broadcast %cst_7 : f32 to vector<576x64xf32>
    %10 = arith.cmpf oge, %8, %9 : vector<576x64xf32>
    %cst_8 = arith.constant 2.000000e-01 : f32
    %11 = vector.broadcast %cst_8 : f32 to vector<576x64xf32>
    %12 = arith.mulf %11, %8 : vector<576x64xf32>
    %13 = arith.select %10, %8, %12 : vector<576x64xi1>, vector<576x64xf32>
    %c0_9 = arith.constant 0 : index
    %c0_10 = arith.constant 0 : index
    %14 = vector.load %arg5[%c0_9, %c0_10] : memref<576x64xf32, #tpu.memory_space<vmem>>, vector<576x64xf32>
    tpu.vector_store %arg5[%c0_9, %c0_10], %13 {strides = array<i32>} : memref<576x64xf32, #tpu.memory_space<vmem>>, vector<576x64xf32>,
    return
  }
  func.func @transform_0(%arg0: i32) -> (i32, i32) {
    %c0_i32 = arith.constant 0 : i32
    %c0_i32_0 = arith.constant 0 : i32
    return %arg0, %c0_i32 : i32, i32
  }
  func.func @transform_1(%arg0: i32) -> (i32, i32) {
    %c0_i32 = arith.constant 0 : i32
    %c0_i32_0 = arith.constant 0 : i32
    %c0_i32_1 = arith.constant 0 : i32
    return %c0_i32, %c0_i32_0 : i32, i32
  }
  func.func @transform_2(%arg0: i32) -> (i32, i32) {
    %c0_i32 = arith.constant 0 : i32
    %c0_i32_0 = arith.constant 0 : i32
    %c0_i32_1 = arith.constant 0 : i32
    return %c0_i32, %c0_i32_0 : i32, i32
  }
  func.func @transform_3(%arg0: i32) -> (i32, i32) {
    %c0_i32 = arith.constant 0 : i32
    %c0_i32_0 = arith.constant 0 : i32
    %c0_i32_1 = arith.constant 0 : i32
    return %c0_i32, %c0_i32_0 : i32, i32
  }
  func.func @transform_4(%arg0: i32) -> (i32, i32) {
    %c0_i32 = arith.constant 0 : i32
    %c0_i32_0 = arith.constant 0 : i32
    return %arg0, %c0_i32 : i32, i32
  }
}

module attributes {stable_mosaic.version = 11 : i64} {
  func.func @_deconv_final_kernel(%arg0: i32, %arg1: memref<1024x216xbf16, #tpu.memory_space<vmem>>, %arg2: memref<216x32xbf16, #tpu.memory_space<vmem>>, %arg3: memref<1x32xf32, #tpu.memory_space<vmem>>, %arg4: memref<1x32xf32, #tpu.memory_space<vmem>>, %arg5: memref<32x24xf32, #tpu.memory_space<vmem>>, %arg6: memref<1024x24xf32, #tpu.memory_space<vmem>>) attributes {dimension_semantics = [#tpu.dimension_semantics<parallel>], iteration_bounds = array<i64: 9>, scalar_prefetch = 0 : i64, scratch_operands = 0 : i64, tpu.core_type = #tpu.core_type<tc>, window_params = [{transform_indices = @transform_0, window_bounds = array<i64: 1024, 216>}, {pipeline_mode = #tpu.pipeline_mode<synchronous>, transform_indices = @transform_1, window_bounds = array<i64: 216, 32>}, {pipeline_mode = #tpu.pipeline_mode<synchronous>, transform_indices = @transform_2, window_bounds = array<i64: 1, 32>}, {pipeline_mode = #tpu.pipeline_mode<synchronous>, transform_indices = @transform_3, window_bounds = array<i64: 1, 32>}, {pipeline_mode = #tpu.pipeline_mode<synchronous>, transform_indices = @transform_4, window_bounds = array<i64: 32, 24>}, {transform_indices = @transform_5, window_bounds = array<i64: 1024, 24>}]} {
    %c0 = arith.constant 0 : index
    %c0_0 = arith.constant 0 : index
    %0 = vector.load %arg1[%c0, %c0_0] : memref<1024x216xbf16, #tpu.memory_space<vmem>>, vector<1024x216xbf16>
    %c0_1 = arith.constant 0 : index
    %c0_2 = arith.constant 0 : index
    %1 = vector.load %arg2[%c0_1, %c0_2] : memref<216x32xbf16, #tpu.memory_space<vmem>>, vector<216x32xbf16>
    %cst = arith.constant dense<0.000000e+00> : vector<1024x32xf32>
    %2 = tpu.matmul %0, %1, %cst {dimension_numbers = #tpu.dot_dimension_numbers<[1], [0], [0], [1], [0, 0, 1, 1], [], []>} : vector<1024x216xbf16>, vector<216x32xbf16>, vector<1024x32xf32> -> vector<1024x32xf32>
    %c0_3 = arith.constant 0 : index
    %c0_4 = arith.constant 0 : index
    %3 = vector.load %arg3[%c0_3, %c0_4] : memref<1x32xf32, #tpu.memory_space<vmem>>, vector<1x32xf32>
    %4 = vector.broadcast %3 : vector<1x32xf32> to vector<1024x32xf32>
    %5 = arith.mulf %2, %4 : vector<1024x32xf32>
    %c0_5 = arith.constant 0 : index
    %c0_6 = arith.constant 0 : index
    %6 = vector.load %arg4[%c0_5, %c0_6] : memref<1x32xf32, #tpu.memory_space<vmem>>, vector<1x32xf32>
    %7 = vector.broadcast %6 : vector<1x32xf32> to vector<1024x32xf32>
    %8 = arith.addf %5, %7 : vector<1024x32xf32>
    %cst_7 = arith.constant 0.000000e+00 : f32
    %9 = vector.broadcast %cst_7 : f32 to vector<1024x32xf32>
    %10 = arith.cmpf oge, %8, %9 : vector<1024x32xf32>
    %cst_8 = arith.constant 2.000000e-01 : f32
    %11 = vector.broadcast %cst_8 : f32 to vector<1024x32xf32>
    %12 = arith.mulf %11, %8 : vector<1024x32xf32>
    %13 = arith.select %10, %8, %12 : vector<1024x32xi1>, vector<1024x32xf32>
    %c0_9 = arith.constant 0 : index
    %c0_10 = arith.constant 0 : index
    %14 = vector.load %arg5[%c0_9, %c0_10] : memref<32x24xf32, #tpu.memory_space<vmem>>, vector<32x24xf32>
    %cst_11 = arith.constant dense<0.000000e+00> : vector<1024x24xf32>
    %15 = tpu.matmul %13, %14, %cst_11 {dimension_numbers = #tpu.dot_dimension_numbers<[1], [0], [0], [1], [0, 0, 1, 1], [], []>} : vector<1024x32xf32>, vector<32x24xf32>, vector<1024x24xf32> -> vector<1024x24xf32>
    %16 = math.tanh %15 : vector<1024x24xf32>
    %c0_12 = arith.constant 0 : index
    %c0_13 = arith.constant 0 : index
    %17 = vector.load %arg6[%c0_12, %c0_13] : memref<1024x24xf32, #tpu.memory_space<vmem>>, vector<1024x24xf32>
    tpu.vector_store %arg6[%c0_12, %c0_13], %16 {strides = array<i32>} : memref<1024x24xf32, #tpu.memory_space<vmem>>, vector<1024x24xf32>,
    return
  }
  func.func @transform_0(%arg0: i32) -> (i32, i32) {
    %c0_i32 = arith.constant 0 : i32
    %c0_i32_0 = arith.constant 0 : i32
    return %arg0, %c0_i32 : i32, i32
  }
  func.func @transform_1(%arg0: i32) -> (i32, i32) {
    %c0_i32 = arith.constant 0 : i32
    %c0_i32_0 = arith.constant 0 : i32
    %c0_i32_1 = arith.constant 0 : i32
    return %c0_i32, %c0_i32_0 : i32, i32
  }
  func.func @transform_2(%arg0: i32) -> (i32, i32) {
    %c0_i32 = arith.constant 0 : i32
    %c0_i32_0 = arith.constant 0 : i32
    %c0_i32_1 = arith.constant 0 : i32
    return %c0_i32, %c0_i32_0 : i32, i32
  }
  func.func @transform_3(%arg0: i32) -> (i32, i32) {
    %c0_i32 = arith.constant 0 : i32
    %c0_i32_0 = arith.constant 0 : i32
    %c0_i32_1 = arith.constant 0 : i32
    return %c0_i32, %c0_i32_0 : i32, i32
  }
  func.func @transform_4(%arg0: i32) -> (i32, i32) {
    %c0_i32 = arith.constant 0 : i32
    %c0_i32_0 = arith.constant 0 : i32
    %c0_i32_1 = arith.constant 0 : i32
    return %c0_i32, %c0_i32_0 : i32, i32
  }
  func.func @transform_5(%arg0: i32) -> (i32, i32) {
    %c0_i32 = arith.constant 0 : i32
    %c0_i32_0 = arith.constant 0 : i32
    return %arg0, %c0_i32 : i32, i32
  }
}

</mosaic_0001>

<bundles_post_ra>
// kernel: tile.48
= control target key start
LH: loop header
LB: loop body
LE: loop exit
PB: predicated region body
PF: predicated region fallthrough
CT: control target
= control target key end

     0   :  { %s36_s8 = smov 3  ;;  %s230_s9 = smov 96   ;;  %vm3_vm0 = vcmask 261120   ;;  %vm23_vm1 = vcmask 1048320   ;;  %vm47_vm2 = vcmask 785920   ;;  %vm71_vm3 = vcmask 523520   ;;  %s343_s0 = inlined_call_operand.vmem [shape: f32[72,32], index: 0, kind: input, shape index: {}]   ;;  %s344_s1 = inlined_call_operand.vmem [shape: f32[1,2304], index: 1, kind: output, shape index: {}]  }
   0x1   :  { %v201_v0 = vld [vmem:[%s343_s0 + $0x3] ss:$4 sm:$0xff]   ;;  %v205_v2 = vld [vmem:[%s343_s0 + $0x22] ss:$4 sm:$0xff]   ;;  %s231_s14 = smov 64   ;;  %s60_s15 = smov 3 }
   0x2   :  { %21 = vrot.lane.b32.xlu0 %v201_v0, %s230_s9  ;;  %v203_v1 = vld [vmem:[%s343_s0 + $0x43] ss:$4 sm:%s36_s8]   ;;  %52 = vrot.lane.b32.xlu2 %v205_v2, %s231_s14  ;;  %s84_s22 = smov 3  ;;  %s232_s29 = smov 32  }
   0x3   :  { %38 = vrot.lane.b32.xlu1 %v203_v1, %s230_s9  ;;  %v202_v3 = vld [vmem:[%s343_s0 + $0x23] ss:$4 sm:$0xff]   ;;  %v204_v4 = vld [vmem:[%s343_s0 + $0x2] ss:$4 sm:$0xff]   ;;  %v207_v6 = vld [vmem:[%s343_s0 + $0x1] ss:$4 sm:$0xff]  }
   0x4   :  { %v206_v5 = vld [vmem:[%s343_s0 + $0x42] ss:$4 sm:%s60_s15]   ;;  %v208_v7 = vld [vmem:[%s343_s0 + $0x21] ss:$4 sm:$0xff]   ;;  %s14_s30 = smov 3 }
   0x5   :  { %v209_v8 = vld [vmem:[%s343_s0 + $0x41] ss:$4 sm:%s84_s22]   ;;  %v2_v9 = vld [vmem:[%s343_s0] ss:$4 sm:$0xff]  }
   0x6   :  { %v200_v10 = vld [vmem:[%s343_s0 + $0x40] ss:$4 sm:%s14_s30]   ;;  %4 = vst.msk [vmem:[#allocation0] ss:$8 sm:$0xf] %vm3_vm0, %v2_v9  }
   0x7   :  { %5 = vst.msk [vmem:[#allocation0] ss:$8 sm:$0xf0] %vm3_vm0, %v2_v9   ;;  %v199_v11 = vld [vmem:[%s343_s0 + $0x20] ss:$4 sm:$0xff]  }
   0x8   :  { %18 = vst.msk [vmem:[#allocation0 + $0x80] ss:$8 sm:$0x3] %vm3_vm0, %v200_v10  }
   0x9   :  { %10 = vst.msk [vmem:[#allocation0 + $0x40] ss:$8 sm:$0xf] %vm3_vm0, %v199_v11  }
   0xa   :  { %28 = vrot.lane.b32.xlu0 %v202_v3, %s230_s9  ;;  %62 = vrot.lane.b32.xlu2 %v206_v5, %s231_s14  ;;  %12 = vst.msk [vmem:[#allocation0 + $0x40] ss:$8 sm:$0xf0] %vm3_vm0, %v199_v11  }
   0xb   :  { %45 = vrot.lane.b32.xlu1 %v204_v4, %s231_s14 }
  0x12   :  { %69 = vrot.lane.b32.xlu0 %v207_v6, %s232_s29  ;;  %86 = vrot.lane.b32.xlu2 %v209_v8, %s232_s29 }
  0x13   :  { %76 = vrot.lane.b32.xlu1 %v208_v7, %s232_s29 }
  0x5c   :  { %v53_v12 = vpop.permute.xlu2 %52  }
  0x64   :  { %v63_v13 = vpop.permute.xlu2 %62  }
  0x6c   :  { %v87_v14 = vpop.permute.xlu2 %86  }
  0x74   :  { %v22_v15 = vpop.permute.xlu0 %21  }
  0x75   :  { %24 = vst.msk [vmem:[#allocation0] ss:$8 sm:$0xf] %vm23_vm1, %v22_v15   ;;  %v39_v16 = vpop.permute.xlu1 %38  }
  0x76   :  { %25 = vst.msk [vmem:[#allocation0] ss:$8 sm:$0xf0] %vm23_vm1, %v22_v15  }
  0x77   :  { %42 = vst.msk [vmem:[#allocation0 + $0x80] ss:$8 sm:$0x3] %vm23_vm1, %v39_v16  }
  0x78   :  { %66 = vst.msk [vmem:[#allocation0 + $0x80] ss:$8 sm:$0x3] %vm47_vm2, %v63_v13  }
  0x79   :  { %90 = vst.msk [vmem:[#allocation0 + $0x80] ss:$8 sm:$0x3] %vm71_vm3, %v87_v14  }
  0x7c   :  { %v29_v17 = vpop.permute.xlu0 %28  }
  0x7d   :  { %32 = vst.msk [vmem:[#allocation0 + $0x40] ss:$8 sm:$0xf] %vm23_vm1, %v29_v17   ;;  %v46_v18 = vpop.permute.xlu1 %45  }
  0x7e   :  { %34 = vst.msk [vmem:[#allocation0 + $0x40] ss:$8 sm:$0xf0] %vm23_vm1, %v29_v17  }
  0x7f   :  { %56 = vst.msk [vmem:[#allocation0 + $0x40] ss:$8 sm:$0xf] %vm47_vm2, %v53_v12  }
  0x80   :  { %58 = vst.msk [vmem:[#allocation0 + $0x40] ss:$8 sm:$0xf0] %vm47_vm2, %v53_v12   ;;  %v188_v19 = vld [vmem:[#allocation0 + $0x80] sm:$0x1] }
  0x81   :  { %48 = vst.msk [vmem:[#allocation0] ss:$8 sm:$0xf] %vm47_vm2, %v46_v18   ;;  %v194_v20 = vld [vmem:[#allocation0 + $0x88] sm:$0x1] }
  0x82   :  { %49 = vst.msk [vmem:[#allocation0] ss:$8 sm:$0xf0] %vm47_vm2, %v46_v18  }
  0x83   :  { %225 = vst [vmem:[%s344_s1 + $0x10] sm:$0x1] %v188_v19 }
  0x84   :  { %226 = vst [vmem:[%s344_s1 + $0x11] sm:$0x1] %v194_v20  ;;  %v70_v21 = vpop.permute.xlu0 %69  }
  0x85   :  { %v77_v22 = vpop.permute.xlu1 %76   ;;  %72 = vst.msk [vmem:[#allocation0] ss:$8 sm:$0xf] %vm71_vm3, %v70_v21  }
  0x86   :  { %80 = vst.msk [vmem:[#allocation0 + $0x40] ss:$8 sm:$0xf] %vm71_vm3, %v77_v22  }
  0x87   :  { %82 = vst.msk [vmem:[#allocation0 + $0x40] ss:$8 sm:$0xf0] %vm71_vm3, %v77_v22  }
  0x88   :  { %73 = vst.msk [vmem:[#allocation0] ss:$8 sm:$0xf0] %vm71_vm3, %v70_v21  }
  0x8c   :  { %v93_v31 = vld [vmem:[#allocation0] sm:$0x1]  ;;  %v98_v32 = vld [vmem:[#allocation0 + $0x8] sm:$0x1]  ;;  %v104_v33 = vld [vmem:[#allocation0 + $0x10] sm:$0x1] }
  0x8d   :  { %v140_v23 = vld [vmem:[#allocation0 + $0x40] sm:$0x1]  ;;  %v146_v24 = vld [vmem:[#allocation0 + $0x48] sm:$0x1]  ;;  %v152_v25 = vld [vmem:[#allocation0 + $0x50] sm:$0x1] }
  0x8e   :  { %217 = vst [vmem:[%s344_s1 + $0x8] sm:$0x1] %v140_v23  ;;  %v158_v26 = vld [vmem:[#allocation0 + $0x58] sm:$0x1]  ;;  %v164_v27 = vld [vmem:[#allocation0 + $0x60] sm:$0x1] }
  0x8f   :  { %218 = vst [vmem:[%s344_s1 + $0x9] sm:$0x1] %v146_v24  ;;  %v170_v28 = vld [vmem:[#allocation0 + $0x68] sm:$0x1]  ;;  %v176_v29 = vld [vmem:[#allocation0 + $0x70] sm:$0x1] }
  0x90   :  { %219 = vst [vmem:[%s344_s1 + $0xa] sm:$0x1] %v152_v25  ;;  %v182_v30 = vld [vmem:[#allocation0 + $0x78] sm:$0x1]  ;;  %v116_v35 = vld [vmem:[#allocation0 + $0x20] sm:$0x1] }
  0x91   :  { %220 = vst [vmem:[%s344_s1 + $0xb] sm:$0x1] %v158_v26  ;;  %v110_v34 = vld [vmem:[#allocation0 + $0x18] sm:$0x1]  ;;  %v122_v36 = vld [vmem:[#allocation0 + $0x28] sm:$0x1] }
  0x92   :  { %221 = vst [vmem:[%s344_s1 + $0xc] sm:$0x1] %v164_v27  ;;  %v128_v37 = vld [vmem:[#allocation0 + $0x30] sm:$0x1]  ;;  %v134_v38 = vld [vmem:[#allocation0 + $0x38] sm:$0x1] }
  0x93   :  { %222 = vst [vmem:[%s344_s1 + $0xd] sm:$0x1] %v170_v28 }
  0x94   :  { %223 = vst [vmem:[%s344_s1 + $0xe] sm:$0x1] %v176_v29 }
  0x95   :  { %224 = vst [vmem:[%s344_s1 + $0xf] sm:$0x1] %v182_v30 }
  0x96   :  { %96 = vst [vmem:[%s344_s1] sm:$0x1] %v93_v31 }
  0x97   :  { %210 = vst [vmem:[%s344_s1 + $0x1] sm:$0x1] %v98_v32 }
  0x98   :  { %211 = vst [vmem:[%s344_s1 + $0x2] sm:$0x1] %v104_v33 }
  0x99   :  { %212 = vst [vmem:[%s344_s1 + $0x3] sm:$0x1] %v110_v34 }
  0x9a   :  { %213 = vst [vmem:[%s344_s1 + $0x4] sm:$0x1] %v116_v35 }
  0x9b   :  { %214 = vst [vmem:[%s344_s1 + $0x5] sm:$0x1] %v122_v36 }
  0x9c   :  { %215 = vst [vmem:[%s344_s1 + $0x6] sm:$0x1] %v128_v37 }
  0x9d   :  { %216 = vst [vmem:[%s344_s1 + $0x7] sm:$0x1] %v134_v38 }

// kernel: tile.43
= control target key start
LH: loop header
LB: loop body
LE: loop exit
PB: predicated region body
PF: predicated region fallthrough
CT: control target
= control target key end

     0   :  { %2 = vsyncpa [#allocation1], 0  ;;  %s72_s8 = smov [#allocation0]   ;;  %s113_s0 = inlined_call_operand.hbm [shape: f32[32], index: 0, kind: input, shape index: {}]   ;;  %s114_s1 = inlined_call_operand.vmem [shape: f32[72,32], index: 1, kind: output, shape index: {}]  }
   0x1   :  { %s8_s0 = sshll.u32 %s113_s0, 4  ;;  %s10_s9 = sshll.u32 %s72_s8, 4  ;;  %s9_s0 = int_to_ptr.hbm [resolvable:$true] %s8_s0  ;;  %s11_s9 = int_to_ptr.vmem [resolvable:$true] %s10_s9 }
   0x2   :  { %13 = dma.hbm_to_vmem [thread:$0]  %s9_s0, 16, %s11_s9, [#allocation1]  }
   0x3   :  { %70 = dma.done.wait [#allocation1], 16  }
   0x4   :  { %71 = vsyncadd [#allocation1], 4294967280  ;;  %v18_v0 = vld [vmem:[#allocation0] ss:$0 sm:$0xff] }
   0x5   :  { %19 = vst [vmem:[%s114_s1] sm:$0xff] %v18_v0 }
   0x6   :  { %37 = vst [vmem:[%s114_s1 + $0x8] sm:$0xff] %v18_v0 }
   0x7   :  { %38 = vst [vmem:[%s114_s1 + $0x10] sm:$0xff] %v18_v0 }
   0x8   :  { %39 = vst [vmem:[%s114_s1 + $0x18] sm:$0xff] %v18_v0 }
   0x9   :  { %40 = vst [vmem:[%s114_s1 + $0x20] sm:$0xff] %v18_v0 }
   0xa   :  { %41 = vst [vmem:[%s114_s1 + $0x28] sm:$0xff] %v18_v0 }
   0xb   :  { %42 = vst [vmem:[%s114_s1 + $0x30] sm:$0xff] %v18_v0 }
   0xc   :  { %43 = vst [vmem:[%s114_s1 + $0x38] sm:$0xff] %v18_v0 }
   0xd   :  { %44 = vst [vmem:[%s114_s1 + $0x40] sm:$0xff] %v18_v0 }
   0xe   :  { %36 = vsyncpa [#allocation1], 1 }

// kernel: gen_forward.4
= control target key start
LH: loop header
LB: loop body
LE: loop exit
PB: predicated region body
PF: predicated region fallthrough
CT: control target
= control target key end

     0   :  { %12 = vsyncpa [#allocation3], 0  ;;  %s724_s27 = smov [#allocation2]   ;;  %s1019_s0 = inlined_call_operand.vmem [shape: f32[8,16], index: 0, kind: input, shape index: {}]   ;;  %s1020_s1 = inlined_call_operand.vmem [shape: f32[16,16], index: 1, kind: input, shape index: {}]   ;;  %s1021_s2 = inlined_call_operand.hbm [shape: f32[1,16], index: 2, kind: input, shape index: {}]   ;;  %s1022_s3 = inlined_call_operand.vmem [shape: f32[1,16], index: 3, kind: input, shape index: {}]   ;;  %s1023_s4 = inlined_call_operand.vmem [shape: f32[16,2304], index: 4, kind: input, shape index: {}]   ;;  %s1024_s5 = inlined_call_operand.vmem [shape: f32[1,2304], index: 5, kind: input, shape index: {}]   ;;  %s1025_s6 = inlined_call_operand.vmem [shape: f32[1,2304], index: 6, kind: input, shape index: {}]   ;;  %s1026_s7 = inlined_call_operand.vmem [shape: f32[8,2304], index: 7, kind: output, shape index: {}]  }
   0x1   :  { %s22_s26 = sshll.u32 %s1021_s2, 4  ;;  %s24_s28 = sshll.u32 %s724_s27, 4  ;;  %s23_s26 = int_to_ptr.hbm [resolvable:$true] %s22_s26  ;;  %s25_s28 = int_to_ptr.vmem [resolvable:$true] %s24_s28 }
   0x2   :  { %27 = dma.hbm_to_vmem [thread:$0]  %s23_s26, 16, %s25_s28, [#allocation3]  }
   0x3   :  { %722 = dma.done.wait [#allocation3], 16  }
   0x4   :  { %723 = vsyncadd [#allocation3], 4294967280  ;;  %v42_v0 = vld [vmem:[%s1020_s1 + $0x8] sm:$0xff]  ;;  %v41_v1 = vld [vmem:[%s1020_s1] sm:$0xff]  ;;  %vm43_vm0 = vcmask 130048  }
   0x5   :  { %61 = vmatpush.msra.mxu0 %v42_v0  ;;  %v40_v2 = vld [vmem:[%s1019_s0] sm:$0xff]  ;;  %v98_v3 = vld [vmem:[%s1023_s4 + $0x90] sm:$0xff]  ;;  %v99_v4 = vld [vmem:[%s1023_s4 + $0x98] sm:$0xff] }
   0x6   :  { %v100_v5 = vld [vmem:[%s1023_s4 + $0xa0] sm:$0xff]  ;;  %133 = vmatpush.msra.mxu1 %v98_v3  ;;  %153 = vmatpush.msra.mxu2 %v99_v4  ;;  %v101_v6 = vld [vmem:[%s1023_s4 + $0xa8] sm:$0xff]  ;;  %v82_v9 = vld [vmem:[%s1023_s4 + $0x10] sm:$0xff] }
   0x7   :  { %62 = vmatpush.msra.mxu0 %v41_v1  ;;  %173 = vmatpush.msra.mxu3 %v100_v5  ;;  %v80_v7 = vld [vmem:[%s1023_s4] sm:$0xff]  ;;  %v81_v8 = vld [vmem:[%s1023_s4 + $0x8] sm:$0xff]  ;;  %v83_v10 = vld [vmem:[%s1023_s4 + $0x18] sm:$0xff] }
   0x8   :  { %676 = vmatmul.msk.f32.vlgmr.msra.gmra.mxu0 %vm43_vm0, %v40_v2  ;;  %134 = vmatpush.msra.mxu1 %v80_v7  ;;  %v103_v11 = vld [vmem:[%s1023_s4 + $0xb8] sm:$0xff]  ;;  %v85_v12 = vld [vmem:[%s1023_s4 + $0x28] sm:$0xff]  ;;  %v102_v13 = vld [vmem:[%s1023_s4 + $0xb0] sm:$0xff] }
   0x9   :  { %193 = vmatpush.msrb.mxu0 %v101_v6  ;;  %154 = vmatpush.msra.mxu2 %v81_v8  ;;  %v104_v14 = vld [vmem:[%s1023_s4 + $0xc0] sm:$0xff]  ;;  %v105_v15 = vld [vmem:[%s1023_s4 + $0xc8] sm:$0xff]  ;;  %v86_v17 = vld [vmem:[%s1023_s4 + $0x30] sm:$0xff] }
   0xa   :  { %174 = vmatpush.msra.mxu3 %v82_v9  ;;  %213 = vmatpush.msrb.mxu1 %v102_v13  ;;  %v84_v16 = vld [vmem:[%s1023_s4 + $0x20] sm:$0xff]  ;;  %v87_v18 = vld [vmem:[%s1023_s4 + $0x38] sm:$0xff]  ;;  %v106_v27 = vld [vmem:[%s1023_s4 + $0xd0] sm:$0xff] }
   0xb   :  { %194 = vmatpush.msrb.mxu0 %v83_v10  ;;  %233 = vmatpush.msrb.mxu2 %v103_v11  ;;  %v696_v19 = vld [vmem:[#allocation2] ss:$0 sm:$0xff]  ;;  %v107_v26 = vld [vmem:[%s1023_s4 + $0xd8] sm:$0xff]  ;;  %v109_v29 = vld [vmem:[%s1023_s4 + $0xe8] sm:$0xff] }
   0xc   :  { %253 = vmatpush.msrb.mxu3 %v104_v14  ;;  %214 = vmatpush.msrb.mxu1 %v84_v16  ;;  %v697_v20 = vld [vmem:[%s1022_s3] ss:$0 sm:$0xff]  ;;  %v89_v30 = vld [vmem:[%s1023_s4 + $0x48] sm:$0xff]  ;;  %v90_v32 = vld [vmem:[%s1023_s4 + $0x50] sm:$0xff] }
   0xd   :  { %273 = vmatpush.msra.mxu0 %v105_v15  ;;  %234 = vmatpush.msrb.mxu2 %v85_v12  ;;  %v108_v28 = vld [vmem:[%s1023_s4 + $0xe0] sm:$0xff]  ;;  %v91_v33 = vld [vmem:[%s1023_s4 + $0x58] sm:$0xff]  ;;  %v110_v35 = vld [vmem:[%s1023_s4 + $0xf0] sm:$0xff] }
   0xe   :  { %254 = vmatpush.msrb.mxu3 %v86_v17  ;;  %v88_v31 = vld [vmem:[%s1023_s4 + $0x40] sm:$0xff]  ;;  %v111_v34 = vld [vmem:[%s1023_s4 + $0xf8] sm:$0xff]  ;;  %v113_v37 = vld [vmem:[%s1023_s4 + $0x108] sm:$0xff] }
   0xf   :  { %274 = vmatpush.msra.mxu0 %v87_v18  ;;  %v112_v36 = vld [vmem:[%s1023_s4 + $0x100] sm:$0xff]  ;;  %v93_v38 = vld [vmem:[%s1023_s4 + $0x68] sm:$0xff]  ;;  %v94_v40 = vld [vmem:[%s1023_s4 + $0x70] sm:$0xff] }
  0x10   :  { %v92_v39 = vld [vmem:[%s1023_s4 + $0x60] sm:$0xff]  ;;  %v95_v41 = vld [vmem:[%s1023_s4 + $0x78] sm:$0xff]  ;;  %v114_v43 = vld [vmem:[%s1023_s4 + $0x110] sm:$0xff] }
  0x11   :  { %v115_v42 = vld [vmem:[%s1023_s4 + $0x118] sm:$0xff]  ;;  %v97_v44 = vld [vmem:[%s1023_s4 + $0x88] sm:$0xff]  ;;  %v96_v45 = vld [vmem:[%s1023_s4 + $0x80] sm:$0xff] }
  0x12   :  { %v910_v46 = vld [vmem:[%s1024_s5] sm:$0xff]  ;;  %v940_v18 = vld [vmem:[%s1024_s5 + $0x8] sm:$0xff] }
  0x13   :  { %v915_v47 = vld [vmem:[%s1025_s6] sm:$0xff]  ;;  %v485_v48 = vperm.slane %v910_v46, 0  ;;  %v488_v49 = vperm.slane %v910_v46, 3  ;;  %v486_v57 = vperm.slane %v910_v46, 1  ;;  %v487_v59 = vperm.slane %v910_v46, 2 }
  0x14   :  { %v545_v50 = vperm.slane %v915_v47, 0  ;;  %v548_v52 = vperm.slane %v915_v47, 3  ;;  %v546_v61 = vperm.slane %v915_v47, 1  ;;  %v489_v62 = vperm.slane %v910_v46, 4 }
  0x15   :  { %v547_v1 = vperm.slane %v915_v47, 2  ;;  %v492_v2 = vperm.slane %v910_v46, 7  ;;  %v549_v6 = vperm.slane %v915_v47, 4  ;;  %v552_v10 = vperm.slane %v915_v47, 7 }
  0x16   :  { %v490_v16 = vperm.slane %v910_v46, 5  ;;  %v491_v17 = vperm.slane %v910_v46, 6  ;;  %v494_v46 = vperm.slane %v940_v18, 1 }
  0x85   :  { %v64_v21 = vpop.f32.mrf.mxu0 }
  0x86   :  { %v71_v22 = vmul.f32 %v696_v19, %v64_v21  ;;  %v550_v21 = vperm.slane %v915_v47, 5 }
  0x88   :  { %v76_v23 = vadd.f32 %v697_v20, %v71_v22 }
  0x8a   :  { %vm77_vm1 = vcmp.ge.f32.partialorder %v76_v23, 0.0  ;;  %v78_v24 = vmul.f32 0.2, %v76_v23 }
  0x8c   :  { %v79_v25 = vsel %vm77_vm1, %v76_v23, %v78_v24  ;;  %v551_v24 = vperm.slane %v915_v47, 6  ;;  %v495_v47 = vperm.slane %v940_v18, 2 }
  0x8d   :  { %677 = vmatmul.msk.f32.vlgmr.msra.gmra.mxu1 %vm43_vm0, %v79_v25  ;;  %678 = vmatmul.msk.f32.vlgmr.msra.gmra.mxu2 %vm43_vm0, %v79_v25 }
  0x8e   :  { %679 = vmatmul.msk.f32.vlgmr.msra.gmra.mxu3 %vm43_vm0, %v79_v25  ;;  %680 = vmatmul.msk.f32.vlgmr.msrb.gmra.mxu0 %vm43_vm0, %v79_v25 }
  0x8f   :  { %313 = vmatpush.msra.mxu2 %v107_v26  ;;  %293 = vmatpush.msra.mxu1 %v106_v27 }
  0x90   :  { %333 = vmatpush.msra.mxu3 %v108_v28  ;;  %353 = vmatpush.msrb.mxu0 %v109_v29  ;;  %v493_v28 = vperm.slane %v940_v18, 0 }
  0x91   :  { %314 = vmatpush.msra.mxu2 %v89_v30  ;;  %294 = vmatpush.msra.mxu1 %v88_v31 }
  0x92   :  { %334 = vmatpush.msra.mxu3 %v90_v32  ;;  %354 = vmatpush.msrb.mxu0 %v91_v33  ;;  %v496_v32 = vperm.slane %v940_v18, 3 }
  0x95   :  { %681 = vmatmul.msk.f32.vlgmr.msrb.gmra.mxu1 %vm43_vm0, %v79_v25  ;;  %682 = vmatmul.msk.f32.vlgmr.msrb.gmra.mxu2 %vm43_vm0, %v79_v25 }
  0x96   :  { %683 = vmatmul.msk.f32.vlgmr.msrb.gmra.mxu3 %vm43_vm0, %v79_v25  ;;  %684 = vmatmul.msk.f32.vlgmr.msra.gmra.mxu0 %vm43_vm0, %v79_v25 }
  0x97   :  { %393 = vmatpush.msrb.mxu2 %v111_v34  ;;  %373 = vmatpush.msrb.mxu1 %v110_v35 }
  0x98   :  { %413 = vmatpush.msrb.mxu3 %v112_v36  ;;  %433 = vmatpush.msra.mxu0 %v113_v37 }
  0x99   :  { %394 = vmatpush.msrb.mxu2 %v93_v38  ;;  %374 = vmatpush.msrb.mxu1 %v92_v39 }
  0x9a   :  { %414 = vmatpush.msrb.mxu3 %v94_v40  ;;  %434 = vmatpush.msra.mxu0 %v95_v41 }
  0x9d   :  { %685 = vmatmul.msk.f32.vlgmr.msra.gmra.mxu1 %vm43_vm0, %v79_v25  ;;  %686 = vmatmul.msk.f32.vlgmr.msra.gmra.mxu2 %vm43_vm0, %v79_v25 }
  0x9e   :  { %687 = vmatmul.msk.f32.vlgmr.msra.gmra.mxu3 %vm43_vm0, %v79_v25  ;;  %688 = vmatmul.msk.f32.vlgmr.msrb.gmra.mxu0 %vm43_vm0, %v79_v25 }
  0x9f   :  { %473 = vmatpush.msra.mxu2 %v115_v42  ;;  %453 = vmatpush.msra.mxu1 %v114_v43 }
  0xa1   :  { %474 = vmatpush.msra.mxu2 %v97_v44  ;;  %454 = vmatpush.msra.mxu1 %v96_v45 }
  0xa5   :  { %689 = vmatmul.msk.f32.vlgmr.msrb.gmra.mxu1 %vm43_vm0, %v79_v25  ;;  %690 = vmatmul.msk.f32.vlgmr.msrb.gmra.mxu2 %vm43_vm0, %v79_v25 }
  0xa6   :  { %691 = vmatmul.msk.f32.vlgmr.msrb.gmra.mxu3 %vm43_vm0, %v79_v25  ;;  %692 = vmatmul.msk.f32.vlgmr.msra.gmra.mxu0 %vm43_vm0, %v79_v25 }
  0xad   :  { %693 = vmatmul.msk.f32.vlgmr.msra.gmra.mxu1 %vm43_vm0, %v79_v25  ;;  %694 = vmatmul.msk.f32.vlgmr.msra.gmra.mxu2 %vm43_vm0, %v79_v25  ;;  %v947_v25 = vld [vmem:[%s1025_s6 + $0x8] sm:$0xff] }
  0xae   :  { %v553_v36 = vperm.slane %v947_v25, 0  ;;  %v556_v40 = vperm.slane %v947_v25, 3 }
 0x10a   :  { %v136_v51 = vpop.f32.mrf.mxu1 }
 0x10b   :  { %v521_v53 = vmul.f32 %v485_v48, %v136_v51  ;;  %v196_v54 = vpop.f32.mrf.mxu0 }
 0x10c   :  { %v524_v55 = vmul.f32 %v488_v49, %v196_v54 }
 0x10d   :  { %v581_v56 = vadd.f32 %v545_v50, %v521_v53  ;;  %v554_v50 = vperm.slane %v947_v25, 1  ;;  %v555_v53 = vperm.slane %v947_v25, 2 }
 0x10e   :  { %v584_v58 = vadd.f32 %v548_v52, %v524_v55 }
 0x10f   :  { %vm599_vm2 = vcmp.ge.f32.partialorder %v581_v56, 0.0  ;;  %v617_v60 = vmul.f32 0.2, %v581_v56 }
 0x110   :  { %vm602_vm3 = vcmp.ge.f32.partialorder %v584_v58, 0.0  ;;  %v620_v63 = vmul.f32 0.2, %v584_v58  ;;  %v156_v0 = vpop.f32.mrf.mxu2 }
 0x111   :  { %v635_v3 = vsel %vm599_vm2, %v581_v56, %v617_v60  ;;  %v522_v4 = vmul.f32 %v486_v57, %v156_v0  ;;  %v176_v5 = vpop.f32.mrf.mxu3  ;;  %v497_v56 = vperm.slane %v940_v18, 4  ;;  %v500_v60 = vperm.slane %v940_v18, 7 }
 0x112   :  { %653 = vst [vmem:[%s1026_s7] sm:$0xff] %v635_v3  ;;  %v638_v7 = vsel %vm602_vm3, %v584_v58, %v620_v63  ;;  %v523_v8 = vmul.f32 %v487_v59, %v176_v5  ;;  %v216_v9 = vpop.f32.mrf.mxu1  ;;  %v557_v0 = vperm.slane %v947_v25, 4 }
 0x113   :  { %656 = vst [vmem:[%s1026_s7 + $0x18] sm:$0xff] %v638_v7  ;;  %v582_v11 = vadd.f32 %v546_v61, %v522_v4  ;;  %v525_v12 = vmul.f32 %v489_v62, %v216_v9  ;;  %v276_v13 = vpop.f32.mrf.mxu0  ;;  %v560_v4 = vperm.slane %v947_v25, 7 }
 0x114   :  { %v583_v14 = vadd.f32 %v547_v1, %v523_v8  ;;  %v528_v15 = vmul.f32 %v492_v2, %v276_v13 }
 0x115   :  { %vm600_vm4 = vcmp.ge.f32.partialorder %v582_v11, 0.0  ;;  %v618_v19 = vmul.f32 0.2, %v582_v11  ;;  %v585_v20 = vadd.f32 %v549_v6, %v525_v12 }
 0x116   :  { %vm601_vm5 = vcmp.ge.f32.partialorder %v583_v14, 0.0  ;;  %v619_v22 = vmul.f32 0.2, %v583_v14  ;;  %v588_v23 = vadd.f32 %v552_v10, %v528_v15  ;;  %v498_v10 = vperm.slane %v940_v18, 5 }
 0x117   :  { %v636_v26 = vsel %vm600_vm4, %v582_v11, %v618_v19  ;;  %vm603_vm6 = vcmp.ge.f32.partialorder %v585_v20, 0.0  ;;  %v621_v27 = vmul.f32 0.2, %v585_v20  ;;  %v481_v11 = vld [vmem:[%s1024_s5 + $0x10] sm:$0x3] }
 0x118   :  { %654 = vst [vmem:[%s1026_s7 + $0x8] sm:$0xff] %v636_v26  ;;  %v637_v29 = vsel %vm601_vm5, %v583_v14, %v619_v22  ;;  %vm606_vm7 = vcmp.ge.f32.partialorder %v588_v23, 0.0  ;;  %v624_v30 = vmul.f32 0.2, %v588_v23  ;;  %v236_v31 = vpop.f32.mrf.mxu2  ;;  %v499_v14 = vperm.slane %v940_v18, 6 }
 0x119   :  { %655 = vst [vmem:[%s1026_s7 + $0x10] sm:$0xff] %v637_v29  ;;  %v639_v33 = vsel %vm603_vm6, %v585_v20, %v621_v27  ;;  %v526_v34 = vmul.f32 %v490_v16, %v236_v31  ;;  %v256_v35 = vpop.f32.mrf.mxu3  ;;  %v541_v19 = vld [vmem:[%s1025_s6 + $0x10] sm:$0x3]  ;;  %v501_v22 = vperm.slane %v481_v11, 0  ;;  %v559_v26 = vperm.slane %v947_v25, 6 }
 0x11a   :  { %657 = vst [vmem:[%s1026_s7 + $0x20] sm:$0xff] %v639_v33  ;;  %v642_v37 = vsel %vm606_vm7, %v588_v23, %v624_v30  ;;  %v527_v38 = vmul.f32 %v491_v17, %v256_v35  ;;  %v296_v39 = vpop.f32.mrf.mxu1  ;;  %v558_v17 = vperm.slane %v947_v25, 5  ;;  %v561_v30 = vperm.slane %v541_v19, 0 }
 0x11b   :  { %660 = vst [vmem:[%s1026_s7 + $0x38] sm:$0xff] %v642_v37  ;;  %v586_v41 = vadd.f32 %v550_v21, %v526_v34  ;;  %v529_v42 = vmul.f32 %v493_v28, %v296_v39  ;;  %v356_v43 = vpop.f32.mrf.mxu0 }
 0x11c   :  { %v587_v44 = vadd.f32 %v551_v24, %v527_v38  ;;  %v532_v45 = vmul.f32 %v496_v32, %v356_v43  ;;  %v502_v38 = vperm.slane %v481_v11, 1 }
 0x11d   :  { %vm604_vm8 = vcmp.ge.f32.partialorder %v586_v41, 0.0  ;;  %v622_v48 = vmul.f32 0.2, %v586_v41  ;;  %v589_v49 = vadd.f32 %v553_v36, %v529_v42  ;;  %v562_v42 = vperm.slane %v541_v19, 1 }
 0x11e   :  { %vm605_vm9 = vcmp.ge.f32.partialorder %v587_v44, 0.0  ;;  %v623_v51 = vmul.f32 0.2, %v587_v44  ;;  %v592_v52 = vadd.f32 %v556_v40, %v532_v45 }
 0x11f   :  { %v640_v54 = vsel %vm604_vm8, %v586_v41, %v622_v48  ;;  %vm607_vm10 = vcmp.ge.f32.partialorder %v589_v49, 0.0  ;;  %v625_v55 = vmul.f32 0.2, %v589_v49 }
 0x120   :  { %658 = vst [vmem:[%s1026_s7 + $0x28] sm:$0xff] %v640_v54  ;;  %v641_v57 = vsel %vm605_vm9, %v587_v44, %v623_v51  ;;  %vm610_vm11 = vcmp.ge.f32.partialorder %v592_v52, 0.0  ;;  %v628_v58 = vmul.f32 0.2, %v592_v52  ;;  %v316_v59 = vpop.f32.mrf.mxu2 }
 0x121   :  { %659 = vst [vmem:[%s1026_s7 + $0x30] sm:$0xff] %v641_v57  ;;  %v643_v61 = vsel %vm607_vm10, %v589_v49, %v625_v55  ;;  %v530_v62 = vmul.f32 %v494_v46, %v316_v59  ;;  %v336_v63 = vpop.f32.mrf.mxu3 }
 0x122   :  { %661 = vst [vmem:[%s1026_s7 + $0x40] sm:$0xff] %v643_v61  ;;  %v646_v1 = vsel %vm610_vm11, %v592_v52, %v628_v58  ;;  %v531_v2 = vmul.f32 %v495_v47, %v336_v63  ;;  %v376_v3 = vpop.f32.mrf.mxu1 }
 0x123   :  { %664 = vst [vmem:[%s1026_s7 + $0x58] sm:$0xff] %v646_v1  ;;  %v590_v5 = vadd.f32 %v554_v50, %v530_v62  ;;  %v533_v6 = vmul.f32 %v497_v56, %v376_v3  ;;  %v436_v7 = vpop.f32.mrf.mxu0 }
 0x124   :  { %v591_v8 = vadd.f32 %v555_v53, %v531_v2  ;;  %v536_v9 = vmul.f32 %v500_v60, %v436_v7 }
 0x125   :  { %vm608_vm12 = vcmp.ge.f32.partialorder %v590_v5, 0.0  ;;  %v626_v12 = vmul.f32 0.2, %v590_v5  ;;  %v593_v13 = vadd.f32 %v557_v0, %v533_v6 }
 0x126   :  { %vm609_vm13 = vcmp.ge.f32.partialorder %v591_v8, 0.0  ;;  %v627_v15 = vmul.f32 0.2, %v591_v8  ;;  %v596_v16 = vadd.f32 %v560_v4, %v536_v9 }
 0x127   :  { %v644_v20 = vsel %vm608_vm12, %v590_v5, %v626_v12  ;;  %vm611_vm14 = vcmp.ge.f32.partialorder %v593_v13, 0.0  ;;  %v629_v21 = vmul.f32 0.2, %v593_v13 }
 0x128   :  { %662 = vst [vmem:[%s1026_s7 + $0x48] sm:$0xff] %v644_v20  ;;  %v645_v23 = vsel %vm609_vm13, %v591_v8, %v627_v15  ;;  %vm614_vm15 = vcmp.ge.f32.partialorder %v596_v16, 0.0  ;;  %v632_v18 = vmul.f32 0.2, %v596_v16  ;;  %v396_v24 = vpop.f32.mrf.mxu2 }
 0x129   :  { %663 = vst [vmem:[%s1026_s7 + $0x50] sm:$0xff] %v645_v23  ;;  %v647_v27 = vsel %vm611_vm14, %v593_v13, %v629_v21  ;;  %v534_v28 = vmul.f32 %v498_v10, %v396_v24  ;;  %v416_v29 = vpop.f32.mrf.mxu3 }
 0x12a   :  { %665 = vst [vmem:[%s1026_s7 + $0x60] sm:$0xff] %v647_v27  ;;  %v650_v31 = vsel %vm614_vm15, %v596_v16, %v632_v18  ;;  %v535_v32 = vmul.f32 %v499_v14, %v416_v29  ;;  %v456_v33 = vpop.f32.mrf.mxu1 }
 0x12b   :  { %668 = vst [vmem:[%s1026_s7 + $0x78] sm:$0xff] %v650_v31  ;;  %v594_v25 = vadd.f32 %v558_v17, %v534_v28  ;;  %v537_v34 = vmul.f32 %v501_v22, %v456_v33 }
 0x12c   :  { %v595_v35 = vadd.f32 %v559_v26, %v535_v32 }
 0x12d   :  { %vm612_vm0 = vcmp.ge.f32.partialorder %v594_v25, 0.0  ;;  %v630_v36 = vmul.f32 0.2, %v594_v25  ;;  %v597_v37 = vadd.f32 %v561_v30, %v537_v34 }
 0x12e   :  { %vm613_vm1 = vcmp.ge.f32.partialorder %v595_v35, 0.0  ;;  %v631_v39 = vmul.f32 0.2, %v595_v35 }
 0x12f   :  { %v648_v40 = vsel %vm612_vm0, %v594_v25, %v630_v36  ;;  %vm615_vm2 = vcmp.ge.f32.partialorder %v597_v37, 0.0  ;;  %v633_v41 = vmul.f32 0.2, %v597_v37 }
 0x130   :  { %666 = vst [vmem:[%s1026_s7 + $0x68] sm:$0xff] %v648_v40  ;;  %v649_v43 = vsel %vm613_vm1, %v595_v35, %v631_v39  ;;  %v476_v44 = vpop.f32.mrf.mxu2 }
 0x131   :  { %667 = vst [vmem:[%s1026_s7 + $0x70] sm:$0xff] %v649_v43  ;;  %v651_v45 = vsel %vm615_vm2, %v597_v37, %v633_v41  ;;  %v538_v46 = vmul.f32 %v502_v38, %v476_v44 }
 0x132   :  { %669 = vst [vmem:[%s1026_s7 + $0x80] sm:$0xff] %v651_v45 }
 0x133   :  { %v598_v47 = vadd.f32 %v562_v42, %v538_v46 }
 0x135   :  { %vm616_vm3 = vcmp.ge.f32.partialorder %v598_v47, 0.0  ;;  %v634_v48 = vmul.f32 0.2, %v598_v47 }
 0x137   :  { %v652_v49 = vsel %vm616_vm3, %v598_v47, %v634_v48 }
 0x138   :  { %670 = vst [vmem:[%s1026_s7 + $0x88] sm:$0xff] %v652_v49 }
 0x139   :  { %675 = vsyncpa [#allocation3], 1 }

// kernel: tile.53
= control target key start
LH: loop header
LB: loop body
LE: loop exit
PB: predicated region body
PF: predicated region fallthrough
CT: control target
= control target key end

     0   :  { %s22_s0 = inlined_call_operand.vmem [shape: f32[16], index: 0, kind: input, shape index: {}]   ;;  %s23_s1 = inlined_call_operand.vmem [shape: f32[8,16], index: 1, kind: output, shape index: {}]  }
   0x1   :  { %v4_v0 = vld [vmem:[%s22_s0] ss:$0 sm:$0xff] }
   0x2   :  { %5 = vst [vmem:[%s23_s1] sm:$0xff] %v4_v0 }

// kernel: tile.58
= control target key start
LH: loop header
LB: loop body
LE: loop exit
PB: predicated region body
PF: predicated region fallthrough
CT: control target
= control target key end

     0   :  { %s67_s10 = smov 112   ;;  %s68_s11 = smov 80   ;;  %vm3_vm0 = vcmask 130048   ;;  %vm9_vm1 = vcmask 1048448   ;;  %vm15_vm2 = vcmask 917248   ;;  %vm21_vm3 = vcmask 786048   ;;  %s111_s0 = inlined_call_operand.vmem [shape: f32[8,16], index: 0, kind: input, shape index: {}]   ;;  %s112_s1 = inlined_call_operand.vmem [shape: f32[1,128], index: 1, kind: output, shape index: {}]  }
   0x1   :  { %v53_v0 = vld [vmem:[%s111_s0 + $0x7] sm:$0x1]   ;;  %v55_v1 = vld [vmem:[%s111_s0 + $0x5] sm:$0x1]   ;;  %v57_v2 = vld [vmem:[%s111_s0 + $0x3] sm:$0x1]  }
   0x2   :  { %7 = vrot.lane.b32.xlu0 %v53_v0, %s67_s10  ;;  %19 = vrot.lane.b32.xlu1 %v55_v1, %s68_s11  ;;  %s69_s14 = smov 48   ;;  %v54_v3 = vld [vmem:[%s111_s0 + $0x6] sm:$0x1]   ;;  %v56_v4 = vld [vmem:[%s111_s0 + $0x4] sm:$0x1]   ;;  %s70_s21 = smov 96  }
   0x3   :  { %31 = vrot.lane.b32.xlu2 %v57_v2, %s69_s14  ;;  %v58_v5 = vld [vmem:[%s111_s0 + $0x2] sm:$0x1]   ;;  %s71_s22 = smov 64   ;;  %s72_s23 = smov 32   ;;  %v59_v6 = vld [vmem:[%s111_s0 + $0x1] sm:$0x1]  }
   0x4   :  { %s73_s26 = smov 16   ;;  %v2_v7 = vld [vmem:[%s111_s0] sm:$0x1]   ;;  %vm27_vm4 = vcmask 654848   ;;  %vm33_vm5 = vcmask 523648   ;;  %vm39_vm6 = vcmask 392448  }
   0x5   :  { %4 = vst.msk [vmem:[#allocation0] sm:$0x1] %vm3_vm0, %v2_v7   ;;  %vm45_vm7 = vcmask 261248  }
   0xa   :  { %13 = vrot.lane.b32.xlu0 %v54_v3, %s70_s21  ;;  %25 = vrot.lane.b32.xlu1 %v56_v4, %s71_s22 }
   0xb   :  { %37 = vrot.lane.b32.xlu2 %v58_v5, %s72_s23 }
  0x12   :  { %43 = vrot.lane.b32.xlu0 %v59_v6, %s73_s26 }
  0x5d   :  { %v32_v8 = vpop.permute.xlu2 %31  }
  0x65   :  { %v38_v9 = vpop.permute.xlu2 %37  }
  0x74   :  { %v8_v10 = vpop.permute.xlu0 %7   ;;  %v20_v11 = vpop.permute.xlu1 %19  }
  0x75   :  { %10 = vst.msk [vmem:[#allocation0] sm:$0x1] %vm9_vm1, %v8_v10  }
  0x7c   :  { %v14_v12 = vpop.permute.xlu0 %13   ;;  %v26_v13 = vpop.permute.xlu1 %25  }
  0x7d   :  { %16 = vst.msk [vmem:[#allocation0] sm:$0x1] %vm15_vm2, %v14_v12  }
  0x7e   :  { %22 = vst.msk [vmem:[#allocation0] sm:$0x1] %vm21_vm3, %v20_v11  }
  0x7f   :  { %28 = vst.msk [vmem:[#allocation0] sm:$0x1] %vm27_vm4, %v26_v13  }
  0x80   :  { %34 = vst.msk [vmem:[#allocation0] sm:$0x1] %vm33_vm5, %v32_v8  }
  0x81   :  { %40 = vst.msk [vmem:[#allocation0] sm:$0x1] %vm39_vm6, %v38_v9  }
  0x84   :  { %v44_v14 = vpop.permute.xlu0 %43  }
  0x85   :  { %46 = vst.msk [vmem:[#allocation0] sm:$0x1] %vm45_vm7, %v44_v14  }
  0x8c   :  { %v49_v15 = vld [vmem:[#allocation0] sm:$0x1] }
  0x8d   :  { %52 = vst [vmem:[%s112_s1] sm:$0x1] %v49_v15 }

// kernel: gen_forward.5
= control target key start
LH: loop header
LB: loop body
LE: loop exit
PB: predicated region body
PF: predicated region fallthrough
CT: control target
= control target key end

     0   :  { %vm837_vm0 = vcmask 785408   ;;  %s2799_s1 = inlined_call_operand.vmem [shape: bf16[864,128], index: 1, kind: input, shape index: {}]   ;;  %s2800_s0 = inlined_call_operand.vmem [shape: bf16[144,864], index: 0, kind: input, shape index: {}]   ;;  %s2801_s2 = inlined_call_operand.vmem [shape: f32[1,128], index: 2, kind: input, shape index: {}]   ;;  %s2802_s3 = inlined_call_operand.vmem [shape: f32[1,128], index: 3, kind: input, shape index: {}]   ;;  %s2803_s4 = inlined_call_operand.vmem [shape: f32[144,128], index: 4, kind: output, shape index: {}]  }
   0x1   :  { %v1910_v0 = vld [vmem:[%s2799_s1 + $0x38] sm:$0xff]  ;;  %v1909_v3 = vld [vmem:[%s2799_s1 + $0x30] sm:$0xff]  ;;  %v1908_v6 = vld [vmem:[%s2799_s1 + $0x28] sm:$0xff] }
   0x2   :  { %v2014_v1 = vld [vmem:[%s2799_s1 + $0xb8] sm:$0xff]  ;;  %865 = vmatpush.bf16.msra.mxu0 %v1910_v0  ;;  %1957 = vmatpush.bf16.msra.mxu3 %v1910_v0  ;;  %v2029_v4 = vld [vmem:[%s2799_s1 + $0xb0] sm:$0xff]  ;;  %v2044_v7 = vld [vmem:[%s2799_s1 + $0xa8] sm:$0xff] }
   0x3   :  { %v2019_v2 = vld [vmem:[%s2799_s1 + $0x78] sm:$0xff]  ;;  %1973 = vmatpush.bf16.msra.mxu2 %v2014_v1  ;;  %v2034_v5 = vld [vmem:[%s2799_s1 + $0x70] sm:$0xff]  ;;  %v2049_v8 = vld [vmem:[%s2799_s1 + $0x68] sm:$0xff] }
   0x4   :  { %1965 = vmatpush.bf16.msra.mxu1 %v2019_v2  ;;  %v1907_v9 = vld [vmem:[%s2799_s1 + $0x20] sm:$0xff]  ;;  %v1906_v12 = vld [vmem:[%s2799_s1 + $0x18] sm:$0xff]  ;;  %v1905_v15 = vld [vmem:[%s2799_s1 + $0x10] sm:$0xff] }
   0x5   :  { %v2059_v10 = vld [vmem:[%s2799_s1 + $0xa0] sm:$0xff]  ;;  %v2074_v13 = vld [vmem:[%s2799_s1 + $0x98] sm:$0xff]  ;;  %v2089_v16 = vld [vmem:[%s2799_s1 + $0x90] sm:$0xff] }
   0x6   :  { %866 = vmatpush.bf16.msra.mxu0 %v1909_v3  ;;  %1958 = vmatpush.bf16.msra.mxu3 %v1909_v3  ;;  %v2064_v11 = vld [vmem:[%s2799_s1 + $0x60] sm:$0xff]  ;;  %v2079_v14 = vld [vmem:[%s2799_s1 + $0x58] sm:$0xff]  ;;  %v2094_v17 = vld [vmem:[%s2799_s1 + $0x50] sm:$0xff] }
   0x7   :  { %1974 = vmatpush.bf16.msra.mxu2 %v2029_v4  ;;  %v1904_v18 = vld [vmem:[%s2799_s1 + $0x8] sm:$0xff]  ;;  %v1903_v21 = vld [vmem:[%s2799_s1] sm:$0xff]  ;;  %v1843_v25 = vld [vmem:[%s2800_s0 + $0x18] sm:$0xf0] }
   0x8   :  { %1966 = vmatpush.bf16.msra.mxu1 %v2034_v5  ;;  %v2104_v19 = vld [vmem:[%s2799_s1 + $0x88] sm:$0xff]  ;;  %v2117_v22 = vld [vmem:[%s2799_s1 + $0x80] sm:$0xff]  ;;  %v1421_v26 = vld [vmem:[%s2800_s0 + $0x70] sm:$0xf] }
   0x9   :  { %v2109_v20 = vld [vmem:[%s2799_s1 + $0x48] sm:$0xff]  ;;  %v2122_v23 = vld [vmem:[%s2799_s1 + $0x40] sm:$0xff]  ;;  %v1429_v28 = vld [vmem:[%s2800_s0 + $0x78] sm:$0xf] }
   0xa   :  { %867 = vmatpush.bf16.msra.mxu0 %v1908_v6  ;;  %1959 = vmatpush.bf16.msra.mxu3 %v1908_v6  ;;  %v1365_v24 = vld [vmem:[%s2800_s0] sm:$0xf]  ;;  %v1857_v27 = vld [vmem:[%s2800_s0 + $0x88] sm:$0xf0]  ;;  %v1858_v29 = vld [vmem:[%s2800_s0 + $0x90] sm:$0xf0] }
   0xb   :  { %1975 = vmatpush.bf16.msra.mxu2 %v2044_v7  ;;  %v1854_v30 = vld [vmem:[%s2800_s0 + $0x74] sm:$0xf]  ;;  %v1423_v31 = vld [vmem:[%s2800_s0 + $0x8c] sm:$0xf0]  ;;  %v1934_v32 = vld [vmem:[%s2799_s1 + $0xf8] sm:$0xff]  ;;  %v1366_v33 = vor.u32 %v1843_v25, %v1365_v24  ;;  %v1422_v34 = vor.u32 %v1857_v27, %v1421_v26  ;;  %v1430_v35 = vor.u32 %v1858_v29, %v1429_v28 }
   0xc   :  { %1967 = vmatpush.bf16.msra.mxu1 %v2049_v8  ;;  %v1426_v36 = vor.u32 %v1854_v30, %v1423_v31  ;;  %v1956_v37 = vld [vmem:[%s2799_s1 + $0x1a8] sm:$0xff]  ;;  %v1950_v38 = vld [vmem:[%s2799_s1 + $0x178] sm:$0xff]  ;;  %v1933_v39 = vld [vmem:[%s2799_s1 + $0xf0] sm:$0xff] }
   0xd   :  { %v1949_v40 = vld [vmem:[%s2799_s1 + $0x170] sm:$0xff]  ;;  %v1955_v41 = vld [vmem:[%s2799_s1 + $0x1a0] sm:$0xff]  ;;  %v1932_v42 = vld [vmem:[%s2799_s1 + $0xe8] sm:$0xff] }
   0xe   :  { %868 = vmatpush.bf16.msra.mxu0 %v1907_v9  ;;  %1960 = vmatpush.bf16.msra.mxu3 %v1907_v9  ;;  %v1948_v43 = vld [vmem:[%s2799_s1 + $0x168] sm:$0xff]  ;;  %v1954_v44 = vld [vmem:[%s2799_s1 + $0x198] sm:$0xff]  ;;  %v1931_v45 = vld [vmem:[%s2799_s1 + $0xe0] sm:$0xff] }
   0xf   :  { %1976 = vmatpush.bf16.msra.mxu2 %v2059_v10  ;;  %v1393_v46 = vld [vmem:[%s2800_s0 + $0x38] sm:$0xf]  ;;  %v1850_v47 = vld [vmem:[%s2800_s0 + $0x50] sm:$0xf0]  ;;  %v1449_v48 = vld [vmem:[%s2800_s0 + $0xa8] sm:$0xf] }
  0x10   :  { %1968 = vmatpush.bf16.msra.mxu1 %v2064_v11  ;;  %v1864_v49 = vld [vmem:[%s2800_s0 + $0xc0] sm:$0xf0]  ;;  %v1457_v50 = vld [vmem:[%s2800_s0 + $0xb0] sm:$0xf]  ;;  %v1865_v51 = vld [vmem:[%s2800_s0 + $0xc8] sm:$0xf0]  ;;  %v1394_v54 = vor.u32 %v1850_v47, %v1393_v46 }
  0x11   :  { %v1861_v52 = vld [vmem:[%s2800_s0 + $0xac] sm:$0xf]  ;;  %v1451_v53 = vld [vmem:[%s2800_s0 + $0xc4] sm:$0xf0]  ;;  %v1450_v55 = vor.u32 %v1864_v49, %v1449_v48  ;;  %v1458_v56 = vor.u32 %v1865_v51, %v1457_v50  ;;  %v1947_v58 = vld [vmem:[%s2799_s1 + $0x160] sm:$0xff] }
  0x12   :  { %869 = vmatpush.bf16.msra.mxu0 %v1906_v12  ;;  %1961 = vmatpush.bf16.msra.mxu3 %v1906_v12  ;;  %v1454_v57 = vor.u32 %v1861_v52, %v1451_v53  ;;  %v1930_v59 = vld [vmem:[%s2799_s1 + $0xd8] sm:$0xff]  ;;  %v1477_v60 = vld [vmem:[%s2800_s0 + $0xe0] sm:$0xf]  ;;  %v1840_v62 = vld [vmem:[%s2800_s0 + $0x4] sm:$0xf] }
  0x13   :  { %1977 = vmatpush.bf16.msra.mxu2 %v2074_v13  ;;  %v1871_v61 = vld [vmem:[%s2800_s0 + $0xf8] sm:$0xf0]  ;;  %v1367_v63 = vld [vmem:[%s2800_s0 + $0x1c] sm:$0xf0]  ;;  %v1485_v0 = vld [vmem:[%s2800_s0 + $0xe8] sm:$0xf] }
  0x14   :  { %1969 = vmatpush.bf16.msra.mxu1 %v2079_v14  ;;  %v1868_v3 = vld [vmem:[%s2800_s0 + $0xe4] sm:$0xf]  ;;  %v1953_v6 = vld [vmem:[%s2799_s1 + $0x190] sm:$0xff]  ;;  %v1370_v9 = vor.u32 %v1840_v62, %v1367_v63  ;;  %v1952_v28 = vld [vmem:[%s2799_s1 + $0x188] sm:$0xff] }
  0x15   :  { %v1928_v29 = vld [vmem:[%s2799_s1 + $0xc8] sm:$0xff]  ;;  %v1942_v30 = vld [vmem:[%s2799_s1 + $0x138] sm:$0xff]  ;;  %v1533_v31 = vld [vmem:[%s2800_s0 + $0x150] sm:$0xf] }
  0x16   :  { %870 = vmatpush.bf16.msra.mxu0 %v1905_v15  ;;  %1962 = vmatpush.bf16.msra.mxu3 %v1905_v15  ;;  %v1929_v15 = vld [vmem:[%s2799_s1 + $0xd0] sm:$0xff]  ;;  %v1938_v46 = vld [vmem:[%s2799_s1 + $0x118] sm:$0xff]  ;;  %v1561_v47 = vld [vmem:[%s2800_s0 + $0x188] sm:$0xf] }
  0x17   :  { %1978 = vmatpush.bf16.msra.mxu2 %v2089_v16  ;;  %v1892_v48 = vld [vmem:[%s2800_s0 + $0x1a0] sm:$0xf0]  ;;  %v1401_v49 = vld [vmem:[%s2800_s0 + $0x40] sm:$0xf]  ;;  %v1851_v50 = vld [vmem:[%s2800_s0 + $0x58] sm:$0xf0] }
  0x18   :  { %1970 = vmatpush.bf16.msra.mxu1 %v2094_v17  ;;  %v1569_v51 = vld [vmem:[%s2800_s0 + $0x190] sm:$0xf]  ;;  %v1893_v52 = vld [vmem:[%s2800_s0 + $0x1a8] sm:$0xf0]  ;;  %v1589_v62 = vld [vmem:[%s2800_s0 + $0x1c0] sm:$0xf] }
  0x19   :  { %v1889_v53 = vld [vmem:[%s2800_s0 + $0x18c] sm:$0xf]  ;;  %v1899_v63 = vld [vmem:[%s2800_s0 + $0x1d8] sm:$0xf0] }
  0x1a   :  { %871 = vmatpush.bf16.msra.mxu0 %v1904_v18  ;;  %1963 = vmatpush.bf16.msra.mxu3 %v1904_v18  ;;  %v1847_v18 = vld [vmem:[%s2800_s0 + $0x3c] sm:$0xf] }
  0x1b   :  { %1979 = vmatpush.bf16.msra.mxu2 %v2104_v19 }
  0x1c   :  { %1971 = vmatpush.bf16.msra.mxu1 %v2109_v20 }
  0x1e   :  { %872 = vmatpush.bf16.msra.mxu0 %v1903_v21  ;;  %1964 = vmatpush.bf16.msra.mxu3 %v1903_v21  ;;  %v1875_v21 = vld [vmem:[%s2800_s0 + $0x11c] sm:$0xf] }
  0x1f   :  { %1980 = vmatpush.bf16.msra.mxu2 %v2117_v22 }
  0x20   :  { %1972 = vmatpush.bf16.msra.mxu1 %v2122_v23 }
  0x21   :  { %873 = vmatmul.bf16.vlgmr.msra.gmra.mxu0 %v1366_v33  ;;  %883 = vmatmul.bf16.vlgmr.msra.gmra.mxu3 %v1422_v34  ;;  %v1541_v33 = vld [vmem:[%s2800_s0 + $0x158] sm:$0xf]  ;;  %v1886_v34 = vld [vmem:[%s2800_s0 + $0x170] sm:$0xf0] }
  0x22   :  { %1027 = vmatpush.bf16.msrb.mxu3 %v1934_v32  ;;  %919 = vmatpush.bf16.msrb.mxu0 %v2019_v2  ;;  %v1872_v2 = vld [vmem:[%s2800_s0 + $0x100] sm:$0xf0]  ;;  %v1373_v32 = vld [vmem:[%s2800_s0 + $0x8] sm:$0xf] }
  0x23   :  { %991 = vmatmul.bf16.vlgmr.msra.gmra.mxu2 %v1430_v35  ;;  %937 = vmatmul.bf16.vlgmr.msra.gmra.mxu1 %v1426_v36  ;;  %v1882_v35 = vld [vmem:[%s2800_s0 + $0x154] sm:$0xf]  ;;  %v1535_v36 = vld [vmem:[%s2800_s0 + $0x16c] sm:$0xf0] }
  0x24   :  { %1191 = vmatpush.bf16.msrb.mxu2 %v1956_v37  ;;  %1135 = vmatpush.bf16.msrb.mxu1 %v1950_v38  ;;  %v1941_v37 = vld [vmem:[%s2799_s1 + $0x130] sm:$0xff] }
  0x26   :  { %920 = vmatpush.bf16.msrb.mxu0 %v2034_v5  ;;  %1028 = vmatpush.bf16.msrb.mxu3 %v1933_v39  ;;  %v1479_v5 = vld [vmem:[%s2800_s0 + $0xfc] sm:$0xf0] }
  0x27   :  { %v1482_v12 = vor.u32 %v1868_v3, %v1479_v5  ;;  %v1845_v3 = vld [vmem:[%s2800_s0 + $0x28] sm:$0xf0]  ;;  %v1900_v5 = vld [vmem:[%s2800_s0 + $0x1e0] sm:$0xf0] }
  0x28   :  { %1136 = vmatpush.bf16.msrb.mxu1 %v1949_v40  ;;  %1192 = vmatpush.bf16.msrb.mxu2 %v1955_v41  ;;  %v1538_v40 = vor.u32 %v1882_v35, %v1535_v36  ;;  %v1940_v41 = vld [vmem:[%s2799_s1 + $0x128] sm:$0xff] }
  0x2a   :  { %921 = vmatpush.bf16.msrb.mxu0 %v2049_v8  ;;  %1029 = vmatpush.bf16.msrb.mxu3 %v1932_v42  ;;  %v1478_v8 = vor.u32 %v1871_v61, %v1477_v60  ;;  %v1927_v42 = vld [vmem:[%s2799_s1 + $0xc0] sm:$0xff]  ;;  %v1936_v60 = vld [vmem:[%s2799_s1 + $0x108] sm:$0xff] }
  0x2b   :  { %v1935_v61 = vld [vmem:[%s2799_s1 + $0x100] sm:$0xff] }
  0x2c   :  { %1137 = vmatpush.bf16.msrb.mxu1 %v1948_v43  ;;  %1193 = vmatpush.bf16.msrb.mxu2 %v1954_v44  ;;  %v1951_v43 = vld [vmem:[%s2799_s1 + $0x180] sm:$0xff] }
  0x2d   :  { %v1943_v44 = vld [vmem:[%s2799_s1 + $0x140] sm:$0xff] }
  0x2e   :  { %922 = vmatpush.bf16.msrb.mxu0 %v2064_v11  ;;  %1030 = vmatpush.bf16.msrb.mxu3 %v1931_v45  ;;  %v1486_v11 = vor.u32 %v1872_v2, %v1485_v0  ;;  %v1939_v45 = vld [vmem:[%s2799_s1 + $0x120] sm:$0xff]  ;;  %v1597_v0 = vld [vmem:[%s2800_s0 + $0x1c8] sm:$0xf]  ;;  %v1381_v2 = vld [vmem:[%s2800_s0 + $0x10] sm:$0xf] }
  0x30   :  { %1138 = vmatpush.bf16.msrb.mxu1 %v1947_v58  ;;  %1194 = vmatpush.bf16.msrb.mxu2 %v1953_v6  ;;  %v1570_v58 = vor.u32 %v1893_v52, %v1569_v51  ;;  %v1896_v6 = vld [vmem:[%s2800_s0 + $0x1c4] sm:$0xf] }
  0x31   :  { %878 = vmatmul.bf16.gmra.mxu0 %v1394_v54  ;;  %888 = vmatmul.bf16.gmra.mxu3 %v1450_v55  ;;  %v1563_v54 = vld [vmem:[%s2800_s0 + $0x1a4] sm:$0xf0]  ;;  %v1937_v55 = vld [vmem:[%s2799_s1 + $0x110] sm:$0xff] }
  0x32   :  { %923 = vmatpush.bf16.msrb.mxu0 %v2079_v14  ;;  %1031 = vmatpush.bf16.msrb.mxu3 %v1930_v59  ;;  %v1946_v14 = vld [vmem:[%s2799_s1 + $0x158] sm:$0xff]  ;;  %v1566_v59 = vor.u32 %v1889_v53, %v1563_v54 }
  0x33   :  { %996 = vmatmul.bf16.gmra.mxu2 %v1458_v56  ;;  %942 = vmatmul.bf16.gmra.mxu1 %v1454_v57  ;;  %v1562_v56 = vor.u32 %v1892_v48, %v1561_v47  ;;  %v1402_v57 = vor.u32 %v1851_v50, %v1401_v49  ;;  %v1860_v47 = vld [vmem:[%s2800_s0 + $0xa0] sm:$0xf0]  ;;  %v1439_v49 = vld [vmem:[%s2800_s0 + $0x9c] sm:$0xf0] }
  0x34   :  { %1139 = vmatpush.bf16.msrb.mxu1 %v1946_v14  ;;  %1195 = vmatpush.bf16.msrb.mxu2 %v1952_v28  ;;  %v1417_v28 = vld [vmem:[%s2800_s0 + $0x50] sm:$0xf]  ;;  %v1856_v48 = vld [vmem:[%s2800_s0 + $0x84] sm:$0xf] }
  0x36   :  { %924 = vmatpush.bf16.msrb.mxu0 %v2094_v17  ;;  %1032 = vmatpush.bf16.msrb.mxu3 %v1929_v15  ;;  %v1878_v17 = vld [vmem:[%s2800_s0 + $0x130] sm:$0xf0]  ;;  %v1841_v15 = vld [vmem:[%s2800_s0 + $0xc] sm:$0xf] }
  0x38   :  { %1196 = vmatpush.bf16.msrb.mxu2 %v1951_v43  ;;  %v1431_v43 = vld [vmem:[%s2800_s0 + $0x94] sm:$0xf0] }
  0x3a   :  { %925 = vmatpush.bf16.msrb.mxu0 %v2109_v20  ;;  %v1879_v20 = vld [vmem:[%s2800_s0 + $0x138] sm:$0xf0]  ;;  %1033 = vmatpush.bf16.msrb.mxu3 %v1928_v29  ;;  %v1437_v29 = vld [vmem:[%s2800_s0 + $0x80] sm:$0xf] }
  0x3e   :  { %926 = vmatpush.bf16.msrb.mxu0 %v2122_v23  ;;  %v1507_v23 = vld [vmem:[%s2800_s0 + $0x134] sm:$0xf0]  ;;  %1034 = vmatpush.bf16.msrb.mxu3 %v1927_v42  ;;  %v1855_v42 = vld [vmem:[%s2800_s0 + $0x7c] sm:$0xf] }
  0x3f   :  { %v1510_v27 = vor.u32 %v1875_v21, %v1507_v23  ;;  %v1383_v21 = vld [vmem:[%s2800_s0 + $0x2c] sm:$0xf0]  ;;  %v1434_v53 = vor.u32 %v1855_v42, %v1431_v43 }
  0x41   :  { %893 = vmatmul.bf16.gmra.mxu3 %v1478_v8  ;;  %927 = vmatmul.bf16.vlgmr.msrb.gmra.mxu0 %v1370_v9  ;;  %v1591_v8 = vld [vmem:[%s2800_s0 + $0x1dc] sm:$0xf0]  ;;  %v1590_v9 = vor.u32 %v1899_v63, %v1589_v62 }
  0x42   :  { %973 = vmatpush.bf16.msra.mxu0 %v2014_v1  ;;  %v1505_v1 = vld [vmem:[%s2800_s0 + $0x118] sm:$0xf]  ;;  %v1594_v14 = vor.u32 %v1896_v6, %v1591_v8  ;;  %v1473_v6 = vld [vmem:[%s2800_s0 + $0xc0] sm:$0xf]  ;;  %v1493_v8 = vld [vmem:[%s2800_s0 + $0xf0] sm:$0xf] }
  0x43   :  { %1001 = vmatmul.bf16.gmra.mxu2 %v1486_v11  ;;  %947 = vmatmul.bf16.gmra.mxu1 %v1482_v12  ;;  %v1506_v24 = vor.u32 %v1878_v17, %v1505_v1  ;;  %v1382_v11 = vor.u32 %v1845_v3, %v1381_v2  ;;  %v1598_v12 = vor.u32 %v1900_v5, %v1597_v0  ;;  %v1375_v1 = vld [vmem:[%s2800_s0 + $0x24] sm:$0xf0]  ;;  %v1389_v17 = vld [vmem:[%s2800_s0 + $0x18] sm:$0xf]  ;;  %v1862_v3 = vld [vmem:[%s2800_s0 + $0xb4] sm:$0xf] }
  0x44   :  { %v1378_v23 = vor.u32 %v1841_v15, %v1375_v1  ;;  %v1459_v5 = vld [vmem:[%s2800_s0 + $0xcc] sm:$0xf0] }
  0x46   :  { %974 = vmatpush.bf16.msra.mxu0 %v2029_v4  ;;  %v1395_v4 = vld [vmem:[%s2800_s0 + $0x54] sm:$0xf0] }
  0x47   :  { %v1398_v25 = vor.u32 %v1847_v18, %v1395_v4  ;;  %v1409_v18 = vld [vmem:[%s2800_s0 + $0x48] sm:$0xf]  ;;  %v1852_v4 = vld [vmem:[%s2800_s0 + $0x60] sm:$0xf0] }
  0x4a   :  { %975 = vmatpush.bf16.msra.mxu0 %v2044_v7  ;;  %v1513_v7 = vld [vmem:[%s2800_s0 + $0x120] sm:$0xf] }
  0x4b   :  { %v1514_v26 = vor.u32 %v1879_v20, %v1513_v7  ;;  %v1846_v7 = vld [vmem:[%s2800_s0 + $0x30] sm:$0xf0] }
  0x4c   :  { %v1842_v20 = vld [vmem:[%s2800_s0 + $0x14] sm:$0xf] }
  0x4e   :  { %976 = vmatpush.bf16.msra.mxu0 %v2059_v10  ;;  %v1945_v10 = vld [vmem:[%s2799_s1 + $0x150] sm:$0xff] }
  0x4f   :  { %1140 = vmatpush.bf16.msrb.mxu1 %v1945_v10  ;;  %v1403_v10 = vld [vmem:[%s2800_s0 + $0x5c] sm:$0xf0] }
  0x51   :  { %898 = vmatmul.bf16.gmra.mxu3 %v1506_v24  ;;  %932 = vmatmul.bf16.gmra.mxu0 %v1398_v25  ;;  %v1410_v24 = vor.u32 %v1852_v4, %v1409_v18  ;;  %v1390_v25 = vor.u32 %v1846_v7, %v1389_v17  ;;  %v1462_v18 = vor.u32 %v1862_v3, %v1459_v5 }
  0x52   :  { %977 = vmatpush.bf16.msra.mxu0 %v2074_v13  ;;  %v1944_v13 = vld [vmem:[%s2799_s1 + $0x148] sm:$0xff] }
  0x53   :  { %1006 = vmatmul.bf16.gmra.mxu2 %v1514_v26  ;;  %952 = vmatmul.bf16.gmra.mxu1 %v1510_v27  ;;  %v1386_v26 = vor.u32 %v1842_v20, %v1383_v21  ;;  %v1848_v27 = vld [vmem:[%s2800_s0 + $0x44] sm:$0xf] }
  0x54   :  { %1141 = vmatpush.bf16.msrb.mxu1 %v1944_v13  ;;  %v1859_v13 = vld [vmem:[%s2800_s0 + $0x98] sm:$0xf0] }
  0x56   :  { %978 = vmatpush.bf16.msra.mxu0 %v2089_v16  ;;  %v1885_v16 = vld [vmem:[%s2800_s0 + $0x168] sm:$0xf0] }
  0x57   :  { %v1534_v38 = vor.u32 %v1885_v16, %v1533_v31  ;;  %v1849_v31 = vld [vmem:[%s2800_s0 + $0x4c] sm:$0xf]  ;;  %v1411_v16 = vld [vmem:[%s2800_s0 + $0x64] sm:$0xf0] }
  0x58   :  { %1142 = vmatpush.bf16.msrb.mxu1 %v1943_v44  ;;  %v1414_v35 = vor.u32 %v1849_v31, %v1411_v16  ;;  %v1445_v44 = vld [vmem:[%s2800_s0 + $0x88] sm:$0xf]  ;;  %v1501_v31 = vld [vmem:[%s2800_s0 + $0xf8] sm:$0xf] }
  0x59   :  { %v1521_v16 = vld [vmem:[%s2800_s0 + $0x128] sm:$0xf] }
  0x5a   :  { %979 = vmatpush.bf16.msra.mxu0 %v2104_v19  ;;  %v1844_v19 = vld [vmem:[%s2800_s0 + $0x20] sm:$0xf0] }
  0x5b   :  { %v1374_v39 = vor.u32 %v1844_v19, %v1373_v32  ;;  %v1406_v32 = vor.u32 %v1848_v27, %v1403_v10  ;;  %v1438_v19 = vor.u32 %v1859_v13, %v1437_v29  ;;  %v1869_v13 = vld [vmem:[%s2800_s0 + $0xec] sm:$0xf] }
  0x5e   :  { %980 = vmatpush.bf16.msra.mxu0 %v2117_v22  ;;  %v1542_v22 = vor.u32 %v1886_v34, %v1541_v33 }
  0x61   :  { %903 = vmatmul.bf16.gmra.mxu3 %v1534_v38  ;;  %981 = vmatmul.bf16.vlgmr.msra.gmra.mxu0 %v1374_v39 }
  0x62   :  { %1081 = vmatpush.bf16.msrb.mxu0 %v1942_v30  ;;  %v1853_v30 = vld [vmem:[%s2800_s0 + $0x68] sm:$0xf0] }
  0x63   :  { %1011 = vmatmul.bf16.gmra.mxu2 %v1542_v22  ;;  %957 = vmatmul.bf16.gmra.mxu1 %v1538_v40  ;;  %v1418_v34 = vor.u32 %v1853_v30, %v1417_v28  ;;  %v1487_v30 = vld [vmem:[%s2800_s0 + $0x104] sm:$0xf0] }
  0x66   :  { %1082 = vmatpush.bf16.msrb.mxu0 %v1941_v37 }
  0x6a   :  { %1083 = vmatpush.bf16.msrb.mxu0 %v1940_v41 }
  0x6e   :  { %1084 = vmatpush.bf16.msrb.mxu0 %v1939_v45  ;;  %v1465_v45 = vld [vmem:[%s2800_s0 + $0xb8] sm:$0xf] }
  0x71   :  { %908 = vmatmul.bf16.gmra.mxu3 %v1562_v56  ;;  %986 = vmatmul.bf16.gmra.mxu0 %v1402_v57  ;;  %v1446_v56 = vor.u32 %v1860_v47, %v1445_v44  ;;  %v1442_v57 = vor.u32 %v1856_v48, %v1439_v49 }
  0x72   :  { %1085 = vmatpush.bf16.msrb.mxu0 %v1938_v46  ;;  %v1866_v46 = vld [vmem:[%s2800_s0 + $0xd0] sm:$0xf0] }
  0x73   :  { %1016 = vmatmul.bf16.gmra.mxu2 %v1570_v58  ;;  %962 = vmatmul.bf16.gmra.mxu1 %v1566_v59  ;;  %v1466_v54 = vor.u32 %v1866_v46, %v1465_v45 }
  0x76   :  { %1086 = vmatpush.bf16.msrb.mxu0 %v1937_v55 }
  0x7a   :  { %1087 = vmatpush.bf16.msrb.mxu0 %v1936_v60 }
  0x7e   :  { %1088 = vmatpush.bf16.msrb.mxu0 %v1935_v61 }
  0x81   :  { %913 = vmatmul.bf16.gmra.mxu3 %v1590_v9  ;;  %1089 = vmatmul.bf16.vlgmr.msrb.gmra.mxu0 %v1382_v11  ;;  %v1873_v9 = vld [vmem:[%s2800_s0 + $0x108] sm:$0xf0]  ;;  %v1867_v11 = vld [vmem:[%s2800_s0 + $0xd8] sm:$0xf0] }
  0x82   :  { %v1494_v4 = vor.u32 %v1873_v9, %v1493_v8  ;;  %v1474_v20 = vor.u32 %v1867_v11, %v1473_v6 }
  0x83   :  { %1021 = vmatmul.bf16.gmra.mxu2 %v1598_v12  ;;  %967 = vmatmul.bf16.gmra.mxu1 %v1594_v14  ;;  %v1863_v12 = vld [vmem:[%s2800_s0 + $0xbc] sm:$0xf]  ;;  %v1467_v14 = vld [vmem:[%s2800_s0 + $0xd4] sm:$0xf0] }
  0x84   :  { %v1470_v21 = vor.u32 %v1863_v12, %v1467_v14 }
  0x91   :  { %1035 = vmatmul.bf16.vlgmr.msrb.gmra.mxu3 %v1378_v23  ;;  %1094 = vmatmul.bf16.gmra.mxu0 %v1410_v24 }
  0x93   :  { %1831 = vmatmul.msk.bf16.vlgmr.msrb.gmra.mxu2 %vm837_vm0, %v1390_v25  ;;  %1143 = vmatmul.bf16.vlgmr.msrb.gmra.mxu1 %v1386_v26 }
  0x9e   :  { %v2451_v33 = vpop.f32.mrf.mxu0 }
  0xa0   :  { %v938_v36 = vpop.f32.mrf.mxu1 }
  0xa1   :  { %1040 = vmatmul.bf16.gmra.mxu3 %v1406_v32  ;;  %1099 = vmatmul.bf16.gmra.mxu0 %v1438_v19  ;;  %v1880_v32 = vld [vmem:[%s2800_s0 + $0x140] sm:$0xf0]  ;;  %v1874_v19 = vld [vmem:[%s2800_s0 + $0x110] sm:$0xf0] }
  0xa2   :  { %v1502_v43 = vor.u32 %v1874_v19, %v1501_v31  ;;  %v1551_v31 = vld [vmem:[%s2800_s0 + $0x17c] sm:$0xf0] }
  0xa3   :  { %1832 = vmatmul.msk.bf16.gmra.mxu2 %vm837_vm0, %v1418_v34  ;;  %1148 = vmatmul.bf16.gmra.mxu1 %v1414_v35  ;;  %v1870_v34 = vld [vmem:[%s2800_s0 + $0xf4] sm:$0xf]  ;;  %v1495_v35 = vld [vmem:[%s2800_s0 + $0x10c] sm:$0xf0] }
  0xa4   :  { %v884_v37 = vpop.f32.mrf.mxu3  ;;  %v1498_v44 = vor.u32 %v1870_v34, %v1495_v35 }
  0xa5   :  { %v939_v38 = vadd.f32 %v938_v36, %v884_v37 }
  0xa6   :  { %v992_v39 = vpop.f32.mrf.mxu2  ;;  %v2454_v22 = vpop.f32.mrf.mxu0 }
  0xa7   :  { %v2456_v40 = vadd.f32 %v992_v39, %v939_v38  ;;  %v1490_v39 = vor.u32 %v1869_v13, %v1487_v30  ;;  %v1888_v13 = vld [vmem:[%s2800_s0 + $0x180] sm:$0xf0] }
  0xa8   :  { %v940_v41 = vpop.f32.mrf.mxu1  ;;  %v1884_v30 = vld [vmem:[%s2800_s0 + $0x164] sm:$0xf] }
  0xac   :  { %v886_v50 = vpop.f32.mrf.mxu3 }
  0xad   :  { %v941_v51 = vadd.f32 %v940_v41, %v886_v50  ;;  %v1522_v41 = vor.u32 %v1880_v32, %v1521_v16 }
  0xae   :  { %v994_v52 = vpop.f32.mrf.mxu2  ;;  %v2482_v55 = vpop.f32.mrf.mxu0 }
  0xaf   :  { %v2484_v58 = vadd.f32 %v994_v52, %v941_v51 }
  0xb0   :  { %v943_v59 = vpop.f32.mrf.mxu1 }
  0xb1   :  { %1045 = vmatmul.bf16.gmra.mxu3 %v1434_v53  ;;  %1104 = vmatmul.bf16.gmra.mxu0 %v1466_v54  ;;  %v1876_v53 = vld [vmem:[%s2800_s0 + $0x124] sm:$0xf]  ;;  %v1515_v54 = vld [vmem:[%s2800_s0 + $0x13c] sm:$0xf0] }
  0xb2   :  { %v1518_v6 = vor.u32 %v1876_v53, %v1515_v54  ;;  %v1571_v53 = vld [vmem:[%s2800_s0 + $0x1ac] sm:$0xf0]  ;;  %v1585_v54 = vld [vmem:[%s2800_s0 + $0x1a0] sm:$0xf] }
  0xb3   :  { %1833 = vmatmul.msk.bf16.gmra.mxu2 %vm837_vm0, %v1446_v56  ;;  %1153 = vmatmul.bf16.gmra.mxu1 %v1442_v57  ;;  %v1529_v56 = vld [vmem:[%s2800_s0 + $0x130] sm:$0xf]  ;;  %v1549_v57 = vld [vmem:[%s2800_s0 + $0x160] sm:$0xf] }
  0xb4   :  { %v889_v60 = vpop.f32.mrf.mxu3 }
  0xb5   :  { %v944_v61 = vadd.f32 %v943_v59, %v889_v60  ;;  %v1887_v59 = vld [vmem:[%s2800_s0 + $0x178] sm:$0xf0]  ;;  %v1881_v60 = vld [vmem:[%s2800_s0 + $0x148] sm:$0xf0] }
  0xb6   :  { %v997_v62 = vpop.f32.mrf.mxu2  ;;  %v2487_v63 = vpop.f32.mrf.mxu0  ;;  %v1550_v8 = vor.u32 %v1887_v59, %v1549_v57  ;;  %v1530_v11 = vor.u32 %v1881_v60, %v1529_v56  ;;  %v1605_v56 = vld [vmem:[%s2800_s0 + $0x1d0] sm:$0xf]  ;;  %v1901_v57 = vld [vmem:[%s2800_s0 + $0x1e8] sm:$0xf0]  ;;  %v1895_v59 = vld [vmem:[%s2800_s0 + $0x1b8] sm:$0xf0] }
  0xb7   :  { %v2489_v0 = vadd.f32 %v997_v62, %v944_v61  ;;  %v1877_v61 = vld [vmem:[%s2800_s0 + $0x12c] sm:$0xf]  ;;  %v1523_v62 = vld [vmem:[%s2800_s0 + $0x144] sm:$0xf0]  ;;  %v1891_v60 = vld [vmem:[%s2800_s0 + $0x19c] sm:$0xf] }
  0xb8   :  { %v945_v2 = vpop.f32.mrf.mxu1  ;;  %v1526_v12 = vor.u32 %v1877_v61, %v1523_v62  ;;  %v1579_v61 = vld [vmem:[%s2800_s0 + $0x1b4] sm:$0xf0] }
  0xbc   :  { %v891_v15 = vpop.f32.mrf.mxu3 }
  0xbd   :  { %v946_v1 = vadd.f32 %v945_v2, %v891_v15 }
  0xbe   :  { %v999_v17 = vpop.f32.mrf.mxu2  ;;  %v2515_v7 = vpop.f32.mrf.mxu0 }
  0xbf   :  { %v2517_v23 = vadd.f32 %v999_v17, %v946_v1 }
  0xc0   :  { %v948_v24 = vpop.f32.mrf.mxu1 }
  0xc1   :  { %1050 = vmatmul.bf16.gmra.mxu3 %v1462_v18  ;;  %1109 = vmatmul.bf16.gmra.mxu0 %v1494_v4 }
  0xc3   :  { %1834 = vmatmul.msk.bf16.gmra.mxu2 %vm837_vm0, %v1474_v20  ;;  %1158 = vmatmul.bf16.gmra.mxu1 %v1470_v21 }
  0xc4   :  { %v894_v25 = vpop.f32.mrf.mxu3 }
  0xc5   :  { %v949_v26 = vadd.f32 %v948_v24, %v894_v25  ;;  %v1883_v24 = vld [vmem:[%s2800_s0 + $0x15c] sm:$0xf]  ;;  %v1543_v25 = vld [vmem:[%s2800_s0 + $0x174] sm:$0xf0] }
  0xc6   :  { %v1002_v27 = vpop.f32.mrf.mxu2  ;;  %v2520_v10 = vpop.f32.mrf.mxu0  ;;  %v1546_v34 = vor.u32 %v1883_v24, %v1543_v25 }
  0xc7   :  { %v2522_v28 = vadd.f32 %v1002_v27, %v949_v26  ;;  %v1557_v26 = vld [vmem:[%s2800_s0 + $0x168] sm:$0xf]  ;;  %v1577_v27 = vld [vmem:[%s2800_s0 + $0x198] sm:$0xf] }
  0xc8   :  { %v950_v29 = vpop.f32.mrf.mxu1 }
  0xcc   :  { %v896_v36 = vpop.f32.mrf.mxu3 }
  0xcd   :  { %v951_v37 = vadd.f32 %v950_v29, %v896_v36  ;;  %v1894_v29 = vld [vmem:[%s2800_s0 + $0x1b0] sm:$0xf0] }
  0xce   :  { %v1004_v38 = vpop.f32.mrf.mxu2  ;;  %v2548_v42 = vpop.f32.mrf.mxu0  ;;  %v1578_v35 = vor.u32 %v1894_v29, %v1577_v27  ;;  %v1897_v27 = vld [vmem:[%s2800_s0 + $0x1cc] sm:$0xf]  ;;  %v1599_v29 = vld [vmem:[%s2800_s0 + $0x1e4] sm:$0xf0] }
  0xcf   :  { %v2550_v45 = vadd.f32 %v1004_v38, %v951_v37  ;;  %v1558_v37 = vor.u32 %v1888_v13, %v1557_v26  ;;  %v1554_v38 = vor.u32 %v1884_v30, %v1551_v31  ;;  %v1613_v13 = vld [vmem:[%s2800_s0 + $0x1d8] sm:$0xf]  ;;  %v1902_v30 = vld [vmem:[%s2800_s0 + $0x1f0] sm:$0xf0] }
  0xd0   :  { %v953_v46 = vpop.f32.mrf.mxu1  ;;  %v1898_v31 = vld [vmem:[%s2800_s0 + $0x1d4] sm:$0xf] }
  0xd1   :  { %1055 = vmatmul.bf16.gmra.mxu3 %v1490_v39  ;;  %1114 = vmatmul.bf16.gmra.mxu0 %v1522_v41 }
  0xd3   :  { %1835 = vmatmul.msk.bf16.gmra.mxu2 %vm837_vm0, %v1502_v43  ;;  %1163 = vmatmul.bf16.gmra.mxu1 %v1498_v44 }
  0xd4   :  { %v899_v47 = vpop.f32.mrf.mxu3 }
  0xd5   :  { %v954_v48 = vadd.f32 %v953_v46, %v899_v47 }
  0xd6   :  { %v1007_v49 = vpop.f32.mrf.mxu2  ;;  %v2553_v50 = vpop.f32.mrf.mxu0 }
  0xd7   :  { %v2555_v51 = vadd.f32 %v1007_v49, %v954_v48 }
  0xd8   :  { %v955_v52 = vpop.f32.mrf.mxu1 }
  0xdc   :  { %v901_v2 = vpop.f32.mrf.mxu3 }
  0xdd   :  { %v956_v3 = vadd.f32 %v955_v52, %v901_v2  ;;  %v1890_v52 = vld [vmem:[%s2800_s0 + $0x194] sm:$0xf] }
  0xde   :  { %v1009_v5 = vpop.f32.mrf.mxu2  ;;  %v2581_v9 = vpop.f32.mrf.mxu0 }
  0xdf   :  { %v2583_v14 = vadd.f32 %v1009_v5, %v956_v3  ;;  %v1574_v5 = vor.u32 %v1890_v52, %v1571_v53 }
  0xe0   :  { %v958_v15 = vpop.f32.mrf.mxu1 }
  0xe1   :  { %1060 = vmatmul.bf16.gmra.mxu3 %v1518_v6  ;;  %1119 = vmatmul.bf16.gmra.mxu0 %v1550_v8  ;;  %v1606_v6 = vor.u32 %v1901_v57, %v1605_v56  ;;  %v1586_v8 = vor.u32 %v1895_v59, %v1585_v54 }
  0xe3   :  { %1836 = vmatmul.msk.bf16.gmra.mxu2 %vm837_vm0, %v1530_v11  ;;  %1168 = vmatmul.bf16.gmra.mxu1 %v1526_v12  ;;  %v1582_v11 = vor.u32 %v1891_v60, %v1579_v61  ;;  %v931_v60 = vadd.f32 %v2520_v10, %v2454_v22 }
  0xe4   :  { %v904_v1 = vpop.f32.mrf.mxu3 }
  0xe5   :  { %v959_v17 = vadd.f32 %v958_v15, %v904_v1 }
  0xe6   :  { %v1012_v18 = vpop.f32.mrf.mxu2  ;;  %v2586_v4 = vpop.f32.mrf.mxu0 }
  0xe7   :  { %v2588_v20 = vadd.f32 %v1012_v18, %v959_v17 }
  0xe8   :  { %v960_v21 = vpop.f32.mrf.mxu1 }
  0xec   :  { %v906_v16 = vpop.f32.mrf.mxu3 }
  0xed   :  { %v961_v32 = vadd.f32 %v960_v21, %v906_v16  ;;  %v1607_v16 = vld [vmem:[%s2800_s0 + $0x1ec] sm:$0xf0] }
  0xee   :  { %v1014_v19 = vpop.f32.mrf.mxu2  ;;  %v2614_v36 = vpop.f32.mrf.mxu0 }
  0xef   :  { %v2616_v39 = vadd.f32 %v1014_v19, %v961_v32 }
  0xf0   :  { %v963_v41 = vpop.f32.mrf.mxu1 }
  0xf1   :  { %1065 = vmatmul.bf16.gmra.mxu3 %v1546_v34  ;;  %1124 = vmatmul.bf16.gmra.mxu0 %v1578_v35  ;;  %v1602_v35 = vor.u32 %v1897_v27, %v1599_v29 }
  0xf3   :  { %1837 = vmatmul.msk.bf16.gmra.mxu2 %vm837_vm0, %v1558_v37  ;;  %1173 = vmatmul.bf16.gmra.mxu1 %v1554_v38  ;;  %v1614_v37 = vor.u32 %v1902_v30, %v1613_v13  ;;  %v1610_v38 = vor.u32 %v1898_v31, %v1607_v16  ;;  %v936_v31 = vadd.f32 %v2553_v50, %v2487_v63 }
  0xf4   :  { %v909_v43 = vpop.f32.mrf.mxu3 }
  0xf5   :  { %v964_v44 = vadd.f32 %v963_v41, %v909_v43 }
  0xf6   :  { %v1017_v46 = vpop.f32.mrf.mxu2  ;;  %v2619_v47 = vpop.f32.mrf.mxu0 }
  0xf7   :  { %v2621_v48 = vadd.f32 %v1017_v46, %v964_v44  ;;  %v929_v46 = vadd.f32 %v2515_v7, %v2451_v33  ;;  %v2681_v33 = vld [vmem:[%s2801_s2] ss:$0 sm:$0xff]  ;;  %v985_v7 = vadd.f32 %v2586_v4, %v931_v60 }
  0xf8   :  { %v965_v49 = vpop.f32.mrf.mxu1 }
  0xfc   :  { %v911_v62 = vpop.f32.mrf.mxu3 }
  0xfd   :  { %v966_v2 = vadd.f32 %v965_v49, %v911_v62  ;;  %v983_v49 = vadd.f32 %v2581_v9, %v929_v46  ;;  %v2687_v9 = vld [vmem:[%s2802_s3] ss:$0 sm:$0xff] }
  0xfe   :  { %v1019_v3 = vpop.f32.mrf.mxu2  ;;  %v1090_v12 = vpop.f32.mrf.mxu0 }
  0xff   :  { %v2647_v15 = vadd.f32 %v1019_v3, %v966_v2 }
 0x100   :  { %v968_v1 = vpop.f32.mrf.mxu1 }
 0x101   :  { %1070 = vmatmul.bf16.gmra.mxu3 %v1574_v5  ;;  %1129 = vmatmul.bf16.gmra.mxu0 %v1606_v6 }
 0x103   :  { %1838 = vmatmul.msk.bf16.gmra.mxu2 %vm837_vm0, %v1586_v8  ;;  %1178 = vmatmul.bf16.gmra.mxu1 %v1582_v11 }
 0x104   :  { %v914_v17 = vpop.f32.mrf.mxu3 }
 0x105   :  { %v969_v18 = vadd.f32 %v968_v1, %v914_v17 }
 0x106   :  { %v1022_v21 = vpop.f32.mrf.mxu2  ;;  %v1092_v24 = vpop.f32.mrf.mxu0 }
 0x107   :  { %v2650_v25 = vadd.f32 %v1022_v21, %v969_v18 }
 0x108   :  { %v970_v26 = vpop.f32.mrf.mxu1 }
 0x10c   :  { %v916_v32 = vpop.f32.mrf.mxu3 }
 0x10d   :  { %v971_v19 = vadd.f32 %v970_v26, %v916_v32  ;;  %v990_v32 = vadd.f32 %v2619_v47, %v936_v31 }
 0x10e   :  { %v1024_v34 = vpop.f32.mrf.mxu2  ;;  %v1095_v41 = vpop.f32.mrf.mxu0 }
 0x10f   :  { %v2670_v43 = vadd.f32 %v1024_v34, %v971_v19 }
 0x110   :  { %v1144_v44 = vpop.f32.mrf.mxu1 }
 0x111   :  { %1075 = vmatmul.bf16.gmra.mxu3 %v1602_v35 }
 0x113   :  { %1839 = vmatmul.msk.bf16.gmra.mxu2 %vm837_vm0, %v1614_v37  ;;  %1183 = vmatmul.bf16.gmra.mxu1 %v1610_v38 }
 0x114   :  { %v1036_v52 = vpop.f32.mrf.mxu3 }
 0x115   :  { %v1037_v53 = vadd.f32 %v1036_v52, %v983_v49 }
 0x116   :  { %v1198_v54 = vpop.f32.mrf.mxu2  ;;  %v1097_v56 = vpop.f32.mrf.mxu0 }
 0x117   :  { %v1091_v57 = vadd.f32 %v1090_v12, %v1037_v53  ;;  %v934_v12 = vadd.f32 %v2548_v42, %v2482_v55 }
 0x118   :  { %v1146_v59 = vpop.f32.mrf.mxu1 }
 0x119   :  { %v1145_v61 = vadd.f32 %v1144_v44, %v1091_v57  ;;  %v988_v17 = vadd.f32 %v2614_v36, %v934_v12 }
 0x11b   :  { %v1199_v62 = vadd.f32 %v1198_v54, %v1145_v61 }
 0x11c   :  { %v1038_v2 = vpop.f32.mrf.mxu3 }
 0x11d   :  { %v1247_v3 = vmul.f32 %v2681_v33, %v1199_v62  ;;  %v1039_v5 = vadd.f32 %v1038_v2, %v985_v7 }
 0x11e   :  { %v1200_v6 = vpop.f32.mrf.mxu2  ;;  %v1100_v22 = vpop.f32.mrf.mxu0 }
 0x11f   :  { %v1269_v10 = vadd.f32 %v2687_v9, %v1247_v3  ;;  %v1093_v8 = vadd.f32 %v1092_v24, %v1039_v5 }
 0x120   :  { %v1149_v11 = vpop.f32.mrf.mxu1 }
 0x121   :  { %vm1287_vm1 = vcmp.ge.f32.partialorder %v1269_v10, 0.0  ;;  %v1305_v4 = vmul.f32 0.2, %v1269_v10  ;;  %v1147_v1 = vadd.f32 %v1146_v59, %v1093_v8 }
 0x123   :  { %v1323_v18 = vsel %vm1287_vm1, %v1269_v10, %v1305_v4  ;;  %v1201_v21 = vadd.f32 %v1200_v6, %v1147_v1 }
 0x124   :  { %1341 = vst [vmem:[%s2803_s4] sm:$0xff] %v1323_v18  ;;  %v1041_v26 = vpop.f32.mrf.mxu3 }
 0x125   :  { %v1248_v27 = vmul.f32 %v2681_v33, %v1201_v21  ;;  %v1042_v29 = vadd.f32 %v1041_v26, %v988_v17 }
 0x126   :  { %v1203_v24 = vpop.f32.mrf.mxu2  ;;  %v1102_v13 = vpop.f32.mrf.mxu0 }
 0x127   :  { %v1270_v30 = vadd.f32 %v2687_v9, %v1248_v27  ;;  %v1096_v55 = vadd.f32 %v1095_v41, %v1042_v29 }
 0x128   :  { %v1151_v42 = vpop.f32.mrf.mxu1 }
 0x129   :  { %vm1288_vm2 = vcmp.ge.f32.partialorder %v1270_v30, 0.0  ;;  %v1306_v36 = vmul.f32 0.2, %v1270_v30  ;;  %v1150_v16 = vadd.f32 %v1149_v11, %v1096_v55 }
 0x12b   :  { %v1324_v19 = vsel %vm1288_vm2, %v1270_v30, %v1306_v36  ;;  %v1204_v34 = vadd.f32 %v1203_v24, %v1150_v16 }
 0x12c   :  { %1342 = vst [vmem:[%s2803_s4 + $0x8] sm:$0xff] %v1324_v19  ;;  %v1043_v35 = vpop.f32.mrf.mxu3 }
 0x12d   :  { %v1249_v37 = vmul.f32 %v2681_v33, %v1204_v34  ;;  %v1044_v38 = vadd.f32 %v1043_v35, %v990_v32 }
 0x12e   :  { %v1205_v41 = vpop.f32.mrf.mxu2  ;;  %v1105_v50 = vpop.f32.mrf.mxu0 }
 0x12f   :  { %v1271_v44 = vadd.f32 %v2687_v9, %v1249_v37  ;;  %v1098_v46 = vadd.f32 %v1097_v56, %v1044_v38 }
 0x130   :  { %v1154_v63 = vpop.f32.mrf.mxu1 }
 0x131   :  { %vm1289_vm3 = vcmp.ge.f32.partialorder %v1271_v44, 0.0  ;;  %v1307_v49 = vmul.f32 0.2, %v1271_v44  ;;  %v1152_v52 = vadd.f32 %v1151_v42, %v1098_v46 }
 0x133   :  { %v1325_v47 = vsel %vm1289_vm3, %v1271_v44, %v1307_v49  ;;  %v1206_v53 = vadd.f32 %v1205_v41, %v1152_v52 }
 0x134   :  { %1343 = vst [vmem:[%s2803_s4 + $0x10] sm:$0xff] %v1325_v47  ;;  %v1046_v54 = vpop.f32.mrf.mxu3 }
 0x135   :  { %v1250_v57 = vmul.f32 %v2681_v33, %v1206_v53  ;;  %v1047_v59 = vadd.f32 %v1046_v54, %v2456_v40 }
 0x136   :  { %v1208_v60 = vpop.f32.mrf.mxu2  ;;  %v1107_v3 = vpop.f32.mrf.mxu0 }
 0x137   :  { %v1272_v61 = vadd.f32 %v2687_v9, %v1250_v57  ;;  %v1101_v56 = vadd.f32 %v1100_v22, %v1047_v59 }
 0x138   :  { %v1156_v7 = vpop.f32.mrf.mxu1 }
 0x139   :  { %vm1290_vm4 = vcmp.ge.f32.partialorder %v1272_v61, 0.0  ;;  %v1308_v62 = vmul.f32 0.2, %v1272_v61  ;;  %v1155_v2 = vadd.f32 %v1154_v63, %v1101_v56 }
 0x13b   :  { %v1326_v5 = vsel %vm1290_vm4, %v1272_v61, %v1308_v62  ;;  %v1209_v6 = vadd.f32 %v1208_v60, %v1155_v2 }
 0x13c   :  { %1344 = vst [vmem:[%s2803_s4 + $0x18] sm:$0xff] %v1326_v5  ;;  %v1048_v10 = vpop.f32.mrf.mxu3 }
 0x13d   :  { %v1251_v8 = vmul.f32 %v2681_v33, %v1209_v6  ;;  %v1049_v40 = vadd.f32 %v1048_v10, %v2484_v58 }
 0x13e   :  { %v1210_v11 = vpop.f32.mrf.mxu2  ;;  %v1110_v27 = vpop.f32.mrf.mxu0 }
 0x13f   :  { %v1273_v12 = vadd.f32 %v2687_v9, %v1251_v8  ;;  %v1103_v22 = vadd.f32 %v1102_v13, %v1049_v40 }
 0x140   :  { %v1159_v4 = vpop.f32.mrf.mxu1 }
 0x141   :  { %vm1291_vm5 = vcmp.ge.f32.partialorder %v1273_v12, 0.0  ;;  %v1309_v1 = vmul.f32 0.2, %v1273_v12  ;;  %v1157_v17 = vadd.f32 %v1156_v7, %v1103_v22 }
 0x143   :  { %v1327_v18 = vsel %vm1291_vm5, %v1273_v12, %v1309_v1  ;;  %v1211_v21 = vadd.f32 %v1210_v11, %v1157_v17 }
 0x144   :  { %1345 = vst [vmem:[%s2803_s4 + $0x20] sm:$0xff] %v1327_v18  ;;  %v1051_v26 = vpop.f32.mrf.mxu3 }
 0x145   :  { %v1252_v29 = vmul.f32 %v2681_v33, %v1211_v21  ;;  %v1052_v58 = vadd.f32 %v1051_v26, %v2489_v0 }
 0x146   :  { %v1213_v24 = vpop.f32.mrf.mxu2  ;;  %v1112_v35 = vpop.f32.mrf.mxu0 }
 0x147   :  { %v1274_v30 = vadd.f32 %v2687_v9, %v1252_v29  ;;  %v1106_v13 = vadd.f32 %v1105_v50, %v1052_v58 }
 0x148   :  { %v1161_v55 = vpop.f32.mrf.mxu1 }
 0x149   :  { %vm1292_vm6 = vcmp.ge.f32.partialorder %v1274_v30, 0.0  ;;  %v1310_v42 = vmul.f32 0.2, %v1274_v30  ;;  %v1160_v31 = vadd.f32 %v1159_v4, %v1106_v13 }
 0x14b   :  { %v1328_v36 = vsel %vm1292_vm6, %v1274_v30, %v1310_v42  ;;  %v1214_v16 = vadd.f32 %v1213_v24, %v1160_v31 }
 0x14c   :  { %1346 = vst [vmem:[%s2803_s4 + $0x28] sm:$0xff] %v1328_v36  ;;  %v1053_v32 = vpop.f32.mrf.mxu3 }
 0x14d   :  { %v1253_v19 = vmul.f32 %v2681_v33, %v1214_v16  ;;  %v1054_v34 = vadd.f32 %v1053_v32, %v2517_v23 }
 0x14e   :  { %v1215_v0 = vpop.f32.mrf.mxu2  ;;  %v1115_v59 = vpop.f32.mrf.mxu0 }
 0x14f   :  { %v1275_v37 = vadd.f32 %v2687_v9, %v1253_v19  ;;  %v1108_v38 = vadd.f32 %v1107_v3, %v1054_v34 }
 0x150   :  { %v1164_v41 = vpop.f32.mrf.mxu1 }
 0x151   :  { %vm1293_vm7 = vcmp.ge.f32.partialorder %v1275_v37, 0.0  ;;  %v1311_v44 = vmul.f32 0.2, %v1275_v37  ;;  %v1162_v46 = vadd.f32 %v1161_v55, %v1108_v38 }
 0x153   :  { %v1329_v63 = vsel %vm1293_vm7, %v1275_v37, %v1311_v44  ;;  %v1216_v50 = vadd.f32 %v1215_v0, %v1162_v46 }
 0x154   :  { %1347 = vst [vmem:[%s2803_s4 + $0x30] sm:$0xff] %v1329_v63  ;;  %v1056_v49 = vpop.f32.mrf.mxu3 }
 0x155   :  { %v1254_v52 = vmul.f32 %v2681_v33, %v1216_v50  ;;  %v1057_v23 = vadd.f32 %v1056_v49, %v2522_v28 }
 0x156   :  { %v1218_v47 = vpop.f32.mrf.mxu2  ;;  %v1117_v11 = vpop.f32.mrf.mxu0 }
 0x157   :  { %v1276_v53 = vadd.f32 %v2687_v9, %v1254_v52  ;;  %v1111_v54 = vadd.f32 %v1110_v27, %v1057_v23 }
 0x158   :  { %v1166_v57 = vpop.f32.mrf.mxu1 }
 0x159   :  { %vm1294_vm8 = vcmp.ge.f32.partialorder %v1276_v53, 0.0  ;;  %v1312_v60 = vmul.f32 0.2, %v1276_v53  ;;  %v1165_v61 = vadd.f32 %v1164_v41, %v1111_v54 }
 0x15b   :  { %v1330_v56 = vsel %vm1294_vm8, %v1276_v53, %v1312_v60  ;;  %v1219_v7 = vadd.f32 %v1218_v47, %v1165_v61 }
 0x15c   :  { %1348 = vst [vmem:[%s2803_s4 + $0x38] sm:$0xff] %v1330_v56  ;;  %v1058_v62 = vpop.f32.mrf.mxu3 }
 0x15d   :  { %v1255_v2 = vmul.f32 %v2681_v33, %v1219_v7  ;;  %v1059_v28 = vadd.f32 %v1058_v62, %v2550_v45 }
 0x15e   :  { %v1220_v3 = vpop.f32.mrf.mxu2  ;;  %v1120_v13 = vpop.f32.mrf.mxu0 }
 0x15f   :  { %v1277_v5 = vadd.f32 %v2687_v9, %v1255_v2  ;;  %v1113_v6 = vadd.f32 %v1112_v35, %v1059_v28 }
 0x160   :  { %v1169_v10 = vpop.f32.mrf.mxu1 }
 0x161   :  { %vm1295_vm9 = vcmp.ge.f32.partialorder %v1277_v5, 0.0  ;;  %v1313_v8 = vmul.f32 0.2, %v1277_v5  ;;  %v1167_v40 = vadd.f32 %v1166_v57, %v1113_v6 }
 0x163   :  { %v1331_v12 = vsel %vm1295_vm9, %v1277_v5, %v1313_v8  ;;  %v1221_v22 = vadd.f32 %v1220_v3, %v1167_v40 }
 0x164   :  { %1349 = vst [vmem:[%s2803_s4 + $0x40] sm:$0xff] %v1331_v12  ;;  %v1061_v4 = vpop.f32.mrf.mxu3 }
 0x165   :  { %v1256_v1 = vmul.f32 %v2681_v33, %v1221_v22  ;;  %v1062_v45 = vadd.f32 %v1061_v4, %v2555_v51 }
 0x166   :  { %v1223_v17 = vpop.f32.mrf.mxu2  ;;  %v1122_v41 = vpop.f32.mrf.mxu0 }
 0x167   :  { %v1278_v18 = vadd.f32 %v2687_v9, %v1256_v1  ;;  %v1116_v21 = vadd.f32 %v1115_v59, %v1062_v45 }
 0x168   :  { %v1171_v26 = vpop.f32.mrf.mxu1 }
 0x169   :  { %vm1296_vm10 = vcmp.ge.f32.partialorder %v1278_v18, 0.0  ;;  %v1314_v27 = vmul.f32 0.2, %v1278_v18  ;;  %v1170_v29 = vadd.f32 %v1169_v10, %v1116_v21 }
 0x16b   :  { %v1332_v58 = vsel %vm1296_vm10, %v1278_v18, %v1314_v27  ;;  %v1224_v24 = vadd.f32 %v1223_v17, %v1170_v29 }
 0x16c   :  { %1350 = vst [vmem:[%s2803_s4 + $0x48] sm:$0xff] %v1332_v58  ;;  %v1063_v30 = vpop.f32.mrf.mxu3 }
 0x16d   :  { %v1257_v55 = vmul.f32 %v2681_v33, %v1224_v24  ;;  %v1064_v51 = vadd.f32 %v1063_v30, %v2583_v14 }
 0x16e   :  { %v1225_v42 = vpop.f32.mrf.mxu2  ;;  %v1125_v60 = vpop.f32.mrf.mxu0 }
 0x16f   :  { %v1279_v31 = vadd.f32 %v2687_v9, %v1257_v55  ;;  %v1118_v36 = vadd.f32 %v1117_v11, %v1064_v51 }
 0x170   :  { %v1174_v16 = vpop.f32.mrf.mxu1 }
 0x171   :  { %vm1297_vm11 = vcmp.ge.f32.partialorder %v1279_v31, 0.0  ;;  %v1315_v32 = vmul.f32 0.2, %v1279_v31  ;;  %v1172_v19 = vadd.f32 %v1171_v26, %v1118_v36 }
 0x173   :  { %v1333_v34 = vsel %vm1297_vm11, %v1279_v31, %v1315_v32  ;;  %v1226_v0 = vadd.f32 %v1225_v42, %v1172_v19 }
 0x174   :  { %1351 = vst [vmem:[%s2803_s4 + $0x50] sm:$0xff] %v1333_v34  ;;  %v1066_v35 = vpop.f32.mrf.mxu3 }
 0x175   :  { %v1258_v37 = vmul.f32 %v2681_v33, %v1226_v0  ;;  %v1067_v38 = vadd.f32 %v1066_v35, %v2588_v20 }
 0x176   :  { %v1228_v14 = vpop.f32.mrf.mxu2  ;;  %v1127_v11 = vpop.f32.mrf.mxu0 }
 0x177   :  { %v1280_v44 = vadd.f32 %v2687_v9, %v1258_v37  ;;  %v1121_v46 = vadd.f32 %v1120_v13, %v1067_v38 }
 0x178   :  { %v1176_v63 = vpop.f32.mrf.mxu1 }
 0x179   :  { %vm1298_vm12 = vcmp.ge.f32.partialorder %v1280_v44, 0.0  ;;  %v1316_v50 = vmul.f32 0.2, %v1280_v44  ;;  %v1175_v49 = vadd.f32 %v1174_v16, %v1121_v46 }
 0x17b   :  { %v1334_v52 = vsel %vm1298_vm12, %v1280_v44, %v1316_v50  ;;  %v1229_v23 = vadd.f32 %v1228_v14, %v1175_v49 }
 0x17c   :  { %1352 = vst [vmem:[%s2803_s4 + $0x58] sm:$0xff] %v1334_v52  ;;  %v1068_v47 = vpop.f32.mrf.mxu3 }
 0x17d   :  { %v1259_v53 = vmul.f32 %v2681_v33, %v1229_v23  ;;  %v1069_v20 = vadd.f32 %v1068_v47, %v2616_v39 }
 0x17e   :  { %v1230_v54 = vpop.f32.mrf.mxu2  ;;  %v1130_v24 = vpop.f32.mrf.mxu0 }
 0x17f   :  { %v1281_v57 = vadd.f32 %v2687_v9, %v1259_v53  ;;  %v1123_v59 = vadd.f32 %v1122_v41, %v1069_v20 }
 0x180   :  { %v1179_v7 = vpop.f32.mrf.mxu1 }
 0x181   :  { %vm1299_vm13 = vcmp.ge.f32.partialorder %v1281_v57, 0.0  ;;  %v1317_v61 = vmul.f32 0.2, %v1281_v57  ;;  %v1177_v56 = vadd.f32 %v1176_v63, %v1123_v59 }
 0x183   :  { %v1335_v62 = vsel %vm1299_vm13, %v1281_v57, %v1317_v61  ;;  %v1231_v2 = vadd.f32 %v1230_v54, %v1177_v56 }
 0x184   :  { %1353 = vst [vmem:[%s2803_s4 + $0x60] sm:$0xff] %v1335_v62  ;;  %v1071_v28 = vpop.f32.mrf.mxu3 }
 0x185   :  { %v1260_v3 = vmul.f32 %v2681_v33, %v1231_v2  ;;  %v1072_v39 = vadd.f32 %v1071_v28, %v2621_v48 }
 0x186   :  { %v1233_v5 = vpop.f32.mrf.mxu2 }
 0x187   :  { %v1282_v6 = vadd.f32 %v2687_v9, %v1260_v3  ;;  %v1126_v10 = vadd.f32 %v1125_v60, %v1072_v39 }
 0x188   :  { %v1181_v4 = vpop.f32.mrf.mxu1 }
 0x189   :  { %vm1300_vm14 = vcmp.ge.f32.partialorder %v1282_v6, 0.0  ;;  %v1318_v8 = vmul.f32 0.2, %v1282_v6  ;;  %v1180_v40 = vadd.f32 %v1179_v7, %v1126_v10 }
 0x18b   :  { %v1336_v12 = vsel %vm1300_vm14, %v1282_v6, %v1318_v8  ;;  %v1234_v22 = vadd.f32 %v1233_v5, %v1180_v40 }
 0x18c   :  { %1354 = vst [vmem:[%s2803_s4 + $0x68] sm:$0xff] %v1336_v12  ;;  %v1073_v1 = vpop.f32.mrf.mxu3 }
 0x18d   :  { %v1261_v45 = vmul.f32 %v2681_v33, %v1234_v22  ;;  %v1074_v48 = vadd.f32 %v1073_v1, %v2647_v15 }
 0x18e   :  { %v1235_v17 = vpop.f32.mrf.mxu2 }
 0x18f   :  { %v1283_v18 = vadd.f32 %v2687_v9, %v1261_v45  ;;  %v1128_v21 = vadd.f32 %v1127_v11, %v1074_v48 }
 0x190   :  { %v1184_v15 = vpop.f32.mrf.mxu1 }
 0x191   :  { %vm1301_vm15 = vcmp.ge.f32.partialorder %v1283_v18, 0.0  ;;  %v1319_v26 = vmul.f32 0.2, %v1283_v18  ;;  %v1182_v27 = vadd.f32 %v1181_v4, %v1128_v21 }
 0x193   :  { %v1337_v29 = vsel %vm1301_vm15, %v1283_v18, %v1319_v26  ;;  %v1236_v58 = vadd.f32 %v1235_v17, %v1182_v27 }
 0x194   :  { %1355 = vst [vmem:[%s2803_s4 + $0x70] sm:$0xff] %v1337_v29  ;;  %v1076_v30 = vpop.f32.mrf.mxu3 }
 0x195   :  { %v1262_v13 = vmul.f32 %v2681_v33, %v1236_v58  ;;  %v1077_v55 = vadd.f32 %v1076_v30, %v2650_v25  ;;  %v1132_v25 = vpop.f32.mrf.mxu0 }
 0x196   :  { %v1238_v31 = vpop.f32.mrf.mxu2 }
 0x197   :  { %v1284_v51 = vadd.f32 %v2687_v9, %v1262_v13  ;;  %v1131_v42 = vadd.f32 %v1130_v24, %v1077_v55 }
 0x198   :  { %v1186_v14 = vpop.f32.mrf.mxu1 }
 0x199   :  { %vm1302_vm0 = vcmp.ge.f32.partialorder %v1284_v51, 0.0  ;;  %v1320_v36 = vmul.f32 0.2, %v1284_v51  ;;  %v1185_v16 = vadd.f32 %v1184_v15, %v1131_v42 }
 0x19b   :  { %v1338_v32 = vsel %vm1302_vm0, %v1284_v51, %v1320_v36  ;;  %v1239_v19 = vadd.f32 %v1238_v31, %v1185_v16 }
 0x19c   :  { %1356 = vst [vmem:[%s2803_s4 + $0x78] sm:$0xff] %v1338_v32  ;;  %v1078_v34 = vpop.f32.mrf.mxu3 }
 0x19d   :  { %v1263_v0 = vmul.f32 %v2681_v33, %v1239_v19  ;;  %v1079_v35 = vadd.f32 %v1078_v34, %v2670_v43 }
 0x19e   :  { %v1240_v46 = vpop.f32.mrf.mxu2 }
 0x19f   :  { %v1285_v37 = vadd.f32 %v2687_v9, %v1263_v0  ;;  %v1133_v38 = vadd.f32 %v1132_v25, %v1079_v35 }
 0x1a1   :  { %vm1303_vm1 = vcmp.ge.f32.partialorder %v1285_v37, 0.0  ;;  %v1321_v41 = vmul.f32 0.2, %v1285_v37  ;;  %v1187_v44 = vadd.f32 %v1186_v14, %v1133_v38 }
 0x1a3   :  { %v1339_v63 = vsel %vm1303_vm1, %v1285_v37, %v1321_v41  ;;  %v1241_v50 = vadd.f32 %v1240_v46, %v1187_v44 }
 0x1a4   :  { %1357 = vst [vmem:[%s2803_s4 + $0x80] sm:$0xff] %v1339_v63 }
 0x1a5   :  { %v1264_v49 = vmul.f32 %v2681_v33, %v1241_v50 }
 0x1a7   :  { %v1286_v52 = vadd.f32 %v2687_v9, %v1264_v49 }
 0x1a9   :  { %vm1304_vm2 = vcmp.ge.f32.partialorder %v1286_v52, 0.0  ;;  %v1322_v43 = vmul.f32 0.2, %v1286_v52 }
 0x1ab   :  { %v1340_v23 = vsel %vm1304_vm2, %v1286_v52, %v1322_v43 }
 0x1ac   :  { %1358 = vst [vmem:[%s2803_s4 + $0x88] sm:$0xff] %v1340_v23 }

// kernel: tile.63
= control target key start
LH: loop header
LB: loop body
LE: loop exit
PB: predicated region body
PF: predicated region fallthrough
CT: control target
= control target key end

     0   :  { %s22_s0 = inlined_call_operand.vmem [shape: f32[8], index: 0, kind: input, shape index: {}]   ;;  %s23_s1 = inlined_call_operand.vmem [shape: f32[8,8], index: 1, kind: output, shape index: {}]  }
   0x1   :  { %v4_v0 = vld [vmem:[%s22_s0] ss:$0 sm:$0xff] }
   0x2   :  { %5 = vst [vmem:[%s23_s1] sm:$0xff] %v4_v0 }

// kernel: tile.68
= control target key start
LH: loop header
LB: loop body
LE: loop exit
PB: predicated region body
PF: predicated region fallthrough
CT: control target
= control target key end

     0   :  { %s67_s10 = smov 56   ;;  %s68_s11 = smov 40   ;;  %vm3_vm0 = vcmask 64512   ;;  %vm9_vm1 = vcmask 523712   ;;  %vm15_vm2 = vcmask 458112   ;;  %vm21_vm3 = vcmask 392512   ;;  %s111_s0 = inlined_call_operand.vmem [shape: f32[8,8], index: 0, kind: input, shape index: {}]   ;;  %s112_s1 = inlined_call_operand.vmem [shape: f32[1,64], index: 1, kind: output, shape index: {}]  }
   0x1   :  { %v53_v0 = vld [vmem:[%s111_s0 + $0x7] sm:$0x1]   ;;  %v55_v1 = vld [vmem:[%s111_s0 + $0x5] sm:$0x1]   ;;  %v57_v2 = vld [vmem:[%s111_s0 + $0x3] sm:$0x1]  }
   0x2   :  { %7 = vrot.lane.b32.xlu0 %v53_v0, %s67_s10  ;;  %19 = vrot.lane.b32.xlu1 %v55_v1, %s68_s11  ;;  %s69_s14 = smov 24   ;;  %v54_v3 = vld [vmem:[%s111_s0 + $0x6] sm:$0x1]   ;;  %v56_v4 = vld [vmem:[%s111_s0 + $0x4] sm:$0x1]   ;;  %s70_s21 = smov 48  }
   0x3   :  { %31 = vrot.lane.b32.xlu2 %v57_v2, %s69_s14  ;;  %v58_v5 = vld [vmem:[%s111_s0 + $0x2] sm:$0x1]   ;;  %s71_s22 = smov 32   ;;  %s72_s23 = smov 16   ;;  %v59_v6 = vld [vmem:[%s111_s0 + $0x1] sm:$0x1]  }
   0x4   :  { %s73_s26 = smov 8   ;;  %v2_v7 = vld [vmem:[%s111_s0] sm:$0x1]   ;;  %vm27_vm4 = vcmask 326912   ;;  %vm33_vm5 = vcmask 261312   ;;  %vm39_vm6 = vcmask 195712  }
   0x5   :  { %4 = vst.msk [vmem:[#allocation0] sm:$0x1] %vm3_vm0, %v2_v7   ;;  %vm45_vm7 = vcmask 130112  }
   0xa   :  { %13 = vrot.lane.b32.xlu0 %v54_v3, %s70_s21  ;;  %25 = vrot.lane.b32.xlu1 %v56_v4, %s71_s22 }
   0xb   :  { %37 = vrot.lane.b32.xlu2 %v58_v5, %s72_s23 }
  0x12   :  { %43 = vrot.lane.b32.xlu0 %v59_v6, %s73_s26 }
  0x5d   :  { %v32_v8 = vpop.permute.xlu2 %31  }
  0x65   :  { %v38_v9 = vpop.permute.xlu2 %37  }
  0x74   :  { %v8_v10 = vpop.permute.xlu0 %7   ;;  %v20_v11 = vpop.permute.xlu1 %19  }
  0x75   :  { %10 = vst.msk [vmem:[#allocation0] sm:$0x1] %vm9_vm1, %v8_v10  }
  0x7c   :  { %v14_v12 = vpop.permute.xlu0 %13   ;;  %v26_v13 = vpop.permute.xlu1 %25  }
  0x7d   :  { %16 = vst.msk [vmem:[#allocation0] sm:$0x1] %vm15_vm2, %v14_v12  }
  0x7e   :  { %22 = vst.msk [vmem:[#allocation0] sm:$0x1] %vm21_vm3, %v20_v11  }
  0x7f   :  { %28 = vst.msk [vmem:[#allocation0] sm:$0x1] %vm27_vm4, %v26_v13  }
  0x80   :  { %34 = vst.msk [vmem:[#allocation0] sm:$0x1] %vm33_vm5, %v32_v8  }
  0x81   :  { %40 = vst.msk [vmem:[#allocation0] sm:$0x1] %vm39_vm6, %v38_v9  }
  0x84   :  { %v44_v14 = vpop.permute.xlu0 %43  }
  0x85   :  { %46 = vst.msk [vmem:[#allocation0] sm:$0x1] %vm45_vm7, %v44_v14  }
  0x8c   :  { %v49_v15 = vld [vmem:[#allocation0] sm:$0x1] }
  0x8d   :  { %52 = vst [vmem:[%s112_s1] sm:$0x1] %v49_v15 }

// kernel: gen_forward.6
= control target key start
LH: loop header
LB: loop body
LE: loop exit
PB: predicated region body
PF: predicated region fallthrough
CT: control target
= control target key end

     0   :  { %s3560_s15 = smov 0   ;;  %s4308_s0 = inlined_call_operand.vmem [shape: bf16[1152,432], index: 0, kind: input, shape index: {}]   ;;  %s4309_s1 = inlined_call_operand.vmem [shape: bf16[432,64], index: 1, kind: input, shape index: {}]   ;;  %s4310_s2 = inlined_call_operand.vmem [shape: f32[1,64], index: 2, kind: input, shape index: {}]   ;;  %s4311_s3 = inlined_call_operand.vmem [shape: f32[1,64], index: 3, kind: input, shape index: {}]   ;;  %s4312_s4 = inlined_call_operand.vmem [shape: f32[1152,64], index: 4, kind: output, shape index: {}]  }
   0x1 LB: > { %s2611_s16 = sadd.s32 4294967295, %s3533_s15   ;;  %p2615_p0 = scmp.ge.s32.totalorder %s3533_s15, 1  ;;  %s3533_s15 = sphi %s3560_s15, %s14_s15  }
   0x2   : > { %p164_p1 = scmp.lt.s32.totalorder %s3533_s15, 3 }
   0x4   : > { %p165_p2 = pnand %p2615_p0, %p164_p1 }
   0x5   : > { %s191_s23 = smul.u32 (!%p165_p2), 72, %s2611_s16 }
   0x6   : > { %168 = sbr.rel (%p165_p2) target bundleno = 757 (0x2f5), region = 36 }
   0x7   : > { %p192_p3 = scmp.lt.s32.totalorder (!%p165_p2), %s191_s23, 143 }
   0xb   : > { %v3493_v0 = vld [vmem:[%s4309_s1 + $0x38] sm:$0xff]  ;;  %v3492_v3 = vld [vmem:[%s4309_s1 + $0x30] sm:$0xff]  ;;  %s4314_s23 = smov (!%p192_p3, %s191_s23), 143  ;;  %v3491_v7 = vld [vmem:[%s4309_s1 + $0x28] sm:$0xff]  ;;  %vm1249_vm0 = vcmask 392192   ;;  %vm2482_vm1 = vcmask 523264  }
   0xc   : > { %v3501_v1 = vld [vmem:[%s4309_s1 + $0x78] sm:$0xff]  ;;  %1358 = vmatpush.bf16.msra.mxu0 %v3493_v0  ;;  %v3500_v4 = vld [vmem:[%s4309_s1 + $0x70] sm:$0xff]  ;;  %v3499_v8 = vld [vmem:[%s4309_s1 + $0x68] sm:$0xff]  ;;  %s3341_s10 = sshll.u32 %s4314_s23, 4  ;;  %s2618_s7 = sshll.u32 %s4314_s23, 3 }
   0xd   : > { %v3509_v2 = vld [vmem:[%s4309_s1 + $0xb8] sm:$0xff]  ;;  %1547 = vmatpush.bf16.msra.mxu1 %v3501_v1  ;;  %v3508_v5 = vld [vmem:[%s4309_s1 + $0xb0] sm:$0xff]  ;;  %v3507_v9 = vld [vmem:[%s4309_s1 + $0xa8] sm:$0xff]  ;;  %s3607_s18 = scalar_lea.vmem %s4308_s0, %s3341_s10  ;;  %s3765_s10 = scalar_lea.vmem %s4312_s4, %s2618_s7 }
   0xe   : > { %1736 = vmatpush.bf16.msra.mxu2 %v3509_v2  ;;  %v3512_v6 = vld [vmem:[%s4309_s1 + $0xd0] sm:$0xff]  ;;  %v3511_v10 = vld [vmem:[%s4309_s1 + $0xc8] sm:$0xff]  ;;  %v3490_v11 = vld [vmem:[%s4309_s1 + $0x20] sm:$0xff] }
   0xf   : > { %1930 = vmatpush.bf16.msra.mxu3 %v3512_v6  ;;  %v3498_v12 = vld [vmem:[%s4309_s1 + $0x60] sm:$0xff]  ;;  %v3343_v15 = vld [vmem:[%s3607_s18 + $0xc] sm:$0xf]  ;;  %v2631_v16 = vld [vmem:[%s3607_s18 + $0x18] sm:$0xf0] }
  0x10   : > { %1359 = vmatpush.bf16.msra.mxu0 %v3492_v3  ;;  %v3506_v13 = vld [vmem:[%s4309_s1 + $0xa0] sm:$0xff]  ;;  %v3489_v17 = vld [vmem:[%s4309_s1 + $0x18] sm:$0xff]  ;;  %v2634_v20 = vor.u32 %v3343_v15, %v2631_v16  ;;  %v3488_v21 = vld [vmem:[%s4309_s1 + $0x10] sm:$0xff] }
  0x11   : > { %1548 = vmatpush.bf16.msra.mxu1 %v3500_v4  ;;  %v3510_v14 = vld [vmem:[%s4309_s1 + $0xc0] sm:$0xff]  ;;  %v3497_v18 = vld [vmem:[%s4309_s1 + $0x58] sm:$0xff]  ;;  %v3496_v22 = vld [vmem:[%s4309_s1 + $0x50] sm:$0xff] }
  0x12   : > { %1737 = vmatpush.bf16.msra.mxu2 %v3508_v5  ;;  %v3505_v19 = vld [vmem:[%s4309_s1 + $0x98] sm:$0xff]  ;;  %v3504_v23 = vld [vmem:[%s4309_s1 + $0x90] sm:$0xff]  ;;  %v3487_v24 = vld [vmem:[%s4309_s1 + $0x8] sm:$0xff] }
  0x13   : > { %1931 = vmatpush.bf16.msra.mxu3 %v3511_v10  ;;  %v3495_v25 = vld [vmem:[%s4309_s1 + $0x48] sm:$0xff]  ;;  %v3486_v27 = vld [vmem:[%s4309_s1] sm:$0xff]  ;;  %v3344_v30 = vld [vmem:[%s3607_s18 + $0xc] sm:$0xf0] }
  0x14   : > { %1360 = vmatpush.bf16.msra.mxu0 %v3491_v7  ;;  %v3503_v26 = vld [vmem:[%s4309_s1 + $0x88] sm:$0xff]  ;;  %v3494_v28 = vld [vmem:[%s4309_s1 + $0x40] sm:$0xff]  ;;  %v2623_v32 = vld [vmem:[%s3607_s18 + $0x10] sm:$0xf0] }
  0x15   : > { %1549 = vmatpush.bf16.msra.mxu1 %v3499_v8  ;;  %v2621_v29 = vld [vmem:[%s3607_s18] sm:$0xf]  ;;  %v3342_v31 = vld [vmem:[%s3607_s18 + $0x4] sm:$0xf]  ;;  %v2629_v34 = vld [vmem:[%s3607_s18 + $0x8] sm:$0xf] }
  0x16   : > { %1738 = vmatpush.bf16.msra.mxu2 %v3507_v9  ;;  %v3502_v33 = vld [vmem:[%s4309_s1 + $0x80] sm:$0xff]  ;;  %v3345_v35 = vld [vmem:[%s3607_s18 + $0x14] sm:$0xf0]  ;;  %v3347_v36 = vld [vmem:[%s3607_s18 + $0x2c] sm:$0xf]  ;;  %v2622_v38 = vor.u32 %v3344_v30, %v2621_v29  ;;  %v2626_v39 = vor.u32 %v3342_v31, %v2623_v32 }
  0x17   : > { %1932 = vmatpush.bf16.msra.mxu3 %v3510_v14  ;;  %v2647_v37 = vld [vmem:[%s3607_s18 + $0x38] sm:$0xf0]  ;;  %v2630_v40 = vor.u32 %v3345_v35, %v2629_v34  ;;  %v2637_v42 = vld [vmem:[%s3607_s18 + $0x20] sm:$0xf]  ;;  %v3348_v43 = vld [vmem:[%s3607_s18 + $0x2c] sm:$0xf0] }
  0x18   : > { %1361 = vmatpush.bf16.msra.mxu0 %v3490_v11  ;;  %v2650_v41 = vor.u32 %v3347_v36, %v2647_v37  ;;  %v3346_v44 = vld [vmem:[%s3607_s18 + $0x24] sm:$0xf]  ;;  %v2639_v45 = vld [vmem:[%s3607_s18 + $0x30] sm:$0xf0]  ;;  %v2645_v46 = vld [vmem:[%s3607_s18 + $0x28] sm:$0xf]  ;;  %v2638_v50 = vor.u32 %v3348_v43, %v2637_v42 }
  0x19   : > { %1550 = vmatpush.bf16.msra.mxu1 %v3498_v12  ;;  %v3349_v47 = vld [vmem:[%s3607_s18 + $0x34] sm:$0xf0]  ;;  %v3351_v48 = vld [vmem:[%s3607_s18 + $0x4c] sm:$0xf]  ;;  %v2663_v49 = vld [vmem:[%s3607_s18 + $0x58] sm:$0xf0]  ;;  %v2642_v51 = vor.u32 %v3346_v44, %v2639_v45 }
  0x1a   : > { %1739 = vmatpush.bf16.msra.mxu2 %v3506_v13  ;;  %3303 = vmatmul.msk.bf16.vlgmr.msra.gmra.mxu3 %vm1249_vm0, %v2634_v20  ;;  %v2646_v52 = vor.u32 %v3349_v47, %v2645_v46  ;;  %v2666_v53 = vor.u32 %v3351_v48, %v2663_v49  ;;  %v2653_v54 = vld [vmem:[%s3607_s18 + $0x40] sm:$0xf]  ;;  %v3352_v55 = vld [vmem:[%s3607_s18 + $0x4c] sm:$0xf0]  ;;  %v3350_v56 = vld [vmem:[%s3607_s18 + $0x44] sm:$0xf] }
  0x1b   : > { %v2655_v57 = vld [vmem:[%s3607_s18 + $0x50] sm:$0xf0]  ;;  %v2661_v58 = vld [vmem:[%s3607_s18 + $0x48] sm:$0xf]  ;;  %v3353_v59 = vld [vmem:[%s3607_s18 + $0x54] sm:$0xf0]  ;;  %v2654_v62 = vor.u32 %v3352_v55, %v2653_v54 }
  0x1c   : > { %1362 = vmatpush.bf16.msra.mxu0 %v3489_v17  ;;  %v3355_v60 = vld [vmem:[%s3607_s18 + $0x6c] sm:$0xf]  ;;  %v2679_v61 = vld [vmem:[%s3607_s18 + $0x78] sm:$0xf0]  ;;  %v2658_v63 = vor.u32 %v3350_v56, %v2655_v57  ;;  %v2662_v0 = vor.u32 %v3353_v59, %v2661_v58  ;;  %v2669_v2 = vld [vmem:[%s3607_s18 + $0x60] sm:$0xf] }
  0x1d   : > { %1551 = vmatpush.bf16.msra.mxu1 %v3497_v18  ;;  %v2682_v1 = vor.u32 %v3355_v60, %v2679_v61  ;;  %v3356_v3 = vld [vmem:[%s3607_s18 + $0x6c] sm:$0xf0]  ;;  %v3354_v4 = vld [vmem:[%s3607_s18 + $0x64] sm:$0xf]  ;;  %v2671_v5 = vld [vmem:[%s3607_s18 + $0x70] sm:$0xf0] }
  0x1e   : > { %1740 = vmatpush.bf16.msra.mxu2 %v3505_v19  ;;  %v2677_v6 = vld [vmem:[%s3607_s18 + $0x68] sm:$0xf]  ;;  %v3357_v7 = vld [vmem:[%s3607_s18 + $0x74] sm:$0xf0]  ;;  %v3359_v8 = vld [vmem:[%s3607_s18 + $0x8c] sm:$0xf]  ;;  %v2670_v10 = vor.u32 %v3356_v3, %v2669_v2  ;;  %v2674_v11 = vor.u32 %v3354_v4, %v2671_v5 }
  0x1f   : > { %v2695_v9 = vld [vmem:[%s3607_s18 + $0x98] sm:$0xf0]  ;;  %v2678_v12 = vor.u32 %v3357_v7, %v2677_v6  ;;  %v2685_v14 = vld [vmem:[%s3607_s18 + $0x80] sm:$0xf]  ;;  %v3360_v15 = vld [vmem:[%s3607_s18 + $0x8c] sm:$0xf0] }
  0x20   : > { %1363 = vmatpush.bf16.msra.mxu0 %v3488_v21  ;;  %v2698_v13 = vor.u32 %v3359_v8, %v2695_v9  ;;  %v3358_v16 = vld [vmem:[%s3607_s18 + $0x84] sm:$0xf]  ;;  %v2687_v17 = vld [vmem:[%s3607_s18 + $0x90] sm:$0xf0]  ;;  %v2693_v18 = vld [vmem:[%s3607_s18 + $0x88] sm:$0xf] }
  0x21   : > { %1552 = vmatpush.bf16.msra.mxu1 %v3496_v22  ;;  %v3361_v19 = vld [vmem:[%s3607_s18 + $0x94] sm:$0xf0]  ;;  %v3363_v20 = vld [vmem:[%s3607_s18 + $0xac] sm:$0xf]  ;;  %v2711_v21 = vld [vmem:[%s3607_s18 + $0xb8] sm:$0xf0]  ;;  %v2686_v22 = vor.u32 %v3360_v15, %v2685_v14 }
  0x22   : > { %1741 = vmatpush.bf16.msra.mxu2 %v3504_v23  ;;  %v2690_v23 = vor.u32 %v3358_v16, %v2687_v17  ;;  %v2703_v29 = vld [vmem:[%s3607_s18 + $0xb0] sm:$0xf0]  ;;  %v2709_v30 = vld [vmem:[%s3607_s18 + $0xa8] sm:$0xf]  ;;  %v3365_v31 = vld [vmem:[%s3607_s18 + $0xb4] sm:$0xf0] }
  0x23   : > { %v3367_v32 = vld [vmem:[%s3607_s18 + $0xcc] sm:$0xf]  ;;  %v2710_v36 = vor.u32 %v3365_v31, %v2709_v30  ;;  %v2725_v42 = vld [vmem:[%s3607_s18 + $0xc8] sm:$0xf]  ;;  %v3369_v43 = vld [vmem:[%s3607_s18 + $0xd4] sm:$0xf0] }
  0x24   : > { %1364 = vmatpush.bf16.msra.mxu0 %v3487_v24  ;;  %v2694_v24 = vor.u32 %v3361_v19, %v2693_v18  ;;  %v3371_v44 = vld [vmem:[%s3607_s18 + $0xec] sm:$0xf]  ;;  %v2743_v45 = vld [vmem:[%s3607_s18 + $0xf8] sm:$0xf0]  ;;  %v2726_v48 = vor.u32 %v3369_v43, %v2725_v42  ;;  %v2741_v54 = vld [vmem:[%s3607_s18 + $0xe8] sm:$0xf] }
  0x25   : > { %1553 = vmatpush.bf16.msra.mxu1 %v3495_v25  ;;  %v2714_v25 = vor.u32 %v3363_v20, %v2711_v21  ;;  %v2746_v49 = vor.u32 %v3371_v44, %v2743_v45  ;;  %v3373_v55 = vld [vmem:[%s3607_s18 + $0xf4] sm:$0xf0]  ;;  %v3375_v56 = vld [vmem:[%s3607_s18 + $0x10c] sm:$0xf]  ;;  %v2759_v57 = vld [vmem:[%s3607_s18 + $0x118] sm:$0xf0] }
  0x26   : > { %1742 = vmatpush.bf16.msra.mxu2 %v3503_v26  ;;  %v2701_v26 = vld [vmem:[%s3607_s18 + $0xa0] sm:$0xf]  ;;  %v2742_v60 = vor.u32 %v3373_v55, %v2741_v54  ;;  %v2762_v61 = vor.u32 %v3375_v56, %v2759_v57  ;;  %v2751_v2 = vld [vmem:[%s3607_s18 + $0x110] sm:$0xf0]  ;;  %v2757_v3 = vld [vmem:[%s3607_s18 + $0x108] sm:$0xf] }
  0x27   : > { %v3377_v4 = vld [vmem:[%s3607_s18 + $0x114] sm:$0xf0]  ;;  %v3379_v5 = vld [vmem:[%s3607_s18 + $0x12c] sm:$0xf]  ;;  %v2775_v6 = vld [vmem:[%s3607_s18 + $0x138] sm:$0xf0] }
  0x28   : > { %1365 = vmatpush.bf16.msra.mxu0 %v3486_v27  ;;  %v3364_v27 = vld [vmem:[%s3607_s18 + $0xac] sm:$0xf0]  ;;  %v3744_v17 = vld [vmem:[%s4310_s2] ss:$0 sm:$0xff] }
  0x29   : > { %1554 = vmatpush.bf16.msra.mxu1 %v3494_v28  ;;  %v3362_v28 = vld [vmem:[%s3607_s18 + $0xa4] sm:$0xf]  ;;  %v2702_v34 = vor.u32 %v3364_v27, %v2701_v26  ;;  %v2767_v27 = vld [vmem:[%s3607_s18 + $0x130] sm:$0xf0]  ;;  %v2781_v57 = vld [vmem:[%s3607_s18 + $0x140] sm:$0xf] }
  0x2a   : > { %1743 = vmatpush.bf16.msra.mxu2 %v3502_v33  ;;  %3304 = vmatmul.msk.bf16.gmra.mxu3 %vm1249_vm0, %v2650_v41  ;;  %v2727_v33 = vld [vmem:[%s3607_s18 + $0xd8] sm:$0xf0]  ;;  %v2706_v35 = vor.u32 %v3362_v28, %v2703_v29  ;;  %v2719_v41 = vld [vmem:[%s3607_s18 + $0xd0] sm:$0xf0]  ;;  %v3378_v26 = vld [vmem:[%s3607_s18 + $0x124] sm:$0xf] }
  0x2b   : > { %1366 = vmatmul.bf16.vlgmr.msra.gmra.mxu0 %v2622_v38  ;;  %v2730_v37 = vor.u32 %v3367_v32, %v2727_v33  ;;  %v2717_v38 = vld [vmem:[%s3607_s18 + $0xc0] sm:$0xf]  ;;  %v2773_v28 = vld [vmem:[%s3607_s18 + $0x128] sm:$0xf]  ;;  %v3381_v29 = vld [vmem:[%s3607_s18 + $0x134] sm:$0xf0] }
  0x2c   : > { %1555 = vmatmul.bf16.vlgmr.msra.gmra.mxu1 %v2626_v39  ;;  %v3368_v39 = vld [vmem:[%s3607_s18 + $0xcc] sm:$0xf0]  ;;  %v3383_v32 = vld [vmem:[%s3607_s18 + $0x14c] sm:$0xf]  ;;  %v2791_v33 = vld [vmem:[%s3607_s18 + $0x158] sm:$0xf0] }
  0x2d   : > { %1744 = vmatmul.bf16.vlgmr.msra.gmra.mxu2 %v2630_v40  ;;  %v3366_v40 = vld [vmem:[%s3607_s18 + $0xc4] sm:$0xf]  ;;  %v2718_v46 = vor.u32 %v3368_v39, %v2717_v38  ;;  %v2794_v43 = vor.u32 %v3383_v32, %v2791_v33  ;;  %v2799_v33 = vld [vmem:[%s3607_s18 + $0x170] sm:$0xf0] }
  0x2e   : > { %v2722_v47 = vor.u32 %v3366_v40, %v2719_v41  ;;  %v2774_v41 = vor.u32 %v3381_v29, %v2773_v28  ;;  %v2797_v29 = vld [vmem:[%s3607_s18 + $0x160] sm:$0xf]  ;;  %v3386_v32 = vld [vmem:[%s3607_s18 + $0x164] sm:$0xf] }
  0x3a   : > { %3305 = vmatmul.msk.bf16.gmra.mxu3 %vm1249_vm0, %v2666_v53  ;;  %v2735_v53 = vld [vmem:[%s3607_s18 + $0xf0] sm:$0xf0] }
  0x3b   : > { %1371 = vmatmul.bf16.gmra.mxu0 %v2638_v50  ;;  %v2733_v50 = vld [vmem:[%s3607_s18 + $0xe0] sm:$0xf] }
  0x3c   : > { %1560 = vmatmul.bf16.gmra.mxu1 %v2642_v51  ;;  %v3372_v51 = vld [vmem:[%s3607_s18 + $0xec] sm:$0xf0] }
  0x3d   : > { %1749 = vmatmul.bf16.gmra.mxu2 %v2646_v52  ;;  %v3370_v52 = vld [vmem:[%s3607_s18 + $0xe4] sm:$0xf]  ;;  %v2734_v58 = vor.u32 %v3372_v51, %v2733_v50 }
  0x3e   : > { %v2738_v59 = vor.u32 %v3370_v52, %v2735_v53 }
  0x4a   : > { %3306 = vmatmul.msk.bf16.gmra.mxu3 %vm1249_vm0, %v2682_v1  ;;  %v3374_v1 = vld [vmem:[%s3607_s18 + $0x104] sm:$0xf] }
  0x4b   : > { %1376 = vmatmul.bf16.gmra.mxu0 %v2654_v62  ;;  %v2754_v8 = vor.u32 %v3374_v1, %v2751_v2  ;;  %v3387_v2 = vld [vmem:[%s3607_s18 + $0x16c] sm:$0xf] }
  0x4c   : > { %1565 = vmatmul.bf16.gmra.mxu1 %v2658_v63  ;;  %v2749_v63 = vld [vmem:[%s3607_s18 + $0x100] sm:$0xf] }
  0x4d   : > { %1754 = vmatmul.bf16.gmra.mxu2 %v2662_v0  ;;  %v3376_v0 = vld [vmem:[%s3607_s18 + $0x10c] sm:$0xf0] }
  0x4e   : > { %v2750_v7 = vor.u32 %v3376_v0, %v2749_v63  ;;  %v3385_v63 = vld [vmem:[%s3607_s18 + $0x154] sm:$0xf0] }
  0x5a   : > { %3307 = vmatmul.msk.bf16.gmra.mxu3 %vm1249_vm0, %v2698_v13  ;;  %v2778_v13 = vor.u32 %v3379_v5, %v2775_v6 }
  0x5b   : > { %1381 = vmatmul.bf16.gmra.mxu0 %v2670_v10 }
  0x5c   : > { %1570 = vmatmul.bf16.gmra.mxu1 %v2674_v11  ;;  %v2758_v11 = vor.u32 %v3377_v4, %v2757_v3  ;;  %v2807_v3 = vld [vmem:[%s3607_s18 + $0x178] sm:$0xf0] }
  0x5d   : > { %1759 = vmatmul.bf16.gmra.mxu2 %v2678_v12 }
  0x6a   : > { %3308 = vmatmul.msk.bf16.gmra.mxu3 %vm1249_vm0, %v2714_v25  ;;  %v3380_v25 = vld [vmem:[%s3607_s18 + $0x12c] sm:$0xf0] }
  0x6b   : > { %1386 = vmatmul.bf16.gmra.mxu0 %v2686_v22  ;;  %v3749_v22 = vld [vmem:[%s4311_s3] ss:$0 sm:$0xff] }
  0x6c   : > { %1575 = vmatmul.bf16.gmra.mxu1 %v2690_v23  ;;  %v2765_v23 = vld [vmem:[%s3607_s18 + $0x120] sm:$0xf] }
  0x6d   : > { %1764 = vmatmul.bf16.gmra.mxu2 %v2694_v24 }
  0x7a   : > { %3309 = vmatmul.msk.bf16.gmra.mxu3 %vm1249_vm0, %v2730_v37 }
  0x7b   : > { %1391 = vmatmul.bf16.gmra.mxu0 %v2702_v34 }
  0x7c   : > { %1580 = vmatmul.bf16.gmra.mxu1 %v2706_v35  ;;  %v2766_v35 = vor.u32 %v3380_v25, %v2765_v23 }
  0x7d   : > { %1769 = vmatmul.bf16.gmra.mxu2 %v2710_v36  ;;  %v2770_v36 = vor.u32 %v3378_v26, %v2767_v27 }
  0x8a   : > { %3310 = vmatmul.msk.bf16.gmra.mxu3 %vm1249_vm0, %v2746_v49 }
  0x8b   : > { %1396 = vmatmul.bf16.gmra.mxu0 %v2718_v46 }
  0x8c   : > { %1585 = vmatmul.bf16.gmra.mxu1 %v2722_v47 }
  0x8d   : > { %1774 = vmatmul.bf16.gmra.mxu2 %v2726_v48 }
  0x9a   : > { %3311 = vmatmul.msk.bf16.gmra.mxu3 %vm1249_vm0, %v2762_v61  ;;  %v2783_v61 = vld [vmem:[%s3607_s18 + $0x150] sm:$0xf0] }
  0x9b   : > { %1401 = vmatmul.bf16.gmra.mxu0 %v2734_v58 }
  0x9c   : > { %1590 = vmatmul.bf16.gmra.mxu1 %v2738_v59  ;;  %v3384_v59 = vld [vmem:[%s3607_s18 + $0x14c] sm:$0xf0] }
  0x9d   : > { %1779 = vmatmul.bf16.gmra.mxu2 %v2742_v60  ;;  %v1934_v62 = vpop.f32.mrf.mxu3  ;;  %v3382_v60 = vld [vmem:[%s3607_s18 + $0x144] sm:$0xf]  ;;  %v2782_v5 = vor.u32 %v3384_v59, %v2781_v57 }
  0x9e   : > { %v2786_v6 = vor.u32 %v3382_v60, %v2783_v61 }
  0xa5   : > { %v1936_v12 = vpop.f32.mrf.mxu3 }
  0xa8   : > { %v1367_v9 = vpop.f32.mrf.mxu0 }
  0xa9   : > { %v1556_v10 = vpop.f32.mrf.mxu1 }
  0xaa   : > { %v1557_v14 = vadd.f32 %v1556_v10, %v1367_v9  ;;  %3312 = vmatmul.msk.bf16.gmra.mxu3 %vm1249_vm0, %v2778_v13  ;;  %v2810_v13 = vor.u32 %v3387_v2, %v2807_v3  ;;  %v3390_v2 = vld [vmem:[%s3607_s18 + $0x184] sm:$0xf]  ;;  %v2815_v3 = vld [vmem:[%s3607_s18 + $0x190] sm:$0xf0] }
  0xab   : > { %1406 = vmatmul.bf16.gmra.mxu0 %v2750_v7 }
  0xac   : > { %1595 = vmatmul.bf16.gmra.mxu1 %v2754_v8 }
  0xad   : > { %1784 = vmatmul.bf16.gmra.mxu2 %v2758_v11  ;;  %v1939_v20 = vpop.f32.mrf.mxu3 }
  0xb0   : > { %v1745_v15 = vpop.f32.mrf.mxu2  ;;  %v1369_v18 = vpop.f32.mrf.mxu0 }
  0xb1   : > { %v1746_v16 = vadd.f32 %v1745_v15, %v1557_v14  ;;  %v1558_v19 = vpop.f32.mrf.mxu1 }
  0xb2   : > { %v1559_v31 = vadd.f32 %v1558_v19, %v1369_v18 }
  0xb3   : > { %v1935_v21 = vadd.f32 %v1934_v62, %v1746_v16  ;;  %v2789_v62 = vld [vmem:[%s3607_s18 + $0x148] sm:$0xf] }
  0xb4   : > { %v2790_v11 = vor.u32 %v3385_v63, %v2789_v62  ;;  %v2813_v63 = vld [vmem:[%s3607_s18 + $0x180] sm:$0xf] }
  0xb5   : > { %v2118_v24 = vmul.f32 %v3744_v17, %v1935_v21  ;;  %v1941_v42 = vpop.f32.mrf.mxu3 }
  0xb7   : > { %v2194_v30 = vadd.f32 %v3749_v22, %v2118_v24 }
  0xb8   : > { %v1747_v34 = vpop.f32.mrf.mxu2  ;;  %v1372_v39 = vpop.f32.mrf.mxu0 }
  0xb9   : > { %vm2266_vm2 = vcmp.ge.f32.partialorder %v2194_v30, 0.0  ;;  %v2338_v37 = vmul.f32 0.2, %v2194_v30  ;;  %v1748_v38 = vadd.f32 %v1747_v34, %v1559_v31  ;;  %v1561_v40 = vpop.f32.mrf.mxu1  ;;  %v3388_v31 = vld [vmem:[%s3607_s18 + $0x16c] sm:$0xf0] }
  0xba   : > { %v1562_v47 = vadd.f32 %v1561_v40, %v1372_v39  ;;  %3313 = vmatmul.msk.bf16.gmra.mxu3 %vm1249_vm0, %v2794_v43  ;;  %v2805_v34 = vld [vmem:[%s3607_s18 + $0x168] sm:$0xf]  ;;  %v2823_v39 = vld [vmem:[%s3607_s18 + $0x198] sm:$0xf0] }
  0xbb   : > { %v2410_v44 = vsel %vm2266_vm2, %v2194_v30, %v2338_v37  ;;  %v1937_v45 = vadd.f32 %v1936_v12, %v1748_v38  ;;  %1411 = vmatmul.bf16.gmra.mxu0 %v2766_v35  ;;  %v3389_v35 = vld [vmem:[%s3607_s18 + $0x174] sm:$0xf0]  ;;  %v3391_v38 = vld [vmem:[%s3607_s18 + $0x18c] sm:$0xf] }
  0xbc   : > { %2483 = vst.msk [vmem:[%s3765_s10] sm:$0xff] %vm2482_vm1, %v2410_v44  ;;  %1600 = vmatmul.bf16.gmra.mxu1 %v2770_v36 }
  0xbd   : > { %v2119_v46 = vmul.f32 %v3744_v17, %v1937_v45  ;;  %1789 = vmatmul.bf16.gmra.mxu2 %v2774_v41  ;;  %v1944_v54 = vpop.f32.mrf.mxu3  ;;  %v2798_v41 = vor.u32 %v3388_v31, %v2797_v29 }
  0xbf   : > { %v2195_v48 = vadd.f32 %v3749_v22, %v2119_v46 }
  0xc0   : > { %v1750_v49 = vpop.f32.mrf.mxu2  ;;  %v1374_v52 = vpop.f32.mrf.mxu0 }
  0xc1   : > { %vm2267_vm3 = vcmp.ge.f32.partialorder %v2195_v48, 0.0  ;;  %v2339_v50 = vmul.f32 0.2, %v2195_v48  ;;  %v1751_v51 = vadd.f32 %v1750_v49, %v1562_v47  ;;  %v1563_v53 = vpop.f32.mrf.mxu1  ;;  %v2806_v47 = vor.u32 %v3389_v35, %v2805_v34  ;;  %v2829_v35 = vld [vmem:[%s3607_s18 + $0x1a0] sm:$0xf] }
  0xc2   : > { %v1564_v1 = vadd.f32 %v1563_v53, %v1374_v52  ;;  %v2826_v49 = vor.u32 %v3391_v38, %v2823_v39  ;;  %v3394_v38 = vld [vmem:[%s3607_s18 + $0x1a4] sm:$0xf]  ;;  %v2831_v39 = vld [vmem:[%s3607_s18 + $0x1b0] sm:$0xf0] }
  0xc3   : > { %v2411_v55 = vsel %vm2267_vm3, %v2195_v48, %v2339_v50  ;;  %v1940_v56 = vadd.f32 %v1939_v20, %v1751_v51 }
  0xc4   : > { %2484 = vst.msk [vmem:[%s3765_s10 + $0x8] sm:$0xff] %vm2482_vm1, %v2411_v55 }
  0xc5   : > { %v2120_v58 = vmul.f32 %v3744_v17, %v1940_v56  ;;  %v1946_v12 = vpop.f32.mrf.mxu3 }
  0xc7   : > { %v2196_v0 = vadd.f32 %v3749_v22, %v2120_v58 }
  0xc8   : > { %v1752_v4 = vpop.f32.mrf.mxu2  ;;  %v1377_v9 = vpop.f32.mrf.mxu0 }
  0xc9   : > { %vm2268_vm4 = vcmp.ge.f32.partialorder %v2196_v0, 0.0  ;;  %v2340_v7 = vmul.f32 0.2, %v2196_v0  ;;  %v1753_v8 = vadd.f32 %v1752_v4, %v1564_v1  ;;  %v1566_v10 = vpop.f32.mrf.mxu1  ;;  %v3392_v1 = vld [vmem:[%s3607_s18 + $0x18c] sm:$0xf0] }
  0xca   : > { %v1567_v18 = vadd.f32 %v1566_v10, %v1377_v9  ;;  %3314 = vmatmul.msk.bf16.gmra.mxu3 %vm1249_vm0, %v2810_v13  ;;  %v2821_v4 = vld [vmem:[%s3607_s18 + $0x188] sm:$0xf]  ;;  %v2839_v9 = vld [vmem:[%s3607_s18 + $0x1b8] sm:$0xf0] }
  0xcb   : > { %v2412_v14 = vsel %vm2268_vm4, %v2196_v0, %v2340_v7  ;;  %v1942_v15 = vadd.f32 %v1941_v42, %v1753_v8  ;;  %1416 = vmatmul.bf16.gmra.mxu0 %v2782_v5  ;;  %v2802_v42 = vor.u32 %v3386_v32, %v2799_v33  ;;  %v3393_v5 = vld [vmem:[%s3607_s18 + $0x194] sm:$0xf0]  ;;  %v3395_v8 = vld [vmem:[%s3607_s18 + $0x1ac] sm:$0xf] }
  0xcc   : > { %2485 = vst.msk [vmem:[%s3765_s10 + $0x10] sm:$0xff] %vm2482_vm1, %v2412_v14  ;;  %1605 = vmatmul.bf16.gmra.mxu1 %v2786_v6 }
  0xcd   : > { %v2121_v16 = vmul.f32 %v3744_v17, %v1942_v15  ;;  %1794 = vmatmul.bf16.gmra.mxu2 %v2790_v11  ;;  %v1949_v26 = vpop.f32.mrf.mxu3  ;;  %v2814_v11 = vor.u32 %v3392_v1, %v2813_v63 }
  0xcf   : > { %v2197_v19 = vadd.f32 %v3749_v22, %v2121_v16 }
  0xd0   : > { %v1755_v20 = vpop.f32.mrf.mxu2  ;;  %v1379_v24 = vpop.f32.mrf.mxu0 }
  0xd1   : > { %vm2269_vm5 = vcmp.ge.f32.partialorder %v2197_v19, 0.0  ;;  %v2341_v21 = vmul.f32 0.2, %v2197_v19  ;;  %v1756_v23 = vadd.f32 %v1755_v20, %v1567_v18  ;;  %v1568_v25 = vpop.f32.mrf.mxu1  ;;  %v2822_v18 = vor.u32 %v3393_v5, %v2821_v4  ;;  %v2845_v5 = vld [vmem:[%s3607_s18 + $0x1c0] sm:$0xf] }
  0xd2   : > { %v1569_v37 = vadd.f32 %v1568_v25, %v1379_v24  ;;  %v2842_v20 = vor.u32 %v3395_v8, %v2839_v9  ;;  %v3398_v8 = vld [vmem:[%s3607_s18 + $0x1c4] sm:$0xf]  ;;  %v2847_v9 = vld [vmem:[%s3607_s18 + $0x1d0] sm:$0xf0] }
  0xd3   : > { %v2413_v27 = vsel %vm2269_vm5, %v2197_v19, %v2341_v21  ;;  %v1945_v28 = vadd.f32 %v1944_v54, %v1756_v23 }
  0xd4   : > { %2486 = vst.msk [vmem:[%s3765_s10 + $0x18] sm:$0xff] %vm2482_vm1, %v2413_v27 }
  0xd5   : > { %v2122_v30 = vmul.f32 %v3744_v17, %v1945_v28  ;;  %v1951_v48 = vpop.f32.mrf.mxu3 }
  0xd7   : > { %v2198_v36 = vadd.f32 %v3749_v22, %v2122_v30 }
  0xd8   : > { %v1757_v40 = vpop.f32.mrf.mxu2  ;;  %v1382_v45 = vpop.f32.mrf.mxu0 }
  0xd9   : > { %vm2270_vm6 = vcmp.ge.f32.partialorder %v2198_v36, 0.0  ;;  %v2342_v43 = vmul.f32 0.2, %v2198_v36  ;;  %v1758_v44 = vadd.f32 %v1757_v40, %v1569_v37  ;;  %v1571_v46 = vpop.f32.mrf.mxu1  ;;  %v3396_v37 = vld [vmem:[%s3607_s18 + $0x1ac] sm:$0xf0] }
  0xda   : > { %v1572_v53 = vadd.f32 %v1571_v46, %v1382_v45  ;;  %3315 = vmatmul.msk.bf16.gmra.mxu3 %vm1249_vm0, %v2826_v49  ;;  %v2837_v40 = vld [vmem:[%s3607_s18 + $0x1a8] sm:$0xf]  ;;  %v2855_v45 = vld [vmem:[%s3607_s18 + $0x1d8] sm:$0xf0] }
  0xdb   : > { %v2414_v50 = vsel %vm2270_vm6, %v2198_v36, %v2342_v43  ;;  %v1947_v51 = vadd.f32 %v1946_v12, %v1758_v44  ;;  %1421 = vmatmul.bf16.gmra.mxu0 %v2798_v41  ;;  %v2818_v12 = vor.u32 %v3390_v2, %v2815_v3  ;;  %v3397_v41 = vld [vmem:[%s3607_s18 + $0x1b4] sm:$0xf0]  ;;  %v3399_v44 = vld [vmem:[%s3607_s18 + $0x1cc] sm:$0xf] }
  0xdc   : > { %2487 = vst.msk [vmem:[%s3765_s10 + $0x20] sm:$0xff] %vm2482_vm1, %v2414_v50  ;;  %1610 = vmatmul.bf16.gmra.mxu1 %v2802_v42 }
  0xdd   : > { %v2123_v52 = vmul.f32 %v3744_v17, %v1947_v51  ;;  %1799 = vmatmul.bf16.gmra.mxu2 %v2806_v47  ;;  %v1954_v60 = vpop.f32.mrf.mxu3  ;;  %v2830_v47 = vor.u32 %v3396_v37, %v2829_v35 }
  0xdf   : > { %v2199_v54 = vadd.f32 %v3749_v22, %v2123_v52 }
  0xe0   : > { %v1760_v55 = vpop.f32.mrf.mxu2  ;;  %v1384_v58 = vpop.f32.mrf.mxu0 }
  0xe1   : > { %vm2271_vm7 = vcmp.ge.f32.partialorder %v2199_v54, 0.0  ;;  %v2343_v56 = vmul.f32 0.2, %v2199_v54  ;;  %v1761_v57 = vadd.f32 %v1760_v55, %v1572_v53  ;;  %v1573_v59 = vpop.f32.mrf.mxu1  ;;  %v2838_v53 = vor.u32 %v3397_v41, %v2837_v40  ;;  %v2861_v41 = vld [vmem:[%s3607_s18 + $0x1e0] sm:$0xf] }
  0xe2   : > { %v1574_v7 = vadd.f32 %v1573_v59, %v1384_v58  ;;  %v2858_v55 = vor.u32 %v3399_v44, %v2855_v45  ;;  %v3402_v44 = vld [vmem:[%s3607_s18 + $0x1e4] sm:$0xf]  ;;  %v2863_v45 = vld [vmem:[%s3607_s18 + $0x1f0] sm:$0xf0] }
  0xe3   : > { %v2415_v61 = vsel %vm2271_vm7, %v2199_v54, %v2343_v56  ;;  %v1950_v62 = vadd.f32 %v1949_v26, %v1761_v57 }
  0xe4   : > { %2488 = vst.msk [vmem:[%s3765_s10 + $0x28] sm:$0xff] %vm2482_vm1, %v2415_v61 }
  0xe5   : > { %v2124_v0 = vmul.f32 %v3744_v17, %v1950_v62  ;;  %v1956_v19 = vpop.f32.mrf.mxu3 }
  0xe7   : > { %v2200_v6 = vadd.f32 %v3749_v22, %v2124_v0 }
  0xe8   : > { %v1762_v10 = vpop.f32.mrf.mxu2  ;;  %v1387_v15 = vpop.f32.mrf.mxu0 }
  0xe9   : > { %vm2272_vm8 = vcmp.ge.f32.partialorder %v2200_v6, 0.0  ;;  %v2344_v13 = vmul.f32 0.2, %v2200_v6  ;;  %v1763_v14 = vadd.f32 %v1762_v10, %v1574_v7  ;;  %v1576_v16 = vpop.f32.mrf.mxu1  ;;  %v3400_v7 = vld [vmem:[%s3607_s18 + $0x1cc] sm:$0xf0] }
  0xea   : > { %v1577_v25 = vadd.f32 %v1576_v16, %v1387_v15  ;;  %3316 = vmatmul.msk.bf16.gmra.mxu3 %vm1249_vm0, %v2842_v20  ;;  %v2853_v10 = vld [vmem:[%s3607_s18 + $0x1c8] sm:$0xf]  ;;  %v2871_v15 = vld [vmem:[%s3607_s18 + $0x1f8] sm:$0xf0] }
  0xeb   : > { %v2416_v21 = vsel %vm2272_vm8, %v2200_v6, %v2344_v13  ;;  %v1952_v23 = vadd.f32 %v1951_v48, %v1763_v14  ;;  %1426 = vmatmul.bf16.gmra.mxu0 %v2814_v11  ;;  %v2834_v48 = vor.u32 %v3394_v38, %v2831_v39  ;;  %v3401_v11 = vld [vmem:[%s3607_s18 + $0x1d4] sm:$0xf0]  ;;  %v3403_v14 = vld [vmem:[%s3607_s18 + $0x1ec] sm:$0xf] }
  0xec   : > { %2489 = vst.msk [vmem:[%s3765_s10 + $0x30] sm:$0xff] %vm2482_vm1, %v2416_v21  ;;  %1615 = vmatmul.bf16.gmra.mxu1 %v2818_v12 }
  0xed   : > { %v2125_v24 = vmul.f32 %v3744_v17, %v1952_v23  ;;  %1804 = vmatmul.bf16.gmra.mxu2 %v2822_v18  ;;  %v1959_v32 = vpop.f32.mrf.mxu3  ;;  %v2846_v18 = vor.u32 %v3400_v7, %v2845_v5 }
  0xef   : > { %v2201_v26 = vadd.f32 %v3749_v22, %v2125_v24 }
  0xf0   : > { %v1765_v27 = vpop.f32.mrf.mxu2  ;;  %v1389_v30 = vpop.f32.mrf.mxu0 }
  0xf1   : > { %vm2273_vm9 = vcmp.ge.f32.partialorder %v2201_v26, 0.0  ;;  %v2345_v28 = vmul.f32 0.2, %v2201_v26  ;;  %v1766_v29 = vadd.f32 %v1765_v27, %v1577_v25  ;;  %v1578_v31 = vpop.f32.mrf.mxu1  ;;  %v2854_v25 = vor.u32 %v3401_v11, %v2853_v10  ;;  %v2877_v11 = vld [vmem:[%s3607_s18 + $0x200] sm:$0xf] }
  0xf2   : > { %v1579_v43 = vadd.f32 %v1578_v31, %v1389_v30  ;;  %v2874_v27 = vor.u32 %v3403_v14, %v2871_v15  ;;  %v3406_v14 = vld [vmem:[%s3607_s18 + $0x204] sm:$0xf]  ;;  %v2879_v15 = vld [vmem:[%s3607_s18 + $0x210] sm:$0xf0] }
  0xf3   : > { %v2417_v33 = vsel %vm2273_vm9, %v2201_v26, %v2345_v28  ;;  %v1955_v34 = vadd.f32 %v1954_v60, %v1766_v29 }
  0xf4   : > { %2490 = vst.msk [vmem:[%s3765_s10 + $0x38] sm:$0xff] %vm2482_vm1, %v2417_v33 }
  0xf5   : > { %v2126_v36 = vmul.f32 %v3744_v17, %v1955_v34  ;;  %v1961_v54 = vpop.f32.mrf.mxu3 }
  0xf7   : > { %v2202_v42 = vadd.f32 %v3749_v22, %v2126_v36 }
  0xf8   : > { %v1767_v46 = vpop.f32.mrf.mxu2  ;;  %v1392_v51 = vpop.f32.mrf.mxu0 }
  0xf9   : > { %vm2274_vm10 = vcmp.ge.f32.partialorder %v2202_v42, 0.0  ;;  %v2346_v49 = vmul.f32 0.2, %v2202_v42  ;;  %v1768_v50 = vadd.f32 %v1767_v46, %v1579_v43  ;;  %v1581_v52 = vpop.f32.mrf.mxu1  ;;  %v3404_v43 = vld [vmem:[%s3607_s18 + $0x1ec] sm:$0xf0] }
  0xfa   : > { %v1582_v59 = vadd.f32 %v1581_v52, %v1392_v51  ;;  %3317 = vmatmul.msk.bf16.gmra.mxu3 %vm1249_vm0, %v2858_v55  ;;  %v2869_v46 = vld [vmem:[%s3607_s18 + $0x1e8] sm:$0xf]  ;;  %v2887_v51 = vld [vmem:[%s3607_s18 + $0x218] sm:$0xf0] }
  0xfb   : > { %v2418_v56 = vsel %vm2274_vm10, %v2202_v42, %v2346_v49  ;;  %v1957_v57 = vadd.f32 %v1956_v19, %v1768_v50  ;;  %1431 = vmatmul.bf16.gmra.mxu0 %v2830_v47  ;;  %v2850_v19 = vor.u32 %v3398_v8, %v2847_v9  ;;  %v3405_v47 = vld [vmem:[%s3607_s18 + $0x1f4] sm:$0xf0]  ;;  %v3407_v50 = vld [vmem:[%s3607_s18 + $0x20c] sm:$0xf] }
  0xfc   : > { %2491 = vst.msk [vmem:[%s3765_s10 + $0x40] sm:$0xff] %vm2482_vm1, %v2418_v56  ;;  %1620 = vmatmul.bf16.gmra.mxu1 %v2834_v48 }
  0xfd   : > { %v2127_v58 = vmul.f32 %v3744_v17, %v1957_v57  ;;  %1809 = vmatmul.bf16.gmra.mxu2 %v2838_v53  ;;  %v1964_v2 = vpop.f32.mrf.mxu3  ;;  %v2862_v53 = vor.u32 %v3404_v43, %v2861_v41 }
  0xff   : > { %v2203_v60 = vadd.f32 %v3749_v22, %v2127_v58 }
 0x100   : > { %v1770_v61 = vpop.f32.mrf.mxu2  ;;  %v1394_v0 = vpop.f32.mrf.mxu0 }
 0x101   : > { %vm2275_vm11 = vcmp.ge.f32.partialorder %v2203_v60, 0.0  ;;  %v2347_v62 = vmul.f32 0.2, %v2203_v60  ;;  %v1771_v63 = vadd.f32 %v1770_v61, %v1582_v59  ;;  %v1583_v1 = vpop.f32.mrf.mxu1  ;;  %v2870_v59 = vor.u32 %v3405_v47, %v2869_v46  ;;  %v2893_v47 = vld [vmem:[%s3607_s18 + $0x220] sm:$0xf] }
 0x102   : > { %v1584_v13 = vadd.f32 %v1583_v1, %v1394_v0  ;;  %v2890_v61 = vor.u32 %v3407_v50, %v2887_v51  ;;  %v3410_v50 = vld [vmem:[%s3607_s18 + $0x224] sm:$0xf]  ;;  %v2895_v51 = vld [vmem:[%s3607_s18 + $0x230] sm:$0xf0] }
 0x103   : > { %v2419_v3 = vsel %vm2275_vm11, %v2203_v60, %v2347_v62  ;;  %v1960_v4 = vadd.f32 %v1959_v32, %v1771_v63 }
 0x104   : > { %2492 = vst.msk [vmem:[%s3765_s10 + $0x48] sm:$0xff] %vm2482_vm1, %v2419_v3 }
 0x105   : > { %v2128_v6 = vmul.f32 %v3744_v17, %v1960_v4  ;;  %v1966_v26 = vpop.f32.mrf.mxu3 }
 0x107   : > { %v2204_v12 = vadd.f32 %v3749_v22, %v2128_v6 }
 0x108   : > { %v1772_v16 = vpop.f32.mrf.mxu2  ;;  %v1397_v23 = vpop.f32.mrf.mxu0 }
 0x109   : > { %vm2276_vm12 = vcmp.ge.f32.partialorder %v2204_v12, 0.0  ;;  %v2348_v20 = vmul.f32 0.2, %v2204_v12  ;;  %v1773_v21 = vadd.f32 %v1772_v16, %v1584_v13  ;;  %v1586_v24 = vpop.f32.mrf.mxu1  ;;  %v3408_v13 = vld [vmem:[%s3607_s18 + $0x20c] sm:$0xf0] }
 0x10a   : > { %v1587_v31 = vadd.f32 %v1586_v24, %v1397_v23  ;;  %3318 = vmatmul.msk.bf16.gmra.mxu3 %vm1249_vm0, %v2874_v27  ;;  %v2885_v16 = vld [vmem:[%s3607_s18 + $0x208] sm:$0xf]  ;;  %v2903_v23 = vld [vmem:[%s3607_s18 + $0x238] sm:$0xf0] }
 0x10b   : > { %v2420_v28 = vsel %vm2276_vm12, %v2204_v12, %v2348_v20  ;;  %v1962_v29 = vadd.f32 %v1961_v54, %v1773_v21  ;;  %1436 = vmatmul.bf16.gmra.mxu0 %v2846_v18  ;;  %v2866_v54 = vor.u32 %v3402_v44, %v2863_v45  ;;  %v3409_v18 = vld [vmem:[%s3607_s18 + $0x214] sm:$0xf0]  ;;  %v3411_v21 = vld [vmem:[%s3607_s18 + $0x22c] sm:$0xf] }
 0x10c   : > { %2493 = vst.msk [vmem:[%s3765_s10 + $0x50] sm:$0xff] %vm2482_vm1, %v2420_v28  ;;  %1625 = vmatmul.bf16.gmra.mxu1 %v2850_v19 }
 0x10d   : > { %v2129_v30 = vmul.f32 %v3744_v17, %v1962_v29  ;;  %1814 = vmatmul.bf16.gmra.mxu2 %v2854_v25  ;;  %v1969_v38 = vpop.f32.mrf.mxu3  ;;  %v2878_v25 = vor.u32 %v3408_v13, %v2877_v11 }
 0x10f   : > { %v2205_v32 = vadd.f32 %v3749_v22, %v2129_v30 }
 0x110   : > { %v1775_v33 = vpop.f32.mrf.mxu2  ;;  %v1399_v36 = vpop.f32.mrf.mxu0 }
 0x111   : > { %vm2277_vm13 = vcmp.ge.f32.partialorder %v2205_v32, 0.0  ;;  %v2349_v34 = vmul.f32 0.2, %v2205_v32  ;;  %v1776_v35 = vadd.f32 %v1775_v33, %v1587_v31  ;;  %v1588_v37 = vpop.f32.mrf.mxu1  ;;  %v2886_v31 = vor.u32 %v3409_v18, %v2885_v16  ;;  %v2909_v18 = vld [vmem:[%s3607_s18 + $0x240] sm:$0xf] }
 0x112   : > { %v1589_v49 = vadd.f32 %v1588_v37, %v1399_v36  ;;  %v2906_v33 = vor.u32 %v3411_v21, %v2903_v23  ;;  %v3414_v21 = vld [vmem:[%s3607_s18 + $0x244] sm:$0xf]  ;;  %v2911_v23 = vld [vmem:[%s3607_s18 + $0x250] sm:$0xf0] }
 0x113   : > { %v2421_v39 = vsel %vm2277_vm13, %v2205_v32, %v2349_v34  ;;  %v1965_v40 = vadd.f32 %v1964_v2, %v1776_v35 }
 0x114   : > { %2494 = vst.msk [vmem:[%s3765_s10 + $0x58] sm:$0xff] %vm2482_vm1, %v2421_v39 }
 0x115   : > { %v2130_v42 = vmul.f32 %v3744_v17, %v1965_v40  ;;  %v1971_v60 = vpop.f32.mrf.mxu3 }
 0x117   : > { %v2206_v48 = vadd.f32 %v3749_v22, %v2130_v42 }
 0x118   : > { %v1777_v52 = vpop.f32.mrf.mxu2  ;;  %v1402_v57 = vpop.f32.mrf.mxu0 }
 0x119   : > { %vm2278_vm14 = vcmp.ge.f32.partialorder %v2206_v48, 0.0  ;;  %v2350_v55 = vmul.f32 0.2, %v2206_v48  ;;  %v1778_v56 = vadd.f32 %v1777_v52, %v1589_v49  ;;  %v1591_v58 = vpop.f32.mrf.mxu1  ;;  %v3412_v49 = vld [vmem:[%s3607_s18 + $0x22c] sm:$0xf0] }
 0x11a   : > { %v1592_v1 = vadd.f32 %v1591_v58, %v1402_v57  ;;  %3319 = vmatmul.msk.bf16.gmra.mxu3 %vm1249_vm0, %v2890_v61  ;;  %v2901_v52 = vld [vmem:[%s3607_s18 + $0x228] sm:$0xf]  ;;  %v2919_v57 = vld [vmem:[%s3607_s18 + $0x258] sm:$0xf0] }
 0x11b   : > { %v2422_v62 = vsel %vm2278_vm14, %v2206_v48, %v2350_v55  ;;  %v1967_v63 = vadd.f32 %v1966_v26, %v1778_v56  ;;  %1441 = vmatmul.bf16.gmra.mxu0 %v2862_v53  ;;  %v2882_v26 = vor.u32 %v3406_v14, %v2879_v15  ;;  %v3413_v53 = vld [vmem:[%s3607_s18 + $0x234] sm:$0xf0]  ;;  %v3415_v56 = vld [vmem:[%s3607_s18 + $0x24c] sm:$0xf] }
 0x11c   : > { %2495 = vst.msk [vmem:[%s3765_s10 + $0x60] sm:$0xff] %vm2482_vm1, %v2422_v62  ;;  %1630 = vmatmul.bf16.gmra.mxu1 %v2866_v54 }
 0x11d   : > { %v2131_v0 = vmul.f32 %v3744_v17, %v1967_v63  ;;  %1819 = vmatmul.bf16.gmra.mxu2 %v2870_v59  ;;  %v1974_v8 = vpop.f32.mrf.mxu3  ;;  %v2894_v59 = vor.u32 %v3412_v49, %v2893_v47 }
 0x11f   : > { %v2207_v2 = vadd.f32 %v3749_v22, %v2131_v0 }
 0x120   : > { %v1780_v3 = vpop.f32.mrf.mxu2  ;;  %v1404_v6 = vpop.f32.mrf.mxu0 }
 0x121   : > { %vm2279_vm15 = vcmp.ge.f32.partialorder %v2207_v2, 0.0  ;;  %v2351_v4 = vmul.f32 0.2, %v2207_v2  ;;  %v1781_v5 = vadd.f32 %v1780_v3, %v1592_v1  ;;  %v1593_v7 = vpop.f32.mrf.mxu1  ;;  %v2902_v1 = vor.u32 %v3413_v53, %v2901_v52  ;;  %v2925_v53 = vld [vmem:[%s3607_s18 + $0x260] sm:$0xf] }
 0x122   : > { %v1594_v20 = vadd.f32 %v1593_v7, %v1404_v6  ;;  %v2922_v3 = vor.u32 %v3415_v56, %v2919_v57  ;;  %v3418_v56 = vld [vmem:[%s3607_s18 + $0x264] sm:$0xf]  ;;  %v2927_v57 = vld [vmem:[%s3607_s18 + $0x270] sm:$0xf0] }
 0x123   : > { %v2423_v9 = vsel %vm2279_vm15, %v2207_v2, %v2351_v4  ;;  %v1970_v10 = vadd.f32 %v1969_v38, %v1781_v5 }
 0x124   : > { %2496 = vst.msk [vmem:[%s3765_s10 + $0x68] sm:$0xff] %vm2482_vm1, %v2423_v9 }
 0x125   : > { %v2132_v12 = vmul.f32 %v3744_v17, %v1970_v10  ;;  %v1976_v32 = vpop.f32.mrf.mxu3 }
 0x127   : > { %v2208_v19 = vadd.f32 %v3749_v22, %v2132_v12 }
 0x128   : > { %v1782_v24 = vpop.f32.mrf.mxu2  ;;  %v1407_v29 = vpop.f32.mrf.mxu0 }
 0x129   : > { %vm2280_vm2 = vcmp.ge.f32.partialorder %v2208_v19, 0.0  ;;  %v2352_v27 = vmul.f32 0.2, %v2208_v19  ;;  %v1783_v28 = vadd.f32 %v1782_v24, %v1594_v20  ;;  %v1596_v30 = vpop.f32.mrf.mxu1  ;;  %v3416_v20 = vld [vmem:[%s3607_s18 + $0x24c] sm:$0xf0] }
 0x12a   : > { %v1597_v37 = vadd.f32 %v1596_v30, %v1407_v29  ;;  %3320 = vmatmul.msk.bf16.gmra.mxu3 %vm1249_vm0, %v2906_v33  ;;  %v2917_v24 = vld [vmem:[%s3607_s18 + $0x248] sm:$0xf]  ;;  %v2935_v29 = vld [vmem:[%s3607_s18 + $0x278] sm:$0xf0] }
 0x12b   : > { %v2424_v34 = vsel %vm2280_vm2, %v2208_v19, %v2352_v27  ;;  %v1972_v35 = vadd.f32 %v1971_v60, %v1783_v28  ;;  %1446 = vmatmul.bf16.gmra.mxu0 %v2878_v25  ;;  %v2898_v60 = vor.u32 %v3410_v50, %v2895_v51  ;;  %v3417_v25 = vld [vmem:[%s3607_s18 + $0x254] sm:$0xf0]  ;;  %v3419_v28 = vld [vmem:[%s3607_s18 + $0x26c] sm:$0xf] }
 0x12c   : > { %2497 = vst.msk [vmem:[%s3765_s10 + $0x70] sm:$0xff] %vm2482_vm1, %v2424_v34  ;;  %1635 = vmatmul.bf16.gmra.mxu1 %v2882_v26 }
 0x12d   : > { %v2133_v36 = vmul.f32 %v3744_v17, %v1972_v35  ;;  %1824 = vmatmul.bf16.gmra.mxu2 %v2886_v31  ;;  %v1979_v44 = vpop.f32.mrf.mxu3  ;;  %v2910_v31 = vor.u32 %v3416_v20, %v2909_v18 }
 0x12f   : > { %v2209_v38 = vadd.f32 %v3749_v22, %v2133_v36 }
 0x130   : > { %v1785_v39 = vpop.f32.mrf.mxu2  ;;  %v1409_v42 = vpop.f32.mrf.mxu0 }
 0x131   : > { %vm2281_vm3 = vcmp.ge.f32.partialorder %v2209_v38, 0.0  ;;  %v2353_v40 = vmul.f32 0.2, %v2209_v38  ;;  %v1786_v41 = vadd.f32 %v1785_v39, %v1597_v37  ;;  %v1598_v43 = vpop.f32.mrf.mxu1  ;;  %v2918_v37 = vor.u32 %v3417_v25, %v2917_v24  ;;  %v2941_v25 = vld [vmem:[%s3607_s18 + $0x280] sm:$0xf] }
 0x132   : > { %v1599_v55 = vadd.f32 %v1598_v43, %v1409_v42  ;;  %v2938_v39 = vor.u32 %v3419_v28, %v2935_v29  ;;  %v3422_v28 = vld [vmem:[%s3607_s18 + $0x284] sm:$0xf]  ;;  %v2943_v29 = vld [vmem:[%s3607_s18 + $0x290] sm:$0xf0] }
 0x133   : > { %v2425_v45 = vsel %vm2281_vm3, %v2209_v38, %v2353_v40  ;;  %v1975_v46 = vadd.f32 %v1974_v8, %v1786_v41 }
 0x134   : > { %2498 = vst.msk [vmem:[%s3765_s10 + $0x78] sm:$0xff] %vm2482_vm1, %v2425_v45 }
 0x135   : > { %v2134_v48 = vmul.f32 %v3744_v17, %v1975_v46  ;;  %v1981_v2 = vpop.f32.mrf.mxu3 }
 0x137   : > { %v2210_v54 = vadd.f32 %v3749_v22, %v2134_v48 }
 0x138   : > { %v1787_v58 = vpop.f32.mrf.mxu2  ;;  %v1412_v63 = vpop.f32.mrf.mxu0 }
 0x139   : > { %vm2282_vm4 = vcmp.ge.f32.partialorder %v2210_v54, 0.0  ;;  %v2354_v61 = vmul.f32 0.2, %v2210_v54  ;;  %v1788_v62 = vadd.f32 %v1787_v58, %v1599_v55  ;;  %v1601_v0 = vpop.f32.mrf.mxu1  ;;  %v3420_v55 = vld [vmem:[%s3607_s18 + $0x26c] sm:$0xf0] }
 0x13a   : > { %v1602_v7 = vadd.f32 %v1601_v0, %v1412_v63  ;;  %3321 = vmatmul.msk.bf16.gmra.mxu3 %vm1249_vm0, %v2922_v3  ;;  %v2933_v58 = vld [vmem:[%s3607_s18 + $0x268] sm:$0xf]  ;;  %v2951_v63 = vld [vmem:[%s3607_s18 + $0x298] sm:$0xf0] }
 0x13b   : > { %v2426_v4 = vsel %vm2282_vm4, %v2210_v54, %v2354_v61  ;;  %v1977_v5 = vadd.f32 %v1976_v32, %v1788_v62  ;;  %1451 = vmatmul.bf16.gmra.mxu0 %v2894_v59  ;;  %v2914_v32 = vor.u32 %v3414_v21, %v2911_v23  ;;  %v3421_v59 = vld [vmem:[%s3607_s18 + $0x274] sm:$0xf0]  ;;  %v3423_v62 = vld [vmem:[%s3607_s18 + $0x28c] sm:$0xf] }
 0x13c   : > { %2499 = vst.msk [vmem:[%s3765_s10 + $0x80] sm:$0xff] %vm2482_vm1, %v2426_v4  ;;  %1640 = vmatmul.bf16.gmra.mxu1 %v2898_v60 }
 0x13d   : > { %v2135_v6 = vmul.f32 %v3744_v17, %v1977_v5  ;;  %1829 = vmatmul.bf16.gmra.mxu2 %v2902_v1  ;;  %v1984_v14 = vpop.f32.mrf.mxu3  ;;  %v2926_v1 = vor.u32 %v3420_v55, %v2925_v53 }
 0x13f   : > { %v2211_v8 = vadd.f32 %v3749_v22, %v2135_v6 }
 0x140   : > { %v1790_v9 = vpop.f32.mrf.mxu2  ;;  %v1414_v12 = vpop.f32.mrf.mxu0 }
 0x141   : > { %vm2283_vm5 = vcmp.ge.f32.partialorder %v2211_v8, 0.0  ;;  %v2355_v10 = vmul.f32 0.2, %v2211_v8  ;;  %v1791_v11 = vadd.f32 %v1790_v9, %v1602_v7  ;;  %v1603_v13 = vpop.f32.mrf.mxu1  ;;  %v2934_v7 = vor.u32 %v3421_v59, %v2933_v58  ;;  %v2957_v58 = vld [vmem:[%s3607_s18 + $0x2a0] sm:$0xf] }
 0x142   : > { %v1604_v27 = vadd.f32 %v1603_v13, %v1414_v12  ;;  %v2954_v9 = vor.u32 %v3423_v62, %v2951_v63  ;;  %v2959_v62 = vld [vmem:[%s3607_s18 + $0x2b0] sm:$0xf0]  ;;  %v2965_v63 = vld [vmem:[%s3607_s18 + $0x2a8] sm:$0xf] }
 0x143   : > { %v2427_v15 = vsel %vm2283_vm5, %v2211_v8, %v2355_v10  ;;  %v1980_v16 = vadd.f32 %v1979_v44, %v1791_v11 }
 0x144   : > { %2500 = vst.msk [vmem:[%s3765_s10 + $0x88] sm:$0xff] %vm2482_vm1, %v2427_v15 }
 0x145   : > { %v2136_v19 = vmul.f32 %v3744_v17, %v1980_v16  ;;  %v1986_v38 = vpop.f32.mrf.mxu3 }
 0x147   : > { %v2212_v26 = vadd.f32 %v3749_v22, %v2136_v19 }
 0x148   : > { %v1792_v30 = vpop.f32.mrf.mxu2  ;;  %v1417_v35 = vpop.f32.mrf.mxu0 }
 0x149   : > { %vm2284_vm6 = vcmp.ge.f32.partialorder %v2212_v26, 0.0  ;;  %v2356_v33 = vmul.f32 0.2, %v2212_v26  ;;  %v1793_v34 = vadd.f32 %v1792_v30, %v1604_v27  ;;  %v1606_v36 = vpop.f32.mrf.mxu1  ;;  %v3424_v27 = vld [vmem:[%s3607_s18 + $0x28c] sm:$0xf0] }
 0x14a   : > { %v1607_v43 = vadd.f32 %v1606_v36, %v1417_v35  ;;  %3322 = vmatmul.msk.bf16.gmra.mxu3 %vm1249_vm0, %v2938_v39  ;;  %v2949_v30 = vld [vmem:[%s3607_s18 + $0x288] sm:$0xf]  ;;  %v2967_v35 = vld [vmem:[%s3607_s18 + $0x2b8] sm:$0xf0] }
 0x14b   : > { %v2428_v40 = vsel %vm2284_vm6, %v2212_v26, %v2356_v33  ;;  %v1982_v41 = vadd.f32 %v1981_v2, %v1793_v34  ;;  %1456 = vmatmul.bf16.gmra.mxu0 %v2910_v31  ;;  %v2930_v2 = vor.u32 %v3418_v56, %v2927_v57  ;;  %v3425_v31 = vld [vmem:[%s3607_s18 + $0x294] sm:$0xf0]  ;;  %v3427_v34 = vld [vmem:[%s3607_s18 + $0x2ac] sm:$0xf] }
 0x14c   : > { %2501 = vst.msk [vmem:[%s3765_s10 + $0x90] sm:$0xff] %vm2482_vm1, %v2428_v40  ;;  %1645 = vmatmul.bf16.gmra.mxu1 %v2914_v32 }
 0x14d   : > { %v2137_v42 = vmul.f32 %v3744_v17, %v1982_v41  ;;  %1834 = vmatmul.bf16.gmra.mxu2 %v2918_v37  ;;  %v1989_v50 = vpop.f32.mrf.mxu3  ;;  %v2942_v37 = vor.u32 %v3424_v27, %v2941_v25 }
 0x14f   : > { %v2213_v44 = vadd.f32 %v3749_v22, %v2137_v42 }
 0x150   : > { %v1795_v45 = vpop.f32.mrf.mxu2  ;;  %v1419_v48 = vpop.f32.mrf.mxu0 }
 0x151   : > { %vm2285_vm7 = vcmp.ge.f32.partialorder %v2213_v44, 0.0  ;;  %v2357_v46 = vmul.f32 0.2, %v2213_v44  ;;  %v1796_v47 = vadd.f32 %v1795_v45, %v1607_v43  ;;  %v1608_v49 = vpop.f32.mrf.mxu1  ;;  %v2950_v43 = vor.u32 %v3425_v31, %v2949_v30  ;;  %v2973_v31 = vld [vmem:[%s3607_s18 + $0x2c0] sm:$0xf] }
 0x152   : > { %v1609_v61 = vadd.f32 %v1608_v49, %v1419_v48  ;;  %v2970_v45 = vor.u32 %v3427_v34, %v2967_v35  ;;  %v3430_v34 = vld [vmem:[%s3607_s18 + $0x2c4] sm:$0xf]  ;;  %v2975_v35 = vld [vmem:[%s3607_s18 + $0x2d0] sm:$0xf0] }
 0x153   : > { %v2429_v51 = vsel %vm2285_vm7, %v2213_v44, %v2357_v46  ;;  %v1985_v52 = vadd.f32 %v1984_v14, %v1796_v47 }
 0x154   : > { %2502 = vst.msk [vmem:[%s3765_s10 + $0x98] sm:$0xff] %vm2482_vm1, %v2429_v51 }
 0x155   : > { %v2138_v54 = vmul.f32 %v3744_v17, %v1985_v52  ;;  %v1991_v8 = vpop.f32.mrf.mxu3 }
 0x157   : > { %v2214_v60 = vadd.f32 %v3749_v22, %v2138_v54 }
 0x158   : > { %v1797_v0 = vpop.f32.mrf.mxu2  ;;  %v1422_v5 = vpop.f32.mrf.mxu0 }
 0x159   : > { %vm2286_vm8 = vcmp.ge.f32.partialorder %v2214_v60, 0.0  ;;  %v2358_v3 = vmul.f32 0.2, %v2214_v60  ;;  %v1798_v4 = vadd.f32 %v1797_v0, %v1609_v61  ;;  %v1611_v6 = vpop.f32.mrf.mxu1  ;;  %v3426_v61 = vld [vmem:[%s3607_s18 + $0x2a4] sm:$0xf] }
 0x15a   : > { %v1612_v13 = vadd.f32 %v1611_v6, %v1422_v5  ;;  %3323 = vmatmul.msk.bf16.gmra.mxu3 %vm1249_vm0, %v2954_v9  ;;  %v3429_v0 = vld [vmem:[%s3607_s18 + $0x2b4] sm:$0xf0]  ;;  %v2983_v5 = vld [vmem:[%s3607_s18 + $0x2d8] sm:$0xf0] }
 0x15b   : > { %v2430_v10 = vsel %vm2286_vm8, %v2214_v60, %v2358_v3  ;;  %v1987_v11 = vadd.f32 %v1986_v38, %v1798_v4  ;;  %1461 = vmatmul.bf16.gmra.mxu0 %v2926_v1  ;;  %v2946_v38 = vor.u32 %v3422_v28, %v2943_v29  ;;  %v3428_v60 = vld [vmem:[%s3607_s18 + $0x2ac] sm:$0xf0]  ;;  %v3976_v1 = vld [vmem:[%s4311_s3] ss:$0 sm:$0xff]  ;;  %v3431_v4 = vld [vmem:[%s3607_s18 + $0x2cc] sm:$0xf] }
 0x15c   : > { %2503 = vst.msk [vmem:[%s3765_s10 + $0xa0] sm:$0xff] %vm2482_vm1, %v2430_v10  ;;  %1650 = vmatmul.bf16.gmra.mxu1 %v2930_v2 }
 0x15d   : > { %v2139_v12 = vmul.f32 %v3744_v17, %v1987_v11  ;;  %1839 = vmatmul.bf16.gmra.mxu2 %v2934_v7  ;;  %v1994_v21 = vpop.f32.mrf.mxu3  ;;  %v2958_v7 = vor.u32 %v3428_v60, %v2957_v58 }
 0x15f   : > { %v2215_v14 = vadd.f32 %v3749_v22, %v2139_v12 }
 0x160   : > { %v1800_v15 = vpop.f32.mrf.mxu2  ;;  %v1424_v19 = vpop.f32.mrf.mxu0 }
 0x161   : > { %vm2287_vm9 = vcmp.ge.f32.partialorder %v2215_v14, 0.0  ;;  %v2359_v16 = vmul.f32 0.2, %v2215_v14  ;;  %v1801_v18 = vadd.f32 %v1800_v15, %v1612_v13  ;;  %v1613_v20 = vpop.f32.mrf.mxu1  ;;  %v2966_v13 = vor.u32 %v3429_v0, %v2965_v63  ;;  %v2989_v0 = vld [vmem:[%s3607_s18 + $0x2e0] sm:$0xf] }
 0x162   : > { %v1614_v33 = vadd.f32 %v1613_v20, %v1424_v19  ;;  %v2986_v15 = vor.u32 %v3431_v4, %v2983_v5  ;;  %v3434_v4 = vld [vmem:[%s3607_s18 + $0x2e4] sm:$0xf]  ;;  %v2991_v5 = vld [vmem:[%s3607_s18 + $0x2f0] sm:$0xf0] }
 0x163   : > { %v2431_v23 = vsel %vm2287_vm9, %v2215_v14, %v2359_v16  ;;  %v1990_v24 = vadd.f32 %v1989_v50, %v1801_v18 }
 0x164   : > { %2504 = vst.msk [vmem:[%s3765_s10 + $0xa8] sm:$0xff] %vm2482_vm1, %v2431_v23 }
 0x165   : > { %v2140_v26 = vmul.f32 %v3744_v17, %v1990_v24  ;;  %v1996_v44 = vpop.f32.mrf.mxu3 }
 0x167   : > { %v2216_v32 = vadd.f32 %v3749_v22, %v2140_v26 }
 0x168   : > { %v1802_v36 = vpop.f32.mrf.mxu2  ;;  %v1427_v41 = vpop.f32.mrf.mxu0 }
 0x169   : > { %vm2288_vm10 = vcmp.ge.f32.partialorder %v2216_v32, 0.0  ;;  %v2360_v39 = vmul.f32 0.2, %v2216_v32  ;;  %v1803_v40 = vadd.f32 %v1802_v36, %v1614_v33  ;;  %v1616_v42 = vpop.f32.mrf.mxu1  ;;  %v3432_v33 = vld [vmem:[%s3607_s18 + $0x2cc] sm:$0xf0] }
 0x16a   : > { %v1617_v49 = vadd.f32 %v1616_v42, %v1427_v41  ;;  %3324 = vmatmul.msk.bf16.gmra.mxu3 %vm1249_vm0, %v2970_v45  ;;  %v2981_v36 = vld [vmem:[%s3607_s18 + $0x2c8] sm:$0xf]  ;;  %v2999_v41 = vld [vmem:[%s3607_s18 + $0x2f8] sm:$0xf0] }
 0x16b   : > { %v2432_v46 = vsel %vm2288_vm10, %v2216_v32, %v2360_v39  ;;  %v1992_v47 = vadd.f32 %v1991_v8, %v1803_v40  ;;  %1466 = vmatmul.bf16.gmra.mxu0 %v2942_v37  ;;  %v2962_v8 = vor.u32 %v3426_v61, %v2959_v62  ;;  %v3433_v37 = vld [vmem:[%s3607_s18 + $0x2d4] sm:$0xf0]  ;;  %v3435_v40 = vld [vmem:[%s3607_s18 + $0x2ec] sm:$0xf] }
 0x16c   : > { %2505 = vst.msk [vmem:[%s3765_s10 + $0xb0] sm:$0xff] %vm2482_vm1, %v2432_v46  ;;  %1655 = vmatmul.bf16.gmra.mxu1 %v2946_v38 }
 0x16d   : > { %v2141_v48 = vmul.f32 %v3744_v17, %v1992_v47  ;;  %1844 = vmatmul.bf16.gmra.mxu2 %v2950_v43  ;;  %v1999_v56 = vpop.f32.mrf.mxu3  ;;  %v2974_v43 = vor.u32 %v3432_v33, %v2973_v31 }
 0x16f   : > { %v2217_v50 = vadd.f32 %v3749_v22, %v2141_v48  ;;  %v3965_v22 = vld [vmem:[%s4310_s2] ss:$0 sm:$0xff] }
 0x170   : > { %v1805_v51 = vpop.f32.mrf.mxu2  ;;  %v1429_v54 = vpop.f32.mrf.mxu0 }
 0x171   : > { %vm2289_vm11 = vcmp.ge.f32.partialorder %v2217_v50, 0.0  ;;  %v2361_v52 = vmul.f32 0.2, %v2217_v50  ;;  %v1806_v53 = vadd.f32 %v1805_v51, %v1617_v49  ;;  %v1618_v55 = vpop.f32.mrf.mxu1  ;;  %v2982_v49 = vor.u32 %v3433_v37, %v2981_v36  ;;  %v3005_v37 = vld [vmem:[%s3607_s18 + $0x300] sm:$0xf] }
 0x172   : > { %v1619_v3 = vadd.f32 %v1618_v55, %v1429_v54  ;;  %v3002_v51 = vor.u32 %v3435_v40, %v2999_v41  ;;  %v3438_v40 = vld [vmem:[%s3607_s18 + $0x304] sm:$0xf]  ;;  %v3007_v41 = vld [vmem:[%s3607_s18 + $0x310] sm:$0xf0] }
 0x173   : > { %v2433_v17 = vsel %vm2289_vm11, %v2217_v50, %v2361_v52  ;;  %v1995_v57 = vadd.f32 %v1994_v21, %v1806_v53 }
 0x174   : > { %2506 = vst.msk [vmem:[%s3765_s10 + $0xb8] sm:$0xff] %vm2482_vm1, %v2433_v17 }
 0x175   : > { %v2142_v59 = vmul.f32 %v3965_v22, %v1995_v57  ;;  %v2001_v14 = vpop.f32.mrf.mxu3 }
 0x177   : > { %v2218_v2 = vadd.f32 %v3976_v1, %v2142_v59 }
 0x178   : > { %v1807_v6 = vpop.f32.mrf.mxu2  ;;  %v1432_v11 = vpop.f32.mrf.mxu0 }
 0x179   : > { %vm2290_vm12 = vcmp.ge.f32.partialorder %v2218_v2, 0.0  ;;  %v2362_v9 = vmul.f32 0.2, %v2218_v2  ;;  %v1808_v10 = vadd.f32 %v1807_v6, %v1619_v3  ;;  %v1621_v12 = vpop.f32.mrf.mxu1  ;;  %v3436_v3 = vld [vmem:[%s3607_s18 + $0x2ec] sm:$0xf0] }
 0x17a   : > { %v1622_v20 = vadd.f32 %v1621_v12, %v1432_v11  ;;  %3325 = vmatmul.msk.bf16.gmra.mxu3 %vm1249_vm0, %v2986_v15  ;;  %v2997_v6 = vld [vmem:[%s3607_s18 + $0x2e8] sm:$0xf]  ;;  %v3015_v11 = vld [vmem:[%s3607_s18 + $0x318] sm:$0xf0] }
 0x17b   : > { %v2434_v16 = vsel %vm2290_vm12, %v2218_v2, %v2362_v9  ;;  %v1997_v18 = vadd.f32 %v1996_v44, %v1808_v10  ;;  %1471 = vmatmul.bf16.gmra.mxu0 %v2958_v7  ;;  %v2978_v44 = vor.u32 %v3430_v34, %v2975_v35  ;;  %v3437_v7 = vld [vmem:[%s3607_s18 + $0x2f4] sm:$0xf0]  ;;  %v3439_v10 = vld [vmem:[%s3607_s18 + $0x30c] sm:$0xf] }
 0x17c   : > { %2507 = vst.msk [vmem:[%s3765_s10 + $0xc0] sm:$0xff] %vm2482_vm1, %v2434_v16  ;;  %1660 = vmatmul.bf16.gmra.mxu1 %v2962_v8 }
 0x17d   : > { %v2143_v19 = vmul.f32 %v3965_v22, %v1997_v18  ;;  %1849 = vmatmul.bf16.gmra.mxu2 %v2966_v13  ;;  %v2004_v28 = vpop.f32.mrf.mxu3  ;;  %v2990_v13 = vor.u32 %v3436_v3, %v2989_v0 }
 0x17f   : > { %v2219_v21 = vadd.f32 %v3976_v1, %v2143_v19 }
 0x180   : > { %v1810_v23 = vpop.f32.mrf.mxu2  ;;  %v1434_v26 = vpop.f32.mrf.mxu0 }
 0x181   : > { %vm2291_vm13 = vcmp.ge.f32.partialorder %v2219_v21, 0.0  ;;  %v2363_v24 = vmul.f32 0.2, %v2219_v21  ;;  %v1811_v25 = vadd.f32 %v1810_v23, %v1622_v20  ;;  %v1623_v27 = vpop.f32.mrf.mxu1  ;;  %v2998_v20 = vor.u32 %v3437_v7, %v2997_v6  ;;  %v3021_v7 = vld [vmem:[%s3607_s18 + $0x320] sm:$0xf] }
 0x182   : > { %v1624_v39 = vadd.f32 %v1623_v27, %v1434_v26  ;;  %v3018_v23 = vor.u32 %v3439_v10, %v3015_v11  ;;  %v3442_v10 = vld [vmem:[%s3607_s18 + $0x324] sm:$0xf]  ;;  %v3023_v11 = vld [vmem:[%s3607_s18 + $0x330] sm:$0xf0] }
 0x183   : > { %v2435_v29 = vsel %vm2291_vm13, %v2219_v21, %v2363_v24  ;;  %v2000_v30 = vadd.f32 %v1999_v56, %v1811_v25 }
 0x184   : > { %2508 = vst.msk [vmem:[%s3765_s10 + $0xc8] sm:$0xff] %vm2482_vm1, %v2435_v29 }
 0x185   : > { %v2144_v32 = vmul.f32 %v3965_v22, %v2000_v30  ;;  %v2006_v50 = vpop.f32.mrf.mxu3 }
 0x187   : > { %v2220_v38 = vadd.f32 %v3976_v1, %v2144_v32 }
 0x188   : > { %v1812_v42 = vpop.f32.mrf.mxu2  ;;  %v1437_v47 = vpop.f32.mrf.mxu0 }
 0x189   : > { %vm2292_vm14 = vcmp.ge.f32.partialorder %v2220_v38, 0.0  ;;  %v2364_v45 = vmul.f32 0.2, %v2220_v38  ;;  %v1813_v46 = vadd.f32 %v1812_v42, %v1624_v39  ;;  %v1626_v48 = vpop.f32.mrf.mxu1  ;;  %v3440_v39 = vld [vmem:[%s3607_s18 + $0x30c] sm:$0xf0] }
 0x18a   : > { %v1627_v55 = vadd.f32 %v1626_v48, %v1437_v47  ;;  %3326 = vmatmul.msk.bf16.gmra.mxu3 %vm1249_vm0, %v3002_v51  ;;  %v3013_v42 = vld [vmem:[%s3607_s18 + $0x308] sm:$0xf]  ;;  %v3031_v47 = vld [vmem:[%s3607_s18 + $0x338] sm:$0xf0] }
 0x18b   : > { %v2436_v52 = vsel %vm2292_vm14, %v2220_v38, %v2364_v45  ;;  %v2002_v53 = vadd.f32 %v2001_v14, %v1813_v46  ;;  %1476 = vmatmul.bf16.gmra.mxu0 %v2974_v43  ;;  %v2994_v14 = vor.u32 %v3434_v4, %v2991_v5  ;;  %v3441_v43 = vld [vmem:[%s3607_s18 + $0x314] sm:$0xf0]  ;;  %v3443_v46 = vld [vmem:[%s3607_s18 + $0x32c] sm:$0xf] }
 0x18c   : > { %2509 = vst.msk [vmem:[%s3765_s10 + $0xd0] sm:$0xff] %vm2482_vm1, %v2436_v52  ;;  %1665 = vmatmul.bf16.gmra.mxu1 %v2978_v44 }
 0x18d   : > { %v2145_v54 = vmul.f32 %v3965_v22, %v2002_v53  ;;  %1854 = vmatmul.bf16.gmra.mxu2 %v2982_v49  ;;  %v2009_v61 = vpop.f32.mrf.mxu3  ;;  %v3006_v49 = vor.u32 %v3440_v39, %v3005_v37 }
 0x18f   : > { %v2221_v56 = vadd.f32 %v3976_v1, %v2145_v54 }
 0x190   : > { %v1815_v17 = vpop.f32.mrf.mxu2  ;;  %v1439_v59 = vpop.f32.mrf.mxu0 }
 0x191   : > { %vm2293_vm15 = vcmp.ge.f32.partialorder %v2221_v56, 0.0  ;;  %v2365_v57 = vmul.f32 0.2, %v2221_v56  ;;  %v1816_v58 = vadd.f32 %v1815_v17, %v1627_v55  ;;  %v1628_v60 = vpop.f32.mrf.mxu1  ;;  %v3014_v55 = vor.u32 %v3441_v43, %v3013_v42  ;;  %v3037_v43 = vld [vmem:[%s3607_s18 + $0x340] sm:$0xf] }
 0x192   : > { %v1629_v9 = vadd.f32 %v1628_v60, %v1439_v59  ;;  %v3034_v17 = vor.u32 %v3443_v46, %v3031_v47  ;;  %v3446_v46 = vld [vmem:[%s3607_s18 + $0x344] sm:$0xf]  ;;  %v3039_v47 = vld [vmem:[%s3607_s18 + $0x350] sm:$0xf0] }
 0x193   : > { %v2437_v62 = vsel %vm2293_vm15, %v2221_v56, %v2365_v57  ;;  %v2005_v63 = vadd.f32 %v2004_v28, %v1816_v58 }
 0x194   : > { %2510 = vst.msk [vmem:[%s3765_s10 + $0xd8] sm:$0xff] %vm2482_vm1, %v2437_v62 }
 0x195   : > { %v2146_v2 = vmul.f32 %v3965_v22, %v2005_v63  ;;  %v2011_v21 = vpop.f32.mrf.mxu3 }
 0x197   : > { %v2222_v8 = vadd.f32 %v3976_v1, %v2146_v2 }
 0x198   : > { %v1817_v12 = vpop.f32.mrf.mxu2  ;;  %v1442_v18 = vpop.f32.mrf.mxu0 }
 0x199   : > { %vm2294_vm2 = vcmp.ge.f32.partialorder %v2222_v8, 0.0  ;;  %v2366_v15 = vmul.f32 0.2, %v2222_v8  ;;  %v1818_v16 = vadd.f32 %v1817_v12, %v1629_v9  ;;  %v1631_v19 = vpop.f32.mrf.mxu1  ;;  %v3444_v9 = vld [vmem:[%s3607_s18 + $0x32c] sm:$0xf0] }
 0x19a   : > { %v1632_v27 = vadd.f32 %v1631_v19, %v1442_v18  ;;  %3327 = vmatmul.msk.bf16.gmra.mxu3 %vm1249_vm0, %v3018_v23  ;;  %v3029_v12 = vld [vmem:[%s3607_s18 + $0x328] sm:$0xf]  ;;  %v3047_v18 = vld [vmem:[%s3607_s18 + $0x358] sm:$0xf0] }
 0x19b   : > { %v2438_v24 = vsel %vm2294_vm2, %v2222_v8, %v2366_v15  ;;  %v2007_v25 = vadd.f32 %v2006_v50, %v1818_v16  ;;  %1481 = vmatmul.bf16.gmra.mxu0 %v2990_v13  ;;  %v3010_v50 = vor.u32 %v3438_v40, %v3007_v41  ;;  %v3445_v13 = vld [vmem:[%s3607_s18 + $0x334] sm:$0xf0]  ;;  %v3447_v16 = vld [vmem:[%s3607_s18 + $0x34c] sm:$0xf] }
 0x19c   : > { %2511 = vst.msk [vmem:[%s3765_s10 + $0xe0] sm:$0xff] %vm2482_vm1, %v2438_v24  ;;  %1670 = vmatmul.bf16.gmra.mxu1 %v2994_v14 }
 0x19d   : > { %v2147_v26 = vmul.f32 %v3965_v22, %v2007_v25  ;;  %1859 = vmatmul.bf16.gmra.mxu2 %v2998_v20  ;;  %v2014_v34 = vpop.f32.mrf.mxu3  ;;  %v3022_v20 = vor.u32 %v3444_v9, %v3021_v7 }
 0x19f   : > { %v2223_v28 = vadd.f32 %v3976_v1, %v2147_v26 }
 0x1a0   : > { %v1820_v29 = vpop.f32.mrf.mxu2  ;;  %v1444_v32 = vpop.f32.mrf.mxu0 }
 0x1a1   : > { %vm2295_vm3 = vcmp.ge.f32.partialorder %v2223_v28, 0.0  ;;  %v2367_v30 = vmul.f32 0.2, %v2223_v28  ;;  %v1821_v31 = vadd.f32 %v1820_v29, %v1632_v27  ;;  %v1633_v33 = vpop.f32.mrf.mxu1  ;;  %v3030_v27 = vor.u32 %v3445_v13, %v3029_v12  ;;  %v3053_v13 = vld [vmem:[%s3607_s18 + $0x360] sm:$0xf] }
 0x1a2   : > { %v1634_v45 = vadd.f32 %v1633_v33, %v1444_v32  ;;  %v3050_v29 = vor.u32 %v3447_v16, %v3047_v18  ;;  %v3450_v16 = vld [vmem:[%s3607_s18 + $0x364] sm:$0xf]  ;;  %v3055_v18 = vld [vmem:[%s3607_s18 + $0x370] sm:$0xf0] }
 0x1a3   : > { %v2439_v35 = vsel %vm2295_vm3, %v2223_v28, %v2367_v30  ;;  %v2010_v36 = vadd.f32 %v2009_v61, %v1821_v31 }
 0x1a4   : > { %2512 = vst.msk [vmem:[%s3765_s10 + $0xe8] sm:$0xff] %vm2482_vm1, %v2439_v35 }
 0x1a5   : > { %v2148_v38 = vmul.f32 %v3965_v22, %v2010_v36  ;;  %v2016_v56 = vpop.f32.mrf.mxu3 }
 0x1a7   : > { %v2224_v44 = vadd.f32 %v3976_v1, %v2148_v38 }
 0x1a8   : > { %v1822_v48 = vpop.f32.mrf.mxu2  ;;  %v1447_v53 = vpop.f32.mrf.mxu0 }
 0x1a9   : > { %vm2296_vm4 = vcmp.ge.f32.partialorder %v2224_v44, 0.0  ;;  %v2368_v51 = vmul.f32 0.2, %v2224_v44  ;;  %v1823_v52 = vadd.f32 %v1822_v48, %v1634_v45  ;;  %v1636_v54 = vpop.f32.mrf.mxu1  ;;  %v3448_v45 = vld [vmem:[%s3607_s18 + $0x34c] sm:$0xf0] }
 0x1aa   : > { %v1637_v60 = vadd.f32 %v1636_v54, %v1447_v53  ;;  %3328 = vmatmul.msk.bf16.gmra.mxu3 %vm1249_vm0, %v3034_v17  ;;  %v3045_v48 = vld [vmem:[%s3607_s18 + $0x348] sm:$0xf]  ;;  %v3063_v53 = vld [vmem:[%s3607_s18 + $0x378] sm:$0xf0] }
 0x1ab   : > { %v2440_v57 = vsel %vm2296_vm4, %v2224_v44, %v2368_v51  ;;  %v2012_v58 = vadd.f32 %v2011_v21, %v1823_v52  ;;  %1486 = vmatmul.bf16.gmra.mxu0 %v3006_v49  ;;  %v3026_v21 = vor.u32 %v3442_v10, %v3023_v11  ;;  %v3449_v49 = vld [vmem:[%s3607_s18 + $0x354] sm:$0xf0]  ;;  %v3451_v52 = vld [vmem:[%s3607_s18 + $0x36c] sm:$0xf] }
 0x1ac   : > { %2513 = vst.msk [vmem:[%s3765_s10 + $0xf0] sm:$0xff] %vm2482_vm1, %v2440_v57  ;;  %1675 = vmatmul.bf16.gmra.mxu1 %v3010_v50 }
 0x1ad   : > { %v2149_v59 = vmul.f32 %v3965_v22, %v2012_v58  ;;  %1864 = vmatmul.bf16.gmra.mxu2 %v3014_v55  ;;  %v2019_v4 = vpop.f32.mrf.mxu3  ;;  %v3038_v55 = vor.u32 %v3448_v45, %v3037_v43 }
 0x1af   : > { %v2225_v61 = vadd.f32 %v3976_v1, %v2149_v59 }
 0x1b0   : > { %v1825_v62 = vpop.f32.mrf.mxu2  ;;  %v1449_v2 = vpop.f32.mrf.mxu0 }
 0x1b1   : > { %vm2297_vm5 = vcmp.ge.f32.partialorder %v2225_v61, 0.0  ;;  %v2369_v63 = vmul.f32 0.2, %v2225_v61  ;;  %v1826_v0 = vadd.f32 %v1825_v62, %v1637_v60  ;;  %v1638_v3 = vpop.f32.mrf.mxu1  ;;  %v3046_v60 = vor.u32 %v3449_v49, %v3045_v48  ;;  %v3069_v49 = vld [vmem:[%s3607_s18 + $0x380] sm:$0xf] }
 0x1b2   : > { %v1639_v15 = vadd.f32 %v1638_v3, %v1449_v2  ;;  %v3066_v62 = vor.u32 %v3451_v52, %v3063_v53  ;;  %v3454_v52 = vld [vmem:[%s3607_s18 + $0x384] sm:$0xf]  ;;  %v3071_v53 = vld [vmem:[%s3607_s18 + $0x390] sm:$0xf0] }
 0x1b3   : > { %v2441_v5 = vsel %vm2297_vm5, %v2225_v61, %v2369_v63  ;;  %v2015_v6 = vadd.f32 %v2014_v34, %v1826_v0 }
 0x1b4   : > { %2514 = vst.msk [vmem:[%s3765_s10 + $0xf8] sm:$0xff] %vm2482_vm1, %v2441_v5 }
 0x1b5   : > { %v2150_v8 = vmul.f32 %v3965_v22, %v2015_v6  ;;  %v2021_v28 = vpop.f32.mrf.mxu3 }
 0x1b7   : > { %v2226_v14 = vadd.f32 %v3976_v1, %v2150_v8 }
 0x1b8   : > { %v1827_v19 = vpop.f32.mrf.mxu2  ;;  %v1452_v25 = vpop.f32.mrf.mxu0 }
 0x1b9   : > { %vm2298_vm6 = vcmp.ge.f32.partialorder %v2226_v14, 0.0  ;;  %v2370_v23 = vmul.f32 0.2, %v2226_v14  ;;  %v1828_v24 = vadd.f32 %v1827_v19, %v1639_v15  ;;  %v1641_v26 = vpop.f32.mrf.mxu1  ;;  %v3452_v15 = vld [vmem:[%s3607_s18 + $0x36c] sm:$0xf0] }
 0x1ba   : > { %v1642_v33 = vadd.f32 %v1641_v26, %v1452_v25  ;;  %3329 = vmatmul.msk.bf16.gmra.mxu3 %vm1249_vm0, %v3050_v29  ;;  %v3061_v19 = vld [vmem:[%s3607_s18 + $0x368] sm:$0xf]  ;;  %v3079_v25 = vld [vmem:[%s3607_s18 + $0x398] sm:$0xf0] }
 0x1bb   : > { %v2442_v30 = vsel %vm2298_vm6, %v2226_v14, %v2370_v23  ;;  %v2017_v31 = vadd.f32 %v2016_v56, %v1828_v24  ;;  %1491 = vmatmul.bf16.gmra.mxu0 %v3022_v20  ;;  %v3042_v56 = vor.u32 %v3446_v46, %v3039_v47  ;;  %v3453_v20 = vld [vmem:[%s3607_s18 + $0x374] sm:$0xf0]  ;;  %v3455_v24 = vld [vmem:[%s3607_s18 + $0x38c] sm:$0xf] }
 0x1bc   : > { %2515 = vst.msk [vmem:[%s3765_s10 + $0x100] sm:$0xff] %vm2482_vm1, %v2442_v30  ;;  %1680 = vmatmul.bf16.gmra.mxu1 %v3026_v21 }
 0x1bd   : > { %v2151_v32 = vmul.f32 %v3965_v22, %v2017_v31  ;;  %1869 = vmatmul.bf16.gmra.mxu2 %v3030_v27  ;;  %v2024_v40 = vpop.f32.mrf.mxu3  ;;  %v3054_v27 = vor.u32 %v3452_v15, %v3053_v13 }
 0x1bf   : > { %v2227_v34 = vadd.f32 %v3976_v1, %v2151_v32 }
 0x1c0   : > { %v1830_v35 = vpop.f32.mrf.mxu2  ;;  %v1454_v38 = vpop.f32.mrf.mxu0 }
 0x1c1   : > { %vm2299_vm7 = vcmp.ge.f32.partialorder %v2227_v34, 0.0  ;;  %v2371_v36 = vmul.f32 0.2, %v2227_v34  ;;  %v1831_v37 = vadd.f32 %v1830_v35, %v1642_v33  ;;  %v1643_v39 = vpop.f32.mrf.mxu1  ;;  %v3062_v33 = vor.u32 %v3453_v20, %v3061_v19  ;;  %v3085_v20 = vld [vmem:[%s3607_s18 + $0x3a0] sm:$0xf] }
 0x1c2   : > { %v1644_v51 = vadd.f32 %v1643_v39, %v1454_v38  ;;  %v3082_v35 = vor.u32 %v3455_v24, %v3079_v25  ;;  %v3458_v24 = vld [vmem:[%s3607_s18 + $0x3a4] sm:$0xf]  ;;  %v3087_v25 = vld [vmem:[%s3607_s18 + $0x3b0] sm:$0xf0] }
 0x1c3   : > { %v2443_v41 = vsel %vm2299_vm7, %v2227_v34, %v2371_v36  ;;  %v2020_v42 = vadd.f32 %v2019_v4, %v1831_v37 }
 0x1c4   : > { %2516 = vst.msk [vmem:[%s3765_s10 + $0x108] sm:$0xff] %vm2482_vm1, %v2443_v41 }
 0x1c5   : > { %v2152_v44 = vmul.f32 %v3965_v22, %v2020_v42  ;;  %v2026_v61 = vpop.f32.mrf.mxu3 }
 0x1c7   : > { %v2228_v50 = vadd.f32 %v3976_v1, %v2152_v44 }
 0x1c8   : > { %v1832_v54 = vpop.f32.mrf.mxu2  ;;  %v1457_v58 = vpop.f32.mrf.mxu0 }
 0x1c9   : > { %vm2300_vm8 = vcmp.ge.f32.partialorder %v2228_v50, 0.0  ;;  %v2372_v17 = vmul.f32 0.2, %v2228_v50  ;;  %v1833_v57 = vadd.f32 %v1832_v54, %v1644_v51  ;;  %v1646_v59 = vpop.f32.mrf.mxu1  ;;  %v3456_v51 = vld [vmem:[%s3607_s18 + $0x38c] sm:$0xf0] }
 0x1ca   : > { %v1647_v3 = vadd.f32 %v1646_v59, %v1457_v58  ;;  %3330 = vmatmul.msk.bf16.gmra.mxu3 %vm1249_vm0, %v3066_v62  ;;  %v3077_v54 = vld [vmem:[%s3607_s18 + $0x388] sm:$0xf]  ;;  %v3095_v58 = vld [vmem:[%s3607_s18 + $0x3b8] sm:$0xf0] }
 0x1cb   : > { %v2444_v63 = vsel %vm2300_vm8, %v2228_v50, %v2372_v17  ;;  %v2022_v0 = vadd.f32 %v2021_v28, %v1833_v57  ;;  %1496 = vmatmul.bf16.gmra.mxu0 %v3038_v55  ;;  %v3058_v28 = vor.u32 %v3450_v16, %v3055_v18  ;;  %v3457_v55 = vld [vmem:[%s3607_s18 + $0x394] sm:$0xf0]  ;;  %v3459_v57 = vld [vmem:[%s3607_s18 + $0x3ac] sm:$0xf] }
 0x1cc   : > { %2517 = vst.msk [vmem:[%s3765_s10 + $0x110] sm:$0xff] %vm2482_vm1, %v2444_v63  ;;  %1685 = vmatmul.bf16.gmra.mxu1 %v3042_v56 }
 0x1cd   : > { %v2153_v2 = vmul.f32 %v3965_v22, %v2022_v0  ;;  %1874 = vmatmul.bf16.gmra.mxu2 %v3046_v60  ;;  %v2029_v10 = vpop.f32.mrf.mxu3  ;;  %v3070_v60 = vor.u32 %v3456_v51, %v3069_v49 }
 0x1cf   : > { %v2229_v4 = vadd.f32 %v3976_v1, %v2153_v2 }
 0x1d0   : > { %v1835_v5 = vpop.f32.mrf.mxu2  ;;  %v1459_v8 = vpop.f32.mrf.mxu0 }
 0x1d1   : > { %vm2301_vm9 = vcmp.ge.f32.partialorder %v2229_v4, 0.0  ;;  %v2373_v6 = vmul.f32 0.2, %v2229_v4  ;;  %v1836_v7 = vadd.f32 %v1835_v5, %v1647_v3  ;;  %v1648_v9 = vpop.f32.mrf.mxu1  ;;  %v3078_v3 = vor.u32 %v3457_v55, %v3077_v54  ;;  %v3101_v55 = vld [vmem:[%s3607_s18 + $0x3c0] sm:$0xf] }
 0x1d2   : > { %v1649_v23 = vadd.f32 %v1648_v9, %v1459_v8  ;;  %v3098_v5 = vor.u32 %v3459_v57, %v3095_v58  ;;  %v3462_v57 = vld [vmem:[%s3607_s18 + $0x3c4] sm:$0xf]  ;;  %v3103_v58 = vld [vmem:[%s3607_s18 + $0x3d0] sm:$0xf0] }
 0x1d3   : > { %v2445_v11 = vsel %vm2301_vm9, %v2229_v4, %v2373_v6  ;;  %v2025_v12 = vadd.f32 %v2024_v40, %v1836_v7 }
 0x1d4   : > { %2518 = vst.msk [vmem:[%s3765_s10 + $0x118] sm:$0xff] %vm2482_vm1, %v2445_v11 }
 0x1d5   : > { %v2154_v14 = vmul.f32 %v3965_v22, %v2025_v12  ;;  %v2031_v34 = vpop.f32.mrf.mxu3 }
 0x1d7   : > { %v2230_v21 = vadd.f32 %v3976_v1, %v2154_v14 }
 0x1d8   : > { %v1837_v26 = vpop.f32.mrf.mxu2  ;;  %v1462_v31 = vpop.f32.mrf.mxu0 }
 0x1d9   : > { %vm2302_vm10 = vcmp.ge.f32.partialorder %v2230_v21, 0.0  ;;  %v2374_v29 = vmul.f32 0.2, %v2230_v21  ;;  %v1838_v30 = vadd.f32 %v1837_v26, %v1649_v23  ;;  %v1651_v32 = vpop.f32.mrf.mxu1  ;;  %v3460_v23 = vld [vmem:[%s3607_s18 + $0x3ac] sm:$0xf0] }
 0x1da   : > { %v1652_v39 = vadd.f32 %v1651_v32, %v1462_v31  ;;  %3331 = vmatmul.msk.bf16.gmra.mxu3 %vm1249_vm0, %v3082_v35  ;;  %v3093_v26 = vld [vmem:[%s3607_s18 + $0x3a8] sm:$0xf]  ;;  %v3111_v31 = vld [vmem:[%s3607_s18 + $0x3d8] sm:$0xf0] }
 0x1db   : > { %v2446_v36 = vsel %vm2302_vm10, %v2230_v21, %v2374_v29  ;;  %v2027_v37 = vadd.f32 %v2026_v61, %v1838_v30  ;;  %1501 = vmatmul.bf16.gmra.mxu0 %v3054_v27  ;;  %v3074_v61 = vor.u32 %v3454_v52, %v3071_v53  ;;  %v3461_v27 = vld [vmem:[%s3607_s18 + $0x3b4] sm:$0xf0]  ;;  %v3463_v30 = vld [vmem:[%s3607_s18 + $0x3cc] sm:$0xf] }
 0x1dc   : > { %2519 = vst.msk [vmem:[%s3765_s10 + $0x120] sm:$0xff] %vm2482_vm1, %v2446_v36  ;;  %1690 = vmatmul.bf16.gmra.mxu1 %v3058_v28 }
 0x1dd   : > { %v2155_v38 = vmul.f32 %v3965_v22, %v2027_v37  ;;  %1879 = vmatmul.bf16.gmra.mxu2 %v3062_v33  ;;  %v2034_v46 = vpop.f32.mrf.mxu3  ;;  %v3086_v33 = vor.u32 %v3460_v23, %v3085_v20 }
 0x1df   : > { %v2231_v40 = vadd.f32 %v3976_v1, %v2155_v38 }
 0x1e0   : > { %v1840_v41 = vpop.f32.mrf.mxu2  ;;  %v1464_v44 = vpop.f32.mrf.mxu0 }
 0x1e1   : > { %vm2303_vm11 = vcmp.ge.f32.partialorder %v2231_v40, 0.0  ;;  %v2375_v42 = vmul.f32 0.2, %v2231_v40  ;;  %v1841_v43 = vadd.f32 %v1840_v41, %v1652_v39  ;;  %v1653_v45 = vpop.f32.mrf.mxu1  ;;  %v3094_v39 = vor.u32 %v3461_v27, %v3093_v26  ;;  %v3117_v27 = vld [vmem:[%s3607_s18 + $0x3e0] sm:$0xf] }
 0x1e2   : > { %v1654_v17 = vadd.f32 %v1653_v45, %v1464_v44  ;;  %v3114_v41 = vor.u32 %v3463_v30, %v3111_v31  ;;  %v3466_v30 = vld [vmem:[%s3607_s18 + $0x3e4] sm:$0xf]  ;;  %v3119_v31 = vld [vmem:[%s3607_s18 + $0x3f0] sm:$0xf0] }
 0x1e3   : > { %v2447_v47 = vsel %vm2303_vm11, %v2231_v40, %v2375_v42  ;;  %v2030_v48 = vadd.f32 %v2029_v10, %v1841_v43 }
 0x1e4   : > { %2520 = vst.msk [vmem:[%s3765_s10 + $0x128] sm:$0xff] %vm2482_vm1, %v2447_v47 }
 0x1e5   : > { %v2156_v50 = vmul.f32 %v3965_v22, %v2030_v48  ;;  %v2036_v4 = vpop.f32.mrf.mxu3 }
 0x1e7   : > { %v2232_v56 = vadd.f32 %v3976_v1, %v2156_v50 }
 0x1e8   : > { %v1842_v59 = vpop.f32.mrf.mxu2  ;;  %v1467_v0 = vpop.f32.mrf.mxu0 }
 0x1e9   : > { %vm2304_vm12 = vcmp.ge.f32.partialorder %v2232_v56, 0.0  ;;  %v2376_v62 = vmul.f32 0.2, %v2232_v56  ;;  %v1843_v63 = vadd.f32 %v1842_v59, %v1654_v17  ;;  %v1656_v2 = vpop.f32.mrf.mxu1  ;;  %v3464_v17 = vld [vmem:[%s3607_s18 + $0x3cc] sm:$0xf0] }
 0x1ea   : > { %v1657_v9 = vadd.f32 %v1656_v2, %v1467_v0  ;;  %3332 = vmatmul.msk.bf16.gmra.mxu3 %vm1249_vm0, %v3098_v5  ;;  %v3109_v59 = vld [vmem:[%s3607_s18 + $0x3c8] sm:$0xf]  ;;  %v3127_v0 = vld [vmem:[%s3607_s18 + $0x3f8] sm:$0xf0] }
 0x1eb   : > { %v2448_v6 = vsel %vm2304_vm12, %v2232_v56, %v2376_v62  ;;  %v2032_v7 = vadd.f32 %v2031_v34, %v1843_v63  ;;  %1506 = vmatmul.bf16.gmra.mxu0 %v3070_v60  ;;  %v3090_v34 = vor.u32 %v3458_v24, %v3087_v25  ;;  %v3465_v60 = vld [vmem:[%s3607_s18 + $0x3d4] sm:$0xf0]  ;;  %v3467_v63 = vld [vmem:[%s3607_s18 + $0x3ec] sm:$0xf] }
 0x1ec   : > { %2521 = vst.msk [vmem:[%s3765_s10 + $0x130] sm:$0xff] %vm2482_vm1, %v2448_v6  ;;  %1695 = vmatmul.bf16.gmra.mxu1 %v3074_v61 }
 0x1ed   : > { %v2157_v8 = vmul.f32 %v3965_v22, %v2032_v7  ;;  %1884 = vmatmul.bf16.gmra.mxu2 %v3078_v3  ;;  %v2039_v16 = vpop.f32.mrf.mxu3  ;;  %v3102_v3 = vor.u32 %v3464_v17, %v3101_v55 }
 0x1ef   : > { %v2233_v10 = vadd.f32 %v3976_v1, %v2157_v8 }
 0x1f0   : > { %v1845_v11 = vpop.f32.mrf.mxu2  ;;  %v1469_v14 = vpop.f32.mrf.mxu0 }
 0x1f1   : > { %vm2305_vm13 = vcmp.ge.f32.partialorder %v2233_v10, 0.0  ;;  %v2377_v12 = vmul.f32 0.2, %v2233_v10  ;;  %v1846_v13 = vadd.f32 %v1845_v11, %v1657_v9  ;;  %v1658_v15 = vpop.f32.mrf.mxu1  ;;  %v3110_v9 = vor.u32 %v3465_v60, %v3109_v59  ;;  %v3133_v60 = vld [vmem:[%s3607_s18 + $0x400] sm:$0xf] }
 0x1f2   : > { %v1659_v29 = vadd.f32 %v1658_v15, %v1469_v14  ;;  %v3130_v11 = vor.u32 %v3467_v63, %v3127_v0  ;;  %v3470_v63 = vld [vmem:[%s3607_s18 + $0x404] sm:$0xf]  ;;  %v3135_v0 = vld [vmem:[%s3607_s18 + $0x410] sm:$0xf0] }
 0x1f3   : > { %v2449_v18 = vsel %vm2305_vm13, %v2233_v10, %v2377_v12  ;;  %v2035_v19 = vadd.f32 %v2034_v46, %v1846_v13 }
 0x1f4   : > { %2522 = vst.msk [vmem:[%s3765_s10 + $0x138] sm:$0xff] %vm2482_vm1, %v2449_v18 }
 0x1f5   : > { %v2158_v21 = vmul.f32 %v3965_v22, %v2035_v19  ;;  %v2041_v40 = vpop.f32.mrf.mxu3 }
 0x1f7   : > { %v2234_v28 = vadd.f32 %v3976_v1, %v2158_v21 }
 0x1f8   : > { %v1847_v32 = vpop.f32.mrf.mxu2  ;;  %v1472_v37 = vpop.f32.mrf.mxu0 }
 0x1f9   : > { %vm2306_vm14 = vcmp.ge.f32.partialorder %v2234_v28, 0.0  ;;  %v2378_v35 = vmul.f32 0.2, %v2234_v28  ;;  %v1848_v36 = vadd.f32 %v1847_v32, %v1659_v29  ;;  %v1661_v38 = vpop.f32.mrf.mxu1  ;;  %v3468_v29 = vld [vmem:[%s3607_s18 + $0x3ec] sm:$0xf0] }
 0x1fa   : > { %v1662_v45 = vadd.f32 %v1661_v38, %v1472_v37  ;;  %3333 = vmatmul.msk.bf16.gmra.mxu3 %vm1249_vm0, %v3114_v41  ;;  %v3125_v32 = vld [vmem:[%s3607_s18 + $0x3e8] sm:$0xf]  ;;  %v3143_v37 = vld [vmem:[%s3607_s18 + $0x418] sm:$0xf0] }
 0x1fb   : > { %v2450_v42 = vsel %vm2306_vm14, %v2234_v28, %v2378_v35  ;;  %v2037_v43 = vadd.f32 %v2036_v4, %v1848_v36  ;;  %1511 = vmatmul.bf16.gmra.mxu0 %v3086_v33  ;;  %v3106_v4 = vor.u32 %v3462_v57, %v3103_v58  ;;  %v3469_v33 = vld [vmem:[%s3607_s18 + $0x3f4] sm:$0xf0]  ;;  %v3471_v36 = vld [vmem:[%s3607_s18 + $0x40c] sm:$0xf] }
 0x1fc   : > { %2523 = vst.msk [vmem:[%s3765_s10 + $0x140] sm:$0xff] %vm2482_vm1, %v2450_v42  ;;  %1700 = vmatmul.bf16.gmra.mxu1 %v3090_v34 }
 0x1fd   : > { %v2159_v44 = vmul.f32 %v3965_v22, %v2037_v43  ;;  %1889 = vmatmul.bf16.gmra.mxu2 %v3094_v39  ;;  %v2044_v52 = vpop.f32.mrf.mxu3  ;;  %v3118_v39 = vor.u32 %v3468_v29, %v3117_v27 }
 0x1ff   : > { %v2235_v46 = vadd.f32 %v3976_v1, %v2159_v44 }
 0x200   : > { %v1850_v47 = vpop.f32.mrf.mxu2  ;;  %v1474_v50 = vpop.f32.mrf.mxu0 }
 0x201   : > { %vm2307_vm15 = vcmp.ge.f32.partialorder %v2235_v46, 0.0  ;;  %v2379_v48 = vmul.f32 0.2, %v2235_v46  ;;  %v1851_v49 = vadd.f32 %v1850_v47, %v1662_v45  ;;  %v1663_v51 = vpop.f32.mrf.mxu1  ;;  %v3126_v45 = vor.u32 %v3469_v33, %v3125_v32  ;;  %v3149_v33 = vld [vmem:[%s3607_s18 + $0x420] sm:$0xf] }
 0x202   : > { %v1664_v62 = vadd.f32 %v1663_v51, %v1474_v50  ;;  %v3146_v47 = vor.u32 %v3471_v36, %v3143_v37  ;;  %v3474_v36 = vld [vmem:[%s3607_s18 + $0x424] sm:$0xf]  ;;  %v3151_v37 = vld [vmem:[%s3607_s18 + $0x430] sm:$0xf0] }
 0x203   : > { %v2451_v53 = vsel %vm2307_vm15, %v2235_v46, %v2379_v48  ;;  %v2040_v54 = vadd.f32 %v2039_v16, %v1851_v49 }
 0x204   : > { %2524 = vst.msk [vmem:[%s3765_s10 + $0x148] sm:$0xff] %vm2482_vm1, %v2451_v53 }
 0x205   : > { %v2160_v56 = vmul.f32 %v3965_v22, %v2040_v54  ;;  %v2046_v10 = vpop.f32.mrf.mxu3 }
 0x207   : > { %v2236_v61 = vadd.f32 %v3976_v1, %v2160_v56 }
 0x208   : > { %v1852_v2 = vpop.f32.mrf.mxu2  ;;  %v1477_v7 = vpop.f32.mrf.mxu0 }
 0x209   : > { %vm2308_vm2 = vcmp.ge.f32.partialorder %v2236_v61, 0.0  ;;  %v2380_v5 = vmul.f32 0.2, %v2236_v61  ;;  %v1853_v6 = vadd.f32 %v1852_v2, %v1664_v62  ;;  %v1666_v8 = vpop.f32.mrf.mxu1  ;;  %v3472_v62 = vld [vmem:[%s3607_s18 + $0x40c] sm:$0xf0] }
 0x20a   : > { %v1667_v15 = vadd.f32 %v1666_v8, %v1477_v7  ;;  %3334 = vmatmul.msk.bf16.gmra.mxu3 %vm1249_vm0, %v3130_v11  ;;  %v3141_v2 = vld [vmem:[%s3607_s18 + $0x408] sm:$0xf]  ;;  %v3159_v7 = vld [vmem:[%s3607_s18 + $0x438] sm:$0xf0] }
 0x20b   : > { %v2452_v12 = vsel %vm2308_vm2, %v2236_v61, %v2380_v5  ;;  %v2042_v13 = vadd.f32 %v2041_v40, %v1853_v6  ;;  %1516 = vmatmul.bf16.gmra.mxu0 %v3102_v3  ;;  %v3122_v40 = vor.u32 %v3466_v30, %v3119_v31  ;;  %v3473_v3 = vld [vmem:[%s3607_s18 + $0x414] sm:$0xf0]  ;;  %v3475_v6 = vld [vmem:[%s3607_s18 + $0x42c] sm:$0xf] }
 0x20c   : > { %2525 = vst.msk [vmem:[%s3765_s10 + $0x150] sm:$0xff] %vm2482_vm1, %v2452_v12  ;;  %1705 = vmatmul.bf16.gmra.mxu1 %v3106_v4 }
 0x20d   : > { %v2161_v14 = vmul.f32 %v3965_v22, %v2042_v13  ;;  %1894 = vmatmul.bf16.gmra.mxu2 %v3110_v9  ;;  %v2049_v24 = vpop.f32.mrf.mxu3  ;;  %v3134_v9 = vor.u32 %v3472_v62, %v3133_v60 }
 0x20f   : > { %v2237_v16 = vadd.f32 %v3976_v1, %v2161_v14 }
 0x210   : > { %v1855_v18 = vpop.f32.mrf.mxu2  ;;  %v1479_v21 = vpop.f32.mrf.mxu0 }
 0x211   : > { %vm2309_vm3 = vcmp.ge.f32.partialorder %v2237_v16, 0.0  ;;  %v2381_v19 = vmul.f32 0.2, %v2237_v16  ;;  %v1856_v20 = vadd.f32 %v1855_v18, %v1667_v15  ;;  %v1668_v23 = vpop.f32.mrf.mxu1  ;;  %v3142_v15 = vor.u32 %v3473_v3, %v3141_v2  ;;  %v3165_v3 = vld [vmem:[%s3607_s18 + $0x440] sm:$0xf] }
 0x212   : > { %v1669_v35 = vadd.f32 %v1668_v23, %v1479_v21  ;;  %v3162_v18 = vor.u32 %v3475_v6, %v3159_v7  ;;  %v3478_v6 = vld [vmem:[%s3607_s18 + $0x444] sm:$0xf]  ;;  %v3167_v7 = vld [vmem:[%s3607_s18 + $0x450] sm:$0xf0] }
 0x213   : > { %v2453_v25 = vsel %vm2309_vm3, %v2237_v16, %v2381_v19  ;;  %v2045_v26 = vadd.f32 %v2044_v52, %v1856_v20 }
 0x214   : > { %2526 = vst.msk [vmem:[%s3765_s10 + $0x158] sm:$0xff] %vm2482_vm1, %v2453_v25 }
 0x215   : > { %v2162_v28 = vmul.f32 %v3965_v22, %v2045_v26  ;;  %v2051_v46 = vpop.f32.mrf.mxu3 }
 0x217   : > { %v2238_v34 = vadd.f32 %v3976_v1, %v2162_v28 }
 0x218   : > { %v1857_v38 = vpop.f32.mrf.mxu2  ;;  %v1482_v43 = vpop.f32.mrf.mxu0 }
 0x219   : > { %vm2310_vm4 = vcmp.ge.f32.partialorder %v2238_v34, 0.0  ;;  %v2382_v41 = vmul.f32 0.2, %v2238_v34  ;;  %v1858_v42 = vadd.f32 %v1857_v38, %v1669_v35  ;;  %v1671_v44 = vpop.f32.mrf.mxu1  ;;  %v3476_v35 = vld [vmem:[%s3607_s18 + $0x42c] sm:$0xf0] }
 0x21a   : > { %v1672_v51 = vadd.f32 %v1671_v44, %v1482_v43  ;;  %3335 = vmatmul.msk.bf16.gmra.mxu3 %vm1249_vm0, %v3146_v47  ;;  %v3157_v38 = vld [vmem:[%s3607_s18 + $0x428] sm:$0xf]  ;;  %v3175_v43 = vld [vmem:[%s3607_s18 + $0x458] sm:$0xf0] }
 0x21b   : > { %v2454_v48 = vsel %vm2310_vm4, %v2238_v34, %v2382_v41  ;;  %v2047_v49 = vadd.f32 %v2046_v10, %v1858_v42  ;;  %1521 = vmatmul.bf16.gmra.mxu0 %v3118_v39  ;;  %v3138_v10 = vor.u32 %v3470_v63, %v3135_v0  ;;  %v3477_v39 = vld [vmem:[%s3607_s18 + $0x434] sm:$0xf0]  ;;  %v3479_v42 = vld [vmem:[%s3607_s18 + $0x44c] sm:$0xf] }
 0x21c   : > { %2527 = vst.msk [vmem:[%s3765_s10 + $0x160] sm:$0xff] %vm2482_vm1, %v2454_v48  ;;  %1710 = vmatmul.bf16.gmra.mxu1 %v3122_v40 }
 0x21d   : > { %v2163_v50 = vmul.f32 %v3965_v22, %v2047_v49  ;;  %1899 = vmatmul.bf16.gmra.mxu2 %v3126_v45  ;;  %v2054_v57 = vpop.f32.mrf.mxu3  ;;  %v3150_v45 = vor.u32 %v3476_v35, %v3149_v33 }
 0x21f   : > { %v2239_v52 = vadd.f32 %v3976_v1, %v2163_v50 }
 0x220   : > { %v1860_v53 = vpop.f32.mrf.mxu2  ;;  %v1484_v56 = vpop.f32.mrf.mxu0 }
 0x221   : > { %vm2311_vm5 = vcmp.ge.f32.partialorder %v2239_v52, 0.0  ;;  %v2383_v54 = vmul.f32 0.2, %v2239_v52  ;;  %v1861_v55 = vadd.f32 %v1860_v53, %v1672_v51  ;;  %v1673_v17 = vpop.f32.mrf.mxu1 }
 0x222   : > { %v1674_v5 = vadd.f32 %v1673_v17, %v1484_v56  ;;  %v4197_v17 = vld [vmem:[%s4311_s3] ss:$0 sm:$0xff] }
 0x223   : > { %v2455_v58 = vsel %vm2311_vm5, %v2239_v52, %v2383_v54  ;;  %v2050_v59 = vadd.f32 %v2049_v24, %v1861_v55  ;;  %v3178_v52 = vor.u32 %v3479_v42, %v3175_v43  ;;  %v3482_v42 = vld [vmem:[%s3607_s18 + $0x464] sm:$0xf]  ;;  %v3183_v43 = vld [vmem:[%s3607_s18 + $0x470] sm:$0xf0] }
 0x224   : > { %2528 = vst.msk [vmem:[%s3765_s10 + $0x168] sm:$0xff] %vm2482_vm1, %v2455_v58 }
 0x225   : > { %v2164_v61 = vmul.f32 %v3965_v22, %v2050_v59  ;;  %v2056_v16 = vpop.f32.mrf.mxu3 }
 0x227   : > { %v2240_v4 = vadd.f32 %v3976_v1, %v2164_v61 }
 0x228   : > { %v1862_v8 = vpop.f32.mrf.mxu2  ;;  %v1487_v13 = vpop.f32.mrf.mxu0 }
 0x229   : > { %vm2312_vm6 = vcmp.ge.f32.partialorder %v2240_v4, 0.0  ;;  %v2384_v11 = vmul.f32 0.2, %v2240_v4  ;;  %v1863_v12 = vadd.f32 %v1862_v8, %v1674_v5  ;;  %v1676_v14 = vpop.f32.mrf.mxu1  ;;  %v3480_v5 = vld [vmem:[%s3607_s18 + $0x44c] sm:$0xf0] }
 0x22a   : > { %v1677_v23 = vadd.f32 %v1676_v14, %v1487_v13  ;;  %3336 = vmatmul.msk.bf16.gmra.mxu3 %vm1249_vm0, %v3162_v18  ;;  %v3173_v8 = vld [vmem:[%s3607_s18 + $0x448] sm:$0xf]  ;;  %v3191_v13 = vld [vmem:[%s3607_s18 + $0x478] sm:$0xf0] }
 0x22b   : > { %v2456_v19 = vsel %vm2312_vm6, %v2240_v4, %v2384_v11  ;;  %v2052_v20 = vadd.f32 %v2051_v46, %v1863_v12  ;;  %1526 = vmatmul.bf16.gmra.mxu0 %v3134_v9  ;;  %v3154_v46 = vor.u32 %v3474_v36, %v3151_v37  ;;  %v3481_v9 = vld [vmem:[%s3607_s18 + $0x454] sm:$0xf0]  ;;  %v3483_v12 = vld [vmem:[%s3607_s18 + $0x46c] sm:$0xf] }
 0x22c   : > { %2529 = vst.msk [vmem:[%s3765_s10 + $0x170] sm:$0xff] %vm2482_vm1, %v2456_v19  ;;  %1715 = vmatmul.bf16.gmra.mxu1 %v3138_v10 }
 0x22d   : > { %v2165_v21 = vmul.f32 %v3965_v22, %v2052_v20  ;;  %1904 = vmatmul.bf16.gmra.mxu2 %v3142_v15  ;;  %v2059_v30 = vpop.f32.mrf.mxu3  ;;  %v3166_v15 = vor.u32 %v3480_v5, %v3165_v3 }
 0x22f   : > { %v2241_v24 = vadd.f32 %v3976_v1, %v2165_v21 }
 0x230   : > { %v1865_v25 = vpop.f32.mrf.mxu2  ;;  %v1489_v28 = vpop.f32.mrf.mxu0 }
 0x231   : > { %vm2313_vm7 = vcmp.ge.f32.partialorder %v2241_v24, 0.0  ;;  %v2385_v26 = vmul.f32 0.2, %v2241_v24  ;;  %v1866_v27 = vadd.f32 %v1865_v25, %v1677_v23  ;;  %v1678_v29 = vpop.f32.mrf.mxu1  ;;  %v3174_v23 = vor.u32 %v3481_v9, %v3173_v8 }
 0x232   : > { %v1679_v41 = vadd.f32 %v1678_v29, %v1489_v28  ;;  %v3194_v25 = vor.u32 %v3483_v12, %v3191_v13 }
 0x233   : > { %v2457_v31 = vsel %vm2313_vm7, %v2241_v24, %v2385_v26  ;;  %v2055_v32 = vadd.f32 %v2054_v57, %v1866_v27 }
 0x234   : > { %2530 = vst.msk [vmem:[%s3765_s10 + $0x178] sm:$0xff] %vm2482_vm1, %v2457_v31 }
 0x235   : > { %v2166_v34 = vmul.f32 %v3965_v22, %v2055_v32  ;;  %v3158_v22 = vor.u32 %v3477_v39, %v3157_v38  ;;  %v2061_v51 = vpop.f32.mrf.mxu3  ;;  %v3181_v39 = vld [vmem:[%s3607_s18 + $0x460] sm:$0xf] }
 0x237   : > { %v2242_v40 = vadd.f32 %v3976_v1, %v2166_v34  ;;  %v4190_v1 = vld [vmem:[%s4310_s2] ss:$0 sm:$0xff] }
 0x238   : > { %v1867_v44 = vpop.f32.mrf.mxu2  ;;  %v1492_v49 = vpop.f32.mrf.mxu0 }
 0x239   : > { %vm2314_vm8 = vcmp.ge.f32.partialorder %v2242_v40, 0.0  ;;  %v2386_v47 = vmul.f32 0.2, %v2242_v40  ;;  %v1868_v48 = vadd.f32 %v1867_v44, %v1679_v41  ;;  %v1681_v50 = vpop.f32.mrf.mxu1  ;;  %v3484_v41 = vld [vmem:[%s3607_s18 + $0x46c] sm:$0xf0] }
 0x23a   : > { %v1682_v56 = vadd.f32 %v1681_v50, %v1492_v49  ;;  %3337 = vmatmul.msk.bf16.gmra.mxu3 %vm1249_vm0, %v3178_v52  ;;  %v3189_v44 = vld [vmem:[%s3607_s18 + $0x468] sm:$0xf]  ;;  %v3182_v49 = vor.u32 %v3484_v41, %v3181_v39  ;;  %v3186_v50 = vor.u32 %v3482_v42, %v3183_v43 }
 0x23b   : > { %v2458_v53 = vsel %vm2314_vm8, %v2242_v40, %v2386_v47  ;;  %v2057_v54 = vadd.f32 %v2056_v16, %v1868_v48  ;;  %1531 = vmatmul.bf16.gmra.mxu0 %v3150_v45  ;;  %v3170_v16 = vor.u32 %v3478_v6, %v3167_v7  ;;  %v3485_v45 = vld [vmem:[%s3607_s18 + $0x474] sm:$0xf0] }
 0x23c   : > { %2531 = vst.msk [vmem:[%s3765_s10 + $0x180] sm:$0xff] %vm2482_vm1, %v2458_v53  ;;  %1720 = vmatmul.bf16.gmra.mxu1 %v3154_v46 }
 0x23d   : > { %v2167_v55 = vmul.f32 %v4190_v1, %v2057_v54  ;;  %1909 = vmatmul.bf16.gmra.mxu2 %v3158_v22  ;;  %v2064_v63 = vpop.f32.mrf.mxu3  ;;  %v3190_v54 = vor.u32 %v3485_v45, %v3189_v44 }
 0x23f   : > { %v2243_v57 = vadd.f32 %v4197_v17, %v2167_v55 }
 0x240   : > { %v1870_v58 = vpop.f32.mrf.mxu2  ;;  %v1494_v61 = vpop.f32.mrf.mxu0 }
 0x241   : > { %vm2315_vm9 = vcmp.ge.f32.partialorder %v2243_v57, 0.0  ;;  %v2387_v59 = vmul.f32 0.2, %v2243_v57  ;;  %v1871_v60 = vadd.f32 %v1870_v58, %v1682_v56  ;;  %v1683_v62 = vpop.f32.mrf.mxu1 }
 0x242   : > { %v1684_v11 = vadd.f32 %v1683_v62, %v1494_v61 }
 0x243   : > { %v2459_v0 = vsel %vm2315_vm9, %v2243_v57, %v2387_v59  ;;  %v2060_v2 = vadd.f32 %v2059_v30, %v1871_v60 }
 0x244   : > { %2532 = vst.msk [vmem:[%s3765_s10 + $0x188] sm:$0xff] %vm2482_vm1, %v2459_v0 }
 0x245   : > { %v2168_v4 = vmul.f32 %v4190_v1, %v2060_v2  ;;  %v2066_v24 = vpop.f32.mrf.mxu3 }
 0x247   : > { %v2244_v10 = vadd.f32 %v4197_v17, %v2168_v4 }
 0x248   : > { %v1872_v14 = vpop.f32.mrf.mxu2  ;;  %v1497_v20 = vpop.f32.mrf.mxu0 }
 0x249   : > { %vm2316_vm10 = vcmp.ge.f32.partialorder %v2244_v10, 0.0  ;;  %v2388_v18 = vmul.f32 0.2, %v2244_v10  ;;  %v1873_v19 = vadd.f32 %v1872_v14, %v1684_v11  ;;  %v1686_v21 = vpop.f32.mrf.mxu1 }
 0x24a   : > { %v1687_v29 = vadd.f32 %v1686_v21, %v1497_v20  ;;  %3338 = vmatmul.msk.bf16.gmra.mxu3 %vm1249_vm0, %v3194_v25 }
 0x24b   : > { %v2460_v26 = vsel %vm2316_vm10, %v2244_v10, %v2388_v18  ;;  %v2062_v27 = vadd.f32 %v2061_v51, %v1873_v19  ;;  %1536 = vmatmul.bf16.gmra.mxu0 %v3166_v15 }
 0x24c   : > { %2533 = vst.msk [vmem:[%s3765_s10 + $0x190] sm:$0xff] %vm2482_vm1, %v2460_v26  ;;  %1725 = vmatmul.bf16.gmra.mxu1 %v3170_v16 }
 0x24d   : > { %v2169_v28 = vmul.f32 %v4190_v1, %v2062_v27  ;;  %1914 = vmatmul.bf16.gmra.mxu2 %v3174_v23  ;;  %v2069_v36 = vpop.f32.mrf.mxu3 }
 0x24f   : > { %v2245_v30 = vadd.f32 %v4197_v17, %v2169_v28 }
 0x250   : > { %v1875_v31 = vpop.f32.mrf.mxu2  ;;  %v1499_v34 = vpop.f32.mrf.mxu0 }
 0x251   : > { %vm2317_vm11 = vcmp.ge.f32.partialorder %v2245_v30, 0.0  ;;  %v2389_v32 = vmul.f32 0.2, %v2245_v30  ;;  %v1876_v33 = vadd.f32 %v1875_v31, %v1687_v29  ;;  %v1688_v35 = vpop.f32.mrf.mxu1 }
 0x252   : > { %v1689_v47 = vadd.f32 %v1688_v35, %v1499_v34 }
 0x253   : > { %v2461_v37 = vsel %vm2317_vm11, %v2245_v30, %v2389_v32  ;;  %v2065_v38 = vadd.f32 %v2064_v63, %v1876_v33 }
 0x254   : > { %2534 = vst.msk [vmem:[%s3765_s10 + $0x198] sm:$0xff] %vm2482_vm1, %v2461_v37 }
 0x255   : > { %v2170_v40 = vmul.f32 %v4190_v1, %v2065_v38  ;;  %v2071_v55 = vpop.f32.mrf.mxu3 }
 0x257   : > { %v2246_v46 = vadd.f32 %v4197_v17, %v2170_v40 }
 0x258   : > { %v1877_v48 = vpop.f32.mrf.mxu2  ;;  %v1502_v52 = vpop.f32.mrf.mxu0 }
 0x259   : > { %vm2318_vm0 = vcmp.ge.f32.partialorder %v2246_v46, 0.0  ;;  %v2390_v22 = vmul.f32 0.2, %v2246_v46  ;;  %v1878_v51 = vadd.f32 %v1877_v48, %v1689_v47  ;;  %v1691_v53 = vpop.f32.mrf.mxu1 }
 0x25a   : > { %v1692_v59 = vadd.f32 %v1691_v53, %v1502_v52 }
 0x25b   : > { %v2462_v56 = vsel %vm2318_vm0, %v2246_v46, %v2390_v22  ;;  %v2067_v57 = vadd.f32 %v2066_v24, %v1878_v51  ;;  %1541 = vmatmul.bf16.gmra.mxu0 %v3182_v49 }
 0x25c   : > { %2535 = vst.msk [vmem:[%s3765_s10 + $0x1a0] sm:$0xff] %vm2482_vm1, %v2462_v56  ;;  %1730 = vmatmul.bf16.gmra.mxu1 %v3186_v50 }
 0x25d   : > { %v2171_v58 = vmul.f32 %v4190_v1, %v2067_v57  ;;  %1919 = vmatmul.bf16.gmra.mxu2 %v3190_v54  ;;  %v2074_v3 = vpop.f32.mrf.mxu3 }
 0x25f   : > { %v2247_v60 = vadd.f32 %v4197_v17, %v2171_v58 }
 0x260   : > { %v1880_v61 = vpop.f32.mrf.mxu2  ;;  %v1504_v0 = vpop.f32.mrf.mxu0 }
 0x261   : > { %vm2319_vm12 = vcmp.ge.f32.partialorder %v2247_v60, 0.0  ;;  %v2391_v62 = vmul.f32 0.2, %v2247_v60  ;;  %v1881_v63 = vadd.f32 %v1880_v61, %v1692_v59  ;;  %v1693_v2 = vpop.f32.mrf.mxu1 }
 0x262   : > { %v1694_v8 = vadd.f32 %v1693_v2, %v1504_v0 }
 0x263   : > { %v2463_v4 = vsel %vm2319_vm12, %v2247_v60, %v2391_v62  ;;  %v2070_v5 = vadd.f32 %v2069_v36, %v1881_v63 }
 0x264   : > { %2536 = vst.msk [vmem:[%s3765_s10 + $0x1a8] sm:$0xff] %vm2482_vm1, %v2463_v4 }
 0x265   : > { %v2172_v6 = vmul.f32 %v4190_v1, %v2070_v5  ;;  %v2076_v14 = vpop.f32.mrf.mxu3 }
 0x267   : > { %v2248_v7 = vadd.f32 %v4197_v17, %v2172_v6 }
 0x268   : > { %v1882_v9 = vpop.f32.mrf.mxu2  ;;  %v1507_v12 = vpop.f32.mrf.mxu0 }
 0x269   : > { %vm2320_vm13 = vcmp.ge.f32.partialorder %v2248_v7, 0.0  ;;  %v2392_v10 = vmul.f32 0.2, %v2248_v7  ;;  %v1883_v11 = vadd.f32 %v1882_v9, %v1694_v8  ;;  %v1696_v13 = vpop.f32.mrf.mxu1 }
 0x26a   : > { %v1697_v19 = vadd.f32 %v1696_v13, %v1507_v12 }
 0x26b   : > { %v2464_v15 = vsel %vm2320_vm13, %v2248_v7, %v2392_v10  ;;  %v2072_v16 = vadd.f32 %v2071_v55, %v1883_v11 }
 0x26c   : > { %2537 = vst.msk [vmem:[%s3765_s10 + $0x1b0] sm:$0xff] %vm2482_vm1, %v2464_v15 }
 0x26d   : > { %v2173_v18 = vmul.f32 %v4190_v1, %v2072_v16  ;;  %v2079_v27 = vpop.f32.mrf.mxu3 }
 0x26f   : > { %v2249_v20 = vadd.f32 %v4197_v17, %v2173_v18 }
 0x270   : > { %v1885_v21 = vpop.f32.mrf.mxu2  ;;  %v1509_v25 = vpop.f32.mrf.mxu0 }
 0x271   : > { %vm2321_vm14 = vcmp.ge.f32.partialorder %v2249_v20, 0.0  ;;  %v2393_v23 = vmul.f32 0.2, %v2249_v20  ;;  %v1886_v24 = vadd.f32 %v1885_v21, %v1697_v19  ;;  %v1698_v26 = vpop.f32.mrf.mxu1 }
 0x272   : > { %v1699_v32 = vadd.f32 %v1698_v26, %v1509_v25 }
 0x273   : > { %v2465_v28 = vsel %vm2321_vm14, %v2249_v20, %v2393_v23  ;;  %v2075_v29 = vadd.f32 %v2074_v3, %v1886_v24 }
 0x274   : > { %2538 = vst.msk [vmem:[%s3765_s10 + $0x1b8] sm:$0xff] %vm2482_vm1, %v2465_v28 }
 0x275   : > { %v2174_v30 = vmul.f32 %v4190_v1, %v2075_v29  ;;  %v2081_v38 = vpop.f32.mrf.mxu3 }
 0x277   : > { %v2250_v31 = vadd.f32 %v4197_v17, %v2174_v30 }
 0x278   : > { %v1887_v33 = vpop.f32.mrf.mxu2  ;;  %v1512_v36 = vpop.f32.mrf.mxu0 }
 0x279   : > { %vm2322_vm15 = vcmp.ge.f32.partialorder %v2250_v31, 0.0  ;;  %v2394_v34 = vmul.f32 0.2, %v2250_v31  ;;  %v1888_v35 = vadd.f32 %v1887_v33, %v1699_v32  ;;  %v1701_v37 = vpop.f32.mrf.mxu1 }
 0x27a   : > { %v1702_v42 = vadd.f32 %v1701_v37, %v1512_v36 }
 0x27b   : > { %v2466_v39 = vsel %vm2322_vm15, %v2250_v31, %v2394_v34  ;;  %v2077_v40 = vadd.f32 %v2076_v14, %v1888_v35 }
 0x27c   : > { %2539 = vst.msk [vmem:[%s3765_s10 + $0x1c0] sm:$0xff] %vm2482_vm1, %v2466_v39 }
 0x27d   : > { %v2175_v41 = vmul.f32 %v4190_v1, %v2077_v40  ;;  %v2084_v49 = vpop.f32.mrf.mxu3 }
 0x27f   : > { %v2251_v43 = vadd.f32 %v4197_v17, %v2175_v41 }
 0x280   : > { %v1890_v44 = vpop.f32.mrf.mxu2  ;;  %v1514_v47 = vpop.f32.mrf.mxu0 }
 0x281   : > { %vm2323_vm2 = vcmp.ge.f32.partialorder %v2251_v43, 0.0  ;;  %v2395_v45 = vmul.f32 0.2, %v2251_v43  ;;  %v1891_v46 = vadd.f32 %v1890_v44, %v1702_v42  ;;  %v1703_v48 = vpop.f32.mrf.mxu1 }
 0x282   : > { %v1704_v53 = vadd.f32 %v1703_v48, %v1514_v47 }
 0x283   : > { %v2467_v50 = vsel %vm2323_vm2, %v2251_v43, %v2395_v45  ;;  %v2080_v22 = vadd.f32 %v2079_v27, %v1891_v46 }
 0x284   : > { %2540 = vst.msk [vmem:[%s3765_s10 + $0x1c8] sm:$0xff] %vm2482_vm1, %v2467_v50 }
 0x285   : > { %v2176_v51 = vmul.f32 %v4190_v1, %v2080_v22  ;;  %v2086_v59 = vpop.f32.mrf.mxu3 }
 0x287   : > { %v2252_v52 = vadd.f32 %v4197_v17, %v2176_v51 }
 0x288   : > { %v1892_v54 = vpop.f32.mrf.mxu2  ;;  %v1517_v57 = vpop.f32.mrf.mxu0 }
 0x289   : > { %vm2324_vm3 = vcmp.ge.f32.partialorder %v2252_v52, 0.0  ;;  %v2396_v55 = vmul.f32 0.2, %v2252_v52  ;;  %v1893_v56 = vadd.f32 %v1892_v54, %v1704_v53  ;;  %v1706_v58 = vpop.f32.mrf.mxu1 }
 0x28a   : > { %v1707_v63 = vadd.f32 %v1706_v58, %v1517_v57 }
 0x28b   : > { %v2468_v60 = vsel %vm2324_vm3, %v2252_v52, %v2396_v55  ;;  %v2082_v61 = vadd.f32 %v2081_v38, %v1893_v56 }
 0x28c   : > { %2541 = vst.msk [vmem:[%s3765_s10 + $0x1d0] sm:$0xff] %vm2482_vm1, %v2468_v60 }
 0x28d   : > { %v2177_v62 = vmul.f32 %v4190_v1, %v2082_v61  ;;  %v2089_v7 = vpop.f32.mrf.mxu3 }
 0x28f   : > { %v2253_v0 = vadd.f32 %v4197_v17, %v2177_v62 }
 0x290   : > { %v1895_v2 = vpop.f32.mrf.mxu2  ;;  %v1519_v5 = vpop.f32.mrf.mxu0 }
 0x291   : > { %vm2325_vm4 = vcmp.ge.f32.partialorder %v2253_v0, 0.0  ;;  %v2397_v3 = vmul.f32 0.2, %v2253_v0  ;;  %v1896_v4 = vadd.f32 %v1895_v2, %v1707_v63  ;;  %v1708_v6 = vpop.f32.mrf.mxu1 }
 0x292   : > { %v1709_v12 = vadd.f32 %v1708_v6, %v1519_v5 }
 0x293   : > { %v2469_v8 = vsel %vm2325_vm4, %v2253_v0, %v2397_v3  ;;  %v2085_v9 = vadd.f32 %v2084_v49, %v1896_v4 }
 0x294   : > { %2542 = vst.msk [vmem:[%s3765_s10 + $0x1d8] sm:$0xff] %vm2482_vm1, %v2469_v8 }
 0x295   : > { %v2178_v10 = vmul.f32 %v4190_v1, %v2085_v9  ;;  %v2091_v19 = vpop.f32.mrf.mxu3 }
 0x297   : > { %v2254_v11 = vadd.f32 %v4197_v17, %v2178_v10 }
 0x298   : > { %v1897_v13 = vpop.f32.mrf.mxu2  ;;  %v1522_v16 = vpop.f32.mrf.mxu0 }
 0x299   : > { %vm2326_vm5 = vcmp.ge.f32.partialorder %v2254_v11, 0.0  ;;  %v2398_v14 = vmul.f32 0.2, %v2254_v11  ;;  %v1898_v15 = vadd.f32 %v1897_v13, %v1709_v12  ;;  %v1711_v18 = vpop.f32.mrf.mxu1 }
 0x29a   : > { %v1712_v24 = vadd.f32 %v1711_v18, %v1522_v16 }
 0x29b   : > { %v2470_v20 = vsel %vm2326_vm5, %v2254_v11, %v2398_v14  ;;  %v2087_v21 = vadd.f32 %v2086_v59, %v1898_v15 }
 0x29c   : > { %2543 = vst.msk [vmem:[%s3765_s10 + $0x1e0] sm:$0xff] %vm2482_vm1, %v2470_v20 }
 0x29d   : > { %v2179_v23 = vmul.f32 %v4190_v1, %v2087_v21  ;;  %v2094_v33 = vpop.f32.mrf.mxu3 }
 0x29f   : > { %v2255_v25 = vadd.f32 %v4197_v17, %v2179_v23 }
 0x2a0   : > { %v1900_v26 = vpop.f32.mrf.mxu2  ;;  %v1524_v29 = vpop.f32.mrf.mxu0 }
 0x2a1   : > { %vm2327_vm6 = vcmp.ge.f32.partialorder %v2255_v25, 0.0  ;;  %v2399_v27 = vmul.f32 0.2, %v2255_v25  ;;  %v1901_v28 = vadd.f32 %v1900_v26, %v1712_v24  ;;  %v1713_v30 = vpop.f32.mrf.mxu1 }
 0x2a2   : > { %v1714_v36 = vadd.f32 %v1713_v30, %v1524_v29 }
 0x2a3   : > { %v2471_v31 = vsel %vm2327_vm6, %v2255_v25, %v2399_v27  ;;  %v2090_v32 = vadd.f32 %v2089_v7, %v1901_v28 }
 0x2a4   : > { %2544 = vst.msk [vmem:[%s3765_s10 + $0x1e8] sm:$0xff] %vm2482_vm1, %v2471_v31 }
 0x2a5   : > { %v2180_v34 = vmul.f32 %v4190_v1, %v2090_v32  ;;  %v2096_v46 = vpop.f32.mrf.mxu3 }
 0x2a7   : > { %v2256_v35 = vadd.f32 %v4197_v17, %v2180_v34 }
 0x2a8   : > { %v1902_v37 = vpop.f32.mrf.mxu2  ;;  %v1527_v40 = vpop.f32.mrf.mxu0 }
 0x2a9   : > { %vm2328_vm7 = vcmp.ge.f32.partialorder %v2256_v35, 0.0  ;;  %v2400_v38 = vmul.f32 0.2, %v2256_v35  ;;  %v1903_v39 = vadd.f32 %v1902_v37, %v1714_v36  ;;  %v1716_v41 = vpop.f32.mrf.mxu1 }
 0x2aa   : > { %v1717_v45 = vadd.f32 %v1716_v41, %v1527_v40 }
 0x2ab   : > { %v2472_v42 = vsel %vm2328_vm7, %v2256_v35, %v2400_v38  ;;  %v2092_v43 = vadd.f32 %v2091_v19, %v1903_v39 }
 0x2ac   : > { %2545 = vst.msk [vmem:[%s3765_s10 + $0x1f0] sm:$0xff] %vm2482_vm1, %v2472_v42 }
 0x2ad   : > { %v2181_v44 = vmul.f32 %v4190_v1, %v2092_v43  ;;  %v2099_v58 = vpop.f32.mrf.mxu3 }
 0x2af   : > { %v2257_v47 = vadd.f32 %v4197_v17, %v2181_v44 }
 0x2b0   : > { %v1905_v48 = vpop.f32.mrf.mxu2  ;;  %v1529_v22 = vpop.f32.mrf.mxu0 }
 0x2b1   : > { %vm2329_vm8 = vcmp.ge.f32.partialorder %v2257_v47, 0.0  ;;  %v2401_v49 = vmul.f32 0.2, %v2257_v47  ;;  %v1906_v50 = vadd.f32 %v1905_v48, %v1717_v45  ;;  %v1718_v51 = vpop.f32.mrf.mxu1 }
 0x2b2   : > { %v1719_v56 = vadd.f32 %v1718_v51, %v1529_v22 }
 0x2b3   : > { %v2473_v52 = vsel %vm2329_vm8, %v2257_v47, %v2401_v49  ;;  %v2095_v53 = vadd.f32 %v2094_v33, %v1906_v50 }
 0x2b4   : > { %2546 = vst.msk [vmem:[%s3765_s10 + $0x1f8] sm:$0xff] %vm2482_vm1, %v2473_v52 }
 0x2b5   : > { %v2182_v54 = vmul.f32 %v4190_v1, %v2095_v53  ;;  %v2101_v10 = vpop.f32.mrf.mxu3 }
 0x2b7   : > { %v2258_v55 = vadd.f32 %v4197_v17, %v2182_v54 }
 0x2b8   : > { %v1907_v57 = vpop.f32.mrf.mxu2  ;;  %v1532_v61 = vpop.f32.mrf.mxu0 }
 0x2b9   : > { %vm2330_vm9 = vcmp.ge.f32.partialorder %v2258_v55, 0.0  ;;  %v2402_v59 = vmul.f32 0.2, %v2258_v55  ;;  %v1908_v60 = vadd.f32 %v1907_v57, %v1719_v56  ;;  %v1721_v62 = vpop.f32.mrf.mxu1 }
 0x2ba   : > { %v1722_v3 = vadd.f32 %v1721_v62, %v1532_v61 }
 0x2bb   : > { %v2474_v63 = vsel %vm2330_vm9, %v2258_v55, %v2402_v59  ;;  %v2097_v0 = vadd.f32 %v2096_v46, %v1908_v60 }
 0x2bc   : > { %2547 = vst.msk [vmem:[%s3765_s10 + $0x200] sm:$0xff] %vm2482_vm1, %v2474_v63 }
 0x2bd   : > { %v2183_v2 = vmul.f32 %v4190_v1, %v2097_v0  ;;  %v2104_v25 = vpop.f32.mrf.mxu3 }
 0x2bf   : > { %v2259_v4 = vadd.f32 %v4197_v17, %v2183_v2 }
 0x2c0   : > { %v1910_v5 = vpop.f32.mrf.mxu2  ;;  %v1534_v8 = vpop.f32.mrf.mxu0 }
 0x2c1   : > { %vm2331_vm10 = vcmp.ge.f32.partialorder %v2259_v4, 0.0  ;;  %v2403_v6 = vmul.f32 0.2, %v2259_v4  ;;  %v1911_v7 = vadd.f32 %v1910_v5, %v1722_v3  ;;  %v1723_v9 = vpop.f32.mrf.mxu1 }
 0x2c2   : > { %v1724_v15 = vadd.f32 %v1723_v9, %v1534_v8 }
 0x2c3   : > { %v2475_v11 = vsel %vm2331_vm10, %v2259_v4, %v2403_v6  ;;  %v2100_v12 = vadd.f32 %v2099_v58, %v1911_v7 }
 0x2c4   : > { %2548 = vst.msk [vmem:[%s3765_s10 + $0x208] sm:$0xff] %vm2482_vm1, %v2475_v11 }
 0x2c5   : > { %v2184_v13 = vmul.f32 %v4190_v1, %v2100_v12  ;;  %v2106_v37 = vpop.f32.mrf.mxu3 }
 0x2c7   : > { %v2260_v14 = vadd.f32 %v4197_v17, %v2184_v13 }
 0x2c8   : > { %v1912_v16 = vpop.f32.mrf.mxu2  ;;  %v1537_v20 = vpop.f32.mrf.mxu0 }
 0x2c9   : > { %vm2332_vm11 = vcmp.ge.f32.partialorder %v2260_v14, 0.0  ;;  %v2404_v18 = vmul.f32 0.2, %v2260_v14  ;;  %v1913_v19 = vadd.f32 %v1912_v16, %v1724_v15  ;;  %v1726_v21 = vpop.f32.mrf.mxu1 }
 0x2ca   : > { %v1727_v27 = vadd.f32 %v1726_v21, %v1537_v20 }
 0x2cb   : > { %v2476_v23 = vsel %vm2332_vm11, %v2260_v14, %v2404_v18  ;;  %v2102_v24 = vadd.f32 %v2101_v10, %v1913_v19 }
 0x2cc   : > { %2549 = vst.msk [vmem:[%s3765_s10 + $0x210] sm:$0xff] %vm2482_vm1, %v2476_v23 }
 0x2cd   : > { %v2185_v26 = vmul.f32 %v4190_v1, %v2102_v24  ;;  %v2109_v50 = vpop.f32.mrf.mxu3 }
 0x2cf   : > { %v2261_v28 = vadd.f32 %v4197_v17, %v2185_v26 }
 0x2d0   : > { %v1915_v29 = vpop.f32.mrf.mxu2  ;;  %v1539_v32 = vpop.f32.mrf.mxu0 }
 0x2d1   : > { %vm2333_vm0 = vcmp.ge.f32.partialorder %v2261_v28, 0.0  ;;  %v2405_v30 = vmul.f32 0.2, %v2261_v28  ;;  %v1916_v31 = vadd.f32 %v1915_v29, %v1727_v27  ;;  %v1728_v33 = vpop.f32.mrf.mxu1 }
 0x2d2   : > { %v1729_v39 = vadd.f32 %v1728_v33, %v1539_v32 }
 0x2d3   : > { %v2477_v34 = vsel %vm2333_vm0, %v2261_v28, %v2405_v30  ;;  %v2105_v35 = vadd.f32 %v2104_v25, %v1916_v31 }
 0x2d4   : > { %2550 = vst.msk [vmem:[%s3765_s10 + $0x218] sm:$0xff] %vm2482_vm1, %v2477_v34 }
 0x2d5   : > { %v2186_v36 = vmul.f32 %v4190_v1, %v2105_v35  ;;  %v2111_v63 = vpop.f32.mrf.mxu3 }
 0x2d7   : > { %v2262_v38 = vadd.f32 %v4197_v17, %v2186_v36 }
 0x2d8   : > { %v1917_v40 = vpop.f32.mrf.mxu2  ;;  %v1542_v43 = vpop.f32.mrf.mxu0 }
 0x2d9   : > { %vm2334_vm12 = vcmp.ge.f32.partialorder %v2262_v38, 0.0  ;;  %v2406_v41 = vmul.f32 0.2, %v2262_v38  ;;  %v1918_v42 = vadd.f32 %v1917_v40, %v1729_v39  ;;  %v1731_v44 = vpop.f32.mrf.mxu1 }
 0x2da   : > { %v1732_v48 = vadd.f32 %v1731_v44, %v1542_v43 }
 0x2db   : > { %v2478_v45 = vsel %vm2334_vm12, %v2262_v38, %v2406_v41  ;;  %v2107_v46 = vadd.f32 %v2106_v37, %v1918_v42 }
 0x2dc   : > { %2551 = vst.msk [vmem:[%s3765_s10 + $0x220] sm:$0xff] %vm2482_vm1, %v2478_v45 }
 0x2dd   : > { %v2187_v47 = vmul.f32 %v4190_v1, %v2107_v46 }
 0x2df   : > { %v2263_v49 = vadd.f32 %v4197_v17, %v2187_v47 }
 0x2e0   : > { %v1920_v22 = vpop.f32.mrf.mxu2  ;;  %v1544_v55 = vpop.f32.mrf.mxu0 }
 0x2e1   : > { %vm2335_vm13 = vcmp.ge.f32.partialorder %v2263_v49, 0.0  ;;  %v2407_v51 = vmul.f32 0.2, %v2263_v49  ;;  %v1921_v52 = vadd.f32 %v1920_v22, %v1732_v48  ;;  %v1733_v56 = vpop.f32.mrf.mxu1 }
 0x2e2   : > { %v1734_v59 = vadd.f32 %v1733_v56, %v1544_v55 }
 0x2e3   : > { %v2479_v53 = vsel %vm2335_vm13, %v2263_v49, %v2407_v51  ;;  %v2110_v54 = vadd.f32 %v2109_v50, %v1921_v52 }
 0x2e4   : > { %2552 = vst.msk [vmem:[%s3765_s10 + $0x228] sm:$0xff] %vm2482_vm1, %v2479_v53 }
 0x2e5   : > { %v2188_v57 = vmul.f32 %v4190_v1, %v2110_v54 }
 0x2e7   : > { %v2264_v58 = vadd.f32 %v4197_v17, %v2188_v57 }
 0x2e8   : > { %v1922_v60 = vpop.f32.mrf.mxu2 }
 0x2e9   : > { %vm2336_vm14 = vcmp.ge.f32.partialorder %v2264_v58, 0.0  ;;  %v2408_v61 = vmul.f32 0.2, %v2264_v58  ;;  %v1923_v62 = vadd.f32 %v1922_v60, %v1734_v59 }
 0x2eb   : > { %v2480_v0 = vsel %vm2336_vm14, %v2264_v58, %v2408_v61  ;;  %v2112_v2 = vadd.f32 %v2111_v63, %v1923_v62 }
 0x2ec   : > { %2553 = vst.msk [vmem:[%s3765_s10 + $0x230] sm:$0xff] %vm2482_vm1, %v2480_v0 }
 0x2ed   : > { %v2189_v3 = vmul.f32 %v4190_v1, %v2112_v2 }
 0x2ef   : > { %v2265_v4 = vadd.f32 %v4197_v17, %v2189_v3 }
 0x2f1   : > { %vm2337_vm15 = vcmp.ge.f32.partialorder %v2265_v4, 0.0  ;;  %v2409_v5 = vmul.f32 0.2, %v2265_v4 }
 0x2f3   : > { %v2481_v6 = vsel %vm2337_vm15, %v2265_v4, %v2409_v5 }
 0x2f4   : > { %2554 = vst.msk [vmem:[%s3765_s10 + $0x238] sm:$0xff] %vm2482_vm1, %v2481_v6 }
 0x2f5 PF: > { %s14_s15 = sadd.s32 1, %s3533_s15  }
 0x2f6   : > { %p11_p4 = scmp.ge.s32.totalorder %s14_s15, 4  }
 0x2f8   :  { %13 = sbr.rel (!%p11_p4) target bundleno = 1 (0x1), region = 66 }

// kernel: tile.73
= control target key start
LH: loop header
LB: loop body
LE: loop exit
PB: predicated region body
PF: predicated region fallthrough
CT: control target
= control target key end

     0   :  { %s22_s0 = inlined_call_operand.vmem [shape: f32[4], index: 0, kind: input, shape index: {}]   ;;  %s23_s1 = inlined_call_operand.vmem [shape: f32[8,4], index: 1, kind: output, shape index: {}]  }
   0x1   :  { %v4_v0 = vld [vmem:[%s22_s0] ss:$0 sm:$0xff] }
   0x2   :  { %5 = vst [vmem:[%s23_s1] sm:$0xff] %v4_v0 }

// kernel: tile.78
= control target key start
LH: loop header
LB: loop body
LE: loop exit
PB: predicated region body
PF: predicated region fallthrough
CT: control target
= control target key end

     0   :  { %s67_s10 = smov 28   ;;  %s68_s11 = smov 20   ;;  %vm3_vm0 = vcmask 31744   ;;  %vm9_vm1 = vcmask 261344   ;;  %vm15_vm2 = vcmask 228544   ;;  %vm21_vm3 = vcmask 195744   ;;  %s111_s0 = inlined_call_operand.vmem [shape: f32[8,4], index: 0, kind: input, shape index: {}]   ;;  %s112_s1 = inlined_call_operand.vmem [shape: f32[1,32], index: 1, kind: output, shape index: {}]  }
   0x1   :  { %v53_v0 = vld [vmem:[%s111_s0 + $0x7] sm:$0x1]   ;;  %v55_v1 = vld [vmem:[%s111_s0 + $0x5] sm:$0x1]   ;;  %v57_v2 = vld [vmem:[%s111_s0 + $0x3] sm:$0x1]  }
   0x2   :  { %7 = vrot.lane.b32.xlu0 %v53_v0, %s67_s10  ;;  %19 = vrot.lane.b32.xlu1 %v55_v1, %s68_s11  ;;  %s69_s14 = smov 12   ;;  %v54_v3 = vld [vmem:[%s111_s0 + $0x6] sm:$0x1]   ;;  %v56_v4 = vld [vmem:[%s111_s0 + $0x4] sm:$0x1]   ;;  %s70_s21 = smov 24  }
   0x3   :  { %31 = vrot.lane.b32.xlu2 %v57_v2, %s69_s14  ;;  %v58_v5 = vld [vmem:[%s111_s0 + $0x2] sm:$0x1]   ;;  %s71_s22 = smov 16   ;;  %s72_s23 = smov 8   ;;  %v59_v6 = vld [vmem:[%s111_s0 + $0x1] sm:$0x1]  }
   0x4   :  { %s73_s26 = smov 4   ;;  %v2_v7 = vld [vmem:[%s111_s0] sm:$0x1]   ;;  %vm27_vm4 = vcmask 162944   ;;  %vm33_vm5 = vcmask 130144   ;;  %vm39_vm6 = vcmask 97344  }
   0x5   :  { %4 = vst.msk [vmem:[#allocation0] sm:$0x1] %vm3_vm0, %v2_v7   ;;  %vm45_vm7 = vcmask 64544  }
   0xa   :  { %13 = vrot.lane.b32.xlu0 %v54_v3, %s70_s21  ;;  %25 = vrot.lane.b32.xlu1 %v56_v4, %s71_s22 }
   0xb   :  { %37 = vrot.lane.b32.xlu2 %v58_v5, %s72_s23 }
  0x12   :  { %43 = vrot.lane.b32.xlu0 %v59_v6, %s73_s26 }
  0x5d   :  { %v32_v8 = vpop.permute.xlu2 %31  }
  0x65   :  { %v38_v9 = vpop.permute.xlu2 %37  }
  0x74   :  { %v8_v10 = vpop.permute.xlu0 %7   ;;  %v20_v11 = vpop.permute.xlu1 %19  }
  0x75   :  { %10 = vst.msk [vmem:[#allocation0] sm:$0x1] %vm9_vm1, %v8_v10  }
  0x7c   :  { %v14_v12 = vpop.permute.xlu0 %13   ;;  %v26_v13 = vpop.permute.xlu1 %25  }
  0x7d   :  { %16 = vst.msk [vmem:[#allocation0] sm:$0x1] %vm15_vm2, %v14_v12  }
  0x7e   :  { %22 = vst.msk [vmem:[#allocation0] sm:$0x1] %vm21_vm3, %v20_v11  }
  0x7f   :  { %28 = vst.msk [vmem:[#allocation0] sm:$0x1] %vm27_vm4, %v26_v13  }
  0x80   :  { %34 = vst.msk [vmem:[#allocation0] sm:$0x1] %vm33_vm5, %v32_v8  }
  0x81   :  { %40 = vst.msk [vmem:[#allocation0] sm:$0x1] %vm39_vm6, %v38_v9  }
  0x84   :  { %v44_v14 = vpop.permute.xlu0 %43  }
  0x85   :  { %46 = vst.msk [vmem:[#allocation0] sm:$0x1] %vm45_vm7, %v44_v14  }
  0x8c   :  { %v49_v15 = vld [vmem:[#allocation0] sm:$0x1] }
  0x8d   :  { %52 = vst [vmem:[%s112_s1] sm:$0x1] %v49_v15 }

// kernel: gen_forward.7
= control target key start
LH: loop header
LB: loop body
LE: loop exit
PB: predicated region body
PF: predicated region fallthrough
CT: control target
= control target key end

     0   :  { %s4888_s18 = smov 0   ;;  %s6162_s0 = inlined_call_operand.vmem [shape: bf16[9216,216], index: 0, kind: input, shape index: {}]   ;;  %s6163_s1 = inlined_call_operand.vmem [shape: bf16[216,32], index: 1, kind: input, shape index: {}]   ;;  %s6164_s2 = inlined_call_operand.vmem [shape: f32[1,32], index: 2, kind: input, shape index: {}]   ;;  %s6165_s3 = inlined_call_operand.vmem [shape: f32[1,32], index: 3, kind: input, shape index: {}]   ;;  %s6166_s4 = inlined_call_operand.vmem [shape: f32[32,24], index: 4, kind: input, shape index: {}]   ;;  %s6167_s5 = inlined_call_operand.vmem [shape: f32[9216,24], index: 5, kind: output, shape index: {}]  }
   0x1 LB: > { %s3650_s19 = sadd.s32 4294967295, %s4856_s18   ;;  %p3654_p0 = scmp.ge.s32.totalorder %s4856_s18, 1  ;;  %s4856_s18 = sphi %s4888_s18, %s15_s18  }
   0x2   : > { %p189_p1 = scmp.lt.s32.totalorder %s4856_s18, 10 }
   0x4   : > { %p190_p2 = pnand %p3654_p0, %p189_p1 }
   0x6   : > { %193 = sbr.rel (%p190_p2) target bundleno = 1094 (0x446), region = 40 }
   0xb   : > { %v4554_v0 = vld [vmem:[%s6163_s1 + $0x38] sm:$0xff]  ;;  %v386_v1 = vld [vmem:[%s6163_s1 + $0x68] sm:$0xf]  ;;  %vm1237_vm0 = vcmask 1043456   ;;  %v4553_v3 = vld [vmem:[%s6163_s1 + $0x30] sm:$0xff]  ;;  %s3655_s26 = sshll.u32 %s3650_s19, 7 }
   0xc   : > { %v1016_v2 = vunpack.c.l.b16 %v386_v1  ;;  %1241 = vmatpush.bf16.msra.mxu0 %v4554_v0  ;;  %4560 = vmatpush.bf16.msra.mxu3 %v4554_v0  ;;  %v4559_v6 = vld [vmem:[%s6163_s1 + $0x60] sm:$0xff]  ;;  %v4552_v7 = vld [vmem:[%s6163_s1 + $0x28] sm:$0xff]  ;;  %p219_p3 = scmp.lt.s32.totalorder %s3655_s26, 1151  ;;  %v4558_v8 = vld [vmem:[%s6163_s1 + $0x58] sm:$0xff]  ;;  %vm1044_vm1 = vcmask 719872   ;;  %vm2551_vm3 = vcmask 261120  }
   0xd   : > { %v4551_v9 = vld [vmem:[%s6163_s1 + $0x20] sm:$0xff]  ;;  %v4557_v10 = vld [vmem:[%s6163_s1 + $0x50] sm:$0xff]  ;;  %v4550_v11 = vld [vmem:[%s6163_s1 + $0x18] sm:$0xff] }
   0xe   : > { %v1030_v4 = vpack.c.b16 %v1016_v2, %v1016_v2  ;;  %s6171_s26 = smov (!%p219_p3, %s3655_s26), 1151  ;;  %v4556_v12 = vld [vmem:[%s6163_s1 + $0x48] sm:$0xff]  ;;  %v4549_v13 = vld [vmem:[%s6163_s1 + $0x10] sm:$0xff]  ;;  %v4555_v14 = vld [vmem:[%s6163_s1 + $0x40] sm:$0xff] }
   0xf   : > { %s4418_s14 = sshll.u32 %s6171_s26, 3  ;;  %v4548_v15 = vld [vmem:[%s6163_s1 + $0x8] sm:$0xff]  ;;  %v4547_v19 = vld [vmem:[%s6163_s1] sm:$0xff] }
  0x10   : > { %v1239_v5 = vsel %vm1237_vm0, %v1030_v4, 0  ;;  %1242 = vmatpush.bf16.msra.mxu0 %v4553_v3  ;;  %4561 = vmatpush.bf16.msra.mxu3 %v4553_v3  ;;  %s4937_s22 = scalar_lea.vmem %s6162_s0, %s4418_s14  ;;  %s5191_s21 = scalar_lea.vmem %s6167_s5, %s4418_s14 }
  0x11   : > { %1572 = vmatpush.bf16.msra.mxu1 %v1239_v5  ;;  %v4419_v16 = vld [vmem:[%s4937_s22 + $0x4] sm:$0xf]  ;;  %v3664_v17 = vld [vmem:[%s4937_s22 + $0x8] sm:$0xf0]  ;;  %v3662_v20 = vld [vmem:[%s4937_s22] sm:$0xf] }
  0x12   : > { %v3667_v18 = vor.u32 %v4419_v16, %v3664_v17  ;;  %v4420_v21 = vld [vmem:[%s4937_s22 + $0x4] sm:$0xf0]  ;;  %v4046_v22 = vld [vmem:[%s4937_s22 + $0x300] sm:$0xf]  ;;  %v4421_v26 = vld [vmem:[%s4937_s22 + $0x14] sm:$0xf] }
  0x13   : > { %v4516_v23 = vld [vmem:[%s4937_s22 + $0x304] sm:$0xf0]  ;;  %v3663_v24 = vor.u32 %v4420_v21, %v3662_v20  ;;  %v3672_v27 = vld [vmem:[%s4937_s22 + $0x18] sm:$0xf0]  ;;  %v3670_v29 = vld [vmem:[%s4937_s22 + $0x10] sm:$0xf] }
  0x14   : > { %1243 = vmatpush.bf16.msra.mxu0 %v4552_v7  ;;  %4562 = vmatpush.bf16.msra.mxu3 %v4552_v7  ;;  %v4047_v25 = vor.u32 %v4516_v23, %v4046_v22  ;;  %v3675_v28 = vor.u32 %v4421_v26, %v3672_v27  ;;  %v4422_v30 = vld [vmem:[%s4937_s22 + $0x14] sm:$0xf0]  ;;  %v4054_v31 = vld [vmem:[%s4937_s22 + $0x310] sm:$0xf]  ;;  %v4423_v35 = vld [vmem:[%s4937_s22 + $0x24] sm:$0xf] }
  0x15   : > { %1573 = vmatpush.bf16.msra.mxu1 %v4559_v6  ;;  %v4518_v32 = vld [vmem:[%s4937_s22 + $0x314] sm:$0xf0]  ;;  %v3671_v33 = vor.u32 %v4422_v30, %v3670_v29  ;;  %v3680_v36 = vld [vmem:[%s4937_s22 + $0x28] sm:$0xf0]  ;;  %v3678_v38 = vld [vmem:[%s4937_s22 + $0x20] sm:$0xf] }
  0x16   : > { %v4055_v34 = vor.u32 %v4518_v32, %v4054_v31  ;;  %v3683_v37 = vor.u32 %v4423_v35, %v3680_v36  ;;  %v4424_v39 = vld [vmem:[%s4937_s22 + $0x24] sm:$0xf0]  ;;  %v4062_v40 = vld [vmem:[%s4937_s22 + $0x320] sm:$0xf]  ;;  %v4425_v44 = vld [vmem:[%s4937_s22 + $0x34] sm:$0xf] }
  0x17   : > { %v4520_v41 = vld [vmem:[%s4937_s22 + $0x324] sm:$0xf0]  ;;  %v3679_v42 = vor.u32 %v4424_v39, %v3678_v38  ;;  %v3688_v45 = vld [vmem:[%s4937_s22 + $0x38] sm:$0xf0]  ;;  %v3686_v47 = vld [vmem:[%s4937_s22 + $0x30] sm:$0xf] }
  0x18   : > { %1244 = vmatpush.bf16.msra.mxu0 %v4551_v9  ;;  %4563 = vmatpush.bf16.msra.mxu3 %v4551_v9  ;;  %v4063_v43 = vor.u32 %v4520_v41, %v4062_v40  ;;  %v3691_v46 = vor.u32 %v4425_v44, %v3688_v45  ;;  %v4426_v48 = vld [vmem:[%s4937_s22 + $0x34] sm:$0xf0]  ;;  %v4070_v49 = vld [vmem:[%s4937_s22 + $0x330] sm:$0xf]  ;;  %v4427_v53 = vld [vmem:[%s4937_s22 + $0x44] sm:$0xf] }
  0x19   : > { %1574 = vmatpush.bf16.msra.mxu1 %v4558_v8  ;;  %v4522_v50 = vld [vmem:[%s4937_s22 + $0x334] sm:$0xf0]  ;;  %v3687_v51 = vor.u32 %v4426_v48, %v3686_v47  ;;  %v3696_v54 = vld [vmem:[%s4937_s22 + $0x48] sm:$0xf0]  ;;  %v3694_v56 = vld [vmem:[%s4937_s22 + $0x40] sm:$0xf] }
  0x1a   : > { %v4071_v52 = vor.u32 %v4522_v50, %v4070_v49  ;;  %v3699_v55 = vor.u32 %v4427_v53, %v3696_v54  ;;  %v4428_v57 = vld [vmem:[%s4937_s22 + $0x44] sm:$0xf0]  ;;  %v4078_v58 = vld [vmem:[%s4937_s22 + $0x340] sm:$0xf]  ;;  %v4429_v62 = vld [vmem:[%s4937_s22 + $0x54] sm:$0xf] }
  0x1b   : > { %v4524_v59 = vld [vmem:[%s4937_s22 + $0x344] sm:$0xf0]  ;;  %v3695_v60 = vor.u32 %v4428_v57, %v3694_v56  ;;  %v3704_v63 = vld [vmem:[%s4937_s22 + $0x58] sm:$0xf0]  ;;  %v3702_v1 = vld [vmem:[%s4937_s22 + $0x50] sm:$0xf] }
  0x1c   : > { %1245 = vmatpush.bf16.msra.mxu0 %v4550_v11  ;;  %4564 = vmatpush.bf16.msra.mxu3 %v4550_v11  ;;  %v4079_v61 = vor.u32 %v4524_v59, %v4078_v58  ;;  %v3707_v0 = vor.u32 %v4429_v62, %v3704_v63  ;;  %v4430_v2 = vld [vmem:[%s4937_s22 + $0x54] sm:$0xf0]  ;;  %v4086_v3 = vld [vmem:[%s4937_s22 + $0x350] sm:$0xf]  ;;  %v4431_v7 = vld [vmem:[%s4937_s22 + $0x64] sm:$0xf] }
  0x1d   : > { %1575 = vmatpush.bf16.msra.mxu1 %v4557_v10  ;;  %v4526_v4 = vld [vmem:[%s4937_s22 + $0x354] sm:$0xf0]  ;;  %v4432_v11 = vld [vmem:[%s4937_s22 + $0x64] sm:$0xf0]  ;;  %v2549_v17 = vld [vmem:[%s6166_s4 + $0x10] sm:$0xff] }
  0x1e   : > { %v2550_v16 = vld [vmem:[%s6166_s4 + $0x18] sm:$0xff]  ;;  %v2547_v21 = vld [vmem:[%s6166_s4] sm:$0xff]  ;;  %v3718_v23 = vld [vmem:[%s4937_s22 + $0x70] sm:$0xf] }
  0x1f   : > { %2948 = vmatpush.msra.mxu2 %v2550_v16  ;;  %v3720_v20 = vld [vmem:[%s4937_s22 + $0x78] sm:$0xf0]  ;;  %v4530_v26 = vld [vmem:[%s4937_s22 + $0x374] sm:$0xf0]  ;;  %v4435_v29 = vld [vmem:[%s4937_s22 + $0x84] sm:$0xf] }
  0x20   : > { %1246 = vmatpush.bf16.msra.mxu0 %v4549_v13  ;;  %4565 = vmatpush.bf16.msra.mxu3 %v4549_v13  ;;  %v4528_v13 = vld [vmem:[%s4937_s22 + $0x364] sm:$0xf0]  ;;  %v3728_v30 = vld [vmem:[%s4937_s22 + $0x88] sm:$0xf0]  ;;  %v4110_v35 = vld [vmem:[%s4937_s22 + $0x380] sm:$0xf] }
  0x21   : > { %1576 = vmatpush.bf16.msra.mxu1 %v4556_v12  ;;  %2949 = vmatpush.msra.mxu2 %v2549_v17  ;;  %v3731_v31 = vor.u32 %v4435_v29, %v3728_v30  ;;  %v4532_v36 = vld [vmem:[%s4937_s22 + $0x384] sm:$0xf0]  ;;  %v4437_v49 = vld [vmem:[%s4937_s22 + $0x94] sm:$0xf]  ;;  %v3736_v50 = vld [vmem:[%s4937_s22 + $0x98] sm:$0xf0] }
  0x22   : > { %v4111_v40 = vor.u32 %v4532_v36, %v4110_v35  ;;  %v3739_v54 = vor.u32 %v4437_v49, %v3736_v50  ;;  %v3734_v56 = vld [vmem:[%s4937_s22 + $0x90] sm:$0xf]  ;;  %v4438_v57 = vld [vmem:[%s4937_s22 + $0x94] sm:$0xf0]  ;;  %v4441_v35 = vld [vmem:[%s4937_s22 + $0xb4] sm:$0xf] }
  0x23   : > { %v4118_v59 = vld [vmem:[%s4937_s22 + $0x390] sm:$0xf]  ;;  %v3735_v63 = vor.u32 %v4438_v57, %v3734_v56  ;;  %v3752_v36 = vld [vmem:[%s4937_s22 + $0xb8] sm:$0xf0]  ;;  %v4538_v49 = vld [vmem:[%s4937_s22 + $0x3b4] sm:$0xf0] }
  0x24   : > { %1247 = vmatpush.bf16.msra.mxu0 %v4548_v15  ;;  %4566 = vmatpush.bf16.msra.mxu3 %v4548_v15 }
  0x25   : > { %1577 = vmatpush.bf16.msra.mxu1 %v4555_v14 }
  0x28   : > { %4224 = vmatmul.msk.bf16.vlgmr.msra.gmra.mxu1 %vm1044_vm1, %v3667_v18  ;;  %1248 = vmatpush.bf16.msra.mxu0 %v4547_v19  ;;  %v2548_v18 = vld [vmem:[%s6166_s4 + $0x8] sm:$0xff] }
  0x29   : > { %4567 = vmatpush.bf16.msra.mxu3 %v4547_v19  ;;  %v4433_v19 = vld [vmem:[%s4937_s22 + $0x74] sm:$0xf]  ;;  %2950 = vmatpush.msra.mxu2 %v2548_v18 }
  0x2a   : > { %v3723_v22 = vor.u32 %v4433_v19, %v3720_v20  ;;  %v4126_v20 = vld [vmem:[%s4937_s22 + $0x3a0] sm:$0xf] }
  0x2b   : > { %1249 = vmatmul.bf16.vlgmr.msra.gmra.mxu0 %v3663_v24  ;;  %2951 = vmatpush.msra.mxu2 %v2547_v21  ;;  %v4434_v24 = vld [vmem:[%s4937_s22 + $0x74] sm:$0xf0] }
  0x2c   : > { %1489 = vmatmul.bf16.vlgmr.msra.gmra.mxu3 %v4047_v25  ;;  %v4102_v25 = vld [vmem:[%s4937_s22 + $0x370] sm:$0xf]  ;;  %v3719_v27 = vor.u32 %v4434_v24, %v3718_v23 }
  0x2d   : > { %4568 = vmatpush.bf16.msrb.mxu3 %v1239_v5  ;;  %v3703_v5 = vor.u32 %v4430_v2, %v3702_v1 }
  0x31   : > { %4569 = vmatpush.bf16.msrb.mxu3 %v4559_v6  ;;  %v4087_v6 = vor.u32 %v4526_v4, %v4086_v3 }
  0x35   : > { %4570 = vmatpush.bf16.msrb.mxu3 %v4558_v8  ;;  %v3712_v8 = vld [vmem:[%s4937_s22 + $0x68] sm:$0xf0] }
  0x36   : > { %v3715_v9 = vor.u32 %v4431_v7, %v3712_v8 }
  0x38   : > { %4225 = vmatmul.msk.bf16.gmra.mxu1 %vm1044_vm1, %v3675_v28  ;;  %v4103_v28 = vor.u32 %v4530_v26, %v4102_v25 }
  0x39   : > { %4571 = vmatpush.bf16.msrb.mxu3 %v4557_v10  ;;  %v3710_v10 = vld [vmem:[%s4937_s22 + $0x60] sm:$0xf] }
  0x3b   : > { %1254 = vmatmul.bf16.gmra.mxu0 %v3671_v33  ;;  %v3726_v33 = vld [vmem:[%s4937_s22 + $0x80] sm:$0xf] }
  0x3c   : > { %1494 = vmatmul.bf16.gmra.mxu3 %v4055_v34  ;;  %v4436_v34 = vld [vmem:[%s4937_s22 + $0x84] sm:$0xf0] }
  0x3d   : > { %4572 = vmatpush.bf16.msrb.mxu3 %v4556_v12  ;;  %v4094_v12 = vld [vmem:[%s4937_s22 + $0x360] sm:$0xf]  ;;  %v3727_v38 = vor.u32 %v4436_v34, %v3726_v33 }
  0x3e   : > { %v4095_v15 = vor.u32 %v4528_v13, %v4094_v12 }
  0x41   : > { %4573 = vmatpush.bf16.msrb.mxu3 %v4555_v14  ;;  %v3711_v14 = vor.u32 %v4432_v11, %v3710_v10  ;;  %v4439_v10 = vld [vmem:[%s4937_s22 + $0xa4] sm:$0xf]  ;;  %v3744_v11 = vld [vmem:[%s4937_s22 + $0xa8] sm:$0xf0] }
  0x45   : > { %4574 = vmatpush.msra.mxu3 %v2550_v16 }
  0x47   : > { %4575 = vmatpush.msra.mxu3 %v2549_v17  ;;  %v3742_v17 = vld [vmem:[%s4937_s22 + $0xa0] sm:$0xf] }
  0x48   : > { %4226 = vmatmul.msk.bf16.gmra.mxu1 %vm1044_vm1, %v3683_v37  ;;  %v5026_v37 = vld [vmem:[%s6164_s2] ss:$0 sm:$0xff] }
  0x49   : > { %4576 = vmatpush.msra.mxu3 %v2548_v18  ;;  %v4440_v18 = vld [vmem:[%s4937_s22 + $0xa4] sm:$0xf0] }
  0x4a   : > { %v3743_v24 = vor.u32 %v4440_v18, %v3742_v17 }
  0x4b   : > { %1259 = vmatmul.bf16.gmra.mxu0 %v3679_v42  ;;  %4577 = vmatpush.msra.mxu3 %v2547_v21  ;;  %v5031_v42 = vld [vmem:[%s6165_s3] ss:$0 sm:$0xff]  ;;  %v4536_v21 = vld [vmem:[%s4937_s22 + $0x3a4] sm:$0xf0] }
  0x4c   : > { %1499 = vmatmul.bf16.gmra.mxu3 %v4063_v43  ;;  %v4127_v26 = vor.u32 %v4536_v21, %v4126_v20 }
  0x58   : > { %4227 = vmatmul.msk.bf16.gmra.mxu1 %vm1044_vm1, %v3691_v46 }
  0x5b   : > { %1264 = vmatmul.bf16.gmra.mxu0 %v3687_v51 }
  0x5c   : > { %1504 = vmatmul.bf16.gmra.mxu3 %v4071_v52 }
  0x68   : > { %4228 = vmatmul.msk.bf16.gmra.mxu1 %vm1044_vm1, %v3699_v55 }
  0x6b   : > { %1269 = vmatmul.bf16.gmra.mxu0 %v3695_v60  ;;  %v4534_v60 = vld [vmem:[%s4937_s22 + $0x394] sm:$0xf0] }
  0x6c   : > { %1509 = vmatmul.bf16.gmra.mxu3 %v4079_v61  ;;  %v4119_v1 = vor.u32 %v4534_v60, %v4118_v59 }
  0x78   : > { %4229 = vmatmul.msk.bf16.gmra.mxu1 %vm1044_vm1, %v3707_v0 }
  0x7b   : > { %1274 = vmatmul.bf16.gmra.mxu0 %v3703_v5 }
  0x7c   : > { %1514 = vmatmul.bf16.gmra.mxu3 %v4087_v6 }
  0x88   : > { %4230 = vmatmul.msk.bf16.gmra.mxu1 %vm1044_vm1, %v3715_v9 }
  0x8b   : > { %1279 = vmatmul.bf16.gmra.mxu0 %v3711_v14 }
  0x8c   : > { %1519 = vmatmul.bf16.gmra.mxu3 %v4095_v15  ;;  %v3747_v15 = vor.u32 %v4439_v10, %v3744_v11  ;;  %v4142_v11 = vld [vmem:[%s4937_s22 + $0x3c0] sm:$0xf] }
  0x98   : > { %4231 = vmatmul.msk.bf16.gmra.mxu1 %vm1044_vm1, %v3723_v22 }
  0x9b   : > { %1284 = vmatmul.bf16.gmra.mxu0 %v3719_v27 }
  0x9c   : > { %1524 = vmatmul.bf16.gmra.mxu3 %v4103_v28 }
  0xa5   : > { %v1579_v32 = vpop.f32.mrf.mxu1 }
  0xa8   : > { %4232 = vmatmul.msk.bf16.gmra.mxu1 %vm1044_vm1, %v3731_v31  ;;  %v1250_v39 = vpop.f32.mrf.mxu0 }
  0xa9   : > { %v1580_v41 = vadd.f32 %v1579_v32, %v1250_v39 }
  0xab   : > { %v1903_v43 = vmul.f32 %v5026_v37, %v1580_v41  ;;  %1289 = vmatmul.bf16.gmra.mxu0 %v3727_v38  ;;  %v3755_v41 = vor.u32 %v4441_v35, %v3752_v36  ;;  %v3766_v35 = vld [vmem:[%s4937_s22 + $0xd0] sm:$0xf]  ;;  %v4446_v36 = vld [vmem:[%s4937_s22 + $0xd4] sm:$0xf0] }
  0xac   : > { %1529 = vmatmul.bf16.gmra.mxu3 %v4111_v40 }
  0xad   : > { %v1581_v44 = vpop.f32.mrf.mxu1  ;;  %v2035_v45 = vadd.f32 %v5031_v42, %v1903_v43 }
  0xaf   : > { %v5035_v46 = vpop.f32.mrf.mxu3  ;;  %vm2163_vm2 = vcmp.ge.f32.partialorder %v2035_v45, 0.0  ;;  %v2291_v47 = vmul.f32 0.2, %v2035_v45 }
  0xb0   : > { %v1252_v48 = vpop.f32.mrf.mxu0 }
  0xb1   : > { %v1582_v51 = vadd.f32 %v1581_v44, %v1252_v48  ;;  %v2419_v52 = vsel %vm2163_vm2, %v2035_v45, %v2291_v47  ;;  %v3750_v44 = vld [vmem:[%s4937_s22 + $0xb0] sm:$0xf]  ;;  %v4442_v45 = vld [vmem:[%s4937_s22 + $0xb4] sm:$0xf0] }
  0xb2   : > { %4288 = vmatmul.msk.f32.vlgmr.msra.gmra.mxu2 %vm2551_vm3, %v2419_v52  ;;  %v4134_v48 = vld [vmem:[%s4937_s22 + $0x3b0] sm:$0xf]  ;;  %v3751_v52 = vor.u32 %v4442_v45, %v3750_v44  ;;  %v3767_v44 = vor.u32 %v4446_v36, %v3766_v35  ;;  %v4546_v36 = vld [vmem:[%s4937_s22 + $0x3f4] sm:$0xf0] }
  0xb3   : > { %v1904_v53 = vmul.f32 %v5026_v37, %v1582_v51  ;;  %v4166_v35 = vld [vmem:[%s4937_s22 + $0x3f0] sm:$0xf] }
  0xb5   : > { %v1584_v55 = vpop.f32.mrf.mxu1  ;;  %v2036_v58 = vadd.f32 %v5031_v42, %v1904_v53 }
  0xb7   : > { %v5046_v61 = vpop.f32.mrf.mxu3  ;;  %vm2164_vm4 = vcmp.ge.f32.partialorder %v2036_v58, 0.0  ;;  %v2292_v62 = vmul.f32 0.2, %v2036_v58 }
  0xb8   : > { %4233 = vmatmul.msk.bf16.gmra.mxu1 %vm1044_vm1, %v3739_v54  ;;  %v1255_v0 = vpop.f32.mrf.mxu0  ;;  %v4135_v54 = vor.u32 %v4538_v49, %v4134_v48 }
  0xb9   : > { %v1585_v2 = vadd.f32 %v1584_v55, %v1255_v0  ;;  %v2420_v3 = vsel %vm2164_vm4, %v2036_v58, %v2292_v62  ;;  %v4443_v0 = vld [vmem:[%s4937_s22 + $0xc4] sm:$0xf] }
  0xba   : > { %4289 = vmatmul.msk.f32.gmra.mxu2 %vm2551_vm3, %v2420_v3 }
  0xbb   : > { %v1905_v4 = vmul.f32 %v5026_v37, %v1585_v2  ;;  %1294 = vmatmul.bf16.gmra.mxu0 %v3735_v63 }
  0xbc   : > { %1534 = vmatmul.bf16.gmra.mxu3 %v4119_v1  ;;  %v3760_v1 = vld [vmem:[%s4937_s22 + $0xc8] sm:$0xf0] }
  0xbd   : > { %v1586_v5 = vpop.f32.mrf.mxu1  ;;  %v2037_v6 = vadd.f32 %v5031_v42, %v1905_v4 }
  0xbf   : > { %v5052_v7 = vpop.f32.mrf.mxu3  ;;  %vm2165_vm5 = vcmp.ge.f32.partialorder %v2037_v6, 0.0  ;;  %v2293_v8 = vmul.f32 0.2, %v2037_v6 }
  0xc0   : > { %v1257_v9 = vpop.f32.mrf.mxu0 }
  0xc1   : > { %v1587_v12 = vadd.f32 %v1586_v5, %v1257_v9  ;;  %v2421_v13 = vsel %vm2165_vm5, %v2037_v6, %v2293_v8  ;;  %v3763_v5 = vor.u32 %v4443_v0, %v3760_v1  ;;  %v3758_v8 = vld [vmem:[%s4937_s22 + $0xc0] sm:$0xf]  ;;  %v4444_v9 = vld [vmem:[%s4937_s22 + $0xc4] sm:$0xf0] }
  0xc2   : > { %4290 = vmatmul.msk.f32.gmra.mxu2 %vm2551_vm3, %v2421_v13 }
  0xc3   : > { %v1906_v14 = vmul.f32 %v5026_v37, %v1587_v12  ;;  %v4540_v12 = vld [vmem:[%s4937_s22 + $0x3c4] sm:$0xf0] }
  0xc4   : > { %v4143_v17 = vor.u32 %v4540_v12, %v4142_v11 }
  0xc5   : > { %v1589_v16 = vpop.f32.mrf.mxu1  ;;  %v2038_v19 = vadd.f32 %v5031_v42, %v1906_v14 }
  0xc7   : > { %v5063_v22 = vpop.f32.mrf.mxu3  ;;  %vm2166_vm6 = vcmp.ge.f32.partialorder %v2038_v19, 0.0  ;;  %v2294_v23 = vmul.f32 0.2, %v2038_v19 }
  0xc8   : > { %4234 = vmatmul.msk.bf16.gmra.mxu1 %vm1044_vm1, %v3747_v15  ;;  %v1260_v25 = vpop.f32.mrf.mxu0  ;;  %v3759_v15 = vor.u32 %v4444_v9, %v3758_v8 }
  0xc9   : > { %v1590_v27 = vadd.f32 %v1589_v16, %v1260_v25  ;;  %v2422_v28 = vsel %vm2166_vm6, %v2038_v19, %v2294_v23 }
  0xca   : > { %4291 = vmatmul.msk.f32.gmra.mxu2 %vm2551_vm3, %v2422_v28  ;;  %v3768_v28 = vld [vmem:[%s4937_s22 + $0xd8] sm:$0xf0] }
  0xcb   : > { %v1907_v29 = vmul.f32 %v5026_v37, %v1590_v27  ;;  %1299 = vmatmul.bf16.gmra.mxu0 %v3743_v24  ;;  %v4445_v27 = vld [vmem:[%s4937_s22 + $0xd4] sm:$0xf] }
  0xcc   : > { %1539 = vmatmul.bf16.gmra.mxu3 %v4127_v26 }
  0xcd   : > { %v1591_v30 = vpop.f32.mrf.mxu1  ;;  %v2039_v31 = vadd.f32 %v5031_v42, %v1907_v29 }
  0xcf   : > { %v5069_v32 = vpop.f32.mrf.mxu3  ;;  %vm2167_vm7 = vcmp.ge.f32.partialorder %v2039_v31, 0.0  ;;  %v2295_v33 = vmul.f32 0.2, %v2039_v31 }
  0xd0   : > { %v1262_v34 = vpop.f32.mrf.mxu0 }
  0xd1   : > { %v1592_v38 = vadd.f32 %v1591_v30, %v1262_v34  ;;  %v2423_v39 = vsel %vm2167_vm7, %v2039_v31, %v2295_v33  ;;  %v3771_v33 = vor.u32 %v4445_v27, %v3768_v28  ;;  %vm3465_vm7 = vcmask 195584  }
  0xd2   : > { %4292 = vmatmul.msk.f32.gmra.mxu2 %vm2551_vm3, %v2423_v39  ;;  %v4150_v39 = vld [vmem:[%s4937_s22 + $0x3d0] sm:$0xf] }
  0xd3   : > { %v1908_v40 = vmul.f32 %v5026_v37, %v1592_v38 }
  0xd5   : > { %v1594_v43 = vpop.f32.mrf.mxu1  ;;  %v2040_v47 = vadd.f32 %v5031_v42, %v1908_v40  ;;  %v4542_v40 = vld [vmem:[%s4937_s22 + $0x3d4] sm:$0xf0] }
  0xd7   : > { %v5080_v50 = vpop.f32.mrf.mxu3  ;;  %vm2168_vm8 = vcmp.ge.f32.partialorder %v2040_v47, 0.0  ;;  %v2296_v51 = vmul.f32 0.2, %v2040_v47 }
  0xd8   : > { %4235 = vmatmul.msk.bf16.gmra.mxu1 %vm1044_vm1, %v3755_v41  ;;  %v1265_v53 = vpop.f32.mrf.mxu0 }
  0xd9   : > { %v1595_v55 = vadd.f32 %v1594_v43, %v1265_v53  ;;  %v2424_v56 = vsel %vm2168_vm8, %v2040_v47, %v2296_v51  ;;  %v4151_v47 = vor.u32 %v4542_v40, %v4150_v39 }
  0xda   : > { %4293 = vmatmul.msk.f32.gmra.mxu2 %vm2551_vm3, %v2424_v56 }
  0xdb   : > { %v1909_v57 = vmul.f32 %v5026_v37, %v1595_v55  ;;  %1304 = vmatmul.bf16.gmra.mxu0 %v3751_v52 }
  0xdc   : > { %1544 = vmatmul.bf16.gmra.mxu3 %v4135_v54 }
  0xdd   : > { %v1596_v58 = vpop.f32.mrf.mxu1  ;;  %v2041_v59 = vadd.f32 %v5031_v42, %v1909_v57  ;;  %v4447_v57 = vld [vmem:[%s4937_s22 + $0xe4] sm:$0xf] }
  0xdf   : > { %v5086_v60 = vpop.f32.mrf.mxu3  ;;  %vm2169_vm9 = vcmp.ge.f32.partialorder %v2041_v59, 0.0  ;;  %v2297_v62 = vmul.f32 0.2, %v2041_v59 }
  0xe0   : > { %v1267_v63 = vpop.f32.mrf.mxu0 }
  0xe1   : > { %v1597_v2 = vadd.f32 %v1596_v58, %v1267_v63  ;;  %v2425_v3 = vsel %vm2169_vm9, %v2041_v59, %v2297_v62  ;;  %v3776_v58 = vld [vmem:[%s4937_s22 + $0xe8] sm:$0xf0] }
  0xe2   : > { %4294 = vmatmul.msk.f32.gmra.mxu2 %vm2551_vm3, %v2425_v3  ;;  %v3779_v0 = vor.u32 %v4447_v57, %v3776_v58  ;;  %v4448_v3 = vld [vmem:[%s4937_s22 + $0xe4] sm:$0xf0]  ;;  %v3792_v57 = vld [vmem:[%s4937_s22 + $0x108] sm:$0xf0] }
  0xe3   : > { %v1910_v4 = vmul.f32 %v5026_v37, %v1597_v2  ;;  %v3774_v2 = vld [vmem:[%s4937_s22 + $0xe0] sm:$0xf] }
  0xe5   : > { %v1599_v6 = vpop.f32.mrf.mxu1  ;;  %v2042_v10 = vadd.f32 %v5031_v42, %v1910_v4 }
  0xe7   : > { %v5097_v13 = vpop.f32.mrf.mxu3  ;;  %vm2170_vm10 = vcmp.ge.f32.partialorder %v2042_v10, 0.0  ;;  %v2298_v14 = vmul.f32 0.2, %v2042_v10 }
  0xe8   : > { %4236 = vmatmul.msk.bf16.gmra.mxu1 %vm1044_vm1, %v3763_v5  ;;  %v1270_v16 = vpop.f32.mrf.mxu0  ;;  %v4158_v5 = vld [vmem:[%s4937_s22 + $0x3e0] sm:$0xf] }
  0xe9   : > { %v1600_v18 = vadd.f32 %v1599_v6, %v1270_v16  ;;  %v2426_v19 = vsel %vm2170_vm10, %v2042_v10, %v2298_v14  ;;  %v4544_v6 = vld [vmem:[%s4937_s22 + $0x3e4] sm:$0xf0]  ;;  %v3775_v10 = vor.u32 %v4448_v3, %v3774_v2 }
  0xea   : > { %4295 = vmatmul.msk.f32.gmra.mxu2 %vm2551_vm3, %v2426_v19  ;;  %v4159_v12 = vor.u32 %v4544_v6, %v4158_v5  ;;  %v4452_v2 = vld [vmem:[%s4937_s22 + $0x104] sm:$0xf0]  ;;  %v4048_v5 = vld [vmem:[%s4937_s22 + $0x308] sm:$0xf0] }
  0xeb   : > { %v1911_v20 = vmul.f32 %v5026_v37, %v1600_v18  ;;  %1309 = vmatmul.bf16.gmra.mxu0 %v3759_v15 }
  0xec   : > { %1549 = vmatmul.bf16.gmra.mxu3 %v4143_v17 }
  0xed   : > { %v1601_v21 = vpop.f32.mrf.mxu1  ;;  %v2043_v23 = vadd.f32 %v5031_v42, %v1911_v20 }
  0xef   : > { %v5103_v24 = vpop.f32.mrf.mxu3  ;;  %vm2171_vm11 = vcmp.ge.f32.partialorder %v2043_v23, 0.0  ;;  %v2299_v25 = vmul.f32 0.2, %v2043_v23 }
  0xf0   : > { %v1272_v26 = vpop.f32.mrf.mxu0 }
  0xf1   : > { %v1602_v29 = vadd.f32 %v1601_v21, %v1272_v26  ;;  %v2427_v30 = vsel %vm2171_vm11, %v2043_v23, %v2299_v25  ;;  %v4449_v23 = vld [vmem:[%s4937_s22 + $0xf4] sm:$0xf]  ;;  %v3784_v25 = vld [vmem:[%s4937_s22 + $0xf8] sm:$0xf0] }
  0xf2   : > { %4296 = vmatmul.msk.f32.gmra.mxu2 %vm2551_vm3, %v2427_v30 }
  0xf3   : > { %v1912_v31 = vmul.f32 %v5026_v37, %v1602_v29  ;;  %v3787_v29 = vor.u32 %v4449_v23, %v3784_v25  ;;  %v4453_v25 = vld [vmem:[%s4937_s22 + $0x114] sm:$0xf] }
  0xf5   : > { %v1604_v34 = vpop.f32.mrf.mxu1  ;;  %v2044_v38 = vadd.f32 %v5031_v42, %v1912_v31  ;;  %v3782_v31 = vld [vmem:[%s4937_s22 + $0xf0] sm:$0xf] }
  0xf7   : > { %v5114_v41 = vpop.f32.mrf.mxu3  ;;  %vm2172_vm12 = vcmp.ge.f32.partialorder %v2044_v38, 0.0  ;;  %v2300_v43 = vmul.f32 0.2, %v2044_v38 }
  0xf8   : > { %4237 = vmatmul.msk.bf16.gmra.mxu1 %vm1044_vm1, %v3771_v33  ;;  %v1275_v45 = vpop.f32.mrf.mxu0  ;;  %v4450_v33 = vld [vmem:[%s4937_s22 + $0xf4] sm:$0xf0] }
  0xf9   : > { %v1605_v48 = vadd.f32 %v1604_v34, %v1275_v45  ;;  %v2428_v49 = vsel %vm2172_vm12, %v2044_v38, %v2300_v43  ;;  %v3783_v40 = vor.u32 %v4450_v33, %v3782_v31  ;;  %v3798_v33 = vld [vmem:[%s4937_s22 + $0x110] sm:$0xf] }
  0xfa   : > { %4297 = vmatmul.msk.f32.gmra.mxu2 %vm2551_vm3, %v2428_v49 }
  0xfb   : > { %v1913_v51 = vmul.f32 %v5026_v37, %v1605_v48  ;;  %1314 = vmatmul.bf16.gmra.mxu0 %v3767_v44  ;;  %v4167_v44 = vor.u32 %v4546_v36, %v4166_v35 }
  0xfc   : > { %1554 = vmatmul.bf16.gmra.mxu3 %v4151_v47 }
  0xfd   : > { %v1606_v52 = vpop.f32.mrf.mxu1  ;;  %v2045_v53 = vadd.f32 %v5031_v42, %v1913_v51 }
  0xff   : > { %v5120_v54 = vpop.f32.mrf.mxu3  ;;  %vm2173_vm13 = vcmp.ge.f32.partialorder %v2045_v53, 0.0  ;;  %v2301_v55 = vmul.f32 0.2, %v2045_v53 }
 0x100   : > { %v1277_v56 = vpop.f32.mrf.mxu0 }
 0x101   : > { %v1607_v59 = vadd.f32 %v1606_v52, %v1277_v56  ;;  %v2429_v62 = vsel %vm2173_vm13, %v2045_v53, %v2301_v55  ;;  %v4451_v56 = vld [vmem:[%s4937_s22 + $0x104] sm:$0xf] }
 0x102   : > { %4298 = vmatmul.msk.f32.gmra.mxu2 %vm2551_vm3, %v2429_v62 }
 0x103   : > { %v1914_v63 = vmul.f32 %v5026_v37, %v1607_v59 }
 0x105   : > { %v1609_v1 = vpop.f32.mrf.mxu1  ;;  %v2046_v4 = vadd.f32 %v5031_v42, %v1914_v63  ;;  %v3795_v63 = vor.u32 %v4451_v56, %v3792_v57 }
 0x107   : > { %v5131_v8 = vpop.f32.mrf.mxu3  ;;  %vm2174_vm14 = vcmp.ge.f32.partialorder %v2046_v4, 0.0  ;;  %v2302_v9 = vmul.f32 0.2, %v2046_v4 }
 0x108   : > { %4238 = vmatmul.msk.bf16.gmra.mxu1 %vm1044_vm1, %v3779_v0  ;;  %v1280_v11 = vpop.f32.mrf.mxu0 }
 0x109   : > { %v1610_v14 = vadd.f32 %v1609_v1, %v1280_v11  ;;  %v2430_v15 = vsel %vm2174_vm14, %v2046_v4, %v2302_v9  ;;  %v3790_v1 = vld [vmem:[%s4937_s22 + $0x100] sm:$0xf]  ;;  %v4515_v4 = vld [vmem:[%s4937_s22 + $0x304] sm:$0xf] }
 0x10a   : > { %4299 = vmatmul.msk.f32.gmra.mxu2 %vm2551_vm3, %v2430_v15 }
 0x10b   : > { %v1915_v16 = vmul.f32 %v5026_v37, %v1610_v14  ;;  %1319 = vmatmul.bf16.gmra.mxu0 %v3775_v10  ;;  %v3791_v10 = vor.u32 %v4452_v2, %v3790_v1  ;;  %v3808_v1 = vld [vmem:[%s4937_s22 + $0x128] sm:$0xf0] }
 0x10c   : > { %1559 = vmatmul.bf16.gmra.mxu3 %v4159_v12  ;;  %v4051_v12 = vor.u32 %v4515_v4, %v4048_v5 }
 0x10d   : > { %v1611_v17 = vpop.f32.mrf.mxu1  ;;  %v2047_v18 = vadd.f32 %v5031_v42, %v1915_v16 }
 0x10f   : > { %v5137_v19 = vpop.f32.mrf.mxu3  ;;  %vm2175_vm15 = vcmp.ge.f32.partialorder %v2047_v18, 0.0  ;;  %v2303_v20 = vmul.f32 0.2, %v2047_v18 }
 0x110   : > { %v1282_v21 = vpop.f32.mrf.mxu0 }
 0x111   : > { %v1612_v26 = vadd.f32 %v1611_v17, %v1282_v21  ;;  %v2431_v27 = vsel %vm2175_vm15, %v2047_v18, %v2303_v20 }
 0x112   : > { %4300 = vmatmul.msk.f32.gmra.mxu2 %vm2551_vm3, %v2431_v27 }
 0x113   : > { %v1916_v28 = vmul.f32 %v5026_v37, %v1612_v26  ;;  %v3800_v26 = vld [vmem:[%s4937_s22 + $0x118] sm:$0xf0] }
 0x115   : > { %v1614_v30 = vpop.f32.mrf.mxu1  ;;  %v2048_v34 = vadd.f32 %v5031_v42, %v1916_v28 }
 0x117   : > { %v5148_v38 = vpop.f32.mrf.mxu3  ;;  %vm2176_vm0 = vcmp.ge.f32.partialorder %v2048_v34, 0.0  ;;  %v2304_v39 = vmul.f32 0.2, %v2048_v34 }
 0x118   : > { %4239 = vmatmul.msk.bf16.gmra.mxu1 %vm1044_vm1, %v3787_v29  ;;  %v1285_v43 = vpop.f32.mrf.mxu0 }
 0x119   : > { %v1615_v45 = vadd.f32 %v1614_v30, %v1285_v43  ;;  %v2432_v47 = vsel %vm2176_vm0, %v2048_v34, %v2304_v39  ;;  %v3803_v30 = vor.u32 %v4453_v25, %v3800_v26  ;;  %v4454_v34 = vld [vmem:[%s4937_s22 + $0x114] sm:$0xf0]  ;;  %v4517_v39 = vld [vmem:[%s4937_s22 + $0x314] sm:$0xf] }
 0x11a   : > { %4301 = vmatmul.msk.f32.gmra.mxu2 %vm2551_vm3, %v2432_v47 }
 0x11b   : > { %v1917_v48 = vmul.f32 %v5026_v37, %v1615_v45  ;;  %1324 = vmatmul.bf16.gmra.mxu0 %v3783_v40  ;;  %v4056_v40 = vld [vmem:[%s4937_s22 + $0x318] sm:$0xf0]  ;;  %v3799_v45 = vor.u32 %v4454_v34, %v3798_v33 }
 0x11c   : > { %1564 = vmatmul.bf16.gmra.mxu3 %v4167_v44 }
 0x11d   : > { %v1616_v49 = vpop.f32.mrf.mxu1  ;;  %v2049_v51 = vadd.f32 %v5031_v42, %v1917_v48  ;;  %v4059_v48 = vor.u32 %v4517_v39, %v4056_v40  ;;  %v4457_v40 = vld [vmem:[%s4937_s22 + $0x134] sm:$0xf] }
 0x11f   : > { %v5154_v52 = vpop.f32.mrf.mxu3  ;;  %vm2177_vm2 = vcmp.ge.f32.partialorder %v2049_v51, 0.0  ;;  %v2305_v53 = vmul.f32 0.2, %v2049_v51 }
 0x120   : > { %v1287_v55 = vpop.f32.mrf.mxu0 }
 0x121   : > { %v1617_v58 = vadd.f32 %v1616_v49, %v1287_v55  ;;  %v2433_v59 = vsel %vm2177_vm2, %v2049_v51, %v2305_v53 }
 0x122   : > { %4302 = vmatmul.msk.f32.gmra.mxu2 %vm2551_vm3, %v2433_v59 }
 0x123   : > { %v1918_v62 = vmul.f32 %v5026_v37, %v1617_v58 }
 0x125   : > { %v1619_v0 = vpop.f32.mrf.mxu1  ;;  %v2050_v3 = vadd.f32 %v5031_v42, %v1918_v62 }
 0x127   : > { %v5165_v6 = vpop.f32.mrf.mxu3  ;;  %vm2178_vm4 = vcmp.ge.f32.partialorder %v2050_v3, 0.0  ;;  %v2306_v9 = vmul.f32 0.2, %v2050_v3 }
 0x128   : > { %4240 = vmatmul.msk.bf16.gmra.mxu1 %vm1044_vm1, %v3795_v63  ;;  %v1290_v11 = vpop.f32.mrf.mxu0 }
 0x129   : > { %v1620_v14 = vadd.f32 %v1619_v0, %v1290_v11  ;;  %v2434_v15 = vsel %vm2178_vm4, %v2050_v3, %v2306_v9  ;;  %v4455_v0 = vld [vmem:[%s4937_s22 + $0x124] sm:$0xf]  ;;  %v3806_v11 = vld [vmem:[%s4937_s22 + $0x120] sm:$0xf] }
 0x12a   : > { %4303 = vmatmul.msk.f32.gmra.mxu2 %vm2551_vm3, %v2434_v15  ;;  %v3811_v5 = vor.u32 %v4455_v0, %v3808_v1 }
 0x12b   : > { %v1919_v16 = vmul.f32 %v5026_v37, %v1620_v14  ;;  %1329 = vmatmul.bf16.gmra.mxu0 %v3791_v10 }
 0x12c   : > { %4272 = vmatmul.msk.bf16.vlgmr.msrb.gmra.mxu3 %vm1044_vm1, %v4051_v12  ;;  %v4456_v12 = vld [vmem:[%s4937_s22 + $0x124] sm:$0xf0] }
 0x12d   : > { %v1621_v17 = vpop.f32.mrf.mxu1  ;;  %v2051_v18 = vadd.f32 %v5031_v42, %v1919_v16  ;;  %v4519_v16 = vld [vmem:[%s4937_s22 + $0x324] sm:$0xf] }
 0x12f   : > { %v5172_v20 = vpop.f32.mrf.mxu3  ;;  %vm2179_vm5 = vcmp.ge.f32.partialorder %v2051_v18, 0.0  ;;  %v2307_v21 = vmul.f32 0.2, %v2051_v18 }
 0x130   : > { %v1292_v23 = vpop.f32.mrf.mxu0 }
 0x131   : > { %v1622_v27 = vadd.f32 %v1621_v17, %v1292_v23  ;;  %v2435_v28 = vsel %vm2179_vm5, %v2051_v18, %v2307_v21  ;;  %v4064_v17 = vld [vmem:[%s4937_s22 + $0x328] sm:$0xf0]  ;;  %v3807_v23 = vor.u32 %v4456_v12, %v3806_v11 }
 0x132   : > { %4304 = vmatmul.msk.f32.gmra.mxu2 %vm2551_vm3, %v2435_v28  ;;  %v4067_v26 = vor.u32 %v4519_v16, %v4064_v17 }
 0x133   : > { %v1920_v29 = vmul.f32 %v5026_v37, %v1622_v27 }
 0x135   : > { %v1624_v31 = vpop.f32.mrf.mxu1  ;;  %v2052_v35 = vadd.f32 %v5031_v42, %v1920_v29  ;;  %v2953_v36 = vpop.f32.mrf.mxu2 }
 0x136   : > { %4588 = vtanh.f32 %v2953_v36 }
 0x137   : > { %v5183_v43 = vpop.f32.mrf.mxu3  ;;  %vm2180_vm6 = vcmp.ge.f32.partialorder %v2052_v35, 0.0  ;;  %v2308_v44 = vmul.f32 0.2, %v2052_v35 }
 0x138   : > { %4241 = vmatmul.msk.bf16.gmra.mxu1 %vm1044_vm1, %v3803_v30  ;;  %v1295_v47 = vpop.f32.mrf.mxu0 }
 0x139   : > { %v1625_v49 = vadd.f32 %v1624_v31, %v1295_v47  ;;  %v2436_v51 = vsel %vm2180_vm6, %v2052_v35, %v2308_v44  ;;  %v3816_v44 = vld [vmem:[%s4937_s22 + $0x138] sm:$0xf0] }
 0x13a   : > { %4305 = vmatmul.msk.f32.gmra.mxu2 %vm2551_vm3, %v2436_v51 }
 0x13b   : > { %v1921_v53 = vmul.f32 %v5026_v37, %v1625_v49  ;;  %1334 = vmatmul.bf16.gmra.mxu0 %v3799_v45  ;;  %v3819_v49 = vor.u32 %v4457_v40, %v3816_v44  ;;  %v4523_v40 = vld [vmem:[%s4937_s22 + $0x344] sm:$0xf]  ;;  %v4080_v44 = vld [vmem:[%s4937_s22 + $0x348] sm:$0xf0] }
 0x13c   : > { %v4589_v55 = vpop.eup %4588  ;;  %4273 = vmatmul.msk.bf16.gmra.mxu3 %vm1044_vm1, %v4059_v48 }
 0x13d   : > { %v1626_v56 = vpop.f32.mrf.mxu1  ;;  %3466 = vst.msk [vmem:[%s5191_s21] sm:$0xff] %vm3465_vm7, %v4589_v55  ;;  %v2053_v57 = vadd.f32 %v5031_v42, %v1921_v53  ;;  %v2956_v58 = vpop.f32.mrf.mxu2  ;;  %v3814_v55 = vld [vmem:[%s4937_s22 + $0x130] sm:$0xf] }
 0x13e   : > { %4590 = vtanh.f32 %v2956_v58 }
 0x13f   : > { %v5199_v59 = vpop.f32.mrf.mxu3  ;;  %vm2181_vm8 = vcmp.ge.f32.partialorder %v2053_v57, 0.0  ;;  %v2309_v62 = vmul.f32 0.2, %v2053_v57 }
 0x140   : > { %v1297_v63 = vpop.f32.mrf.mxu0 }
 0x141   : > { %v1627_v2 = vadd.f32 %v1626_v56, %v1297_v63  ;;  %v2437_v3 = vsel %vm2181_vm8, %v2053_v57, %v2309_v62  ;;  %v4458_v56 = vld [vmem:[%s4937_s22 + $0x134] sm:$0xf0]  ;;  %v4521_v62 = vld [vmem:[%s4937_s22 + $0x334] sm:$0xf]  ;;  %v4072_v63 = vld [vmem:[%s4937_s22 + $0x338] sm:$0xf0] }
 0x142   : > { %4306 = vmatmul.msk.f32.gmra.mxu2 %vm2551_vm3, %v2437_v3 }
 0x143   : > { %v1922_v4 = vmul.f32 %v5026_v37, %v1627_v2  ;;  %v3815_v2 = vor.u32 %v4458_v56, %v3814_v55 }
 0x144   : > { %v4591_v9 = vpop.eup %4590 }
 0x145   : > { %v1629_v10 = vpop.f32.mrf.mxu1  ;;  %3467 = vst.msk [vmem:[%s5191_s21 + $0x8] sm:$0xff] %vm3465_vm7, %v4591_v9  ;;  %v2054_v14 = vadd.f32 %v5031_v42, %v1922_v4  ;;  %v2959_v15 = vpop.f32.mrf.mxu2  ;;  %v4075_v4 = vor.u32 %v4521_v62, %v4072_v63 }
 0x146   : > { %4592 = vtanh.f32 %v2959_v15 }
 0x147   : > { %v5212_v18 = vpop.f32.mrf.mxu3  ;;  %vm2182_vm9 = vcmp.ge.f32.partialorder %v2054_v14, 0.0  ;;  %v2310_v21 = vmul.f32 0.2, %v2054_v14 }
 0x148   : > { %4242 = vmatmul.msk.bf16.gmra.mxu1 %vm1044_vm1, %v3811_v5  ;;  %v1300_v25 = vpop.f32.mrf.mxu0 }
 0x149   : > { %v1630_v27 = vadd.f32 %v1629_v10, %v1300_v25  ;;  %v2438_v28 = vsel %vm2182_vm9, %v2054_v14, %v2310_v21  ;;  %v3824_v25 = vld [vmem:[%s4937_s22 + $0x148] sm:$0xf0] }
 0x14a   : > { %4307 = vmatmul.msk.f32.gmra.mxu2 %vm2551_vm3, %v2438_v28 }
 0x14b   : > { %v1923_v29 = vmul.f32 %v5026_v37, %v1630_v27  ;;  %1339 = vmatmul.bf16.gmra.mxu0 %v3807_v23  ;;  %v4459_v23 = vld [vmem:[%s4937_s22 + $0x144] sm:$0xf] }
 0x14c   : > { %v4593_v30 = vpop.eup %4592  ;;  %4274 = vmatmul.msk.bf16.gmra.mxu3 %vm1044_vm1, %v4067_v26 }
 0x14d   : > { %v1631_v31 = vpop.f32.mrf.mxu1  ;;  %3468 = vst.msk [vmem:[%s5191_s21 + $0x10] sm:$0xff] %vm3465_vm7, %v4593_v30  ;;  %v2055_v33 = vadd.f32 %v5031_v42, %v1923_v29  ;;  %v2962_v34 = vpop.f32.mrf.mxu2  ;;  %v3827_v29 = vor.u32 %v4459_v23, %v3824_v25 }
 0x14e   : > { %4594 = vtanh.f32 %v2962_v34  ;;  %v4460_v34 = vld [vmem:[%s4937_s22 + $0x144] sm:$0xf0] }
 0x14f   : > { %v5221_v35 = vpop.f32.mrf.mxu3  ;;  %vm2183_vm10 = vcmp.ge.f32.partialorder %v2055_v33, 0.0  ;;  %v2311_v36 = vmul.f32 0.2, %v2055_v33 }
 0x150   : > { %v1302_v39 = vpop.f32.mrf.mxu0 }
 0x151   : > { %v1632_v45 = vadd.f32 %v1631_v31, %v1302_v39  ;;  %v2439_v47 = vsel %vm2183_vm10, %v2055_v33, %v2311_v36  ;;  %v3822_v33 = vld [vmem:[%s4937_s22 + $0x140] sm:$0xf] }
 0x152   : > { %4308 = vmatmul.msk.f32.gmra.mxu2 %vm2551_vm3, %v2439_v47 }
 0x153   : > { %v1924_v48 = vmul.f32 %v5026_v37, %v1632_v45 }
 0x154   : > { %v4595_v51 = vpop.eup %4594 }
 0x155   : > { %v1634_v53 = vpop.f32.mrf.mxu1  ;;  %3469 = vst.msk [vmem:[%s5191_s21 + $0x18] sm:$0xff] %vm3465_vm7, %v4595_v51  ;;  %v2056_v57 = vadd.f32 %v5031_v42, %v1924_v48  ;;  %v2965_v58 = vpop.f32.mrf.mxu2  ;;  %v3823_v48 = vor.u32 %v4460_v34, %v3822_v33  ;;  %v4083_v51 = vor.u32 %v4523_v40, %v4080_v44 }
 0x156   : > { %4596 = vtanh.f32 %v2965_v58 }
 0x157   : > { %v5234_v0 = vpop.f32.mrf.mxu3  ;;  %vm2184_vm11 = vcmp.ge.f32.partialorder %v2056_v57, 0.0  ;;  %v2312_v1 = vmul.f32 0.2, %v2056_v57 }
 0x158   : > { %4243 = vmatmul.msk.bf16.gmra.mxu1 %vm1044_vm1, %v3819_v49  ;;  %v1305_v3 = vpop.f32.mrf.mxu0 }
 0x159   : > { %v1635_v5 = vadd.f32 %v1634_v53, %v1305_v3  ;;  %v2440_v9 = vsel %vm2184_vm11, %v2056_v57, %v2312_v1 }
 0x15a   : > { %4309 = vmatmul.msk.f32.gmra.mxu2 %vm2551_vm3, %v2440_v9 }
 0x15b   : > { %v1925_v10 = vmul.f32 %v5026_v37, %v1635_v5  ;;  %1344 = vmatmul.bf16.gmra.mxu0 %v3815_v2  ;;  %v3832_v5 = vld [vmem:[%s4937_s22 + $0x158] sm:$0xf0] }
 0x15c   : > { %v4597_v11 = vpop.eup %4596  ;;  %4275 = vmatmul.msk.bf16.gmra.mxu3 %vm1044_vm1, %v4075_v4  ;;  %v4461_v4 = vld [vmem:[%s4937_s22 + $0x154] sm:$0xf] }
 0x15d   : > { %v1636_v12 = vpop.f32.mrf.mxu1  ;;  %3470 = vst.msk [vmem:[%s5191_s21 + $0x20] sm:$0xff] %vm3465_vm7, %v4597_v11  ;;  %v2057_v14 = vadd.f32 %v5031_v42, %v1925_v10  ;;  %v2968_v15 = vpop.f32.mrf.mxu2 }
 0x15e   : > { %4598 = vtanh.f32 %v2968_v15 }
 0x15f   : > { %v5243_v16 = vpop.f32.mrf.mxu3  ;;  %vm2185_vm12 = vcmp.ge.f32.partialorder %v2057_v14, 0.0  ;;  %v2313_v17 = vmul.f32 0.2, %v2057_v14 }
 0x160   : > { %v1307_v21 = vpop.f32.mrf.mxu0 }
 0x161   : > { %v1637_v26 = vadd.f32 %v1636_v12, %v1307_v21  ;;  %v2441_v27 = vsel %vm2185_vm12, %v2057_v14, %v2313_v17  ;;  %v3835_v12 = vor.u32 %v4461_v4, %v3832_v5  ;;  %v3830_v17 = vld [vmem:[%s4937_s22 + $0x150] sm:$0xf]  ;;  %v4462_v21 = vld [vmem:[%s4937_s22 + $0x154] sm:$0xf0]  ;;  %v3838_v4 = vld [vmem:[%s4937_s22 + $0x160] sm:$0xf] }
 0x162   : > { %4310 = vmatmul.msk.f32.gmra.mxu2 %vm2551_vm3, %v2441_v27  ;;  %v4088_v27 = vld [vmem:[%s4937_s22 + $0x358] sm:$0xf0]  ;;  %v4464_v5 = vld [vmem:[%s4937_s22 + $0x164] sm:$0xf0] }
 0x163   : > { %v1926_v28 = vmul.f32 %v5026_v37, %v1637_v26  ;;  %v4525_v26 = vld [vmem:[%s4937_s22 + $0x354] sm:$0xf] }
 0x164   : > { %v4599_v30 = vpop.eup %4598  ;;  %v4091_v33 = vor.u32 %v4525_v26, %v4088_v27 }
 0x165   : > { %v1639_v31 = vpop.f32.mrf.mxu1  ;;  %3471 = vst.msk [vmem:[%s5191_s21 + $0x28] sm:$0xff] %vm3465_vm7, %v4599_v30  ;;  %v2058_v36 = vadd.f32 %v5031_v42, %v1926_v28  ;;  %v2971_v39 = vpop.f32.mrf.mxu2  ;;  %v3831_v30 = vor.u32 %v4462_v21, %v3830_v17  ;;  %v3839_v17 = vor.u32 %v4464_v5, %v3838_v4 }
 0x166   : > { %4600 = vtanh.f32 %v2971_v39 }
 0x167   : > { %v5256_v45 = vpop.f32.mrf.mxu3  ;;  %vm2186_vm13 = vcmp.ge.f32.partialorder %v2058_v36, 0.0  ;;  %v2314_v47 = vmul.f32 0.2, %v2058_v36 }
 0x168   : > { %4244 = vmatmul.msk.bf16.gmra.mxu1 %vm1044_vm1, %v3827_v29  ;;  %v1310_v49 = vpop.f32.mrf.mxu0 }
 0x169   : > { %v1640_v53 = vadd.f32 %v1639_v31, %v1310_v49  ;;  %v2442_v55 = vsel %vm2186_vm13, %v2058_v36, %v2314_v47 }
 0x16a   : > { %4311 = vmatmul.msk.f32.gmra.mxu2 %vm2551_vm3, %v2442_v55  ;;  %v4463_v55 = vld [vmem:[%s4937_s22 + $0x164] sm:$0xf] }
 0x16b   : > { %v1927_v56 = vmul.f32 %v5026_v37, %v1640_v53  ;;  %1349 = vmatmul.bf16.gmra.mxu0 %v3823_v48 }
 0x16c   : > { %v4601_v57 = vpop.eup %4600  ;;  %4276 = vmatmul.msk.bf16.gmra.mxu3 %vm1044_vm1, %v4083_v51 }
 0x16d   : > { %v1641_v58 = vpop.f32.mrf.mxu1  ;;  %3472 = vst.msk [vmem:[%s5191_s21 + $0x30] sm:$0xff] %vm3465_vm7, %v4601_v57  ;;  %v2059_v62 = vadd.f32 %v5031_v42, %v1927_v56  ;;  %v2974_v63 = vpop.f32.mrf.mxu2  ;;  %v3840_v56 = vld [vmem:[%s4937_s22 + $0x168] sm:$0xf0] }
 0x16e   : > { %4602 = vtanh.f32 %v2974_v63  ;;  %v3843_v63 = vor.u32 %v4463_v55, %v3840_v56  ;;  %v3846_v56 = vld [vmem:[%s4937_s22 + $0x170] sm:$0xf] }
 0x16f   : > { %v5265_v1 = vpop.f32.mrf.mxu3  ;;  %vm2187_vm14 = vcmp.ge.f32.partialorder %v2059_v62, 0.0  ;;  %v2315_v2 = vmul.f32 0.2, %v2059_v62 }
 0x170   : > { %v1312_v3 = vpop.f32.mrf.mxu0 }
 0x171   : > { %v1642_v9 = vadd.f32 %v1641_v58, %v1312_v3  ;;  %v2443_v10 = vsel %vm2187_vm14, %v2059_v62, %v2315_v2 }
 0x172   : > { %4312 = vmatmul.msk.f32.gmra.mxu2 %vm2551_vm3, %v2443_v10 }
 0x173   : > { %v1928_v11 = vmul.f32 %v5026_v37, %v1642_v9 }
 0x174   : > { %v4603_v14 = vpop.eup %4602 }
 0x175   : > { %v1644_v15 = vpop.f32.mrf.mxu1  ;;  %3473 = vst.msk [vmem:[%s5191_s21 + $0x38] sm:$0xff] %vm3465_vm7, %v4603_v14  ;;  %v2060_v23 = vadd.f32 %v5031_v42, %v1928_v11  ;;  %v2977_v25 = vpop.f32.mrf.mxu2  ;;  %v4527_v11 = vld [vmem:[%s4937_s22 + $0x364] sm:$0xf] }
 0x176   : > { %4604 = vtanh.f32 %v2977_v25 }
 0x177   : > { %v5278_v28 = vpop.f32.mrf.mxu3  ;;  %vm2188_vm15 = vcmp.ge.f32.partialorder %v2060_v23, 0.0  ;;  %v2316_v29 = vmul.f32 0.2, %v2060_v23 }
 0x178   : > { %4245 = vmatmul.msk.bf16.gmra.mxu1 %vm1044_vm1, %v3835_v12  ;;  %v1315_v31 = vpop.f32.mrf.mxu0  ;;  %v4096_v12 = vld [vmem:[%s4937_s22 + $0x368] sm:$0xf0] }
 0x179   : > { %v1645_v34 = vadd.f32 %v1644_v15, %v1315_v31  ;;  %v2444_v36 = vsel %vm2188_vm15, %v2060_v23, %v2316_v29  ;;  %v4099_v23 = vor.u32 %v4527_v11, %v4096_v12 }
 0x17a   : > { %4313 = vmatmul.msk.f32.gmra.mxu2 %vm2551_vm3, %v2444_v36 }
 0x17b   : > { %v1929_v39 = vmul.f32 %v5026_v37, %v1645_v34  ;;  %1354 = vmatmul.bf16.gmra.mxu0 %v3831_v30 }
 0x17c   : > { %v4605_v40 = vpop.eup %4604  ;;  %4277 = vmatmul.msk.bf16.gmra.mxu3 %vm1044_vm1, %v4091_v33 }
 0x17d   : > { %v1646_v44 = vpop.f32.mrf.mxu1  ;;  %3474 = vst.msk [vmem:[%s5191_s21 + $0x40] sm:$0xff] %vm3465_vm7, %v4605_v40  ;;  %v2061_v47 = vadd.f32 %v5031_v42, %v1929_v39  ;;  %v2980_v48 = vpop.f32.mrf.mxu2  ;;  %v3848_v40 = vld [vmem:[%s4937_s22 + $0x178] sm:$0xf0] }
 0x17e   : > { %4606 = vtanh.f32 %v2980_v48 }
 0x17f   : > { %v5287_v49 = vpop.f32.mrf.mxu3  ;;  %vm2189_vm0 = vcmp.ge.f32.partialorder %v2061_v47, 0.0  ;;  %v2317_v51 = vmul.f32 0.2, %v2061_v47 }
 0x180   : > { %v1317_v53 = vpop.f32.mrf.mxu0 }
 0x181   : > { %v1647_v57 = vadd.f32 %v1646_v44, %v1317_v53  ;;  %v2445_v58 = vsel %vm2189_vm0, %v2061_v47, %v2317_v51 }
 0x182   : > { %4314 = vmatmul.msk.f32.gmra.mxu2 %vm2551_vm3, %v2445_v58  ;;  %v5327_v58 = vld [vmem:[%s6165_s3] ss:$0 sm:$0xff] }
 0x183   : > { %v1930_v62 = vmul.f32 %v5026_v37, %v1647_v57  ;;  %v4466_v57 = vld [vmem:[%s4937_s22 + $0x174] sm:$0xf0] }
 0x184   : > { %v4607_v2 = vpop.eup %4606 }
 0x185   : > { %v1649_v3 = vpop.f32.mrf.mxu1  ;;  %3475 = vst.msk [vmem:[%s5191_s21 + $0x48] sm:$0xff] %vm3465_vm7, %v4607_v2  ;;  %v2062_v9 = vadd.f32 %v5031_v42, %v1930_v62  ;;  %v2983_v10 = vpop.f32.mrf.mxu2  ;;  %v4529_v2 = vld [vmem:[%s4937_s22 + $0x374] sm:$0xf] }
 0x186   : > { %4608 = vtanh.f32 %v2983_v10 }
 0x187   : > { %v5300_v14 = vpop.f32.mrf.mxu3  ;;  %vm2190_vm2 = vcmp.ge.f32.partialorder %v2062_v9, 0.0  ;;  %v2318_v15 = vmul.f32 0.2, %v2062_v9 }
 0x188   : > { %4246 = vmatmul.msk.bf16.gmra.mxu1 %vm1044_vm1, %v3843_v63  ;;  %v1320_v21 = vpop.f32.mrf.mxu0 }
 0x189   : > { %v1650_v25 = vadd.f32 %v1649_v3, %v1320_v21  ;;  %v2446_v26 = vsel %vm2190_vm2, %v2062_v9, %v2318_v15  ;;  %v4104_v3 = vld [vmem:[%s4937_s22 + $0x378] sm:$0xf0]  ;;  %v3847_v9 = vor.u32 %v4466_v57, %v3846_v56  ;;  %v4531_v56 = vld [vmem:[%s4937_s22 + $0x384] sm:$0xf]  ;;  %v4112_v57 = vld [vmem:[%s4937_s22 + $0x388] sm:$0xf0] }
 0x18a   : > { %4315 = vmatmul.msk.f32.gmra.mxu2 %vm2551_vm3, %v2446_v26  ;;  %v4107_v11 = vor.u32 %v4529_v2, %v4104_v3 }
 0x18b   : > { %v1931_v27 = vmul.f32 %v5026_v37, %v1650_v25  ;;  %1359 = vmatmul.bf16.gmra.mxu0 %v3839_v17  ;;  %v4465_v37 = vld [vmem:[%s4937_s22 + $0x174] sm:$0xf] }
 0x18c   : > { %v4609_v29 = vpop.eup %4608  ;;  %4278 = vmatmul.msk.bf16.gmra.mxu3 %vm1044_vm1, %v4099_v23  ;;  %v3851_v51 = vor.u32 %v4465_v37, %v3848_v40 }
 0x18d   : > { %v1651_v30 = vpop.f32.mrf.mxu1  ;;  %3476 = vst.msk [vmem:[%s5191_s21 + $0x50] sm:$0xff] %vm3465_vm7, %v4609_v29  ;;  %v2063_v31 = vadd.f32 %v5031_v42, %v1931_v27  ;;  %v2986_v33 = vpop.f32.mrf.mxu2  ;;  %v5317_v42 = vld [vmem:[%s6164_s2] ss:$0 sm:$0xff] }
 0x18e   : > { %4610 = vtanh.f32 %v2986_v33  ;;  %v3856_v33 = vld [vmem:[%s4937_s22 + $0x188] sm:$0xf0] }
 0x18f   : > { %v5309_v34 = vpop.f32.mrf.mxu3  ;;  %vm2191_vm4 = vcmp.ge.f32.partialorder %v2063_v31, 0.0  ;;  %v2319_v36 = vmul.f32 0.2, %v2063_v31 }
 0x190   : > { %v1322_v39 = vpop.f32.mrf.mxu0 }
 0x191   : > { %v1652_v44 = vadd.f32 %v1651_v30, %v1322_v39  ;;  %v2447_v47 = vsel %vm2191_vm4, %v2063_v31, %v2319_v36  ;;  %v4467_v31 = vld [vmem:[%s4937_s22 + $0x184] sm:$0xf] }
 0x192   : > { %4316 = vmatmul.msk.f32.gmra.mxu2 %vm2551_vm3, %v2447_v47  ;;  %v3859_v40 = vor.u32 %v4467_v31, %v3856_v33 }
 0x193   : > { %v1932_v48 = vmul.f32 %v5317_v42, %v1652_v44 }
 0x194   : > { %v4611_v53 = vpop.eup %4610 }
 0x195   : > { %v1654_v55 = vpop.f32.mrf.mxu1  ;;  %3477 = vst.msk [vmem:[%s5191_s21 + $0x58] sm:$0xff] %vm3465_vm7, %v4611_v53  ;;  %v2064_v62 = vadd.f32 %v5327_v58, %v1932_v48  ;;  %v2989_v63 = vpop.f32.mrf.mxu2  ;;  %v3854_v48 = vld [vmem:[%s4937_s22 + $0x180] sm:$0xf] }
 0x196   : > { %4612 = vtanh.f32 %v2989_v63 }
 0x197   : > { %v5332_v4 = vpop.f32.mrf.mxu3  ;;  %vm2192_vm5 = vcmp.ge.f32.partialorder %v2064_v62, 0.0  ;;  %v2320_v5 = vmul.f32 0.2, %v2064_v62 }
 0x198   : > { %4247 = vmatmul.msk.bf16.gmra.mxu1 %vm1044_vm1, %v3851_v51  ;;  %v1325_v10 = vpop.f32.mrf.mxu0  ;;  %v4468_v51 = vld [vmem:[%s4937_s22 + $0x184] sm:$0xf0] }
 0x199   : > { %v1655_v12 = vadd.f32 %v1654_v55, %v1325_v10  ;;  %v2448_v15 = vsel %vm2192_vm5, %v2064_v62, %v2320_v5  ;;  %v3855_v2 = vor.u32 %v4468_v51, %v3854_v48  ;;  %v4115_v5 = vor.u32 %v4531_v56, %v4112_v57 }
 0x19a   : > { %4317 = vmatmul.msk.f32.gmra.mxu2 %vm2551_vm3, %v2448_v15 }
 0x19b   : > { %v1933_v17 = vmul.f32 %v5317_v42, %v1655_v12  ;;  %1364 = vmatmul.bf16.gmra.mxu0 %v3847_v9 }
 0x19c   : > { %v4613_v21 = vpop.eup %4612  ;;  %4279 = vmatmul.msk.bf16.gmra.mxu3 %vm1044_vm1, %v4107_v11 }
 0x19d   : > { %v1656_v23 = vpop.f32.mrf.mxu1  ;;  %3478 = vst.msk [vmem:[%s5191_s21 + $0x60] sm:$0xff] %vm3465_vm7, %v4613_v21  ;;  %v2065_v25 = vadd.f32 %v5327_v58, %v1933_v17  ;;  %v2992_v26 = vpop.f32.mrf.mxu2 }
 0x19e   : > { %4614 = vtanh.f32 %v2992_v26 }
 0x19f   : > { %v5341_v27 = vpop.f32.mrf.mxu3  ;;  %vm2193_vm6 = vcmp.ge.f32.partialorder %v2065_v25, 0.0  ;;  %v2321_v29 = vmul.f32 0.2, %v2065_v25 }
 0x1a0   : > { %v1327_v30 = vpop.f32.mrf.mxu0 }
 0x1a1   : > { %v1657_v36 = vadd.f32 %v1656_v23, %v1327_v30  ;;  %v2449_v39 = vsel %vm2193_vm6, %v2065_v25, %v2321_v29  ;;  %v4469_v29 = vld [vmem:[%s4937_s22 + $0x194] sm:$0xf]  ;;  %v3864_v30 = vld [vmem:[%s4937_s22 + $0x198] sm:$0xf0] }
 0x1a2   : > { %4318 = vmatmul.msk.f32.gmra.mxu2 %vm2551_vm3, %v2449_v39  ;;  %v3867_v39 = vor.u32 %v4469_v29, %v3864_v30  ;;  %v4471_v29 = vld [vmem:[%s4937_s22 + $0x1a4] sm:$0xf]  ;;  %v3872_v30 = vld [vmem:[%s4937_s22 + $0x1a8] sm:$0xf0] }
 0x1a3   : > { %v1934_v37 = vmul.f32 %v5317_v42, %v1657_v36 }
 0x1a4   : > { %v4615_v44 = vpop.eup %4614 }
 0x1a5   : > { %v1659_v47 = vpop.f32.mrf.mxu1  ;;  %3479 = vst.msk [vmem:[%s5191_s21 + $0x68] sm:$0xff] %vm3465_vm7, %v4615_v44  ;;  %v2066_v53 = vadd.f32 %v5327_v58, %v1934_v37  ;;  %v2995_v55 = vpop.f32.mrf.mxu2  ;;  %v3862_v44 = vld [vmem:[%s4937_s22 + $0x190] sm:$0xf] }
 0x1a6   : > { %4616 = vtanh.f32 %v2995_v55  ;;  %v4120_v55 = vld [vmem:[%s4937_s22 + $0x398] sm:$0xf0] }
 0x1a7   : > { %v5354_v62 = vpop.f32.mrf.mxu3  ;;  %vm2194_vm8 = vcmp.ge.f32.partialorder %v2066_v53, 0.0  ;;  %v2322_v63 = vmul.f32 0.2, %v2066_v53 }
 0x1a8   : > { %4248 = vmatmul.msk.bf16.gmra.mxu1 %vm1044_vm1, %v3859_v40  ;;  %v1330_v3 = vpop.f32.mrf.mxu0 }
 0x1a9   : > { %v1660_v9 = vadd.f32 %v1659_v47, %v1330_v3  ;;  %v2450_v10 = vsel %vm2194_vm8, %v2066_v53, %v2322_v63  ;;  %v4470_v47 = vld [vmem:[%s4937_s22 + $0x194] sm:$0xf0]  ;;  %v4533_v53 = vld [vmem:[%s4937_s22 + $0x394] sm:$0xf] }
 0x1aa   : > { %4319 = vmatmul.msk.f32.gmra.mxu2 %vm2551_vm3, %v2450_v10  ;;  %v3863_v63 = vor.u32 %v4470_v47, %v3862_v44  ;;  %v4123_v3 = vor.u32 %v4533_v53, %v4120_v55  ;;  %v3870_v44 = vld [vmem:[%s4937_s22 + $0x1a0] sm:$0xf]  ;;  %v4472_v47 = vld [vmem:[%s4937_s22 + $0x1a4] sm:$0xf0]  ;;  %v4535_v53 = vld [vmem:[%s4937_s22 + $0x3a4] sm:$0xf] }
 0x1ab   : > { %v1935_v11 = vmul.f32 %v5317_v42, %v1660_v9  ;;  %1369 = vmatmul.bf16.gmra.mxu0 %v3855_v2  ;;  %v4128_v55 = vld [vmem:[%s4937_s22 + $0x3a8] sm:$0xf0] }
 0x1ac   : > { %v4617_v12 = vpop.eup %4616  ;;  %4280 = vmatmul.msk.bf16.gmra.mxu3 %vm1044_vm1, %v4115_v5 }
 0x1ad   : > { %v1661_v15 = vpop.f32.mrf.mxu1  ;;  %3480 = vst.msk [vmem:[%s5191_s21 + $0x70] sm:$0xff] %vm3465_vm7, %v4617_v12  ;;  %v2067_v17 = vadd.f32 %v5327_v58, %v1935_v11  ;;  %v2998_v21 = vpop.f32.mrf.mxu2 }
 0x1ae   : > { %4618 = vtanh.f32 %v2998_v21 }
 0x1af   : > { %v5363_v23 = vpop.f32.mrf.mxu3  ;;  %vm2195_vm9 = vcmp.ge.f32.partialorder %v2067_v17, 0.0  ;;  %v2323_v25 = vmul.f32 0.2, %v2067_v17 }
 0x1b0   : > { %v1332_v26 = vpop.f32.mrf.mxu0 }
 0x1b1   : > { %v1662_v31 = vadd.f32 %v1661_v15, %v1332_v26  ;;  %v2451_v33 = vsel %vm2195_vm9, %v2067_v17, %v2323_v25 }
 0x1b2   : > { %4320 = vmatmul.msk.f32.gmra.mxu2 %vm2551_vm3, %v2451_v33 }
 0x1b3   : > { %v1936_v36 = vmul.f32 %v5317_v42, %v1662_v31 }
 0x1b4   : > { %v4619_v37 = vpop.eup %4618 }
 0x1b5   : > { %v1664_v40 = vpop.f32.mrf.mxu1  ;;  %3481 = vst.msk [vmem:[%s5191_s21 + $0x78] sm:$0xff] %vm3465_vm7, %v4619_v37  ;;  %v2068_v48 = vadd.f32 %v5327_v58, %v1936_v36  ;;  %v3001_v51 = vpop.f32.mrf.mxu2 }
 0x1b6   : > { %4620 = vtanh.f32 %v3001_v51 }
 0x1b7   : > { %v5377_v56 = vpop.f32.mrf.mxu3  ;;  %vm2196_vm10 = vcmp.ge.f32.partialorder %v2068_v48, 0.0  ;;  %v2324_v57 = vmul.f32 0.2, %v2068_v48 }
 0x1b8   : > { %4249 = vmatmul.msk.bf16.gmra.mxu1 %vm1044_vm1, %v3867_v39  ;;  %6168 = vst [vmem:[#allocation2_spill] sm:$0xff] %v5377_v56  ;;  %v1335_v2 = vpop.f32.mrf.mxu0  ;;  %v3875_v39 = vor.u32 %v4471_v29, %v3872_v30  ;;  %v4168_v56 = vld [vmem:[%s4937_s22 + $0x3f8] sm:$0xf0] }
 0x1b9   : > { %v1665_v5 = vadd.f32 %v1664_v40, %v1335_v2  ;;  %v2452_v9 = vsel %vm2196_vm10, %v2068_v48, %v2324_v57  ;;  %v3871_v2 = vor.u32 %v4472_v47, %v3870_v44 }
 0x1ba   : > { %4321 = vmatmul.msk.f32.gmra.mxu2 %vm2551_vm3, %v2452_v9 }
 0x1bb   : > { %v1937_v10 = vmul.f32 %v5317_v42, %v1665_v5  ;;  %1374 = vmatmul.bf16.gmra.mxu0 %v3863_v63  ;;  %v4131_v5 = vor.u32 %v4535_v53, %v4128_v55 }
 0x1bc   : > { %v4621_v11 = vpop.eup %4620  ;;  %4281 = vmatmul.msk.bf16.gmra.mxu3 %vm1044_vm1, %v4123_v3 }
 0x1bd   : > { %v1666_v12 = vpop.f32.mrf.mxu1  ;;  %3482 = vst.msk [vmem:[%s5191_s21 + $0x80] sm:$0xff] %vm3465_vm7, %v4621_v11  ;;  %v2069_v15 = vadd.f32 %v5327_v58, %v1937_v10  ;;  %v3004_v17 = vpop.f32.mrf.mxu2 }
 0x1be   : > { %4622 = vtanh.f32 %v3004_v17 }
 0x1bf   : > { %v5385_v21 = vpop.f32.mrf.mxu3  ;;  %vm2197_vm11 = vcmp.ge.f32.partialorder %v2069_v15, 0.0  ;;  %v2325_v25 = vmul.f32 0.2, %v2069_v15 }
 0x1c0   : > { %v1337_v26 = vpop.f32.mrf.mxu0 }
 0x1c1   : > { %v1667_v31 = vadd.f32 %v1666_v12, %v1337_v26  ;;  %v2453_v33 = vsel %vm2197_vm11, %v2069_v15, %v2325_v25 }
 0x1c2   : > { %4322 = vmatmul.msk.f32.gmra.mxu2 %vm2551_vm3, %v2453_v33  ;;  %v3880_v33 = vld [vmem:[%s4937_s22 + $0x1b8] sm:$0xf0] }
 0x1c3   : > { %v1938_v36 = vmul.f32 %v5317_v42, %v1667_v31  ;;  %v4473_v31 = vld [vmem:[%s4937_s22 + $0x1b4] sm:$0xf] }
 0x1c4   : > { %v4623_v37 = vpop.eup %4622 }
 0x1c5   : > { %v1669_v40 = vpop.f32.mrf.mxu1  ;;  %3483 = vst.msk [vmem:[%s5191_s21 + $0x88] sm:$0xff] %vm3465_vm7, %v4623_v37  ;;  %v2070_v48 = vadd.f32 %v5327_v58, %v1938_v36  ;;  %v3007_v51 = vpop.f32.mrf.mxu2 }
 0x1c6   : > { %4624 = vtanh.f32 %v3007_v51  ;;  %v4474_v51 = vld [vmem:[%s4937_s22 + $0x1b4] sm:$0xf0] }
 0x1c7   : > { %v5399_v57 = vpop.f32.mrf.mxu3  ;;  %vm2198_vm12 = vcmp.ge.f32.partialorder %v2070_v48, 0.0  ;;  %v2326_v63 = vmul.f32 0.2, %v2070_v48 }
 0x1c8   : > { %4250 = vmatmul.msk.bf16.gmra.mxu1 %vm1044_vm1, %v3875_v39  ;;  %v1340_v3 = vpop.f32.mrf.mxu0 }
 0x1c9   : > { %v1670_v9 = vadd.f32 %v1669_v40, %v1340_v3  ;;  %v2454_v10 = vsel %vm2198_vm12, %v2070_v48, %v2326_v63  ;;  %v3883_v40 = vor.u32 %v4473_v31, %v3880_v33  ;;  %v3878_v48 = vld [vmem:[%s4937_s22 + $0x1b0] sm:$0xf]  ;;  %v4537_v63 = vld [vmem:[%s4937_s22 + $0x3b4] sm:$0xf] }
 0x1ca   : > { %4323 = vmatmul.msk.f32.gmra.mxu2 %vm2551_vm3, %v2454_v10 }
 0x1cb   : > { %v1939_v11 = vmul.f32 %v5317_v42, %v1670_v9  ;;  %1379 = vmatmul.bf16.gmra.mxu0 %v3871_v2  ;;  %v4136_v2 = vld [vmem:[%s4937_s22 + $0x3b8] sm:$0xf0]  ;;  %v3879_v9 = vor.u32 %v4474_v51, %v3878_v48 }
 0x1cc   : > { %v4625_v12 = vpop.eup %4624  ;;  %4282 = vmatmul.msk.bf16.gmra.mxu3 %vm1044_vm1, %v4131_v5 }
 0x1cd   : > { %v1671_v15 = vpop.f32.mrf.mxu1  ;;  %3484 = vst.msk [vmem:[%s5191_s21 + $0x90] sm:$0xff] %vm3465_vm7, %v4625_v12  ;;  %v2071_v17 = vadd.f32 %v5327_v58, %v1939_v11  ;;  %v3010_v25 = vpop.f32.mrf.mxu2  ;;  %v4139_v11 = vor.u32 %v4537_v63, %v4136_v2  ;;  %v3886_v63 = vld [vmem:[%s4937_s22 + $0x1c0] sm:$0xf]  ;;  %v4476_v2 = vld [vmem:[%s4937_s22 + $0x1c4] sm:$0xf0] }
 0x1ce   : > { %4626 = vtanh.f32 %v3010_v25 }
 0x1cf   : > { %v5407_v26 = vpop.f32.mrf.mxu3  ;;  %vm2199_vm13 = vcmp.ge.f32.partialorder %v2071_v17, 0.0  ;;  %v2327_v29 = vmul.f32 0.2, %v2071_v17 }
 0x1d0   : > { %v1342_v30 = vpop.f32.mrf.mxu0 }
 0x1d1   : > { %v1672_v36 = vadd.f32 %v1671_v15, %v1342_v30  ;;  %v2455_v39 = vsel %vm2199_vm13, %v2071_v17, %v2327_v29 }
 0x1d2   : > { %4324 = vmatmul.msk.f32.gmra.mxu2 %vm2551_vm3, %v2455_v39 }
 0x1d3   : > { %v1940_v37 = vmul.f32 %v5317_v42, %v1672_v36 }
 0x1d4   : > { %v4627_v44 = vpop.eup %4626 }
 0x1d5   : > { %v1674_v47 = vpop.f32.mrf.mxu1  ;;  %3485 = vst.msk [vmem:[%s5191_s21 + $0x98] sm:$0xff] %vm3465_vm7, %v4627_v44  ;;  %v2072_v53 = vadd.f32 %v5327_v58, %v1940_v37  ;;  %v3013_v55 = vpop.f32.mrf.mxu2  ;;  %v4475_v37 = vld [vmem:[%s4937_s22 + $0x1c4] sm:$0xf] }
 0x1d6   : > { %4628 = vtanh.f32 %v3013_v55 }
 0x1d7   : > { %v5421_v3 = vpop.f32.mrf.mxu3  ;;  %vm2200_vm14 = vcmp.ge.f32.partialorder %v2072_v53, 0.0  ;;  %v2328_v5 = vmul.f32 0.2, %v2072_v53 }
 0x1d8   : > { %4251 = vmatmul.msk.bf16.gmra.mxu1 %vm1044_vm1, %v3883_v40  ;;  %v1345_v10 = vpop.f32.mrf.mxu0  ;;  %v3888_v40 = vld [vmem:[%s4937_s22 + $0x1c8] sm:$0xf0] }
 0x1d9   : > { %v1675_v12 = vadd.f32 %v1674_v47, %v1345_v10  ;;  %v2456_v15 = vsel %vm2200_vm14, %v2072_v53, %v2328_v5  ;;  %v3891_v51 = vor.u32 %v4475_v37, %v3888_v40  ;;  %v4539_v10 = vld [vmem:[%s4937_s22 + $0x3c4] sm:$0xf] }
 0x1da   : > { %4325 = vmatmul.msk.f32.gmra.mxu2 %vm2551_vm3, %v2456_v15 }
 0x1db   : > { %v1941_v17 = vmul.f32 %v5317_v42, %v1675_v12  ;;  %1384 = vmatmul.bf16.gmra.mxu0 %v3879_v9 }
 0x1dc   : > { %v4629_v25 = vpop.eup %4628  ;;  %4283 = vmatmul.msk.bf16.gmra.mxu3 %vm1044_vm1, %v4139_v11  ;;  %v4144_v11 = vld [vmem:[%s4937_s22 + $0x3c8] sm:$0xf0] }
 0x1dd   : > { %v1676_v29 = vpop.f32.mrf.mxu1  ;;  %3486 = vst.msk [vmem:[%s5191_s21 + $0xa0] sm:$0xff] %vm3465_vm7, %v4629_v25  ;;  %v2073_v30 = vadd.f32 %v5327_v58, %v1941_v17  ;;  %v3016_v31 = vpop.f32.mrf.mxu2  ;;  %v3887_v17 = vor.u32 %v4476_v2, %v3886_v63 }
 0x1de   : > { %4630 = vtanh.f32 %v3016_v31 }
 0x1df   : > { %v5429_v33 = vpop.f32.mrf.mxu3  ;;  %vm2201_vm15 = vcmp.ge.f32.partialorder %v2073_v30, 0.0  ;;  %v2329_v36 = vmul.f32 0.2, %v2073_v30 }
 0x1e0   : > { %v1347_v39 = vpop.f32.mrf.mxu0 }
 0x1e1   : > { %v1677_v44 = vadd.f32 %v1676_v29, %v1347_v39  ;;  %v2457_v47 = vsel %vm2201_vm15, %v2073_v30, %v2329_v36  ;;  %v4147_v29 = vor.u32 %v4539_v10, %v4144_v11 }
 0x1e2   : > { %4326 = vmatmul.msk.f32.gmra.mxu2 %vm2551_vm3, %v2457_v47 }
 0x1e3   : > { %v1942_v48 = vmul.f32 %v5317_v42, %v1677_v44 }
 0x1e4   : > { %v4631_v53 = vpop.eup %4630 }
 0x1e5   : > { %v1679_v55 = vpop.f32.mrf.mxu1  ;;  %3487 = vst.msk [vmem:[%s5191_s21 + $0xa8] sm:$0xff] %vm3465_vm7, %v4631_v53  ;;  %v2074_v5 = vadd.f32 %v5327_v58, %v1942_v48  ;;  %v3019_v9 = vpop.f32.mrf.mxu2  ;;  %v4477_v53 = vld [vmem:[%s4937_s22 + $0x1d4] sm:$0xf] }
 0x1e6   : > { %4632 = vtanh.f32 %v3019_v9 }
 0x1e7   : > { %v5443_v12 = vpop.f32.mrf.mxu3  ;;  %vm2202_vm0 = vcmp.ge.f32.partialorder %v2074_v5, 0.0  ;;  %v2330_v15 = vmul.f32 0.2, %v2074_v5 }
 0x1e8   : > { %4252 = vmatmul.msk.bf16.gmra.mxu1 %vm1044_vm1, %v3891_v51  ;;  %v1350_v25 = vpop.f32.mrf.mxu0 }
 0x1e9   : > { %v1680_v30 = vadd.f32 %v1679_v55, %v1350_v25  ;;  %v2458_v31 = vsel %vm2202_vm0, %v2074_v5, %v2330_v15  ;;  %v3896_v55 = vld [vmem:[%s4937_s22 + $0x1d8] sm:$0xf0]  ;;  %v3894_v15 = vld [vmem:[%s4937_s22 + $0x1d0] sm:$0xf] }
 0x1ea   : > { %4327 = vmatmul.msk.f32.gmra.mxu2 %vm2551_vm3, %v2458_v31  ;;  %v3899_v9 = vor.u32 %v4477_v53, %v3896_v55  ;;  %v4152_v31 = vld [vmem:[%s4937_s22 + $0x3d8] sm:$0xf0] }
 0x1eb   : > { %v1943_v36 = vmul.f32 %v5317_v42, %v1680_v30  ;;  %1389 = vmatmul.bf16.gmra.mxu0 %v3887_v17  ;;  %v4478_v17 = vld [vmem:[%s4937_s22 + $0x1d4] sm:$0xf0]  ;;  %v4541_v30 = vld [vmem:[%s4937_s22 + $0x3d4] sm:$0xf] }
 0x1ec   : > { %v4633_v39 = vpop.eup %4632  ;;  %4284 = vmatmul.msk.bf16.gmra.mxu3 %vm1044_vm1, %v4147_v29 }
 0x1ed   : > { %v1681_v37 = vpop.f32.mrf.mxu1  ;;  %3488 = vst.msk [vmem:[%s5191_s21 + $0xb0] sm:$0xff] %vm3465_vm7, %v4633_v39  ;;  %v2075_v40 = vadd.f32 %v5327_v58, %v1943_v36  ;;  %v3022_v44 = vpop.f32.mrf.mxu2 }
 0x1ee   : > { %4634 = vtanh.f32 %v3022_v44  ;;  %v4155_v44 = vor.u32 %v4541_v30, %v4152_v31 }
 0x1ef   : > { %v5451_v47 = vpop.f32.mrf.mxu3  ;;  %vm2203_vm2 = vcmp.ge.f32.partialorder %v2075_v40, 0.0  ;;  %v2331_v48 = vmul.f32 0.2, %v2075_v40 }
 0x1f0   : > { %v1352_v51 = vpop.f32.mrf.mxu0 }
 0x1f1   : > { %v1682_v63 = vadd.f32 %v1681_v37, %v1352_v51  ;;  %v2459_v2 = vsel %vm2203_vm2, %v2075_v40, %v2331_v48  ;;  %v3895_v37 = vor.u32 %v4478_v17, %v3894_v15  ;;  %v4479_v15 = vld [vmem:[%s4937_s22 + $0x1e4] sm:$0xf]  ;;  %v3904_v17 = vld [vmem:[%s4937_s22 + $0x1e8] sm:$0xf0] }
 0x1f2   : > { %4328 = vmatmul.msk.f32.gmra.mxu2 %vm2551_vm3, %v2459_v2  ;;  %v3907_v31 = vor.u32 %v4479_v15, %v3904_v17 }
 0x1f3   : > { %v1944_v5 = vmul.f32 %v5317_v42, %v1682_v63 }
 0x1f4   : > { %v4635_v10 = vpop.eup %4634 }
 0x1f5   : > { %v1684_v11 = vpop.f32.mrf.mxu1  ;;  %3489 = vst.msk [vmem:[%s5191_s21 + $0xb8] sm:$0xff] %vm3465_vm7, %v4635_v10  ;;  %v2076_v25 = vadd.f32 %v5327_v58, %v1944_v5  ;;  %v3025_v29 = vpop.f32.mrf.mxu2 }
 0x1f6   : > { %4636 = vtanh.f32 %v3025_v29 }
 0x1f7   : > { %v5465_v36 = vpop.f32.mrf.mxu3  ;;  %vm2204_vm4 = vcmp.ge.f32.partialorder %v2076_v25, 0.0  ;;  %v2332_v39 = vmul.f32 0.2, %v2076_v25 }
 0x1f8   : > { %4253 = vmatmul.msk.bf16.gmra.mxu1 %vm1044_vm1, %v3899_v9  ;;  %v1355_v40 = vpop.f32.mrf.mxu0 }
 0x1f9   : > { %v1685_v48 = vadd.f32 %v1684_v11, %v1355_v40  ;;  %v2460_v51 = vsel %vm2204_vm4, %v2076_v25, %v2332_v39  ;;  %v3902_v40 = vld [vmem:[%s4937_s22 + $0x1e0] sm:$0xf] }
 0x1fa   : > { %4329 = vmatmul.msk.f32.gmra.mxu2 %vm2551_vm3, %v2460_v51 }
 0x1fb   : > { %v1945_v53 = vmul.f32 %v5317_v42, %v1685_v48  ;;  %1394 = vmatmul.bf16.gmra.mxu0 %v3895_v37 }
 0x1fc   : > { %v4637_v55 = vpop.eup %4636  ;;  %4285 = vmatmul.msk.bf16.gmra.mxu3 %vm1044_vm1, %v4155_v44  ;;  %v4480_v44 = vld [vmem:[%s4937_s22 + $0x1e4] sm:$0xf0] }
 0x1fd   : > { %v1686_v63 = vpop.f32.mrf.mxu1  ;;  %3490 = vst.msk [vmem:[%s5191_s21 + $0xc0] sm:$0xff] %vm3465_vm7, %v4637_v55  ;;  %v2077_v2 = vadd.f32 %v5327_v58, %v1945_v53  ;;  %v3028_v5 = vpop.f32.mrf.mxu2  ;;  %v4543_v53 = vld [vmem:[%s4937_s22 + $0x3e4] sm:$0xf]  ;;  %v4160_v55 = vld [vmem:[%s4937_s22 + $0x3e8] sm:$0xf0] }
 0x1fe   : > { %4638 = vtanh.f32 %v3028_v5  ;;  %v3903_v5 = vor.u32 %v4480_v44, %v3902_v40 }
 0x1ff   : > { %v5473_v9 = vpop.f32.mrf.mxu3  ;;  %vm2205_vm5 = vcmp.ge.f32.partialorder %v2077_v2, 0.0  ;;  %v2333_v10 = vmul.f32 0.2, %v2077_v2 }
 0x200   : > { %v1357_v11 = vpop.f32.mrf.mxu0 }
 0x201   : > { %v1687_v25 = vadd.f32 %v1686_v63, %v1357_v11  ;;  %v2461_v29 = vsel %vm2205_vm5, %v2077_v2, %v2333_v10  ;;  %v4163_v11 = vor.u32 %v4543_v53, %v4160_v55 }
 0x202   : > { %4330 = vmatmul.msk.f32.gmra.mxu2 %vm2551_vm3, %v2461_v29 }
 0x203   : > { %v1946_v30 = vmul.f32 %v5317_v42, %v1687_v25 }
 0x204   : > { %v4639_v39 = vpop.eup %4638 }
 0x205   : > { %v1689_v37 = vpop.f32.mrf.mxu1  ;;  %3491 = vst.msk [vmem:[%s5191_s21 + $0xc8] sm:$0xff] %vm3465_vm7, %v4639_v39  ;;  %v2078_v48 = vadd.f32 %v5327_v58, %v1946_v30  ;;  %v3031_v51 = vpop.f32.mrf.mxu2 }
 0x206   : > { %4640 = vtanh.f32 %v3031_v51  ;;  %v3912_v51 = vld [vmem:[%s4937_s22 + $0x1f8] sm:$0xf0] }
 0x207   : > { %v5487_v63 = vpop.f32.mrf.mxu3  ;;  %vm2206_vm6 = vcmp.ge.f32.partialorder %v2078_v48, 0.0  ;;  %v2334_v2 = vmul.f32 0.2, %v2078_v48 }
 0x208   : > { %4254 = vmatmul.msk.bf16.gmra.mxu1 %vm1044_vm1, %v3907_v31  ;;  %v1360_v10 = vpop.f32.mrf.mxu0 }
 0x209   : > { %v1690_v15 = vadd.f32 %v1689_v37, %v1360_v10  ;;  %v2462_v17 = vsel %vm2206_vm6, %v2078_v48, %v2334_v2  ;;  %v4481_v48 = vld [vmem:[%s4937_s22 + $0x1f4] sm:$0xf] }
 0x20a   : > { %4331 = vmatmul.msk.f32.gmra.mxu2 %vm2551_vm3, %v2462_v17  ;;  %v4482_v17 = vld [vmem:[%s4937_s22 + $0x1f4] sm:$0xf0] }
 0x20b   : > { %v1947_v25 = vmul.f32 %v5317_v42, %v1690_v15  ;;  %1399 = vmatmul.bf16.gmra.mxu0 %v3903_v5  ;;  %v3915_v5 = vor.u32 %v4481_v48, %v3912_v51  ;;  %v3910_v15 = vld [vmem:[%s4937_s22 + $0x1f0] sm:$0xf] }
 0x20c   : > { %v4641_v29 = vpop.eup %4640  ;;  %4286 = vmatmul.msk.bf16.gmra.mxu3 %vm1044_vm1, %v4163_v11 }
 0x20d   : > { %v1691_v30 = vpop.f32.mrf.mxu1  ;;  %3492 = vst.msk [vmem:[%s5191_s21 + $0xd0] sm:$0xff] %vm3465_vm7, %v4641_v29  ;;  %v2079_v31 = vadd.f32 %v5327_v58, %v1947_v25  ;;  %v3034_v39 = vpop.f32.mrf.mxu2 }
 0x20e   : > { %4642 = vtanh.f32 %v3034_v39  ;;  %v4545_v39 = vld [vmem:[%s4937_s22 + $0x3f4] sm:$0xf] }
 0x20f   : > { %v5495_v37 = vpop.f32.mrf.mxu3  ;;  %vm2207_vm8 = vcmp.ge.f32.partialorder %v2079_v31, 0.0  ;;  %v2335_v40 = vmul.f32 0.2, %v2079_v31  ;;  %v4171_v48 = vor.u32 %v4545_v39, %v4168_v56 }
 0x210   : > { %v1362_v44 = vpop.f32.mrf.mxu0 }
 0x211   : > { %v1692_v53 = vadd.f32 %v1691_v30, %v1362_v44  ;;  %v2463_v55 = vsel %vm2207_vm8, %v2079_v31, %v2335_v40  ;;  %v3911_v40 = vor.u32 %v4482_v17, %v3910_v15 }
 0x212   : > { %4332 = vmatmul.msk.f32.gmra.mxu2 %vm2551_vm3, %v2463_v55  ;;  %v1825_v55 = vadd.f32 %v5385_v21, %v5052_v7 }
 0x213   : > { %v1948_v2 = vmul.f32 %v5317_v42, %v1692_v53 }
 0x214   : > { %v4643_v10 = vpop.eup %4642  ;;  %v2001_v15 = vmul.f32 %v5317_v42, %v1825_v55 }
 0x215   : > { %v1694_v11 = vpop.f32.mrf.mxu1  ;;  %3493 = vst.msk [vmem:[%s5191_s21 + $0xd8] sm:$0xff] %vm3465_vm7, %v4643_v10  ;;  %v2080_v25 = vadd.f32 %v5327_v58, %v1948_v2  ;;  %v3037_v29 = vpop.f32.mrf.mxu2 }
 0x216   : > { %4644 = vtanh.f32 %v3037_v29  ;;  %v3920_v29 = vld [vmem:[%s4937_s22 + $0x208] sm:$0xf0] }
 0x217   : > { %v5509_v30 = vpop.f32.mrf.mxu3  ;;  %vm2208_vm9 = vcmp.ge.f32.partialorder %v2080_v25, 0.0  ;;  %v2336_v31 = vmul.f32 0.2, %v2080_v25 }
 0x218   : > { %4255 = vmatmul.msk.bf16.gmra.mxu1 %vm1044_vm1, %v3915_v5  ;;  %v1365_v44 = vpop.f32.mrf.mxu0 }
 0x219   : > { %v1695_v51 = vadd.f32 %v1694_v11, %v1365_v44  ;;  %v2464_v53 = vsel %vm2208_vm9, %v2080_v25, %v2336_v31  ;;  %v4483_v25 = vld [vmem:[%s4937_s22 + $0x204] sm:$0xf]  ;;  %v1827_v44 = vadd.f32 %v5399_v57, %v5063_v22 }
 0x21a   : > { %4333 = vmatmul.msk.f32.gmra.mxu2 %vm2551_vm3, %v2464_v53 }
 0x21b   : > { %v1949_v2 = vmul.f32 %v5317_v42, %v1695_v51  ;;  %1404 = vmatmul.bf16.gmra.mxu0 %v3911_v40  ;;  %v2133_v40 = vadd.f32 %v5327_v58, %v2001_v15  ;;  %v3923_v51 = vor.u32 %v4483_v25, %v3920_v29  ;;  %v2002_v15 = vmul.f32 %v5317_v42, %v1827_v44 }
 0x21c   : > { %v4645_v5 = vpop.eup %4644  ;;  %4287 = vmatmul.msk.bf16.gmra.mxu3 %vm1044_vm1, %v4171_v48 }
 0x21d   : > { %v1696_v10 = vpop.f32.mrf.mxu1  ;;  %3494 = vst.msk [vmem:[%s5191_s21 + $0xe0] sm:$0xff] %vm3465_vm7, %v4645_v5  ;;  %v2081_v56 = vadd.f32 %v5327_v58, %v1949_v2  ;;  %v3040_v11 = vpop.f32.mrf.mxu2  ;;  %v3918_v2 = vld [vmem:[%s4937_s22 + $0x200] sm:$0xf]  ;;  %v4484_v5 = vld [vmem:[%s4937_s22 + $0x204] sm:$0xf0]  ;;  %vm2261_vm12 = vcmp.ge.f32.partialorder %v2133_v40, 0.0 }
 0x21e   : > { %4646 = vtanh.f32 %v3040_v11  ;;  %v3919_v57 = vor.u32 %v4484_v5, %v3918_v2 }
 0x21f   : > { %v5520_v7 = vpop.f32.mrf.mxu3  ;;  %vm2209_vm10 = vcmp.ge.f32.partialorder %v2081_v56, 0.0  ;;  %v2337_v21 = vmul.f32 0.2, %v2081_v56 }
 0x220   : > { %v1367_v17 = vpop.f32.mrf.mxu0 }
 0x221   : > { %v1697_v39 = vadd.f32 %v1696_v10, %v1367_v17  ;;  %v2465_v31 = vsel %vm2209_vm10, %v2081_v56, %v2337_v21  ;;  %v2389_v56 = vmul.f32 0.2, %v2133_v40 }
 0x222   : > { %4334 = vmatmul.msk.f32.gmra.mxu2 %vm2551_vm3, %v2465_v31  ;;  %v2134_v31 = vadd.f32 %v5327_v58, %v2002_v15 }
 0x223   : > { %v1950_v48 = vmul.f32 %v5317_v42, %v1697_v39  ;;  %v1830_v39 = vadd.f32 %v5407_v26, %v5069_v32 }
 0x224   : > { %v4647_v53 = vpop.eup %4646  ;;  %vm2262_vm14 = vcmp.ge.f32.partialorder %v2134_v31, 0.0 }
 0x225   : > { %v1699_v55 = vpop.f32.mrf.mxu1  ;;  %3495 = vst.msk [vmem:[%s5191_s21 + $0xe8] sm:$0xff] %vm3465_vm7, %v4647_v53  ;;  %v2082_v11 = vadd.f32 %v5327_v58, %v1950_v48  ;;  %v3043_v10 = vpop.f32.mrf.mxu2  ;;  %v2517_v48 = vsel %vm2261_vm12, %v2133_v40, %v2389_v56  ;;  %v2003_v32 = vmul.f32 %v5317_v42, %v1830_v39  ;;  %v3928_v56 = vld [vmem:[%s4937_s22 + $0x218] sm:$0xf0] }
 0x226   : > { %4648 = vtanh.f32 %v3043_v10  ;;  %v4485_v10 = vld [vmem:[%s4937_s22 + $0x214] sm:$0xf] }
 0x227   : > { %v5536_v21 = vpop.f32.mrf.mxu3  ;;  %vm2210_vm11 = vcmp.ge.f32.partialorder %v2082_v11, 0.0  ;;  %v2338_v22 = vmul.f32 0.2, %v2082_v11  ;;  %v3931_v39 = vor.u32 %v4485_v10, %v3928_v56  ;;  %v1835_v56 = vadd.f32 %v5429_v33, %v5086_v60 }
 0x228   : > { %4256 = vmatmul.msk.bf16.gmra.mxu1 %vm1044_vm1, %v3923_v51  ;;  %v1370_v17 = vpop.f32.mrf.mxu0 }
 0x229   : > { %v1700_v25 = vadd.f32 %v1699_v55, %v1370_v17  ;;  %v2466_v29 = vsel %vm2210_vm11, %v2082_v11, %v2338_v22  ;;  %v2390_v11 = vmul.f32 0.2, %v2134_v31  ;;  %v1832_v17 = vadd.f32 %v5421_v3, %v5080_v50 }
 0x22a   : > { %4335 = vmatmul.msk.f32.gmra.mxu2 %vm2551_vm3, %v2466_v29  ;;  %v2005_v60 = vmul.f32 %v5317_v42, %v1835_v56 }
 0x22b   : > { %v1951_v44 = vmul.f32 %v5317_v42, %v1700_v25  ;;  %1409 = vmatmul.bf16.gmra.mxu0 %v3919_v57  ;;  %v2135_v57 = vadd.f32 %v5327_v58, %v2003_v32  ;;  %v2518_v29 = vsel %vm2262_vm14, %v2134_v31, %v2390_v11 }
 0x22c   : > { %v4649_v51 = vpop.eup %4648  ;;  %4386 = vmatmul.msk.f32.vlgmr.msra.gmra.mxu3 %vm2551_vm3, %v2517_v48 }
 0x22d   : > { %v1701_v53 = vpop.f32.mrf.mxu1  ;;  %3496 = vst.msk [vmem:[%s5191_s21 + $0xf0] sm:$0xff] %vm3465_vm7, %v4649_v51  ;;  %v2083_v55 = vadd.f32 %v5327_v58, %v1951_v44  ;;  %v3046_v2 = vpop.f32.mrf.mxu2  ;;  %v3926_v51 = vld [vmem:[%s4937_s22 + $0x210] sm:$0xf]  ;;  %v2391_v32 = vmul.f32 0.2, %v2135_v57  ;;  %vm2263_vm0 = vcmp.ge.f32.partialorder %v2135_v57, 0.0 }
 0x22e   : > { %4650 = vtanh.f32 %v3046_v2  ;;  %v4486_v2 = vld [vmem:[%s4937_s22 + $0x214] sm:$0xf0] }
 0x22f   : > { %v5548_v26 = vpop.f32.mrf.mxu3  ;;  %vm2211_vm13 = vcmp.ge.f32.partialorder %v2083_v55, 0.0  ;;  %v2339_v5 = vmul.f32 0.2, %v2083_v55  ;;  %v3927_v31 = vor.u32 %v4486_v2, %v3926_v51  ;;  %v4487_v2 = vld [vmem:[%s4937_s22 + $0x224] sm:$0xf] }
 0x230   : > { %v1372_v40 = vpop.f32.mrf.mxu0 }
 0x231   : > { %v1702_v15 = vadd.f32 %v1701_v53, %v1372_v40  ;;  %v2467_v22 = vsel %vm2211_vm13, %v2083_v55, %v2339_v5  ;;  %v2004_v5 = vmul.f32 %v5317_v42, %v1832_v17  ;;  %v2519_v17 = vsel %vm2263_vm0, %v2135_v57, %v2391_v32 }
 0x232   : > { %4336 = vmatmul.msk.f32.gmra.mxu2 %vm2551_vm3, %v2467_v22 }
 0x233   : > { %v1952_v25 = vmul.f32 %v5317_v42, %v1702_v15  ;;  %v2136_v15 = vadd.f32 %v5327_v58, %v2004_v5  ;;  %v2137_v5 = vadd.f32 %v5327_v58, %v2005_v60 }
 0x234   : > { %v4651_v44 = vpop.eup %4650  ;;  %4387 = vmatmul.msk.f32.gmra.mxu3 %vm2551_vm3, %v2518_v29 }
 0x235   : > { %v1704_v48 = vpop.f32.mrf.mxu1  ;;  %3497 = vst.msk [vmem:[%s5191_s21 + $0xf8] sm:$0xff] %vm3465_vm7, %v4651_v44  ;;  %v2084_v53 = vadd.f32 %v5327_v58, %v1952_v25  ;;  %v3049_v55 = vpop.f32.mrf.mxu2  ;;  %v2392_v51 = vmul.f32 0.2, %v2136_v15  ;;  %vm2264_vm4 = vcmp.ge.f32.partialorder %v2136_v15, 0.0  ;;  %vm2265_vm6 = vcmp.ge.f32.partialorder %v2137_v5, 0.0 }
 0x236   : > { %4652 = vtanh.f32 %v3049_v55 }
 0x237   : > { %v5565_v50 = vpop.f32.mrf.mxu3  ;;  %vm2212_vm15 = vcmp.ge.f32.partialorder %v2084_v53, 0.0  ;;  %v2340_v3 = vmul.f32 0.2, %v2084_v53 }
 0x238   : > { %4257 = vmatmul.msk.bf16.gmra.mxu1 %vm1044_vm1, %v3931_v39  ;;  %v1375_v11 = vpop.f32.mrf.mxu0 }
 0x239   : > { %v1705_v40 = vadd.f32 %v1704_v48, %v1375_v11  ;;  %v2468_v10 = vsel %vm2212_vm15, %v2084_v53, %v2340_v3  ;;  %v3936_v53 = vld [vmem:[%s4937_s22 + $0x228] sm:$0xf0]  ;;  %v1837_v3 = vadd.f32 %v5443_v12, %v5097_v13  ;;  %v2520_v11 = vsel %vm2264_vm4, %v2136_v15, %v2392_v51 }
 0x23a   : > { %4337 = vmatmul.msk.f32.gmra.mxu2 %vm2551_vm3, %v2468_v10 }
 0x23b   : > { %v1953_v22 = vmul.f32 %v5317_v42, %v1705_v40  ;;  %1414 = vmatmul.bf16.gmra.mxu0 %v3927_v31  ;;  %v3939_v40 = vor.u32 %v4487_v2, %v3936_v53 }
 0x23c   : > { %v4653_v25 = vpop.eup %4652  ;;  %4388 = vmatmul.msk.f32.gmra.mxu3 %vm2551_vm3, %v2519_v17  ;;  %v4488_v17 = vld [vmem:[%s4937_s22 + $0x224] sm:$0xf0] }
 0x23d   : > { %v1706_v29 = vpop.f32.mrf.mxu1  ;;  %3498 = vst.msk [vmem:[%s5191_s21 + $0x100] sm:$0xff] %vm3465_vm7, %v4653_v25  ;;  %v2085_v39 = vadd.f32 %v5327_v58, %v1953_v22  ;;  %v3052_v44 = vpop.f32.mrf.mxu2  ;;  %v3934_v22 = vld [vmem:[%s4937_s22 + $0x220] sm:$0xf] }
 0x23e   : > { %4654 = vtanh.f32 %v3052_v44  ;;  %v2006_v44 = vmul.f32 %v5317_v42, %v1837_v3  ;;  %v3935_v15 = vor.u32 %v4488_v17, %v3934_v22  ;;  %v3944_v22 = vld [vmem:[%s4937_s22 + $0x238] sm:$0xf0] }
 0x23f   : > { %v5577_v33 = vpop.f32.mrf.mxu3  ;;  %vm2213_vm2 = vcmp.ge.f32.partialorder %v2085_v39, 0.0  ;;  %v2341_v48 = vmul.f32 0.2, %v2085_v39 }
 0x240   : > { %v1377_v57 = vpop.f32.mrf.mxu0  ;;  %v2138_v2 = vadd.f32 %v5327_v58, %v2006_v44 }
 0x241   : > { %v1707_v55 = vadd.f32 %v1706_v29, %v1377_v57  ;;  %v2469_v32 = vsel %vm2213_vm2, %v2085_v39, %v2341_v48  ;;  %v2393_v39 = vmul.f32 0.2, %v2137_v5  ;;  %v1840_v57 = vadd.f32 %v5451_v47, %v5103_v24 }
 0x242   : > { %4338 = vmatmul.msk.f32.gmra.mxu2 %vm2551_vm3, %v2469_v32  ;;  %vm2266_vm9 = vcmp.ge.f32.partialorder %v2138_v2, 0.0 }
 0x243   : > { %v1954_v31 = vmul.f32 %v5317_v42, %v1707_v55  ;;  %v2521_v55 = vsel %vm2265_vm6, %v2137_v5, %v2393_v39  ;;  %v2007_v24 = vmul.f32 %v5317_v42, %v1840_v57  ;;  %v4489_v5 = vld [vmem:[%s4937_s22 + $0x234] sm:$0xf]  ;;  %v5617_v39 = vld [vmem:[%s6164_s2] ss:$0 sm:$0xff] }
 0x244   : > { %v4655_v10 = vpop.eup %4654  ;;  %4389 = vmatmul.msk.f32.gmra.mxu3 %vm2551_vm3, %v2520_v11 }
 0x245   : > { %v1709_v56 = vpop.f32.mrf.mxu1  ;;  %3499 = vst.msk [vmem:[%s5191_s21 + $0x108] sm:$0xff] %vm3465_vm7, %v4655_v10  ;;  %v2086_v25 = vadd.f32 %v5327_v58, %v1954_v31  ;;  %v3055_v29 = vpop.f32.mrf.mxu2  ;;  %v2394_v10 = vmul.f32 0.2, %v2138_v2 }
 0x246   : > { %4656 = vtanh.f32 %v3055_v29  ;;  %v2139_v29 = vadd.f32 %v5327_v58, %v2007_v24 }
 0x247   : > { %v5594_v13 = vpop.f32.mrf.mxu3  ;;  %vm2214_vm5 = vcmp.ge.f32.partialorder %v2086_v25, 0.0  ;;  %v2342_v12 = vmul.f32 0.2, %v2086_v25 }
 0x248   : > { %4258 = vmatmul.msk.bf16.gmra.mxu1 %vm1044_vm1, %v3939_v40  ;;  %v1380_v60 = vpop.f32.mrf.mxu0  ;;  %vm2267_vm11 = vcmp.ge.f32.partialorder %v2139_v29, 0.0 }
 0x249   : > { %v1710_v48 = vadd.f32 %v1709_v56, %v1380_v60  ;;  %v2470_v51 = vsel %vm2214_vm5, %v2086_v25, %v2342_v12  ;;  %v2522_v12 = vsel %vm2266_vm9, %v2138_v2, %v2394_v10 }
 0x24a   : > { %4339 = vmatmul.msk.f32.gmra.mxu2 %vm2551_vm3, %v2470_v51  ;;  %v3942_v51 = vld [vmem:[%s4937_s22 + $0x230] sm:$0xf] }
 0x24b   : > { %v1955_v53 = vmul.f32 %v5317_v42, %v1710_v48  ;;  %1419 = vmatmul.bf16.gmra.mxu0 %v3935_v15  ;;  %v1842_v42 = vadd.f32 %v5465_v36, %v5114_v41  ;;  %v3947_v15 = vor.u32 %v4489_v5, %v3944_v22  ;;  %v5628_v41 = vld [vmem:[%s6165_s3] ss:$0 sm:$0xff] }
 0x24c   : > { %v4657_v32 = vpop.eup %4656  ;;  %4390 = vmatmul.msk.f32.gmra.mxu3 %vm2551_vm3, %v2521_v55 }
 0x24d   : > { %v1711_v3 = vpop.f32.mrf.mxu1  ;;  %3500 = vst.msk [vmem:[%s5191_s21 + $0x110] sm:$0xff] %vm3465_vm7, %v4657_v32  ;;  %v2087_v31 = vadd.f32 %v5327_v58, %v1955_v53  ;;  %v3058_v11 = vpop.f32.mrf.mxu2  ;;  %v4490_v58 = vld [vmem:[%s4937_s22 + $0x234] sm:$0xf0]  ;;  %v2395_v53 = vmul.f32 0.2, %v2139_v29  ;;  %v2008_v2 = vmul.f32 %v5617_v39, %v1842_v42 }
 0x24e   : > { %4658 = vtanh.f32 %v3058_v11 }
 0x24f   : > { %v5606_v47 = vpop.f32.mrf.mxu3  ;;  %vm2215_vm8 = vcmp.ge.f32.partialorder %v2087_v31, 0.0  ;;  %v2343_v40 = vmul.f32 0.2, %v2087_v31  ;;  %v2140_v10 = vadd.f32 %v5628_v41, %v2008_v2  ;;  %v2523_v5 = vsel %vm2267_vm11, %v2139_v29, %v2395_v53 }
 0x250   : > { %v1382_v56 = vpop.f32.mrf.mxu0 }
 0x251   : > { %v1712_v17 = vadd.f32 %v1711_v3, %v1382_v56  ;;  %v2471_v25 = vsel %vm2215_vm8, %v2087_v31, %v2343_v40  ;;  %v3943_v3 = vor.u32 %v4490_v58, %v3942_v51  ;;  %v1845_v40 = vadd.f32 %v5473_v9, %v5120_v54 }
 0x252   : > { %4340 = vmatmul.msk.f32.gmra.mxu2 %vm2551_vm3, %v2471_v25  ;;  %vm2268_vm13 = vcmp.ge.f32.partialorder %v2140_v10, 0.0 }
 0x253   : > { %v1956_v44 = vmul.f32 %v5617_v39, %v1712_v17  ;;  %v2009_v54 = vmul.f32 %v5617_v39, %v1845_v40 }
 0x254   : > { %v4659_v60 = vpop.eup %4658  ;;  %4391 = vmatmul.msk.f32.gmra.mxu3 %vm2551_vm3, %v2522_v12  ;;  %v2396_v12 = vmul.f32 0.2, %v2140_v10 }
 0x255   : > { %v1714_v48 = vpop.f32.mrf.mxu1  ;;  %3501 = vst.msk [vmem:[%s5191_s21 + $0x118] sm:$0xff] %vm3465_vm7, %v4659_v60  ;;  %v2088_v36 = vadd.f32 %v5628_v41, %v1956_v44  ;;  %v3061_v57 = vpop.f32.mrf.mxu2  ;;  %v3952_v60 = vld [vmem:[%s4937_s22 + $0x248] sm:$0xf0]  ;;  %v2141_v58 = vadd.f32 %v5628_v41, %v2009_v54 }
 0x256   : > { %4660 = vtanh.f32 %v3061_v57  ;;  %v2524_v53 = vsel %vm2268_vm13, %v2140_v10, %v2396_v12 }
 0x257   : > { %v5633_v55 = vpop.f32.mrf.mxu3  ;;  %vm2216_vm10 = vcmp.ge.f32.partialorder %v2088_v36, 0.0  ;;  %v2344_v32 = vmul.f32 0.2, %v2088_v36  ;;  %vm2269_vm15 = vcmp.ge.f32.partialorder %v2141_v58, 0.0 }
 0x258   : > { %4259 = vmatmul.msk.bf16.gmra.mxu1 %vm1044_vm1, %v3947_v15  ;;  %v1385_v31 = vpop.f32.mrf.mxu0  ;;  %v4491_v15 = vld [vmem:[%s4937_s22 + $0x244] sm:$0xf] }
 0x259   : > { %v1715_v11 = vadd.f32 %v1714_v48, %v1385_v31  ;;  %v2472_v24 = vsel %vm2216_vm10, %v2088_v36, %v2344_v32  ;;  %v1847_v36 = vadd.f32 %v5487_v63, %v5131_v8  ;;  %v3955_v2 = vor.u32 %v4491_v15, %v3952_v60  ;;  %v3950_v31 = vld [vmem:[%s4937_s22 + $0x240] sm:$0xf] }
 0x25a   : > { %4341 = vmatmul.msk.f32.gmra.mxu2 %vm2551_vm3, %v2472_v24 }
 0x25b   : > { %v1957_v56 = vmul.f32 %v5617_v39, %v1715_v11  ;;  %1424 = vmatmul.bf16.gmra.mxu0 %v3943_v3  ;;  %v4492_v11 = vld [vmem:[%s4937_s22 + $0x244] sm:$0xf0] }
 0x25c   : > { %v4661_v22 = vpop.eup %4660  ;;  %4392 = vmatmul.msk.f32.gmra.mxu3 %vm2551_vm3, %v2523_v5  ;;  %v2010_v5 = vmul.f32 %v5617_v39, %v1847_v36  ;;  %v3951_v10 = vor.u32 %v4492_v11, %v3950_v31  ;;  %v1852_v31 = vadd.f32 %v5509_v30, %v5148_v38 }
 0x25d   : > { %v1716_v17 = vpop.f32.mrf.mxu1  ;;  %3502 = vst.msk [vmem:[%s5191_s21 + $0x120] sm:$0xff] %vm3465_vm7, %v4661_v22  ;;  %v2089_v25 = vadd.f32 %v5628_v41, %v1957_v56  ;;  %v3064_v42 = vpop.f32.mrf.mxu2  ;;  %v2397_v56 = vmul.f32 0.2, %v2141_v58 }
 0x25e   : > { %4662 = vtanh.f32 %v3064_v42  ;;  %v1850_v42 = vadd.f32 %v5495_v37, %v5137_v19  ;;  %v2142_v54 = vadd.f32 %v5628_v41, %v2010_v5 }
 0x25f   : > { %v5645_v9 = vpop.f32.mrf.mxu3  ;;  %vm2217_vm12 = vcmp.ge.f32.partialorder %v2089_v25, 0.0  ;;  %v2345_v44 = vmul.f32 0.2, %v2089_v25  ;;  %v2525_v12 = vsel %vm2269_vm15, %v2141_v58, %v2397_v56 }
 0x260   : > { %v1387_v29 = vpop.f32.mrf.mxu0  ;;  %v2011_v19 = vmul.f32 %v5617_v39, %v1850_v42  ;;  %v2398_v36 = vmul.f32 0.2, %v2142_v54  ;;  %vm2270_vm2 = vcmp.ge.f32.partialorder %v2142_v54, 0.0  ;;  %v2012_v42 = vmul.f32 %v5617_v39, %v1852_v31  ;;  %v3968_v31 = vld [vmem:[%s4937_s22 + $0x268] sm:$0xf0] }
 0x261   : > { %v1717_v48 = vadd.f32 %v1716_v17, %v1387_v29  ;;  %v2473_v51 = vsel %vm2217_vm12, %v2089_v25, %v2345_v44 }
 0x262   : > { %4342 = vmatmul.msk.f32.gmra.mxu2 %vm2551_vm3, %v2473_v51 }
 0x263   : > { %v1958_v57 = vmul.f32 %v5617_v39, %v1717_v48 }
 0x264   : > { %v4663_v32 = vpop.eup %4662  ;;  %4393 = vmatmul.msk.f32.gmra.mxu3 %vm2551_vm3, %v2524_v53  ;;  %v3960_v53 = vld [vmem:[%s4937_s22 + $0x258] sm:$0xf0] }
 0x265   : > { %v1719_v3 = vpop.f32.mrf.mxu1  ;;  %3503 = vst.msk [vmem:[%s5191_s21 + $0x128] sm:$0xff] %vm3465_vm7, %v4663_v32  ;;  %v2090_v24 = vadd.f32 %v5628_v41, %v1958_v57  ;;  %v3067_v40 = vpop.f32.mrf.mxu2  ;;  %v4493_v57 = vld [vmem:[%s4937_s22 + $0x254] sm:$0xf] }
 0x266   : > { %4664 = vtanh.f32 %v3067_v40  ;;  %v3963_v40 = vor.u32 %v4493_v57, %v3960_v53 }
 0x267   : > { %v5662_v8 = vpop.f32.mrf.mxu3  ;;  %vm2218_vm14 = vcmp.ge.f32.partialorder %v2090_v24, 0.0  ;;  %v2346_v63 = vmul.f32 0.2, %v2090_v24 }
 0x268   : > { %4260 = vmatmul.msk.bf16.gmra.mxu1 %vm1044_vm1, %v3955_v2  ;;  %v1390_v22 = vpop.f32.mrf.mxu0 }
 0x269   : > { %v1720_v17 = vadd.f32 %v1719_v3, %v1390_v22  ;;  %v2474_v25 = vsel %vm2218_vm14, %v2090_v24, %v2346_v63  ;;  %v2143_v3 = vadd.f32 %v5628_v41, %v2011_v19  ;;  %v2526_v24 = vsel %vm2270_vm2, %v2142_v54, %v2398_v36  ;;  %v3958_v63 = vld [vmem:[%s4937_s22 + $0x250] sm:$0xf] }
 0x26a   : > { %4343 = vmatmul.msk.f32.gmra.mxu2 %vm2551_vm3, %v2474_v25 }
 0x26b   : > { %v1959_v44 = vmul.f32 %v5617_v39, %v1720_v17  ;;  %1429 = vmatmul.bf16.gmra.mxu0 %v3951_v10  ;;  %v4494_v10 = vld [vmem:[%s4937_s22 + $0x254] sm:$0xf0]  ;;  %v2399_v25 = vmul.f32 0.2, %v2143_v3  ;;  %vm2271_vm5 = vcmp.ge.f32.partialorder %v2143_v3, 0.0 }
 0x26c   : > { %v4665_v29 = vpop.eup %4664  ;;  %4394 = vmatmul.msk.f32.gmra.mxu3 %vm2551_vm3, %v2525_v12  ;;  %v3959_v54 = vor.u32 %v4494_v10, %v3958_v63 }
 0x26d   : > { %v1721_v15 = vpop.f32.mrf.mxu1  ;;  %3504 = vst.msk [vmem:[%s5191_s21 + $0x130] sm:$0xff] %vm3465_vm7, %v4665_v29  ;;  %v2091_v60 = vadd.f32 %v5628_v41, %v1959_v44  ;;  %v3070_v48 = vpop.f32.mrf.mxu2  ;;  %v2527_v19 = vsel %vm2271_vm5, %v2143_v3, %v2399_v25  ;;  %v4495_v3 = vld [vmem:[%s4937_s22 + $0x264] sm:$0xf]  ;;  %v3966_v25 = vld [vmem:[%s4937_s22 + $0x260] sm:$0xf] }
 0x26e   : > { %4666 = vtanh.f32 %v3070_v48  ;;  %v3971_v10 = vor.u32 %v4495_v3, %v3968_v31 }
 0x26f   : > { %v5674_v37 = vpop.f32.mrf.mxu3  ;;  %vm2219_vm0 = vcmp.ge.f32.partialorder %v2091_v60, 0.0  ;;  %v2347_v51 = vmul.f32 0.2, %v2091_v60 }
 0x270   : > { %v1392_v58 = vpop.f32.mrf.mxu0 }
 0x271   : > { %v1722_v2 = vadd.f32 %v1721_v15, %v1392_v58  ;;  %v2475_v32 = vsel %vm2219_vm0, %v2091_v60, %v2347_v51  ;;  %v1855_v15 = vadd.f32 %v5520_v7, %v5154_v52  ;;  %v2144_v60 = vadd.f32 %v5628_v41, %v2012_v42  ;;  %v4496_v42 = vld [vmem:[%s4937_s22 + $0x264] sm:$0xf0] }
 0x272   : > { %4344 = vmatmul.msk.f32.gmra.mxu2 %vm2551_vm3, %v2475_v32 }
 0x273   : > { %v1960_v11 = vmul.f32 %v5617_v39, %v1722_v2  ;;  %v2013_v52 = vmul.f32 %v5617_v39, %v1855_v15  ;;  %v2400_v2 = vmul.f32 0.2, %v2144_v60  ;;  %vm2272_vm8 = vcmp.ge.f32.partialorder %v2144_v60, 0.0 }
 0x274   : > { %v4667_v56 = vpop.eup %4666  ;;  %4395 = vmatmul.msk.f32.gmra.mxu3 %vm2551_vm3, %v2526_v24 }
 0x275   : > { %v1724_v5 = vpop.f32.mrf.mxu1  ;;  %3505 = vst.msk [vmem:[%s5191_s21 + $0x138] sm:$0xff] %vm3465_vm7, %v4667_v56  ;;  %v2092_v22 = vadd.f32 %v5628_v41, %v1960_v11  ;;  %v3073_v17 = vpop.f32.mrf.mxu2  ;;  %v1857_v56 = vadd.f32 %v5536_v21, %v5165_v6  ;;  %v2528_v63 = vsel %vm2272_vm8, %v2144_v60, %v2400_v2 }
 0x276   : > { %4668 = vtanh.f32 %v3073_v17 }
 0x277   : > { %v5691_v38 = vpop.f32.mrf.mxu3  ;;  %vm2220_vm4 = vcmp.ge.f32.partialorder %v2092_v22, 0.0  ;;  %v2348_v30 = vmul.f32 0.2, %v2092_v22 }
 0x278   : > { %4261 = vmatmul.msk.bf16.gmra.mxu1 %vm1044_vm1, %v3963_v40  ;;  %v1395_v44 = vpop.f32.mrf.mxu0  ;;  %v2145_v40 = vadd.f32 %v5628_v41, %v2013_v52 }
 0x279   : > { %v1725_v12 = vadd.f32 %v1724_v5, %v1395_v44  ;;  %v2476_v29 = vsel %vm2220_vm4, %v2092_v22, %v2348_v30 }
 0x27a   : > { %4345 = vmatmul.msk.f32.gmra.mxu2 %vm2551_vm3, %v2476_v29  ;;  %v2401_v44 = vmul.f32 0.2, %v2145_v40  ;;  %v3967_v29 = vor.u32 %v4496_v42, %v3966_v25  ;;  %vm2273_vm10 = vcmp.ge.f32.partialorder %v2145_v40, 0.0 }
 0x27b   : > { %v1961_v48 = vmul.f32 %v5617_v39, %v1725_v12  ;;  %1434 = vmatmul.bf16.gmra.mxu0 %v3959_v54  ;;  %v2014_v12 = vmul.f32 %v5617_v39, %v1857_v56 }
 0x27c   : > { %v4669_v51 = vpop.eup %4668  ;;  %4396 = vmatmul.msk.f32.gmra.mxu3 %vm2551_vm3, %v2527_v19  ;;  %v1860_v19 = vadd.f32 %v5548_v26, %v5172_v20 }
 0x27d   : > { %v1726_v36 = vpop.f32.mrf.mxu1  ;;  %3506 = vst.msk [vmem:[%s5191_s21 + $0x140] sm:$0xff] %vm3465_vm7, %v4669_v51  ;;  %v2093_v58 = vadd.f32 %v5628_v41, %v1961_v48  ;;  %v3076_v57 = vpop.f32.mrf.mxu2  ;;  %v2146_v51 = vadd.f32 %v5628_v41, %v2014_v12 }
 0x27e   : > { %4670 = vtanh.f32 %v3076_v57  ;;  %v2015_v20 = vmul.f32 %v5617_v39, %v1860_v19 }
 0x27f   : > { %v5703_v7 = vpop.f32.mrf.mxu3  ;;  %vm2221_vm6 = vcmp.ge.f32.partialorder %v2093_v58, 0.0  ;;  %v2349_v53 = vmul.f32 0.2, %v2093_v58  ;;  %v2402_v3 = vmul.f32 0.2, %v2146_v51  ;;  %vm2274_vm12 = vcmp.ge.f32.partialorder %v2146_v51, 0.0 }
 0x280   : > { %v1397_v32 = vpop.f32.mrf.mxu0 }
 0x281   : > { %v1727_v11 = vadd.f32 %v1726_v36, %v1397_v32  ;;  %v2477_v24 = vsel %vm2221_vm6, %v2093_v58, %v2349_v53  ;;  %v2529_v58 = vsel %vm2273_vm10, %v2145_v40, %v2401_v44 }
 0x282   : > { %4346 = vmatmul.msk.f32.gmra.mxu2 %vm2551_vm3, %v2477_v24  ;;  %v3976_v24 = vld [vmem:[%s4937_s22 + $0x278] sm:$0xf0] }
 0x283   : > { %v1962_v5 = vmul.f32 %v5617_v39, %v1727_v11  ;;  %v4497_v11 = vld [vmem:[%s4937_s22 + $0x274] sm:$0xf] }
 0x284   : > { %v4671_v22 = vpop.eup %4670  ;;  %4397 = vmatmul.msk.f32.gmra.mxu3 %vm2551_vm3, %v2528_v63  ;;  %v1862_v63 = vadd.f32 %v5565_v50, %v5183_v43 }
 0x285   : > { %v1729_v17 = vpop.f32.mrf.mxu1  ;;  %3507 = vst.msk [vmem:[%s5191_s21 + $0x148] sm:$0xff] %vm3465_vm7, %v4671_v22  ;;  %v2094_v30 = vadd.f32 %v5628_v41, %v1962_v5  ;;  %v3079_v54 = vpop.f32.mrf.mxu2  ;;  %v2147_v5 = vadd.f32 %v5628_v41, %v2015_v20  ;;  %v2530_v22 = vsel %vm2274_vm12, %v2146_v51, %v2402_v3  ;;  %v1865_v51 = vadd.f32 %v5577_v33, %v5199_v59 }
 0x286   : > { %4672 = vtanh.f32 %v3079_v54  ;;  %v4498_v54 = vld [vmem:[%s4937_s22 + $0x274] sm:$0xf0] }
 0x287   : > { %v5720_v6 = vpop.f32.mrf.mxu3  ;;  %vm2222_vm9 = vcmp.ge.f32.partialorder %v2094_v30, 0.0  ;;  %v2350_v21 = vmul.f32 0.2, %v2094_v30  ;;  %vm2275_vm14 = vcmp.ge.f32.partialorder %v2147_v5, 0.0  ;;  %v2017_v59 = vmul.f32 %v5617_v39, %v1865_v51 }
 0x288   : > { %4262 = vmatmul.msk.bf16.gmra.mxu1 %vm1044_vm1, %v3971_v10  ;;  %v1400_v15 = vpop.f32.mrf.mxu0 }
 0x289   : > { %v1730_v60 = vadd.f32 %v1729_v17, %v1400_v15  ;;  %v2478_v48 = vsel %vm2222_vm9, %v2094_v30, %v2350_v21  ;;  %v3979_v17 = vor.u32 %v4497_v11, %v3976_v24  ;;  %v3974_v30 = vld [vmem:[%s4937_s22 + $0x270] sm:$0xf]  ;;  %v2403_v21 = vmul.f32 0.2, %v2147_v5  ;;  %v4499_v11 = vld [vmem:[%s4937_s22 + $0x284] sm:$0xf] }
 0x28a   : > { %4347 = vmatmul.msk.f32.gmra.mxu2 %vm2551_vm3, %v2478_v48  ;;  %v3975_v15 = vor.u32 %v4498_v54, %v3974_v30  ;;  %v3984_v24 = vld [vmem:[%s4937_s22 + $0x288] sm:$0xf0]  ;;  %v3982_v30 = vld [vmem:[%s4937_s22 + $0x280] sm:$0xf]  ;;  %v4500_v54 = vld [vmem:[%s4937_s22 + $0x284] sm:$0xf0] }
 0x28b   : > { %v1963_v36 = vmul.f32 %v5617_v39, %v1730_v60  ;;  %1439 = vmatmul.bf16.gmra.mxu0 %v3967_v29  ;;  %v2016_v29 = vmul.f32 %v5617_v39, %v1862_v63  ;;  %v1867_v63 = vadd.f32 %v5594_v13, %v5212_v18 }
 0x28c   : > { %v4673_v57 = vpop.eup %4672  ;;  %4398 = vmatmul.msk.f32.gmra.mxu3 %vm2551_vm3, %v2529_v58 }
 0x28d   : > { %v1731_v52 = vpop.f32.mrf.mxu1  ;;  %3508 = vst.msk [vmem:[%s5191_s21 + $0x150] sm:$0xff] %vm3465_vm7, %v4673_v57  ;;  %v2095_v53 = vadd.f32 %v5628_v41, %v1963_v36  ;;  %v3082_v2 = vpop.f32.mrf.mxu2  ;;  %v2148_v36 = vadd.f32 %v5628_v41, %v2016_v29  ;;  %v2531_v57 = vsel %vm2275_vm14, %v2147_v5, %v2403_v21  ;;  %v2149_v5 = vadd.f32 %v5628_v41, %v2017_v59 }
 0x28e   : > { %4674 = vtanh.f32 %v3082_v2  ;;  %v2018_v29 = vmul.f32 %v5617_v39, %v1867_v63 }
 0x28f   : > { %v5732_v26 = vpop.f32.mrf.mxu3  ;;  %vm2223_vm11 = vcmp.ge.f32.partialorder %v2095_v53, 0.0  ;;  %v2351_v32 = vmul.f32 0.2, %v2095_v53  ;;  %v2404_v3 = vmul.f32 0.2, %v2148_v36  ;;  %vm2276_vm0 = vcmp.ge.f32.partialorder %v2148_v36, 0.0 }
 0x290   : > { %v1402_v31 = vpop.f32.mrf.mxu0  ;;  %v2405_v21 = vmul.f32 0.2, %v2149_v5  ;;  %vm2277_vm4 = vcmp.ge.f32.partialorder %v2149_v5, 0.0  ;;  %v2150_v51 = vadd.f32 %v5628_v41, %v2018_v29 }
 0x291   : > { %v1732_v40 = vadd.f32 %v1731_v52, %v1402_v31  ;;  %v2479_v56 = vsel %vm2223_vm11, %v2095_v53, %v2351_v32 }
 0x292   : > { %4348 = vmatmul.msk.f32.gmra.mxu2 %vm2551_vm3, %v2479_v56  ;;  %v2406_v59 = vmul.f32 0.2, %v2150_v51  ;;  %vm2278_vm6 = vcmp.ge.f32.partialorder %v2150_v51, 0.0 }
 0x293   : > { %v1964_v10 = vmul.f32 %v5617_v39, %v1732_v40 }
 0x294   : > { %v4675_v25 = vpop.eup %4674  ;;  %4399 = vmatmul.msk.f32.gmra.mxu3 %vm2551_vm3, %v2530_v22  ;;  %v2532_v22 = vsel %vm2276_vm0, %v2148_v36, %v2404_v3  ;;  %v4501_v3 = vld [vmem:[%s4937_s22 + $0x294] sm:$0xf]  ;;  %v2534_v63 = vsel %vm2278_vm6, %v2150_v51, %v2406_v59  ;;  %v4000_v59 = vld [vmem:[%s4937_s22 + $0x2a8] sm:$0xf0] }
 0x295   : > { %v1734_v42 = vpop.f32.mrf.mxu1  ;;  %3509 = vst.msk [vmem:[%s5191_s21 + $0x158] sm:$0xff] %vm3465_vm7, %v4675_v25  ;;  %v2096_v44 = vadd.f32 %v5628_v41, %v1964_v10  ;;  %v3085_v12 = vpop.f32.mrf.mxu2 }
 0x296   : > { %4676 = vtanh.f32 %v3085_v12 }
 0x297   : > { %v5749_v43 = vpop.f32.mrf.mxu3  ;;  %vm2224_vm13 = vcmp.ge.f32.partialorder %v2096_v44, 0.0  ;;  %v2352_v50 = vmul.f32 0.2, %v2096_v44 }
 0x298   : > { %4263 = vmatmul.msk.bf16.gmra.mxu1 %vm1044_vm1, %v3979_v17  ;;  %v1405_v60 = vpop.f32.mrf.mxu0  ;;  %v3987_v17 = vor.u32 %v4499_v11, %v3984_v24 }
 0x299   : > { %v1735_v48 = vadd.f32 %v1734_v42, %v1405_v60  ;;  %v2480_v19 = vsel %vm2224_vm13, %v2096_v44, %v2352_v50  ;;  %v3983_v50 = vor.u32 %v4500_v54, %v3982_v30 }
 0x29a   : > { %4349 = vmatmul.msk.f32.gmra.mxu2 %vm2551_vm3, %v2480_v19  ;;  %v1870_v19 = vadd.f32 %v5606_v47, %v5221_v35 }
 0x29b   : > { %v1965_v58 = vmul.f32 %v5617_v39, %v1735_v48  ;;  %1444 = vmatmul.bf16.gmra.mxu0 %v3975_v15 }
 0x29c   : > { %v4677_v52 = vpop.eup %4676  ;;  %4400 = vmatmul.msk.f32.gmra.mxu3 %vm2551_vm3, %v2531_v57  ;;  %v2019_v35 = vmul.f32 %v5617_v39, %v1870_v19 }
 0x29d   : > { %v1736_v53 = vpop.f32.mrf.mxu1  ;;  %3510 = vst.msk [vmem:[%s5191_s21 + $0x160] sm:$0xff] %vm3465_vm7, %v4677_v52  ;;  %v2097_v2 = vadd.f32 %v5628_v41, %v1965_v58  ;;  %v3088_v20 = vpop.f32.mrf.mxu2  ;;  %v2533_v58 = vsel %vm2277_vm4, %v2149_v5, %v2405_v21 }
 0x29e   : > { %4678 = vtanh.f32 %v3088_v20 }
 0x29f   : > { %v5761_v33 = vpop.f32.mrf.mxu3  ;;  %vm2225_vm15 = vcmp.ge.f32.partialorder %v2097_v2, 0.0  ;;  %v2353_v32 = vmul.f32 0.2, %v2097_v2 }
 0x2a0   : > { %v1407_v31 = vpop.f32.mrf.mxu0 }
 0x2a1   : > { %v1737_v40 = vadd.f32 %v1736_v53, %v1407_v31  ;;  %v2481_v56 = vsel %vm2225_vm15, %v2097_v2, %v2353_v32  ;;  %v3992_v31 = vld [vmem:[%s4937_s22 + $0x298] sm:$0xf0] }
 0x2a2   : > { %4350 = vmatmul.msk.f32.gmra.mxu2 %vm2551_vm3, %v2481_v56  ;;  %v1872_v56 = vadd.f32 %v5633_v55, %v5234_v0 }
 0x2a3   : > { %v1966_v10 = vmul.f32 %v5617_v39, %v1737_v40  ;;  %v2151_v40 = vadd.f32 %v5628_v41, %v2019_v35 }
 0x2a4   : > { %v4679_v25 = vpop.eup %4678  ;;  %4401 = vmatmul.msk.f32.gmra.mxu3 %vm2551_vm3, %v2532_v22  ;;  %v2020_v0 = vmul.f32 %v5617_v39, %v1872_v56 }
 0x2a5   : > { %v1739_v42 = vpop.f32.mrf.mxu1  ;;  %3511 = vst.msk [vmem:[%s5191_s21 + $0x168] sm:$0xff] %vm3465_vm7, %v4679_v25  ;;  %v2098_v44 = vadd.f32 %v5628_v41, %v1966_v10  ;;  %v3091_v12 = vpop.f32.mrf.mxu2  ;;  %v3995_v10 = vor.u32 %v4501_v3, %v3992_v31  ;;  %v3990_v25 = vld [vmem:[%s4937_s22 + $0x290] sm:$0xf]  ;;  %vm2279_vm9 = vcmp.ge.f32.partialorder %v2151_v40, 0.0 }
 0x2a6   : > { %4680 = vtanh.f32 %v3091_v12  ;;  %v2407_v12 = vmul.f32 0.2, %v2151_v40 }
 0x2a7   : > { %v5778_v18 = vpop.f32.mrf.mxu3  ;;  %vm2226_vm2 = vcmp.ge.f32.partialorder %v2098_v44, 0.0  ;;  %v2354_v13 = vmul.f32 0.2, %v2098_v44 }
 0x2a8   : > { %4264 = vmatmul.msk.bf16.gmra.mxu1 %vm1044_vm1, %v3987_v17  ;;  %v1410_v15 = vpop.f32.mrf.mxu0  ;;  %v2535_v51 = vsel %vm2279_vm9, %v2151_v40, %v2407_v12 }
 0x2a9   : > { %v1740_v60 = vadd.f32 %v1739_v42, %v1410_v15  ;;  %v2482_v48 = vsel %vm2226_vm2, %v2098_v44, %v2354_v13  ;;  %v4502_v42 = vld [vmem:[%s4937_s22 + $0x294] sm:$0xf0] }
 0x2aa   : > { %4351 = vmatmul.msk.f32.gmra.mxu2 %vm2551_vm3, %v2482_v48  ;;  %v3991_v29 = vor.u32 %v4502_v42, %v3990_v25  ;;  %v2152_v48 = vadd.f32 %v5628_v41, %v2020_v0 }
 0x2ab   : > { %v1967_v36 = vmul.f32 %v5617_v39, %v1740_v60  ;;  %1449 = vmatmul.bf16.gmra.mxu0 %v3983_v50  ;;  %v1875_v60 = vadd.f32 %v5645_v9, %v5243_v16 }
 0x2ac   : > { %v4681_v57 = vpop.eup %4680  ;;  %4402 = vmatmul.msk.f32.gmra.mxu3 %vm2551_vm3, %v2533_v58  ;;  %v2408_v35 = vmul.f32 0.2, %v2152_v48  ;;  %vm2280_vm11 = vcmp.ge.f32.partialorder %v2152_v48, 0.0 }
 0x2ad   : > { %v1741_v52 = vpop.f32.mrf.mxu1  ;;  %3512 = vst.msk [vmem:[%s5191_s21 + $0x170] sm:$0xff] %vm3465_vm7, %v4681_v57  ;;  %v2099_v53 = vadd.f32 %v5628_v41, %v1967_v36  ;;  %v3094_v2 = vpop.f32.mrf.mxu2  ;;  %v2021_v9 = vmul.f32 %v5617_v39, %v1875_v60 }
 0x2ae   : > { %4682 = vtanh.f32 %v3094_v2  ;;  %v2536_v40 = vsel %vm2280_vm11, %v2152_v48, %v2408_v35  ;;  %v1882_v35 = vadd.f32 %v5691_v38, %v5278_v28 }
 0x2af   : > { %v3247_v47 = vpop.f32.mrf.mxu3  ;;  %vm2227_vm5 = vcmp.ge.f32.partialorder %v2099_v53, 0.0  ;;  %v2355_v20 = vmul.f32 0.2, %v2099_v53  ;;  %v2153_v31 = vadd.f32 %v5628_v41, %v2021_v9 }
 0x2b0   : > { %4684 = vtanh.f32 %v3247_v47  ;;  %v1412_v32 = vpop.f32.mrf.mxu0  ;;  %v2024_v28 = vmul.f32 %v5617_v39, %v1882_v35 }
 0x2b1   : > { %v1742_v11 = vadd.f32 %v1741_v52, %v1412_v32  ;;  %v2483_v24 = vsel %vm2227_vm5, %v2099_v53, %v2355_v20  ;;  %v4503_v20 = vld [vmem:[%s4937_s22 + $0x2a4] sm:$0xf]  ;;  %vm2281_vm13 = vcmp.ge.f32.partialorder %v2153_v31, 0.0 }
 0x2b2   : > { %4352 = vmatmul.msk.f32.gmra.mxu2 %vm2551_vm3, %v2483_v24  ;;  %v4003_v56 = vor.u32 %v4503_v20, %v4000_v59 }
 0x2b3   : > { %v1968_v5 = vmul.f32 %v5617_v39, %v1742_v11  ;;  %v1877_v11 = vadd.f32 %v5662_v8, %v5256_v45 }
 0x2b4   : > { %v4683_v22 = vpop.eup %4682  ;;  %4403 = vmatmul.msk.f32.gmra.mxu3 %vm2551_vm3, %v2534_v63 }
 0x2b5   : > { %v1744_v17 = vpop.f32.mrf.mxu1  ;;  %3513 = vst.msk [vmem:[%s5191_s21 + $0x178] sm:$0xff] %vm3465_vm7, %v4683_v22  ;;  %v2100_v30 = vadd.f32 %v5628_v41, %v1968_v5  ;;  %v3097_v54 = vpop.f32.mrf.mxu2  ;;  %v4504_v22 = vld [vmem:[%s4937_s22 + $0x2a4] sm:$0xf0]  ;;  %v2022_v45 = vmul.f32 %v5617_v39, %v1877_v11  ;;  %v4506_v11 = vld [vmem:[%s4937_s22 + $0x2b4] sm:$0xf0] }
 0x2b6   : > { %v4685_v44 = vpop.eup %4684  ;;  %4686 = vtanh.f32 %v3097_v54 }
 0x2b7   : > { %3564 = vst.msk [vmem:[%s5191_s21 + $0x310] sm:$0xff] %vm3465_vm7, %v4685_v44  ;;  %v3250_v55 = vpop.f32.mrf.mxu3  ;;  %vm2228_vm8 = vcmp.ge.f32.partialorder %v2100_v30, 0.0  ;;  %v2356_v21 = vmul.f32 0.2, %v2100_v30 }
 0x2b8   : > { %4265 = vmatmul.msk.bf16.gmra.mxu1 %vm1044_vm1, %v3995_v10  ;;  %4688 = vtanh.f32 %v3250_v55  ;;  %v1415_v13 = vpop.f32.mrf.mxu0  ;;  %v3998_v10 = vld [vmem:[%s4937_s22 + $0x2a0] sm:$0xf] }
 0x2b9   : > { %v1745_v50 = vadd.f32 %v1744_v17, %v1415_v13  ;;  %v2484_v15 = vsel %vm2228_vm8, %v2100_v30, %v2356_v21  ;;  %v2409_v30 = vmul.f32 0.2, %v2153_v31  ;;  %v3999_v44 = vor.u32 %v4504_v22, %v3998_v10 }
 0x2ba   : > { %4353 = vmatmul.msk.f32.gmra.mxu2 %vm2551_vm3, %v2484_v15  ;;  %v1880_v21 = vadd.f32 %v5674_v37, %v5265_v1 }
 0x2bb   : > { %v1969_v19 = vmul.f32 %v5617_v39, %v1745_v50  ;;  %1454 = vmatmul.bf16.gmra.mxu0 %v3991_v29  ;;  %v2154_v29 = vadd.f32 %v5628_v41, %v2022_v45  ;;  %v2537_v50 = vsel %vm2281_vm13, %v2153_v31, %v2409_v30  ;;  %v4006_v31 = vld [vmem:[%s4937_s22 + $0x2b0] sm:$0xf]  ;;  %v2156_v30 = vadd.f32 %v5628_v41, %v2024_v28 }
 0x2bc   : > { %v4687_v36 = vpop.eup %4686  ;;  %4404 = vmatmul.msk.f32.gmra.mxu3 %vm2551_vm3, %v2535_v51  ;;  %v2023_v37 = vmul.f32 %v5617_v39, %v1880_v21  ;;  %v4007_v10 = vor.u32 %v4506_v11, %v4006_v31  ;;  %v1890_v31 = vadd.f32 %v5732_v26, %v5309_v34 }
 0x2bd   : > { %v1746_v58 = vpop.f32.mrf.mxu1  ;;  %3514 = vst.msk [vmem:[%s5191_s21 + $0x180] sm:$0xff] %vm3465_vm7, %v4687_v36  ;;  %v2101_v57 = vadd.f32 %v5628_v41, %v1969_v19  ;;  %v3100_v52 = vpop.f32.mrf.mxu2  ;;  %vm2282_vm15 = vcmp.ge.f32.partialorder %v2154_v29, 0.0  ;;  %vm2284_vm5 = vcmp.ge.f32.partialorder %v2156_v30, 0.0 }
 0x2be   : > { %v4689_v16 = vpop.eup %4688  ;;  %4690 = vtanh.f32 %v3100_v52  ;;  %v4505_v52 = vld [vmem:[%s4937_s22 + $0x2b4] sm:$0xf]  ;;  %v2027_v26 = vmul.f32 %v5617_v39, %v1890_v31  ;;  %v1897_v31 = vadd.f32 %v5778_v18, %v5354_v62 }
 0x2bf   : > { %3565 = vst.msk [vmem:[%s5191_s21 + $0x318] sm:$0xff] %vm3465_vm7, %v4689_v16  ;;  %v3253_v53 = vpop.f32.mrf.mxu3  ;;  %vm2229_vm10 = vcmp.ge.f32.partialorder %v2101_v57, 0.0  ;;  %v2357_v2 = vmul.f32 0.2, %v2101_v57  ;;  %v4008_v16 = vld [vmem:[%s4937_s22 + $0x2b8] sm:$0xf0] }
 0x2c0   : > { %4692 = vtanh.f32 %v3253_v53  ;;  %v1417_v47 = vpop.f32.mrf.mxu0  ;;  %v4011_v59 = vor.u32 %v4505_v52, %v4008_v16  ;;  %v4014_v52 = vld [vmem:[%s4937_s22 + $0x2c0] sm:$0xf]  ;;  %v4508_v16 = vld [vmem:[%s4937_s22 + $0x2c4] sm:$0xf0] }
 0x2c1   : > { %v1747_v32 = vadd.f32 %v1746_v58, %v1417_v47  ;;  %v2485_v3 = vsel %vm2229_vm10, %v2101_v57, %v2357_v2  ;;  %v2410_v58 = vmul.f32 0.2, %v2154_v29  ;;  %v2155_v2 = vadd.f32 %v5628_v41, %v2023_v37 }
 0x2c2   : > { %4354 = vmatmul.msk.f32.gmra.mxu2 %vm2551_vm3, %v2485_v3 }
 0x2c3   : > { %v1970_v24 = vmul.f32 %v5617_v39, %v1747_v32  ;;  %v2538_v20 = vsel %vm2282_vm15, %v2154_v29, %v2410_v58  ;;  %vm2283_vm2 = vcmp.ge.f32.partialorder %v2155_v2, 0.0  ;;  %v2412_v29 = vmul.f32 0.2, %v2156_v30 }
 0x2c4   : > { %v4691_v5 = vpop.eup %4690  ;;  %4405 = vmatmul.msk.f32.gmra.mxu3 %vm2551_vm3, %v2536_v40 }
 0x2c5   : > { %v1749_v63 = vpop.f32.mrf.mxu1  ;;  %3515 = vst.msk [vmem:[%s5191_s21 + $0x188] sm:$0xff] %vm3465_vm7, %v4691_v5  ;;  %v2102_v17 = vadd.f32 %v5628_v41, %v1970_v24  ;;  %v3103_v25 = vpop.f32.mrf.mxu2  ;;  %v2411_v5 = vmul.f32 0.2, %v2155_v2 }
 0x2c6   : > { %v4693_v42 = vpop.eup %4692  ;;  %4694 = vtanh.f32 %v3103_v25 }
 0x2c7   : > { %3566 = vst.msk [vmem:[%s5191_s21 + $0x320] sm:$0xff] %vm3465_vm7, %v4693_v42  ;;  %v3256_v8 = vpop.f32.mrf.mxu3  ;;  %vm2230_vm12 = vcmp.ge.f32.partialorder %v2102_v17, 0.0  ;;  %v2358_v54 = vmul.f32 0.2, %v2102_v17  ;;  %v1885_v42 = vadd.f32 %v5703_v7, %v5287_v49 }
 0x2c8   : > { %4266 = vmatmul.msk.bf16.gmra.mxu1 %vm1044_vm1, %v4003_v56  ;;  %4696 = vtanh.f32 %v3256_v8  ;;  %v1420_v12 = vpop.f32.mrf.mxu0  ;;  %v2539_v8 = vsel %vm2283_vm2, %v2155_v2, %v2411_v5 }
 0x2c9   : > { %v1750_v0 = vadd.f32 %v1749_v63, %v1420_v12  ;;  %v2486_v55 = vsel %vm2230_vm12, %v2102_v17, %v2358_v54  ;;  %v2025_v7 = vmul.f32 %v5617_v39, %v1885_v42  ;;  %v4024_v42 = vld [vmem:[%s4937_s22 + $0x2d8] sm:$0xf0] }
 0x2ca   : > { %4355 = vmatmul.msk.f32.gmra.mxu2 %vm2551_vm3, %v2486_v55 }
 0x2cb   : > { %v1971_v13 = vmul.f32 %v5617_v39, %v1750_v0  ;;  %1459 = vmatmul.bf16.gmra.mxu0 %v3999_v44 }
 0x2cc   : > { %v4695_v15 = vpop.eup %4694  ;;  %4406 = vmatmul.msk.f32.gmra.mxu3 %vm2551_vm3, %v2537_v50  ;;  %v4507_v50 = vld [vmem:[%s4937_s22 + $0x2c4] sm:$0xf] }
 0x2cd   : > { %v1751_v60 = vpop.f32.mrf.mxu1  ;;  %3516 = vst.msk [vmem:[%s5191_s21 + $0x190] sm:$0xff] %vm3465_vm7, %v4695_v15  ;;  %v2103_v48 = vadd.f32 %v5628_v41, %v1971_v13  ;;  %v3106_v19 = vpop.f32.mrf.mxu2  ;;  %v4016_v15 = vld [vmem:[%s4937_s22 + $0x2c8] sm:$0xf0] }
 0x2ce   : > { %v4697_v1 = vpop.eup %4696  ;;  %4698 = vtanh.f32 %v3106_v19  ;;  %v2157_v19 = vadd.f32 %v5628_v41, %v2025_v7 }
 0x2cf   : > { %3567 = vst.msk [vmem:[%s5191_s21 + $0x328] sm:$0xff] %vm3465_vm7, %v4697_v1  ;;  %v3259_v51 = vpop.f32.mrf.mxu3  ;;  %vm2231_vm14 = vcmp.ge.f32.partialorder %v2103_v48, 0.0  ;;  %v2359_v36 = vmul.f32 0.2, %v2103_v48  ;;  %v1887_v1 = vadd.f32 %v5720_v6, %v5300_v14 }
 0x2d0   : > { %4700 = vtanh.f32 %v3259_v51  ;;  %v1422_v57 = vpop.f32.mrf.mxu0  ;;  %v2540_v51 = vsel %vm2284_vm5, %v2156_v30, %v2412_v29  ;;  %v2413_v35 = vmul.f32 0.2, %v2157_v19  ;;  %vm2285_vm8 = vcmp.ge.f32.partialorder %v2157_v19, 0.0 }
 0x2d1   : > { %v1752_v9 = vadd.f32 %v1751_v60, %v1422_v57  ;;  %v2487_v53 = vsel %vm2231_vm14, %v2103_v48, %v2359_v36  ;;  %v4019_v36 = vor.u32 %v4507_v50, %v4016_v15  ;;  %v2026_v14 = vmul.f32 %v5617_v39, %v1887_v1 }
 0x2d2   : > { %4356 = vmatmul.msk.f32.gmra.mxu2 %vm2551_vm3, %v2487_v53 }
 0x2d3   : > { %v1972_v47 = vmul.f32 %v5617_v39, %v1752_v9  ;;  %v2158_v11 = vadd.f32 %v5628_v41, %v2026_v14 }
 0x2d4   : > { %v4699_v32 = vpop.eup %4698  ;;  %4407 = vmatmul.msk.f32.gmra.mxu3 %vm2551_vm3, %v2538_v20  ;;  %v4015_v20 = vor.u32 %v4508_v16, %v4014_v52 }
 0x2d5   : > { %v1754_v3 = vpop.f32.mrf.mxu1  ;;  %3517 = vst.msk [vmem:[%s5191_s21 + $0x198] sm:$0xff] %vm3465_vm7, %v4699_v32  ;;  %v2104_v24 = vadd.f32 %v5628_v41, %v1972_v47  ;;  %v3109_v40 = vpop.f32.mrf.mxu2  ;;  %vm2286_vm10 = vcmp.ge.f32.partialorder %v2158_v11, 0.0 }
 0x2d6   : > { %v4701_v56 = vpop.eup %4700  ;;  %4702 = vtanh.f32 %v3109_v40  ;;  %v2541_v40 = vsel %vm2285_vm8, %v2157_v19, %v2413_v35 }
 0x2d7   : > { %3568 = vst.msk [vmem:[%s5191_s21 + $0x330] sm:$0xff] %vm3465_vm7, %v4701_v56  ;;  %v3262_v38 = vpop.f32.mrf.mxu3  ;;  %vm2232_vm0 = vcmp.ge.f32.partialorder %v2104_v24, 0.0  ;;  %v2360_v63 = vmul.f32 0.2, %v2104_v24 }
 0x2d8   : > { %4267 = vmatmul.msk.bf16.gmra.mxu1 %vm1044_vm1, %v4011_v59  ;;  %4704 = vtanh.f32 %v3262_v38  ;;  %v1425_v22 = vpop.f32.mrf.mxu0 }
 0x2d9   : > { %v1755_v17 = vadd.f32 %v1754_v3, %v1425_v22  ;;  %v2488_v25 = vsel %vm2232_vm0, %v2104_v24, %v2360_v63  ;;  %v2414_v22 = vmul.f32 0.2, %v2158_v11 }
 0x2da   : > { %4357 = vmatmul.msk.f32.gmra.mxu2 %vm2551_vm3, %v2488_v25  ;;  %v4509_v25 = vld [vmem:[%s4937_s22 + $0x2d4] sm:$0xf] }
 0x2db   : > { %v1973_v45 = vmul.f32 %v5617_v39, %v1755_v17  ;;  %1464 = vmatmul.bf16.gmra.mxu0 %v4007_v10 }
 0x2dc   : > { %v4703_v54 = vpop.eup %4702  ;;  %4408 = vmatmul.msk.f32.gmra.mxu3 %vm2551_vm3, %v2539_v8  ;;  %v1892_v8 = vadd.f32 %v5749_v43, %v5332_v4 }
 0x2dd   : > { %v1756_v44 = vpop.f32.mrf.mxu1  ;;  %3518 = vst.msk [vmem:[%s5191_s21 + $0x1a0] sm:$0xff] %vm3465_vm7, %v4703_v54  ;;  %v2105_v12 = vadd.f32 %v5628_v41, %v1973_v45  ;;  %v3112_v0 = vpop.f32.mrf.mxu2  ;;  %v5920_v54 = vld [vmem:[%s6164_s2] ss:$0 sm:$0xff] }
 0x2de   : > { %v4705_v49 = vpop.eup %4704  ;;  %4706 = vtanh.f32 %v3112_v0  ;;  %v4027_v0 = vor.u32 %v4509_v25, %v4024_v42  ;;  %v2028_v50 = vmul.f32 %v5920_v54, %v1892_v8  ;;  %v2030_v62 = vmul.f32 %v5920_v54, %v1897_v31 }
 0x2df   : > { %3569 = vst.msk [vmem:[%s5191_s21 + $0x338] sm:$0xff] %vm3465_vm7, %v4705_v49  ;;  %v3265_v55 = vpop.f32.mrf.mxu3  ;;  %vm2233_vm4 = vcmp.ge.f32.partialorder %v2105_v12, 0.0  ;;  %v2361_v21 = vmul.f32 0.2, %v2105_v12 }
 0x2e0   : > { %4708 = vtanh.f32 %v3265_v55  ;;  %v1427_v13 = vpop.f32.mrf.mxu0  ;;  %v4022_v55 = vld [vmem:[%s4937_s22 + $0x2d0] sm:$0xf] }
 0x2e1   : > { %v1757_v60 = vadd.f32 %v1756_v44, %v1427_v13  ;;  %v2489_v48 = vsel %vm2233_vm4, %v2105_v12, %v2361_v21  ;;  %v2542_v12 = vsel %vm2286_vm10, %v2158_v11, %v2414_v22  ;;  %v4510_v21 = vld [vmem:[%s4937_s22 + $0x2d4] sm:$0xf0] }
 0x2e2   : > { %4358 = vmatmul.msk.f32.gmra.mxu2 %vm2551_vm3, %v2489_v48  ;;  %v4023_v48 = vor.u32 %v4510_v21, %v4022_v55 }
 0x2e3   : > { %v1974_v37 = vmul.f32 %v5617_v39, %v1757_v60 }
 0x2e4   : > { %v4707_v58 = vpop.eup %4706  ;;  %4409 = vmatmul.msk.f32.gmra.mxu3 %vm2551_vm3, %v2540_v51  ;;  %v1895_v51 = vadd.f32 %v5761_v33, %v5341_v27 }
 0x2e5   : > { %v1759_v57 = vpop.f32.mrf.mxu1  ;;  %3519 = vst.msk [vmem:[%s5191_s21 + $0x1a8] sm:$0xff] %vm3465_vm7, %v4707_v58  ;;  %v2106_v9 = vadd.f32 %v5628_v41, %v1974_v37  ;;  %v3115_v53 = vpop.f32.mrf.mxu2 }
 0x2e6   : > { %v4709_v2 = vpop.eup %4708  ;;  %4710 = vtanh.f32 %v3115_v53  ;;  %v2029_v33 = vmul.f32 %v5920_v54, %v1895_v51  ;;  %v4038_v51 = vld [vmem:[%s4937_s22 + $0x2f0] sm:$0xf] }
 0x2e7   : > { %3570 = vst.msk [vmem:[%s5191_s21 + $0x340] sm:$0xff] %vm3465_vm7, %v4709_v2  ;;  %v3268_v6 = vpop.f32.mrf.mxu3  ;;  %vm2234_vm6 = vcmp.ge.f32.partialorder %v2106_v9, 0.0  ;;  %v2362_v47 = vmul.f32 0.2, %v2106_v9 }
 0x2e8   : > { %4268 = vmatmul.msk.bf16.gmra.mxu1 %vm1044_vm1, %v4019_v36  ;;  %4712 = vtanh.f32 %v3268_v6  ;;  %v1430_v59 = vpop.f32.mrf.mxu0 }
 0x2e9   : > { %v1760_v32 = vadd.f32 %v1759_v57, %v1430_v59  ;;  %v2490_v3 = vsel %vm2234_vm6, %v2106_v9, %v2362_v47  ;;  %v4511_v47 = vld [vmem:[%s4937_s22 + $0x2e4] sm:$0xf] }
 0x2ea   : > { %4359 = vmatmul.msk.f32.gmra.mxu2 %vm2551_vm3, %v2490_v3 }
 0x2eb   : > { %v1975_v24 = vmul.f32 %v5617_v39, %v1760_v32  ;;  %1469 = vmatmul.bf16.gmra.mxu0 %v4015_v20  ;;  %v5911_v39 = vld [vmem:[%s6165_s3] ss:$0 sm:$0xff]  ;;  %v4032_v20 = vld [vmem:[%s4937_s22 + $0x2e8] sm:$0xf0] }
 0x2ec   : > { %v4711_v56 = vpop.eup %4710  ;;  %4410 = vmatmul.msk.f32.gmra.mxu3 %vm2551_vm3, %v2541_v40  ;;  %v2159_v45 = vadd.f32 %v5911_v39, %v2027_v26  ;;  %v2160_v36 = vadd.f32 %v5911_v39, %v2028_v50  ;;  %v2161_v3 = vadd.f32 %v5911_v39, %v2029_v33  ;;  %v4035_v40 = vor.u32 %v4511_v47, %v4032_v20 }
 0x2ed   : > { %v1761_v5 = vpop.f32.mrf.mxu1  ;;  %3520 = vst.msk [vmem:[%s5191_s21 + $0x1b0] sm:$0xff] %vm3465_vm7, %v4711_v56  ;;  %v2107_v28 = vadd.f32 %v5628_v41, %v1975_v24  ;;  %v3118_v38 = vpop.f32.mrf.mxu2 }
 0x2ee   : > { %v4713_v34 = vpop.eup %4712  ;;  %4714 = vtanh.f32 %v3118_v38  ;;  %v2415_v13 = vmul.f32 0.2, %v2159_v45  ;;  %vm2287_vm12 = vcmp.ge.f32.partialorder %v2159_v45, 0.0  ;;  %v2416_v14 = vmul.f32 0.2, %v2160_v36 }
 0x2ef   : > { %3571 = vst.msk [vmem:[%s5191_s21 + $0x348] sm:$0xff] %vm3465_vm7, %v4713_v34  ;;  %v3271_v63 = vpop.f32.mrf.mxu3  ;;  %vm2235_vm9 = vcmp.ge.f32.partialorder %v2107_v28, 0.0  ;;  %v2363_v10 = vmul.f32 0.2, %v2107_v28  ;;  %vm2288_vm14 = vcmp.ge.f32.partialorder %v2160_v36, 0.0  ;;  %vm2289_vm0 = vcmp.ge.f32.partialorder %v2161_v3, 0.0 }
 0x2f0   : > { %4716 = vtanh.f32 %v3271_v63  ;;  %v1432_v17 = vpop.f32.mrf.mxu0  ;;  %v2543_v57 = vsel %vm2287_vm12, %v2159_v45, %v2415_v13  ;;  %v2544_v24 = vsel %vm2288_vm14, %v2160_v36, %v2416_v14  ;;  %v4512_v38 = vld [vmem:[%s4937_s22 + $0x2e4] sm:$0xf0]  ;;  %v4040_v13 = vld [vmem:[%s4937_s22 + $0x2f8] sm:$0xf0]  ;;  %v4514_v36 = vld [vmem:[%s4937_s22 + $0x2f4] sm:$0xf0] }
 0x2f1   : > { %v1762_v41 = vadd.f32 %v1761_v5, %v1432_v17  ;;  %v2491_v30 = vsel %vm2235_vm9, %v2107_v28, %v2363_v10  ;;  %v4030_v28 = vld [vmem:[%s4937_s22 + $0x2e0] sm:$0xf]  ;;  %v2417_v10 = vmul.f32 0.2, %v2161_v3 }
 0x2f2   : > { %4360 = vmatmul.msk.f32.gmra.mxu2 %vm2551_vm3, %v2491_v30  ;;  %v4031_v17 = vor.u32 %v4512_v38, %v4030_v28  ;;  %v2162_v30 = vadd.f32 %v5911_v39, %v2030_v62 }
 0x2f3   : > { %v1976_v44 = vmul.f32 %v5920_v54, %v1762_v41  ;;  %v2545_v8 = vsel %vm2289_vm0, %v2161_v3, %v2417_v10 }
 0x2f4   : > { %v4715_v49 = vpop.eup %4714  ;;  %4411 = vmatmul.msk.f32.gmra.mxu3 %vm2551_vm3, %v2542_v12  ;;  %vm2290_vm4 = vcmp.ge.f32.partialorder %v2162_v30, 0.0 }
 0x2f5   : > { %v1764_v7 = vpop.f32.mrf.mxu1  ;;  %3521 = vst.msk [vmem:[%s5191_s21 + $0x1b8] sm:$0xff] %vm3465_vm7, %v4715_v49  ;;  %v2108_v4 = vadd.f32 %v5911_v39, %v1976_v44  ;;  %v3121_v43 = vpop.f32.mrf.mxu2 }
 0x2f6   : > { %v4717_v29 = vpop.eup %4716  ;;  %4718 = vtanh.f32 %v3121_v43 }
 0x2f7   : > { %3572 = vst.msk [vmem:[%s5191_s21 + $0x350] sm:$0xff] %vm3465_vm7, %v4717_v29  ;;  %v3274_v15 = vpop.f32.mrf.mxu3  ;;  %vm2236_vm11 = vcmp.ge.f32.partialorder %v2108_v4, 0.0  ;;  %v2364_v60 = vmul.f32 0.2, %v2108_v4  ;;  %v4513_v29 = vld [vmem:[%s4937_s22 + $0x2f4] sm:$0xf] }
 0x2f8   : > { %4269 = vmatmul.msk.bf16.gmra.mxu1 %vm1044_vm1, %v4027_v0  ;;  %4720 = vtanh.f32 %v3274_v15  ;;  %v1435_v19 = vpop.f32.mrf.mxu0 }
 0x2f9   : > { %v1765_v1 = vadd.f32 %v1764_v7, %v1435_v19  ;;  %v2492_v37 = vsel %vm2236_vm11, %v2108_v4, %v2364_v60  ;;  %v2418_v4 = vmul.f32 0.2, %v2162_v30  ;;  %v4043_v19 = vor.u32 %v4513_v29, %v4040_v13 }
 0x2fa   : > { %4361 = vmatmul.msk.f32.gmra.mxu2 %vm2551_vm3, %v2492_v37 }
 0x2fb   : > { %v1977_v58 = vmul.f32 %v5920_v54, %v1765_v1  ;;  %1474 = vmatmul.bf16.gmra.mxu0 %v4023_v48  ;;  %v2546_v48 = vsel %vm2290_vm4, %v2162_v30, %v2418_v4 }
 0x2fc   : > { %v4719_v52 = vpop.eup %4718  ;;  %4412 = vmatmul.msk.f32.gmra.mxu3 %vm2551_vm3, %v2543_v57 }
 0x2fd   : > { %v1766_v16 = vpop.f32.mrf.mxu1  ;;  %3522 = vst.msk [vmem:[%s5191_s21 + $0x1c0] sm:$0xff] %vm3465_vm7, %v4719_v52  ;;  %v2109_v9 = vadd.f32 %v5911_v39, %v1977_v58  ;;  %v3124_v53 = vpop.f32.mrf.mxu2 }
 0x2fe   : > { %v4721_v27 = vpop.eup %4720  ;;  %4722 = vtanh.f32 %v3124_v53  ;;  %v4039_v53 = vor.u32 %v4514_v36, %v4038_v51 }
 0x2ff   : > { %3573 = vst.msk [vmem:[%s5191_s21 + $0x358] sm:$0xff] %vm3465_vm7, %v4721_v27  ;;  %v3277_v2 = vpop.f32.mrf.mxu3  ;;  %vm2237_vm13 = vcmp.ge.f32.partialorder %v2109_v9, 0.0  ;;  %v2365_v35 = vmul.f32 0.2, %v2109_v9 }
 0x300   : > { %4724 = vtanh.f32 %v3277_v2  ;;  %v1437_v6 = vpop.f32.mrf.mxu0 }
 0x301   : > { %v1767_v59 = vadd.f32 %v1766_v16, %v1437_v6  ;;  %v2493_v32 = vsel %vm2237_vm13, %v2109_v9, %v2365_v35 }
 0x302   : > { %4362 = vmatmul.msk.f32.gmra.mxu2 %vm2551_vm3, %v2493_v32 }
 0x303   : > { %v1978_v11 = vmul.f32 %v5920_v54, %v1767_v59 }
 0x304   : > { %v4723_v56 = vpop.eup %4722  ;;  %4413 = vmatmul.msk.f32.gmra.mxu3 %vm2551_vm3, %v2544_v24 }
 0x305   : > { %v1769_v5 = vpop.f32.mrf.mxu1  ;;  %3523 = vst.msk [vmem:[%s5191_s21 + $0x1c8] sm:$0xff] %vm3465_vm7, %v4723_v56  ;;  %v2110_v34 = vadd.f32 %v5911_v39, %v1978_v11  ;;  %v3127_v26 = vpop.f32.mrf.mxu2 }
 0x306   : > { %v4725_v63 = vpop.eup %4724  ;;  %4726 = vtanh.f32 %v3127_v26 }
 0x307   : > { %3574 = vst.msk [vmem:[%s5191_s21 + $0x360] sm:$0xff] %vm3465_vm7, %v4725_v63  ;;  %v3280_v18 = vpop.f32.mrf.mxu3  ;;  %vm2238_vm15 = vcmp.ge.f32.partialorder %v2110_v34, 0.0  ;;  %v2366_v22 = vmul.f32 0.2, %v2110_v34 }
 0x308   : > { %4270 = vmatmul.msk.bf16.gmra.mxu1 %vm1044_vm1, %v4035_v40  ;;  %4728 = vtanh.f32 %v3280_v18  ;;  %v1440_v25 = vpop.f32.mrf.mxu0 }
 0x309   : > { %v1770_v42 = vadd.f32 %v1769_v5, %v1440_v25  ;;  %v2494_v41 = vsel %vm2238_vm15, %v2110_v34, %v2366_v22 }
 0x30a   : > { %4363 = vmatmul.msk.f32.gmra.mxu2 %vm2551_vm3, %v2494_v41 }
 0x30b   : > { %v1979_v45 = vmul.f32 %v5920_v54, %v1770_v42  ;;  %1479 = vmatmul.bf16.gmra.mxu0 %v4031_v17 }
 0x30c   : > { %v4727_v44 = vpop.eup %4726  ;;  %4414 = vmatmul.msk.f32.gmra.mxu3 %vm2551_vm3, %v2545_v8 }
 0x30d   : > { %v1771_v12 = vpop.f32.mrf.mxu1  ;;  %3524 = vst.msk [vmem:[%s5191_s21 + $0x1d0] sm:$0xff] %vm3465_vm7, %v4727_v44  ;;  %v2111_v0 = vadd.f32 %v5911_v39, %v1979_v45  ;;  %v3130_v49 = vpop.f32.mrf.mxu2 }
 0x30e   : > { %v4729_v7 = vpop.eup %4728  ;;  %4730 = vtanh.f32 %v3130_v49 }
 0x30f   : > { %3575 = vst.msk [vmem:[%s5191_s21 + $0x368] sm:$0xff] %vm3465_vm7, %v4729_v7  ;;  %v3283_v55 = vpop.f32.mrf.mxu3  ;;  %vm2239_vm2 = vcmp.ge.f32.partialorder %v2111_v0, 0.0  ;;  %v2367_v21 = vmul.f32 0.2, %v2111_v0 }
 0x310   : > { %4732 = vtanh.f32 %v3283_v55  ;;  %v1442_v43 = vpop.f32.mrf.mxu0 }
 0x311   : > { %v1772_v50 = vadd.f32 %v1771_v12, %v1442_v43  ;;  %v2495_v15 = vsel %vm2239_vm2, %v2111_v0, %v2367_v21 }
 0x312   : > { %4364 = vmatmul.msk.f32.gmra.mxu2 %vm2551_vm3, %v2495_v15 }
 0x313   : > { %v1980_v60 = vmul.f32 %v5920_v54, %v1772_v50 }
 0x314   : > { %v4731_v1 = vpop.eup %4730  ;;  %4415 = vmatmul.msk.f32.gmra.mxu3 %vm2551_vm3, %v2546_v48 }
 0x315   : > { %v1774_v37 = vpop.f32.mrf.mxu1  ;;  %3525 = vst.msk [vmem:[%s5191_s21 + $0x1d8] sm:$0xff] %vm3465_vm7, %v4731_v1  ;;  %v2112_v58 = vadd.f32 %v5911_v39, %v1980_v60  ;;  %v3133_v57 = vpop.f32.mrf.mxu2 }
 0x316   : > { %v4733_v52 = vpop.eup %4732  ;;  %4734 = vtanh.f32 %v3133_v57 }
 0x317   : > { %3576 = vst.msk [vmem:[%s5191_s21 + $0x370] sm:$0xff] %vm3465_vm7, %v4733_v52  ;;  %v3286_v16 = vpop.f32.mrf.mxu3  ;;  %vm2240_vm5 = vcmp.ge.f32.partialorder %v2112_v58, 0.0  ;;  %v2368_v9 = vmul.f32 0.2, %v2112_v58 }
 0x318   : > { %4271 = vmatmul.msk.bf16.gmra.mxu1 %vm1044_vm1, %v4043_v19  ;;  %4736 = vtanh.f32 %v3286_v16  ;;  %v1445_v27 = vpop.f32.mrf.mxu0 }
 0x319   : > { %v1775_v33 = vadd.f32 %v1774_v37, %v1445_v27  ;;  %v2496_v2 = vsel %vm2240_vm5, %v2112_v58, %v2368_v9 }
 0x31a   : > { %4365 = vmatmul.msk.f32.gmra.mxu2 %vm2551_vm3, %v2496_v2 }
 0x31b   : > { %v1981_v35 = vmul.f32 %v5920_v54, %v1775_v33  ;;  %1484 = vmatmul.bf16.gmra.mxu0 %v4039_v53 }
 0x31c   : > { %v4735_v14 = vpop.eup %4734 }
 0x31d   : > { %v1776_v6 = vpop.f32.mrf.mxu1  ;;  %3526 = vst.msk [vmem:[%s5191_s21 + $0x1e0] sm:$0xff] %vm3465_vm7, %v4735_v14  ;;  %v2113_v47 = vadd.f32 %v5911_v39, %v1981_v35  ;;  %v3136_v20 = vpop.f32.mrf.mxu2 }
 0x31e   : > { %v4737_v59 = vpop.eup %4736  ;;  %4738 = vtanh.f32 %v3136_v20 }
 0x31f   : > { %3577 = vst.msk [vmem:[%s5191_s21 + $0x378] sm:$0xff] %vm3465_vm7, %v4737_v59  ;;  %v3289_v32 = vpop.f32.mrf.mxu3  ;;  %vm2241_vm1 = vcmp.ge.f32.partialorder %v2113_v47, 0.0  ;;  %v2369_v3 = vmul.f32 0.2, %v2113_v47 }
 0x320   : > { %4740 = vtanh.f32 %v3289_v32  ;;  %v1447_v31 = vpop.f32.mrf.mxu0 }
 0x321   : > { %v1777_v11 = vadd.f32 %v1776_v6, %v1447_v31  ;;  %v2497_v24 = vsel %vm2241_vm1, %v2113_v47, %v2369_v3 }
 0x322   : > { %4366 = vmatmul.msk.f32.gmra.mxu2 %vm2551_vm3, %v2497_v24 }
 0x323   : > { %v1982_v40 = vmul.f32 %v5920_v54, %v1777_v11 }
 0x324   : > { %v4739_v56 = vpop.eup %4738 }
 0x325   : > { %v1779_v5 = vpop.f32.mrf.mxu1  ;;  %3527 = vst.msk [vmem:[%s5191_s21 + $0x1e8] sm:$0xff] %vm3465_vm7, %v4739_v56  ;;  %v2114_v28 = vadd.f32 %v5911_v39, %v1982_v40  ;;  %v3139_v38 = vpop.f32.mrf.mxu2 }
 0x326   : > { %v4741_v34 = vpop.eup %4740  ;;  %4742 = vtanh.f32 %v3139_v38 }
 0x327   : > { %3578 = vst.msk [vmem:[%s5191_s21 + $0x380] sm:$0xff] %vm3465_vm7, %v4741_v34  ;;  %v3292_v26 = vpop.f32.mrf.mxu3  ;;  %vm2242_vm6 = vcmp.ge.f32.partialorder %v2114_v28, 0.0  ;;  %v2370_v63 = vmul.f32 0.2, %v2114_v28 }
 0x328   : > { %4744 = vtanh.f32 %v3292_v26  ;;  %v1450_v10 = vpop.f32.mrf.mxu0 }
 0x329   : > { %v1780_v62 = vadd.f32 %v1779_v5, %v1450_v10  ;;  %v2498_v18 = vsel %vm2242_vm6, %v2114_v28, %v2370_v63 }
 0x32a   : > { %4367 = vmatmul.msk.f32.gmra.mxu2 %vm2551_vm3, %v2498_v18 }
 0x32b   : > { %v1983_v22 = vmul.f32 %v5920_v54, %v1780_v62 }
 0x32c   : > { %v4743_v17 = vpop.eup %4742 }
 0x32d   : > { %v1781_v25 = vpop.f32.mrf.mxu1  ;;  %3528 = vst.msk [vmem:[%s5191_s21 + $0x1f0] sm:$0xff] %vm3465_vm7, %v4743_v17  ;;  %v2115_v42 = vadd.f32 %v5911_v39, %v1983_v22  ;;  %v3142_v41 = vpop.f32.mrf.mxu2 }
 0x32e   : > { %v4745_v30 = vpop.eup %4744  ;;  %4746 = vtanh.f32 %v3142_v41 }
 0x32f   : > { %3579 = vst.msk [vmem:[%s5191_s21 + $0x388] sm:$0xff] %vm3465_vm7, %v4745_v30  ;;  %v3295_v45 = vpop.f32.mrf.mxu3  ;;  %vm2243_vm8 = vcmp.ge.f32.partialorder %v2115_v42, 0.0  ;;  %v2371_v8 = vmul.f32 0.2, %v2115_v42 }
 0x330   : > { %4748 = vtanh.f32 %v3295_v45  ;;  %v1452_v44 = vpop.f32.mrf.mxu0 }
 0x331   : > { %v1782_v12 = vadd.f32 %v1781_v25, %v1452_v44  ;;  %v2499_v0 = vsel %vm2243_vm8, %v2115_v42, %v2371_v8 }
 0x332   : > { %4368 = vmatmul.msk.f32.gmra.mxu2 %vm2551_vm3, %v2499_v0 }
 0x333   : > { %v1984_v49 = vmul.f32 %v5920_v54, %v1782_v12 }
 0x334   : > { %v4747_v7 = vpop.eup %4746 }
 0x335   : > { %v1784_v55 = vpop.f32.mrf.mxu1  ;;  %3529 = vst.msk [vmem:[%s5191_s21 + $0x1f8] sm:$0xff] %vm3465_vm7, %v4747_v7  ;;  %v2116_v21 = vadd.f32 %v5911_v39, %v1984_v49  ;;  %v3145_v4 = vpop.f32.mrf.mxu2 }
 0x336   : > { %v4749_v43 = vpop.eup %4748  ;;  %4750 = vtanh.f32 %v3145_v4 }
 0x337   : > { %3580 = vst.msk [vmem:[%s5191_s21 + $0x390] sm:$0xff] %vm3465_vm7, %v4749_v43  ;;  %v3298_v29 = vpop.f32.mrf.mxu3  ;;  %vm2244_vm9 = vcmp.ge.f32.partialorder %v2116_v21, 0.0  ;;  %v2372_v13 = vmul.f32 0.2, %v2116_v21 }
 0x338   : > { %4752 = vtanh.f32 %v3298_v29  ;;  %v1455_v50 = vpop.f32.mrf.mxu0 }
 0x339   : > { %v1785_v15 = vadd.f32 %v1784_v55, %v1455_v50  ;;  %v2500_v60 = vsel %vm2244_vm9, %v2116_v21, %v2372_v13 }
 0x33a   : > { %4369 = vmatmul.msk.f32.gmra.mxu2 %vm2551_vm3, %v2500_v60 }
 0x33b   : > { %v1985_v48 = vmul.f32 %v5920_v54, %v1785_v15 }
 0x33c   : > { %v4751_v19 = vpop.eup %4750 }
 0x33d   : > { %v1786_v1 = vpop.f32.mrf.mxu1  ;;  %3530 = vst.msk [vmem:[%s5191_s21 + $0x200] sm:$0xff] %vm3465_vm7, %v4751_v19  ;;  %v2117_v37 = vadd.f32 %v5911_v39, %v1985_v48  ;;  %v3148_v51 = vpop.f32.mrf.mxu2 }
 0x33e   : > { %v4753_v36 = vpop.eup %4752  ;;  %4754 = vtanh.f32 %v3148_v51 }
 0x33f   : > { %3581 = vst.msk [vmem:[%s5191_s21 + $0x398] sm:$0xff] %vm3465_vm7, %v4753_v36  ;;  %v3301_v58 = vpop.f32.mrf.mxu3  ;;  %vm2245_vm10 = vcmp.ge.f32.partialorder %v2117_v37, 0.0  ;;  %v2373_v57 = vmul.f32 0.2, %v2117_v37 }
 0x340   : > { %4756 = vtanh.f32 %v3301_v58  ;;  %v1457_v52 = vpop.f32.mrf.mxu0 }
 0x341   : > { %v1787_v16 = vadd.f32 %v1786_v1, %v1457_v52  ;;  %v2501_v9 = vsel %vm2245_vm10, %v2117_v37, %v2373_v57 }
 0x342   : > { %4370 = vmatmul.msk.f32.gmra.mxu2 %vm2551_vm3, %v2501_v9 }
 0x343   : > { %v1986_v53 = vmul.f32 %v5920_v54, %v1787_v16 }
 0x344   : > { %v4755_v27 = vpop.eup %4754 }
 0x345   : > { %v1789_v33 = vpop.f32.mrf.mxu1  ;;  %3531 = vst.msk [vmem:[%s5191_s21 + $0x208] sm:$0xff] %vm3465_vm7, %v4755_v27  ;;  %v2118_v2 = vadd.f32 %v5911_v39, %v1986_v53  ;;  %v3151_v35 = vpop.f32.mrf.mxu2 }
 0x346   : > { %v4757_v14 = vpop.eup %4756  ;;  %4758 = vtanh.f32 %v3151_v35 }
 0x347   : > { %3582 = vst.msk [vmem:[%s5191_s21 + $0x3a0] sm:$0xff] %vm3465_vm7, %v4757_v14  ;;  %v3304_v6 = vpop.f32.mrf.mxu3  ;;  %vm2246_vm11 = vcmp.ge.f32.partialorder %v2118_v2, 0.0  ;;  %v2374_v47 = vmul.f32 0.2, %v2118_v2 }
 0x348   : > { %4760 = vtanh.f32 %v3304_v6  ;;  %v1460_v20 = vpop.f32.mrf.mxu0 }
 0x349   : > { %v1790_v59 = vadd.f32 %v1789_v33, %v1460_v20  ;;  %v2502_v32 = vsel %vm2246_vm11, %v2118_v2, %v2374_v47 }
 0x34a   : > { %4371 = vmatmul.msk.f32.gmra.mxu2 %vm2551_vm3, %v2502_v32 }
 0x34b   : > { %v1987_v3 = vmul.f32 %v5920_v54, %v1790_v59 }
 0x34c   : > { %v4759_v31 = vpop.eup %4758 }
 0x34d   : > { %v1791_v11 = vpop.f32.mrf.mxu1  ;;  %3532 = vst.msk [vmem:[%s5191_s21 + $0x210] sm:$0xff] %vm3465_vm7, %v4759_v31  ;;  %v2119_v24 = vadd.f32 %v5911_v39, %v1987_v3  ;;  %v3154_v40 = vpop.f32.mrf.mxu2 }
 0x34e   : > { %v4761_v56 = vpop.eup %4760  ;;  %4762 = vtanh.f32 %v3154_v40 }
 0x34f   : > { %3583 = vst.msk [vmem:[%s5191_s21 + $0x3a8] sm:$0xff] %vm3465_vm7, %v4761_v56  ;;  %v3307_v5 = vpop.f32.mrf.mxu3  ;;  %vm2247_vm12 = vcmp.ge.f32.partialorder %v2119_v24, 0.0  ;;  %v2375_v28 = vmul.f32 0.2, %v2119_v24 }
 0x350   : > { %4764 = vtanh.f32 %v3307_v5  ;;  %v1462_v38 = vpop.f32.mrf.mxu0 }
 0x351   : > { %v1792_v34 = vadd.f32 %v1791_v11, %v1462_v38  ;;  %v2503_v26 = vsel %vm2247_vm12, %v2119_v24, %v2375_v28 }
 0x352   : > { %4372 = vmatmul.msk.f32.gmra.mxu2 %vm2551_vm3, %v2503_v26 }
 0x353   : > { %v1988_v63 = vmul.f32 %v5920_v54, %v1792_v34 }
 0x354   : > { %v4763_v10 = vpop.eup %4762 }
 0x355   : > { %v1794_v62 = vpop.f32.mrf.mxu1  ;;  %3533 = vst.msk [vmem:[%s5191_s21 + $0x218] sm:$0xff] %vm3465_vm7, %v4763_v10  ;;  %v2120_v18 = vadd.f32 %v5911_v39, %v1988_v63  ;;  %v3157_v22 = vpop.f32.mrf.mxu2 }
 0x356   : > { %v4765_v17 = vpop.eup %4764  ;;  %4766 = vtanh.f32 %v3157_v22 }
 0x357   : > { %3584 = vst.msk [vmem:[%s5191_s21 + $0x3b0] sm:$0xff] %vm3465_vm7, %v4765_v17  ;;  %v3310_v25 = vpop.f32.mrf.mxu3  ;;  %vm2248_vm13 = vcmp.ge.f32.partialorder %v2120_v18, 0.0  ;;  %v2376_v42 = vmul.f32 0.2, %v2120_v18 }
 0x358   : > { %4768 = vtanh.f32 %v3310_v25  ;;  %v1465_v41 = vpop.f32.mrf.mxu0 }
 0x359   : > { %v1795_v30 = vadd.f32 %v1794_v62, %v1465_v41  ;;  %v2504_v45 = vsel %vm2248_vm13, %v2120_v18, %v2376_v42 }
 0x35a   : > { %4373 = vmatmul.msk.f32.gmra.mxu2 %vm2551_vm3, %v2504_v45 }
 0x35b   : > { %v1989_v8 = vmul.f32 %v5920_v54, %v1795_v30 }
 0x35c   : > { %v4767_v44 = vpop.eup %4766 }
 0x35d   : > { %v1796_v12 = vpop.f32.mrf.mxu1  ;;  %3534 = vst.msk [vmem:[%s5191_s21 + $0x220] sm:$0xff] %vm3465_vm7, %v4767_v44  ;;  %v2121_v0 = vadd.f32 %v5911_v39, %v1989_v8  ;;  %v3160_v49 = vpop.f32.mrf.mxu2 }
 0x35e   : > { %v4769_v7 = vpop.eup %4768  ;;  %4770 = vtanh.f32 %v3160_v49 }
 0x35f   : > { %3585 = vst.msk [vmem:[%s5191_s21 + $0x3b8] sm:$0xff] %vm3465_vm7, %v4769_v7  ;;  %v3313_v55 = vpop.f32.mrf.mxu3  ;;  %vm2249_vm14 = vcmp.ge.f32.partialorder %v2121_v0, 0.0  ;;  %v2377_v21 = vmul.f32 0.2, %v2121_v0 }
 0x360   : > { %4772 = vtanh.f32 %v3313_v55  ;;  %v1467_v4 = vpop.f32.mrf.mxu0 }
 0x361   : > { %v1797_v43 = vadd.f32 %v1796_v12, %v1467_v4  ;;  %v2505_v29 = vsel %vm2249_vm14, %v2121_v0, %v2377_v21 }
 0x362   : > { %4374 = vmatmul.msk.f32.gmra.mxu2 %vm2551_vm3, %v2505_v29 }
 0x363   : > { %v1990_v13 = vmul.f32 %v5920_v54, %v1797_v43 }
 0x364   : > { %v4771_v50 = vpop.eup %4770 }
 0x365   : > { %v1799_v15 = vpop.f32.mrf.mxu1  ;;  %3535 = vst.msk [vmem:[%s5191_s21 + $0x228] sm:$0xff] %vm3465_vm7, %v4771_v50  ;;  %v2122_v60 = vadd.f32 %v5911_v39, %v1990_v13  ;;  %v3163_v48 = vpop.f32.mrf.mxu2 }
 0x366   : > { %v4773_v19 = vpop.eup %4772  ;;  %4774 = vtanh.f32 %v3163_v48 }
 0x367   : > { %3586 = vst.msk [vmem:[%s5191_s21 + $0x3c0] sm:$0xff] %vm3465_vm7, %v4773_v19  ;;  %v3316_v1 = vpop.f32.mrf.mxu3  ;;  %vm2250_vm15 = vcmp.ge.f32.partialorder %v2122_v60, 0.0  ;;  %v2378_v37 = vmul.f32 0.2, %v2122_v60 }
 0x368   : > { %4776 = vtanh.f32 %v3316_v1  ;;  %v1470_v51 = vpop.f32.mrf.mxu0 }
 0x369   : > { %v1800_v36 = vadd.f32 %v1799_v15, %v1470_v51  ;;  %v2506_v58 = vsel %vm2250_vm15, %v2122_v60, %v2378_v37 }
 0x36a   : > { %4375 = vmatmul.msk.f32.gmra.mxu2 %vm2551_vm3, %v2506_v58 }
 0x36b   : > { %v1991_v57 = vmul.f32 %v5920_v54, %v1800_v36 }
 0x36c   : > { %v4775_v52 = vpop.eup %4774 }
 0x36d   : > { %v1801_v16 = vpop.f32.mrf.mxu1  ;;  %3536 = vst.msk [vmem:[%s5191_s21 + $0x230] sm:$0xff] %vm3465_vm7, %v4775_v52  ;;  %v2123_v9 = vadd.f32 %v5911_v39, %v1991_v57  ;;  %v3166_v53 = vpop.f32.mrf.mxu2 }
 0x36e   : > { %v4777_v27 = vpop.eup %4776  ;;  %4778 = vtanh.f32 %v3166_v53 }
 0x36f   : > { %3587 = vst.msk [vmem:[%s5191_s21 + $0x3c8] sm:$0xff] %vm3465_vm7, %v4777_v27  ;;  %v3319_v33 = vpop.f32.mrf.mxu3  ;;  %vm2251_vm0 = vcmp.ge.f32.partialorder %v2123_v9, 0.0  ;;  %v2379_v2 = vmul.f32 0.2, %v2123_v9 }
 0x370   : > { %4780 = vtanh.f32 %v3319_v33  ;;  %v1472_v35 = vpop.f32.mrf.mxu0 }
 0x371   : > { %v1802_v14 = vadd.f32 %v1801_v16, %v1472_v35  ;;  %v2507_v6 = vsel %vm2251_vm0, %v2123_v9, %v2379_v2 }
 0x372   : > { %4376 = vmatmul.msk.f32.gmra.mxu2 %vm2551_vm3, %v2507_v6 }
 0x373   : > { %v1992_v47 = vmul.f32 %v5920_v54, %v1802_v14 }
 0x374   : > { %v4779_v20 = vpop.eup %4778 }
 0x375   : > { %v1804_v59 = vpop.f32.mrf.mxu1  ;;  %3537 = vst.msk [vmem:[%s5191_s21 + $0x238] sm:$0xff] %vm3465_vm7, %v4779_v20  ;;  %v2124_v32 = vadd.f32 %v5911_v39, %v1992_v47  ;;  %v3169_v3 = vpop.f32.mrf.mxu2 }
 0x376   : > { %v4781_v31 = vpop.eup %4780  ;;  %4782 = vtanh.f32 %v3169_v3  ;;  %v1820_v3 = vadd.f32 %v5363_v23, %v5035_v46  ;;  %v6169_v23 = vld [vmem:[#allocation2_spill] sm:$0xff] }
 0x377   : > { %3588 = vst.msk [vmem:[%s5191_s21 + $0x3d0] sm:$0xff] %vm3465_vm7, %v4781_v31  ;;  %v3322_v11 = vpop.f32.mrf.mxu3  ;;  %vm2252_vm2 = vcmp.ge.f32.partialorder %v2124_v32, 0.0  ;;  %v2380_v24 = vmul.f32 0.2, %v2124_v32 }
 0x378   : > { %4784 = vtanh.f32 %v3322_v11  ;;  %v1475_v40 = vpop.f32.mrf.mxu0 }
 0x379   : > { %v1805_v56 = vadd.f32 %v1804_v59, %v1475_v40  ;;  %v2508_v5 = vsel %vm2252_vm2, %v2124_v32, %v2380_v24 }
 0x37a   : > { %4377 = vmatmul.msk.f32.gmra.mxu2 %vm2551_vm3, %v2508_v5 }
 0x37b   : > { %v1993_v28 = vmul.f32 %v5920_v54, %v1805_v56  ;;  %v1999_v56 = vmul.f32 %v5920_v54, %v1820_v3 }
 0x37c   : > { %v4783_v38 = vpop.eup %4782 }
 0x37d   : > { %v1806_v34 = vpop.f32.mrf.mxu1  ;;  %3538 = vst.msk [vmem:[%s5191_s21 + $0x240] sm:$0xff] %vm3465_vm7, %v4783_v38  ;;  %v2125_v26 = vadd.f32 %v5911_v39, %v1993_v28  ;;  %v3172_v63 = vpop.f32.mrf.mxu2  ;;  %v2131_v46 = vadd.f32 %v5911_v39, %v1999_v56 }
 0x37e   : > { %v4785_v10 = vpop.eup %4784  ;;  %4786 = vtanh.f32 %v3172_v63 }
 0x37f   : > { %3589 = vst.msk [vmem:[%s5191_s21 + $0x3d8] sm:$0xff] %vm3465_vm7, %v4785_v10  ;;  %v3325_v62 = vpop.f32.mrf.mxu3  ;;  %vm2253_vm4 = vcmp.ge.f32.partialorder %v2125_v26, 0.0  ;;  %v2381_v18 = vmul.f32 0.2, %v2125_v26  ;;  %vm2259_vm10 = vcmp.ge.f32.partialorder %v2131_v46, 0.0 }
 0x380   : > { %4788 = vtanh.f32 %v3325_v62  ;;  %v1477_v22 = vpop.f32.mrf.mxu0 }
 0x381   : > { %v1807_v17 = vadd.f32 %v1806_v34, %v1477_v22  ;;  %v2509_v25 = vsel %vm2253_vm4, %v2125_v26, %v2381_v18  ;;  %v1822_v34 = vadd.f32 %v6169_v23, %v5046_v61  ;;  %v2387_v18 = vmul.f32 0.2, %v2131_v46 }
 0x382   : > { %4378 = vmatmul.msk.f32.gmra.mxu2 %vm2551_vm3, %v2509_v25 }
 0x383   : > { %v1994_v42 = vmul.f32 %v5920_v54, %v1807_v17  ;;  %v2000_v10 = vmul.f32 %v5920_v54, %v1822_v34  ;;  %v2515_v17 = vsel %vm2259_vm10, %v2131_v46, %v2387_v18 }
 0x384   : > { %v4787_v41 = vpop.eup %4786 }
 0x385   : > { %v1809_v30 = vpop.f32.mrf.mxu1  ;;  %3539 = vst.msk [vmem:[%s5191_s21 + $0x248] sm:$0xff] %vm3465_vm7, %v4787_v41  ;;  %v2126_v45 = vadd.f32 %v5911_v39, %v1994_v42  ;;  %v3175_v8 = vpop.f32.mrf.mxu2  ;;  %v2132_v22 = vadd.f32 %v5911_v39, %v2000_v10 }
 0x386   : > { %v4789_v44 = vpop.eup %4788  ;;  %4790 = vtanh.f32 %v3175_v8 }
 0x387   : > { %3590 = vst.msk [vmem:[%s5191_s21 + $0x3e0] sm:$0xff] %vm3465_vm7, %v4789_v44  ;;  %v3328_v12 = vpop.f32.mrf.mxu3  ;;  %vm2254_vm5 = vcmp.ge.f32.partialorder %v2126_v45, 0.0  ;;  %v2382_v0 = vmul.f32 0.2, %v2126_v45  ;;  %v2388_v42 = vmul.f32 0.2, %v2132_v22 }
 0x388   : > { %4792 = vtanh.f32 %v3328_v12  ;;  %v1480_v49 = vpop.f32.mrf.mxu0  ;;  %vm2260_vm11 = vcmp.ge.f32.partialorder %v2132_v22, 0.0 }
 0x389   : > { %v1810_v7 = vadd.f32 %v1809_v30, %v1480_v49  ;;  %v2510_v55 = vsel %vm2254_vm5, %v2126_v45, %v2382_v0 }
 0x38a   : > { %4379 = vmatmul.msk.f32.gmra.mxu2 %vm2551_vm3, %v2510_v55 }
 0x38b   : > { %v1995_v21 = vmul.f32 %v5920_v54, %v1810_v7 }
 0x38c   : > { %v4791_v4 = vpop.eup %4790 }
 0x38d   : > { %v1811_v43 = vpop.f32.mrf.mxu1  ;;  %3540 = vst.msk [vmem:[%s5191_s21 + $0x250] sm:$0xff] %vm3465_vm7, %v4791_v4  ;;  %v2127_v29 = vadd.f32 %v5911_v39, %v1995_v21  ;;  %v3178_v13 = vpop.f32.mrf.mxu2 }
 0x38e   : > { %v4793_v50 = vpop.eup %4792  ;;  %4794 = vtanh.f32 %v3178_v13 }
 0x38f   : > { %3591 = vst.msk [vmem:[%s5191_s21 + $0x3e8] sm:$0xff] %vm3465_vm7, %v4793_v50  ;;  %v3331_v15 = vpop.f32.mrf.mxu3  ;;  %vm2255_vm1 = vcmp.ge.f32.partialorder %v2127_v29, 0.0  ;;  %v2383_v60 = vmul.f32 0.2, %v2127_v29 }
 0x390   : > { %4796 = vtanh.f32 %v3331_v15  ;;  %v1482_v48 = vpop.f32.mrf.mxu0 }
 0x391   : > { %v1812_v19 = vadd.f32 %v1811_v43, %v1482_v48  ;;  %v2511_v1 = vsel %vm2255_vm1, %v2127_v29, %v2383_v60 }
 0x392   : > { %4380 = vmatmul.msk.f32.gmra.mxu2 %vm2551_vm3, %v2511_v1 }
 0x393   : > { %v1996_v37 = vmul.f32 %v5920_v54, %v1812_v19 }
 0x394   : > { %v4795_v51 = vpop.eup %4794 }
 0x395   : > { %3541 = vst.msk [vmem:[%s5191_s21 + $0x258] sm:$0xff] %vm3465_vm7, %v4795_v51  ;;  %v2128_v36 = vadd.f32 %v5911_v39, %v1996_v37  ;;  %v3181_v58 = vpop.f32.mrf.mxu2  ;;  %v1814_v52 = vpop.f32.mrf.mxu1 }
 0x396   : > { %v4797_v57 = vpop.eup %4796  ;;  %4798 = vtanh.f32 %v3181_v58 }
 0x397   : > { %3592 = vst.msk [vmem:[%s5191_s21 + $0x3f0] sm:$0xff] %vm3465_vm7, %v4797_v57  ;;  %v3334_v16 = vpop.f32.mrf.mxu3  ;;  %vm2256_vm6 = vcmp.ge.f32.partialorder %v2128_v36, 0.0  ;;  %v2384_v9 = vmul.f32 0.2, %v2128_v36 }
 0x398   : > { %4800 = vtanh.f32 %v3334_v16  ;;  %v1485_v53 = vpop.f32.mrf.mxu0 }
 0x399   : > { %v1815_v27 = vadd.f32 %v1814_v52, %v1485_v53  ;;  %v2512_v33 = vsel %vm2256_vm6, %v2128_v36, %v2384_v9 }
 0x39a   : > { %4381 = vmatmul.msk.f32.gmra.mxu2 %vm2551_vm3, %v2512_v33 }
 0x39b   : > { %v1997_v2 = vmul.f32 %v5920_v54, %v1815_v27 }
 0x39c   : > { %v4799_v35 = vpop.eup %4798 }
 0x39d   : > { %3542 = vst.msk [vmem:[%s5191_s21 + $0x260] sm:$0xff] %vm3465_vm7, %v4799_v35  ;;  %v2129_v14 = vadd.f32 %v5911_v39, %v1997_v2  ;;  %v3184_v6 = vpop.f32.mrf.mxu2  ;;  %v1816_v59 = vpop.f32.mrf.mxu1 }
 0x39e   : > { %v4801_v47 = vpop.eup %4800  ;;  %4802 = vtanh.f32 %v3184_v6 }
 0x39f   : > { %3593 = vst.msk [vmem:[%s5191_s21 + $0x3f8] sm:$0xff] %vm3465_vm7, %v4801_v47  ;;  %vm2257_vm8 = vcmp.ge.f32.partialorder %v2129_v14, 0.0  ;;  %v2385_v20 = vmul.f32 0.2, %v2129_v14 }
 0x3a0   : > { %v1487_v32 = vpop.f32.mrf.mxu0 }
 0x3a1   : > { %v1817_v31 = vadd.f32 %v1816_v59, %v1487_v32  ;;  %v2513_v11 = vsel %vm2257_vm8, %v2129_v14, %v2385_v20 }
 0x3a2   : > { %4382 = vmatmul.msk.f32.gmra.mxu2 %vm2551_vm3, %v2513_v11 }
 0x3a3   : > { %v1998_v24 = vmul.f32 %v5920_v54, %v1817_v31  ;;  %v2516_v54 = vsel %vm2260_vm11, %v2132_v22, %v2388_v42 }
 0x3a4   : > { %v4803_v40 = vpop.eup %4802 }
 0x3a5   : > { %3543 = vst.msk [vmem:[%s5191_s21 + $0x268] sm:$0xff] %vm3465_vm7, %v4803_v40  ;;  %v2130_v5 = vadd.f32 %v5911_v39, %v1998_v24  ;;  %v3187_v28 = vpop.f32.mrf.mxu2 }
 0x3a6   : > { %4804 = vtanh.f32 %v3187_v28 }
 0x3a7   : > { %vm2258_vm9 = vcmp.ge.f32.partialorder %v2130_v5, 0.0  ;;  %v2386_v38 = vmul.f32 0.2, %v2130_v5 }
 0x3a9   : > { %v2514_v26 = vsel %vm2258_vm9, %v2130_v5, %v2386_v38 }
 0x3aa   : > { %4383 = vmatmul.msk.f32.gmra.mxu2 %vm2551_vm3, %v2514_v26 }
 0x3ac   : > { %v4805_v63 = vpop.eup %4804 }
 0x3ad   : > { %3544 = vst.msk [vmem:[%s5191_s21 + $0x270] sm:$0xff] %vm3465_vm7, %v4805_v63  ;;  %v3190_v62 = vpop.f32.mrf.mxu2 }
 0x3ae   : > { %4806 = vtanh.f32 %v3190_v62 }
 0x3b2   : > { %4384 = vmatmul.msk.f32.gmra.mxu2 %vm2551_vm3, %v2515_v17 }
 0x3b4   : > { %v4807_v61 = vpop.eup %4806 }
 0x3b5   : > { %3545 = vst.msk [vmem:[%s5191_s21 + $0x278] sm:$0xff] %vm3465_vm7, %v4807_v61  ;;  %v3193_v25 = vpop.f32.mrf.mxu2 }
 0x3b6   : > { %4808 = vtanh.f32 %v3193_v25 }
 0x3ba   : > { %4385 = vmatmul.msk.f32.gmra.mxu2 %vm2551_vm3, %v2516_v54 }
 0x3bc   : > { %v4809_v41 = vpop.eup %4808 }
 0x3bd   : > { %3546 = vst.msk [vmem:[%s5191_s21 + $0x280] sm:$0xff] %vm3465_vm7, %v4809_v41  ;;  %v3196_v39 = vpop.f32.mrf.mxu2 }
 0x3be   : > { %4810 = vtanh.f32 %v3196_v39 }
 0x3c4   : > { %v4811_v30 = vpop.eup %4810 }
 0x3c5   : > { %3547 = vst.msk [vmem:[%s5191_s21 + $0x288] sm:$0xff] %vm3465_vm7, %v4811_v30  ;;  %v3199_v45 = vpop.f32.mrf.mxu2 }
 0x3c6   : > { %4812 = vtanh.f32 %v3199_v45 }
 0x3cc   : > { %v4813_v8 = vpop.eup %4812 }
 0x3cd   : > { %3548 = vst.msk [vmem:[%s5191_s21 + $0x290] sm:$0xff] %vm3465_vm7, %v4813_v8  ;;  %v3202_v44 = vpop.f32.mrf.mxu2 }
 0x3ce   : > { %4814 = vtanh.f32 %v3202_v44 }
 0x3d4   : > { %v4815_v12 = vpop.eup %4814 }
 0x3d5   : > { %3549 = vst.msk [vmem:[%s5191_s21 + $0x298] sm:$0xff] %vm3465_vm7, %v4815_v12  ;;  %v3205_v0 = vpop.f32.mrf.mxu2 }
 0x3d6   : > { %4816 = vtanh.f32 %v3205_v0 }
 0x3dc   : > { %v4817_v49 = vpop.eup %4816 }
 0x3dd   : > { %3550 = vst.msk [vmem:[%s5191_s21 + $0x2a0] sm:$0xff] %vm3465_vm7, %v4817_v49  ;;  %v3208_v7 = vpop.f32.mrf.mxu2 }
 0x3de   : > { %4818 = vtanh.f32 %v3208_v7 }
 0x3e4   : > { %v4819_v55 = vpop.eup %4818 }
 0x3e5   : > { %3551 = vst.msk [vmem:[%s5191_s21 + $0x2a8] sm:$0xff] %vm3465_vm7, %v4819_v55  ;;  %v3211_v21 = vpop.f32.mrf.mxu2 }
 0x3e6   : > { %4820 = vtanh.f32 %v3211_v21 }
 0x3ec   : > { %v4821_v4 = vpop.eup %4820 }
 0x3ed   : > { %3552 = vst.msk [vmem:[%s5191_s21 + $0x2b0] sm:$0xff] %vm3465_vm7, %v4821_v4  ;;  %v3214_v43 = vpop.f32.mrf.mxu2 }
 0x3ee   : > { %4822 = vtanh.f32 %v3214_v43 }
 0x3f4   : > { %v4823_v29 = vpop.eup %4822 }
 0x3f5   : > { %3553 = vst.msk [vmem:[%s5191_s21 + $0x2b8] sm:$0xff] %vm3465_vm7, %v4823_v29  ;;  %v3217_v13 = vpop.f32.mrf.mxu2 }
 0x3f6   : > { %4824 = vtanh.f32 %v3217_v13 }
 0x3fc   : > { %v4825_v50 = vpop.eup %4824 }
 0x3fd   : > { %3554 = vst.msk [vmem:[%s5191_s21 + $0x2c0] sm:$0xff] %vm3465_vm7, %v4825_v50  ;;  %v3220_v15 = vpop.f32.mrf.mxu2 }
 0x3fe   : > { %4826 = vtanh.f32 %v3220_v15 }
 0x404   : > { %v4827_v60 = vpop.eup %4826 }
 0x405   : > { %3555 = vst.msk [vmem:[%s5191_s21 + $0x2c8] sm:$0xff] %vm3465_vm7, %v4827_v60  ;;  %v3223_v48 = vpop.f32.mrf.mxu2 }
 0x406   : > { %4828 = vtanh.f32 %v3223_v48 }
 0x40c   : > { %v4829_v19 = vpop.eup %4828 }
 0x40d   : > { %3556 = vst.msk [vmem:[%s5191_s21 + $0x2d0] sm:$0xff] %vm3465_vm7, %v4829_v19  ;;  %v3226_v1 = vpop.f32.mrf.mxu2 }
 0x40e   : > { %4830 = vtanh.f32 %v3226_v1 }
 0x414   : > { %v4831_v37 = vpop.eup %4830 }
 0x415   : > { %3557 = vst.msk [vmem:[%s5191_s21 + $0x2d8] sm:$0xff] %vm3465_vm7, %v4831_v37  ;;  %v3229_v51 = vpop.f32.mrf.mxu2 }
 0x416   : > { %4832 = vtanh.f32 %v3229_v51 }
 0x41c   : > { %v4833_v36 = vpop.eup %4832 }
 0x41d   : > { %3558 = vst.msk [vmem:[%s5191_s21 + $0x2e0] sm:$0xff] %vm3465_vm7, %v4833_v36  ;;  %v3232_v58 = vpop.f32.mrf.mxu2 }
 0x41e   : > { %4834 = vtanh.f32 %v3232_v58 }
 0x424   : > { %v4835_v57 = vpop.eup %4834 }
 0x425   : > { %3559 = vst.msk [vmem:[%s5191_s21 + $0x2e8] sm:$0xff] %vm3465_vm7, %v4835_v57  ;;  %v3235_v52 = vpop.f32.mrf.mxu2 }
 0x426   : > { %4836 = vtanh.f32 %v3235_v52 }
 0x42c   : > { %v4837_v16 = vpop.eup %4836 }
 0x42d   : > { %3560 = vst.msk [vmem:[%s5191_s21 + $0x2f0] sm:$0xff] %vm3465_vm7, %v4837_v16  ;;  %v3238_v9 = vpop.f32.mrf.mxu2 }
 0x42e   : > { %4838 = vtanh.f32 %v3238_v9 }
 0x434   : > { %v4839_v53 = vpop.eup %4838 }
 0x435   : > { %3561 = vst.msk [vmem:[%s5191_s21 + $0x2f8] sm:$0xff] %vm3465_vm7, %v4839_v53  ;;  %v3241_v27 = vpop.f32.mrf.mxu2 }
 0x436   : > { %4840 = vtanh.f32 %v3241_v27 }
 0x43c   : > { %v4841_v33 = vpop.eup %4840 }
 0x43d   : > { %3562 = vst.msk [vmem:[%s5191_s21 + $0x300] sm:$0xff] %vm3465_vm7, %v4841_v33  ;;  %v3244_v2 = vpop.f32.mrf.mxu2 }
 0x43e   : > { %4842 = vtanh.f32 %v3244_v2 }
 0x444   : > { %v4843_v35 = vpop.eup %4842 }
 0x445   : > { %3563 = vst.msk [vmem:[%s5191_s21 + $0x308] sm:$0xff] %vm3465_vm7, %v4843_v35 }
 0x446 PF: > { %s15_s18 = sadd.s32 1, %s4856_s18  }
 0x447   : > { %p12_p4 = scmp.ge.s32.totalorder %s15_s18, 11  }
 0x449   :  { %14 = sbr.rel (!%p12_p4) target bundleno = 1 (0x1), region = 70 }

</bundles_post_ra>
